<compile_context>
chip_gen: v7x
topology: tpu7x:2x2x1
jax: 0.10.0
libtpu: 0.0.40
codegen_flags: <defaults>
</compile_context>

<pallas_src>
import math
from functools import partial

import jax
import jax.numpy as jnp
from jax import lax
from jax.experimental import pallas as pl
from jax.experimental.pallas import tpu as pltpu


# ---------------------------------------------------------------------------
# in-kernel helpers (elementary ops only -> guaranteed Mosaic lowering)
# ---------------------------------------------------------------------------
def _batchnorm(x, gamma, beta, eps=1e-5):
    """Train-mode BatchNorm1d over all B*L rows, affine folded into one FMA pass."""
    mean = jnp.mean(x, axis=0, keepdims=True)
    xc = x - mean
    var = jnp.mean(xc * xc, axis=0, keepdims=True)          # biased variance (PyTorch train fwd)
    return xc * (gamma * lax.rsqrt(var + eps)) + beta


def _erf(x):
    # Abramowitz & Stegun 7.1.26 rational approximation, |err| < 1.5e-7 (exact-GELU parity).
    a1, a2, a3, a4, a5 = 0.254829592, -0.284496736, 1.421413741, -1.453152027, 1.061405429
    p = 0.3275911
    ax = jnp.abs(x)
    t = 1.0 / (1.0 + p * ax)
    poly = ((((a5 * t + a4) * t + a3) * t + a2) * t + a1) * t
    y = 1.0 - poly * jnp.exp(-ax * ax)
    return jnp.where(x >= 0, y, -y)


def _gelu_exact(x):
    # PyTorch F.gelu (erf form); exp/poly go to EUP/VPU, negligible at these sizes.
    return 0.5 * x * (1.0 + _erf(x * (1.0 / math.sqrt(2.0))))


# ---------------------------------------------------------------------------
# Kernel 1: input projection  (scale + positional encoding folded into weight/bias at init)
# ---------------------------------------------------------------------------
def _proj_kernel(x_ref, w_ref, bpe_ref, o_ref):
    o_ref[...] = jnp.dot(x_ref[...].astype(jnp.bfloat16), w_ref[...],
                         preferred_element_type=jnp.float32) + bpe_ref[...]


def input_projection(x_flat, w_t, bpe):
    B = x_flat.shape[0]
    LF, LD = w_t.shape
    vmem = pl.BlockSpec(memory_space=pltpu.MemorySpace.VMEM)
    return pl.pallas_call(
        _proj_kernel,
        out_shape=jax.ShapeDtypeStruct((B, LD), jnp.float32),
        in_specs=[vmem, vmem, vmem],
        out_specs=vmem,
        cost_estimate=pl.CostEstimate(
            flops=int(2 * B * LF * LD),
            transcendentals=0,
            bytes_accessed=int(4 * B * LF + 2 * LF * LD + 4 * LD + 4 * B * LD)),
    )(x_flat, w_t, bpe)


# ---------------------------------------------------------------------------
# Kernel 2: fused transformer encoder (all layers) + output head, fully VMEM resident
# ---------------------------------------------------------------------------
def _encoder_head_kernel(x_ref, wqkv_ref, bqkv_ref, wo_ref, bo_ref,
                         g1_ref, be1_ref, w1_ref, b1_ref, w2_ref, b2_ref,
                         g2_ref, be2_ref, wd_ref, bd_ref, wfc_ref, bfc_ref,
                         out2_ref, yhat_ref, *, n_heads, num_layers, max_len):
    N, D = x_ref.shape                     # N = B * L rows, ordered (batch, position)
    L = max_len
    B = N // L
    H = n_heads
    hd = D // H
    sm_scale = 1.0 / math.sqrt(hd)

    x = x_ref[...]                         # (N, D) f32 residual stream (stays on-chip)

    for layer in range(num_layers):        # static unroll (num_layers is small)
        # ---- multi-head self-attention --------------------------------------------------
        # fused QKV projection over all B*L rows at once (M = N, K = D = 128)
        qkv = jnp.dot(x.astype(jnp.bfloat16), wqkv_ref[layer],
                      preferred_element_type=jnp.float32) + bqkv_ref[layer]      # (N, 3D)
        q, k, v = qkv[:, :D], qkv[:, D:2 * D], qkv[:, 2 * D:]                    # 128-aligned

        ctx_rows = []
        for b in range(B):                 # static; each batch element's L rows are contiguous
            r0 = b * L
            q_b, k_b, v_b = q[r0:r0 + L], k[r0:r0 + L], v[r0:r0 + L]
            heads = []
            for h in range(H):             # attention FLOPs are tiny at L=16; keep it simple
                c0 = h * hd
                s = lax.dot_general(q_b[:, c0:c0 + hd].astype(jnp.bfloat16),
                                    k_b[:, c0:c0 + hd].astype(jnp.bfloat16),
                                    (((1,), (1,)), ((), ())),
                                    preferred_element_type=jnp.float32) * sm_scale   # (L, L)
                s = s - jnp.max(s, axis=-1, keepdims=True)
                p = jnp.exp(s)
                p = p * pl.reciprocal(jnp.sum(p, axis=-1, keepdims=True), approx=True)
                heads.append(jnp.dot(p.astype(jnp.bfloat16),
                                     v_b[:, c0:c0 + hd].astype(jnp.bfloat16),
                                     preferred_element_type=jnp.float32))            # (L, hd)
            ctx_rows.append(jnp.concatenate(heads, axis=1))                          # (L, D)
        ctx = jnp.concatenate(ctx_rows, axis=0)                                      # (N, D)

        # single K = D output projection over all rows (concat-of-heads @ Wo)
        attn = jnp.dot(ctx.astype(jnp.bfloat16), wo_ref[layer],
                       preferred_element_type=jnp.float32) + bo_ref[layer]           # (N, D)

        # ---- residual + BN + feed-forward (Linear -> exact GELU -> Linear) + residual + BN
        x = _batchnorm(x + attn, g1_ref[layer], be1_ref[layer])
        h1 = jnp.dot(x.astype(jnp.bfloat16), w1_ref[layer],
                     preferred_element_type=jnp.float32) + b1_ref[layer]             # (N, FF)
        h1 = _gelu_exact(h1)
        y = jnp.dot(h1.astype(jnp.bfloat16), w2_ref[layer],
                    preferred_element_type=jnp.float32) + b2_ref[layer]              # (N, D)
        x = _batchnorm(x + y, g2_ref[layer], be2_ref[layer])

    # ---- output head: downsample Linear, fc over the sequence axis, sigmoid -------------
    y_ds = jnp.dot(x.astype(jnp.bfloat16), wd_ref[...],
                   preferred_element_type=jnp.float32) + bd_ref[...]                 # (N, C)
    w_seq = wfc_ref[...]                                                             # (L, 1)
    logit_rows = []
    for b in range(B):                     # static; contiguous, 8-aligned row blocks
        blk = y_ds[b * L:(b + 1) * L, :]                                             # (L, C)
        out2_ref[b] = blk
        logit_rows.append(jnp.sum(blk * w_seq, axis=0, keepdims=True))               # (1, C)
    logits = jnp.concatenate(logit_rows, axis=0) + bfc_ref[0]                        # (B, C)
    yhat_ref[...] = 1.0 / (1.0 + jnp.exp(-logits))                                   # sigmoid


def encoder_and_head(x2d, p, *, n_heads, num_layers, max_len):
    N, D = x2d.shape
    B = N // max_len
    C = p["ds_w_t"].shape[1]
    FF = p["w1_t"].shape[-1]
    hd = D // n_heads

    vmem = pl.BlockSpec(memory_space=pltpu.MemorySpace.VMEM)
    smem = pl.BlockSpec(memory_space=pltpu.MemorySpace.SMEM)

    flops = num_layers * (2 * N * D * 3 * D
                          + 4 * B * n_heads * max_len * max_len * hd
                          + 2 * N * D * D
                          + 4 * N * D * FF) + 2 * N * D * C
    transc = num_layers * (B * n_heads * max_len * max_len + N * FF)
    bytes_acc = (4 * N * D
                 + num_layers * 2 * (3 * D * D + D * D + 2 * D * FF)
                 + num_layers * 4 * (3 * D + 7 * D + FF)
                 + 2 * D * C + 4 * C + 4 * max_len + 4
                 + 4 * N * C + 4 * B * C)

    kernel = partial(_encoder_head_kernel, n_heads=n_heads,
                     num_layers=num_layers, max_len=max_len)
    out2, yhat = pl.pallas_call(
        kernel,
        out_shape=(jax.ShapeDtypeStruct((B, max_len, C), jnp.float32),
                   jax.ShapeDtypeStruct((B, C), jnp.float32)),
        in_specs=[vmem] * 16 + [smem],
        out_specs=(vmem, vmem),
        cost_estimate=pl.CostEstimate(flops=int(flops), transcendentals=int(transc),
                                      bytes_accessed=int(bytes_acc)),
    )(x2d, p["wqkv_t"], p["bqkv"], p["wo_t"], p["bo"],
      p["gamma1"], p["beta1"], p["w1_t"], p["b1"], p["w2_t"], p["b2"],
      p["gamma2"], p["beta2"], p["ds_w_t"], p["ds_b"], p["fc_w"], p["fc_b"])
    return out2, yhat


# ---------------------------------------------------------------------------
# Full forward pass (two launches total)
# ---------------------------------------------------------------------------
@partial(jax.jit, static_argnames=("d_model", "n_heads", "num_layers", "max_len"))
def ts_transformer_forward(X, params, *, d_model, n_heads, num_layers, max_len):
    B, L, F = X.shape
    x_flat = X.reshape(B, L * F)
    inp = input_projection(x_flat, params["proj_w_t"], params["proj_bpe"])    # (B, L*D)
    x2d = inp.reshape(B * L, d_model)        # free row-major view; rows ordered (batch, position)
    out2, yhat = encoder_and_head(x2d, params, n_heads=n_heads,
                                  num_layers=num_layers, max_len=max_len)
    y_hat_logit = yhat.reshape(B, d_model // 2, 1)                            # (B, d_model//2, 1)
    return y_hat_logit, out2                                                  # out2: (B, L, D//2)


# ---------------------------------------------------------------------------
# Deterministic parameter setup (transposes / bf16 casts / constant folding done ONCE here)
# ---------------------------------------------------------------------------
def init_params(key, *, feat_dim, max_len, d_model, n_heads, num_layers, dim_feedforward):
    D, L, F, FF = d_model, max_len, feat_dim, dim_feedforward
    C = D // 2
    keys = iter(jax.random.split(key, 8 * num_layers + 8))

    def linear(fan_in, fan_out):
        bound = 1.0 / math.sqrt(fan_in)
        w = jax.random.uniform(next(keys), (fan_out, fan_in), jnp.float32, -bound, bound)
        b = jax.random.uniform(next(keys), (fan_out,), jnp.float32, -bound, bound)
        return w, b

    # project_inp: Linear(F*L -> D*L); * sqrt(d_model) and the fixed sinusoidal positional
    # encoding are folded into the weight / bias here (one-time parameter preprocessing).
    wp, bp = linear(F * L, D * L)
    scale = math.sqrt(D)
    pos = jnp.arange(L, dtype=jnp.float32)[:, None]
    div = jnp.exp(jnp.arange(0, D, 2, dtype=jnp.float32) * (-math.log(10000.0) / D))
    pe = jnp.zeros((L, D), jnp.float32)
    pe = pe.at[:, 0::2].set(jnp.sin(pos * div))
    pe = pe.at[:, 1::2].set(jnp.cos(pos * div))
    proj_w_t = (wp.T * scale).astype(jnp.bfloat16)                    # (L*F, L*D)
    proj_bpe = (bp * scale + pe.reshape(L * D)).reshape(1, L * D)     # bias*scale + pos-enc

    wqkv_l, bqkv_l, wo_l, bo_l, w1_l, b1_l, w2_l, b2_l = ([] for _ in range(8))
    for _ in range(num_layers):
        wqkv, bqkv = linear(D, 3 * D)          # MultiheadAttention in_proj
        wo, bo = linear(D, D)                  # MultiheadAttention out_proj
        w1, b1 = linear(D, FF)                 # linear1
        w2, b2 = linear(FF, D)                 # linear2
        wqkv_l.append(wqkv.T.astype(jnp.bfloat16)); bqkv_l.append(bqkv.reshape(1, 3 * D))
        wo_l.append(wo.T.astype(jnp.bfloat16));     bo_l.append(bo.reshape(1, D))
        w1_l.append(w1.T.astype(jnp.bfloat16));     b1_l.append(b1.reshape(1, FF))
        w2_l.append(w2.T.astype(jnp.bfloat16));     b2_l.append(b2.reshape(1, D))

    wd, bd = linear(D, C)                      # downsample Linear(d_model -> d_model/2)
    wfc, bfc = linear(L, 1)                    # fc Linear(max_len -> 1)

    stack = lambda xs: jnp.stack(xs, axis=0)
    return dict(
        proj_w_t=proj_w_t, proj_bpe=proj_bpe,
        wqkv_t=stack(wqkv_l), bqkv=stack(bqkv_l), wo_t=stack(wo_l), bo=stack(bo_l),
        gamma1=jnp.ones((num_layers, 1, D), jnp.float32),
        beta1=jnp.zeros((num_layers, 1, D), jnp.float32),
        gamma2=jnp.ones((num_layers, 1, D), jnp.float32),
        beta2=jnp.zeros((num_layers, 1, D), jnp.float32),
        w1_t=stack(w1_l), b1=stack(b1_l), w2_t=stack(w2_l), b2=stack(b2_l),
        ds_w_t=wd.T.astype(jnp.bfloat16), ds_b=bd.reshape(1, C),
        fc_w=wfc.reshape(L, 1), fc_b=bfc.reshape(1,),
    )


if __name__ == "__main__":
    # Small but lane-dense hyperparameters consistent with the module.
    feat_dim, max_len, d_model = 8, 16, 128
    n_heads, num_layers, dim_feedforward = 4, 2, 256
    batch = 4

    key = jax.random.PRNGKey(0)
    k_param, k_x = jax.random.split(key)
    params = init_params(k_param, feat_dim=feat_dim, max_len=max_len, d_model=d_model,
                         n_heads=n_heads, num_layers=num_layers,
                         dim_feedforward=dim_feedforward)
    X = jax.random.normal(k_x, (batch, max_len, feat_dim), dtype=jnp.float32)

    y_hat_logit, output = ts_transformer_forward(
        X, params, d_model=d_model, n_heads=n_heads,
        num_layers=num_layers, max_len=max_len)
    jax.block_until_ready((y_hat_logit, output))

    assert y_hat_logit.shape == (batch, d_model // 2, 1)
    assert output.shape == (batch, max_len, d_model // 2)
    assert y_hat_logit.dtype == jnp.float32 and output.dtype == jnp.float32
    assert bool(jnp.all(jnp.isfinite(y_hat_logit))) and bool(jnp.all(jnp.isfinite(output)))
    assert bool(jnp.all((y_hat_logit > 0.0) & (y_hat_logit < 1.0)))
    print("KERNEL_OK")
</pallas_src>

<mosaic_0001>
module attributes {stable_mosaic.version = 11 : i64} {
  func.func @_proj_kernel(%arg0: memref<4x128xf32, #tpu.memory_space<vmem>>, %arg1: memref<128x2048xbf16, #tpu.memory_space<vmem>>, %arg2: memref<1x2048xf32, #tpu.memory_space<vmem>>, %arg3: memref<4x2048xf32, #tpu.memory_space<vmem>>) attributes {dimension_semantics = [], scalar_prefetch = 0 : i64, scratch_operands = 0 : i64, tpu.core_type = #tpu.core_type<tc>} {
    %c0 = arith.constant 0 : index
    %c0_0 = arith.constant 0 : index
    %0 = vector.load %arg0[%c0, %c0_0] : memref<4x128xf32, #tpu.memory_space<vmem>>, vector<4x128xf32>
    %1 = arith.truncf %0 : vector<4x128xf32> to vector<4x128xbf16>
    %c0_1 = arith.constant 0 : index
    %c0_2 = arith.constant 0 : index
    %2 = vector.load %arg1[%c0_1, %c0_2] : memref<128x2048xbf16, #tpu.memory_space<vmem>>, vector<128x2048xbf16>
    %cst = arith.constant dense<0.000000e+00> : vector<4x2048xf32>
    %3 = tpu.matmul %1, %2, %cst {dimension_numbers = #tpu.dot_dimension_numbers<[1], [0], [0], [1], [0, 0, 1, 1], [], []>} : vector<4x128xbf16>, vector<128x2048xbf16>, vector<4x2048xf32> -> vector<4x2048xf32>
    %c0_3 = arith.constant 0 : index
    %c0_4 = arith.constant 0 : index
    %4 = vector.load %arg2[%c0_3, %c0_4] : memref<1x2048xf32, #tpu.memory_space<vmem>>, vector<1x2048xf32>
    %5 = vector.broadcast %4 : vector<1x2048xf32> to vector<4x2048xf32>
    %6 = arith.addf %3, %5 : vector<4x2048xf32>
    %c0_5 = arith.constant 0 : index
    %c0_6 = arith.constant 0 : index
    %7 = vector.load %arg3[%c0_5, %c0_6] : memref<4x2048xf32, #tpu.memory_space<vmem>>, vector<4x2048xf32>
    tpu.vector_store %arg3[%c0_5, %c0_6], %6 {strides = array<i32>} : memref<4x2048xf32, #tpu.memory_space<vmem>>, vector<4x2048xf32>,
    return
  }
}

module attributes {stable_mosaic.version = 11 : i64} {
  func.func @_encoder_head_kernel(%arg0: memref<64x128xf32, #tpu.memory_space<vmem>>, %arg1: memref<2x128x384xbf16, #tpu.memory_space<vmem>>, %arg2: memref<2x1x384xf32, #tpu.memory_space<vmem>>, %arg3: memref<2x128x128xbf16, #tpu.memory_space<vmem>>, %arg4: memref<2x1x128xf32, #tpu.memory_space<vmem>>, %arg5: memref<2x1x128xf32, #tpu.memory_space<vmem>>, %arg6: memref<2x1x128xf32, #tpu.memory_space<vmem>>, %arg7: memref<2x128x256xbf16, #tpu.memory_space<vmem>>, %arg8: memref<2x1x256xf32, #tpu.memory_space<vmem>>, %arg9: memref<2x256x128xbf16, #tpu.memory_space<vmem>>, %arg10: memref<2x1x128xf32, #tpu.memory_space<vmem>>, %arg11: memref<2x1x128xf32, #tpu.memory_space<vmem>>, %arg12: memref<2x1x128xf32, #tpu.memory_space<vmem>>, %arg13: memref<128x64xbf16, #tpu.memory_space<vmem>>, %arg14: memref<1x64xf32, #tpu.memory_space<vmem>>, %arg15: memref<16x1xf32, #tpu.memory_space<vmem>>, %arg16: memref<1xf32, #tpu.memory_space<smem>>, %arg17: memref<4x16x64xf32, #tpu.memory_space<vmem>>, %arg18: memref<4x64xf32, #tpu.memory_space<vmem>>) attributes {dimension_semantics = [], scalar_prefetch = 0 : i64, scratch_operands = 0 : i64, tpu.core_type = #tpu.core_type<tc>} {
    %c0 = arith.constant 0 : index
    %c0_0 = arith.constant 0 : index
    %0 = vector.load %arg0[%c0, %c0_0] : memref<64x128xf32, #tpu.memory_space<vmem>>, vector<64x128xf32>
    %1 = arith.truncf %0 : vector<64x128xf32> to vector<64x128xbf16>
    %c0_1 = arith.constant 0 : index
    %c0_2 = arith.constant 0 : index
    %c0_3 = arith.constant 0 : index
    %2 = vector.load %arg1[%c0_1, %c0_2, %c0_3] : memref<2x128x384xbf16, #tpu.memory_space<vmem>>, vector<1x128x384xbf16>
    %3 = vector.shape_cast %2 : vector<1x128x384xbf16> to vector<128x384xbf16>
    %cst = arith.constant dense<0.000000e+00> : vector<64x384xf32>
    %4 = tpu.matmul %1, %3, %cst {dimension_numbers = #tpu.dot_dimension_numbers<[1], [0], [0], [1], [0, 0, 1, 1], [], []>} : vector<64x128xbf16>, vector<128x384xbf16>, vector<64x384xf32> -> vector<64x384xf32>
    %c0_4 = arith.constant 0 : index
    %c0_5 = arith.constant 0 : index
    %c0_6 = arith.constant 0 : index
    %5 = vector.load %arg2[%c0_4, %c0_5, %c0_6] : memref<2x1x384xf32, #tpu.memory_space<vmem>>, vector<1x1x384xf32>
    %6 = vector.shape_cast %5 : vector<1x1x384xf32> to vector<1x384xf32>
    %7 = vector.broadcast %6 : vector<1x384xf32> to vector<64x384xf32>
    %8 = arith.addf %4, %7 : vector<64x384xf32>
    %9 = vector.extract_strided_slice %8 {offsets = [0, 0], sizes = [64, 128], strides = [1, 1]} : vector<64x384xf32> to vector<64x128xf32>
    %10 = vector.extract_strided_slice %8 {offsets = [0, 128], sizes = [64, 128], strides = [1, 1]} : vector<64x384xf32> to vector<64x128xf32>
    %11 = vector.extract_strided_slice %8 {offsets = [0, 256], sizes = [64, 128], strides = [1, 1]} : vector<64x384xf32> to vector<64x128xf32>
    %12 = vector.extract_strided_slice %9 {offsets = [0, 0], sizes = [16, 128], strides = [1, 1]} : vector<64x128xf32> to vector<16x128xf32>
    %13 = vector.extract_strided_slice %10 {offsets = [0, 0], sizes = [16, 128], strides = [1, 1]} : vector<64x128xf32> to vector<16x128xf32>
    %14 = vector.extract_strided_slice %11 {offsets = [0, 0], sizes = [16, 128], strides = [1, 1]} : vector<64x128xf32> to vector<16x128xf32>
    %15 = vector.extract_strided_slice %12 {offsets = [0, 0], sizes = [16, 32], strides = [1, 1]} : vector<16x128xf32> to vector<16x32xf32>
    %16 = arith.truncf %15 : vector<16x32xf32> to vector<16x32xbf16>
    %17 = vector.extract_strided_slice %13 {offsets = [0, 0], sizes = [16, 32], strides = [1, 1]} : vector<16x128xf32> to vector<16x32xf32>
    %18 = arith.truncf %17 : vector<16x32xf32> to vector<16x32xbf16>
    %cst_7 = arith.constant dense<0.000000e+00> : vector<16x16xf32>
    %19 = tpu.matmul %16, %18, %cst_7 {dimension_numbers = #tpu.dot_dimension_numbers<[1], [1], [0], [0], [0, 0, 1, 0], [], []>} : vector<16x32xbf16>, vector<16x32xbf16>, vector<16x16xf32> -> vector<16x16xf32>
    %cst_8 = arith.constant 0.176776692 : f32
    %20 = vector.broadcast %cst_8 : f32 to vector<16x16xf32>
    %21 = arith.mulf %19, %20 : vector<16x16xf32>
    %cst_9 = arith.constant dense<0xFF800000> : vector<16xf32>
    %22 = vector.multi_reduction <maximumf>, %21, %cst_9 [1] : vector<16x16xf32> to vector<16xf32>
    %23 = vector.shape_cast %22 : vector<16xf32> to vector<16x1xf32>
    %24 = vector.broadcast %23 : vector<16x1xf32> to vector<16x16xf32>
    %25 = arith.subf %21, %24 : vector<16x16xf32>
    %26 = math.exp %25 : vector<16x16xf32>
    %cst_10 = arith.constant dense<0.000000e+00> : vector<16xf32>
    %27 = vector.multi_reduction <add>, %26, %cst_10 [1] : vector<16x16xf32> to vector<16xf32>
    %28 = vector.shape_cast %27 : vector<16xf32> to vector<16x1xf32>
    %29 = tpu.reciprocal %28 {approx = true} : vector<16x1xf32> -> vector<16x1xf32>
    %30 = vector.broadcast %29 : vector<16x1xf32> to vector<16x16xf32>
    %31 = arith.mulf %26, %30 : vector<16x16xf32>
    %32 = arith.truncf %31 : vector<16x16xf32> to vector<16x16xbf16>
    %33 = vector.extract_strided_slice %14 {offsets = [0, 0], sizes = [16, 32], strides = [1, 1]} : vector<16x128xf32> to vector<16x32xf32>
    %34 = arith.truncf %33 : vector<16x32xf32> to vector<16x32xbf16>
    %cst_11 = arith.constant dense<0.000000e+00> : vector<16x32xf32>
    %35 = tpu.matmul %32, %34, %cst_11 {dimension_numbers = #tpu.dot_dimension_numbers<[1], [0], [0], [1], [0, 0, 1, 1], [], []>} : vector<16x16xbf16>, vector<16x32xbf16>, vector<16x32xf32> -> vector<16x32xf32>
    %36 = vector.extract_strided_slice %12 {offsets = [0, 32], sizes = [16, 32], strides = [1, 1]} : vector<16x128xf32> to vector<16x32xf32>
    %37 = arith.truncf %36 : vector<16x32xf32> to vector<16x32xbf16>
    %38 = vector.extract_strided_slice %13 {offsets = [0, 32], sizes = [16, 32], strides = [1, 1]} : vector<16x128xf32> to vector<16x32xf32>
    %39 = arith.truncf %38 : vector<16x32xf32> to vector<16x32xbf16>
    %cst_12 = arith.constant dense<0.000000e+00> : vector<16x16xf32>
    %40 = tpu.matmul %37, %39, %cst_12 {dimension_numbers = #tpu.dot_dimension_numbers<[1], [1], [0], [0], [0, 0, 1, 0], [], []>} : vector<16x32xbf16>, vector<16x32xbf16>, vector<16x16xf32> -> vector<16x16xf32>
    %cst_13 = arith.constant 0.176776692 : f32
    %41 = vector.broadcast %cst_13 : f32 to vector<16x16xf32>
    %42 = arith.mulf %40, %41 : vector<16x16xf32>
    %cst_14 = arith.constant dense<0xFF800000> : vector<16xf32>
    %43 = vector.multi_reduction <maximumf>, %42, %cst_14 [1] : vector<16x16xf32> to vector<16xf32>
    %44 = vector.shape_cast %43 : vector<16xf32> to vector<16x1xf32>
    %45 = vector.broadcast %44 : vector<16x1xf32> to vector<16x16xf32>
    %46 = arith.subf %42, %45 : vector<16x16xf32>
    %47 = math.exp %46 : vector<16x16xf32>
    %cst_15 = arith.constant dense<0.000000e+00> : vector<16xf32>
    %48 = vector.multi_reduction <add>, %47, %cst_15 [1] : vector<16x16xf32> to vector<16xf32>
    %49 = vector.shape_cast %48 : vector<16xf32> to vector<16x1xf32>
    %50 = tpu.reciprocal %49 {approx = true} : vector<16x1xf32> -> vector<16x1xf32>
    %51 = vector.broadcast %50 : vector<16x1xf32> to vector<16x16xf32>
    %52 = arith.mulf %47, %51 : vector<16x16xf32>
    %53 = arith.truncf %52 : vector<16x16xf32> to vector<16x16xbf16>
    %54 = vector.extract_strided_slice %14 {offsets = [0, 32], sizes = [16, 32], strides = [1, 1]} : vector<16x128xf32> to vector<16x32xf32>
    %55 = arith.truncf %54 : vector<16x32xf32> to vector<16x32xbf16>
    %cst_16 = arith.constant dense<0.000000e+00> : vector<16x32xf32>
    %56 = tpu.matmul %53, %55, %cst_16 {dimension_numbers = #tpu.dot_dimension_numbers<[1], [0], [0], [1], [0, 0, 1, 1], [], []>} : vector<16x16xbf16>, vector<16x32xbf16>, vector<16x32xf32> -> vector<16x32xf32>
    %57 = vector.extract_strided_slice %12 {offsets = [0, 64], sizes = [16, 32], strides = [1, 1]} : vector<16x128xf32> to vector<16x32xf32>
    %58 = arith.truncf %57 : vector<16x32xf32> to vector<16x32xbf16>
    %59 = vector.extract_strided_slice %13 {offsets = [0, 64], sizes = [16, 32], strides = [1, 1]} : vector<16x128xf32> to vector<16x32xf32>
    %60 = arith.truncf %59 : vector<16x32xf32> to vector<16x32xbf16>
    %cst_17 = arith.constant dense<0.000000e+00> : vector<16x16xf32>
    %61 = tpu.matmul %58, %60, %cst_17 {dimension_numbers = #tpu.dot_dimension_numbers<[1], [1], [0], [0], [0, 0, 1, 0], [], []>} : vector<16x32xbf16>, vector<16x32xbf16>, vector<16x16xf32> -> vector<16x16xf32>
    %cst_18 = arith.constant 0.176776692 : f32
    %62 = vector.broadcast %cst_18 : f32 to vector<16x16xf32>
    %63 = arith.mulf %61, %62 : vector<16x16xf32>
    %cst_19 = arith.constant dense<0xFF800000> : vector<16xf32>
    %64 = vector.multi_reduction <maximumf>, %63, %cst_19 [1] : vector<16x16xf32> to vector<16xf32>
    %65 = vector.shape_cast %64 : vector<16xf32> to vector<16x1xf32>
    %66 = vector.broadcast %65 : vector<16x1xf32> to vector<16x16xf32>
    %67 = arith.subf %63, %66 : vector<16x16xf32>
    %68 = math.exp %67 : vector<16x16xf32>
    %cst_20 = arith.constant dense<0.000000e+00> : vector<16xf32>
    %69 = vector.multi_reduction <add>, %68, %cst_20 [1] : vector<16x16xf32> to vector<16xf32>
    %70 = vector.shape_cast %69 : vector<16xf32> to vector<16x1xf32>
    %71 = tpu.reciprocal %70 {approx = true} : vector<16x1xf32> -> vector<16x1xf32>
    %72 = vector.broadcast %71 : vector<16x1xf32> to vector<16x16xf32>
    %73 = arith.mulf %68, %72 : vector<16x16xf32>
    %74 = arith.truncf %73 : vector<16x16xf32> to vector<16x16xbf16>
    %75 = vector.extract_strided_slice %14 {offsets = [0, 64], sizes = [16, 32], strides = [1, 1]} : vector<16x128xf32> to vector<16x32xf32>
    %76 = arith.truncf %75 : vector<16x32xf32> to vector<16x32xbf16>
    %cst_21 = arith.constant dense<0.000000e+00> : vector<16x32xf32>
    %77 = tpu.matmul %74, %76, %cst_21 {dimension_numbers = #tpu.dot_dimension_numbers<[1], [0], [0], [1], [0, 0, 1, 1], [], []>} : vector<16x16xbf16>, vector<16x32xbf16>, vector<16x32xf32> -> vector<16x32xf32>
    %78 = vector.extract_strided_slice %12 {offsets = [0, 96], sizes = [16, 32], strides = [1, 1]} : vector<16x128xf32> to vector<16x32xf32>
    %79 = arith.truncf %78 : vector<16x32xf32> to vector<16x32xbf16>
    %80 = vector.extract_strided_slice %13 {offsets = [0, 96], sizes = [16, 32], strides = [1, 1]} : vector<16x128xf32> to vector<16x32xf32>
    %81 = arith.truncf %80 : vector<16x32xf32> to vector<16x32xbf16>
    %cst_22 = arith.constant dense<0.000000e+00> : vector<16x16xf32>
    %82 = tpu.matmul %79, %81, %cst_22 {dimension_numbers = #tpu.dot_dimension_numbers<[1], [1], [0], [0], [0, 0, 1, 0], [], []>} : vector<16x32xbf16>, vector<16x32xbf16>, vector<16x16xf32> -> vector<16x16xf32>
    %cst_23 = arith.constant 0.176776692 : f32
    %83 = vector.broadcast %cst_23 : f32 to vector<16x16xf32>
    %84 = arith.mulf %82, %83 : vector<16x16xf32>
    %cst_24 = arith.constant dense<0xFF800000> : vector<16xf32>
    %85 = vector.multi_reduction <maximumf>, %84, %cst_24 [1] : vector<16x16xf32> to vector<16xf32>
    %86 = vector.shape_cast %85 : vector<16xf32> to vector<16x1xf32>
    %87 = vector.broadcast %86 : vector<16x1xf32> to vector<16x16xf32>
    %88 = arith.subf %84, %87 : vector<16x16xf32>
    %89 = math.exp %88 : vector<16x16xf32>
    %cst_25 = arith.constant dense<0.000000e+00> : vector<16xf32>
    %90 = vector.multi_reduction <add>, %89, %cst_25 [1] : vector<16x16xf32> to vector<16xf32>
    %91 = vector.shape_cast %90 : vector<16xf32> to vector<16x1xf32>
    %92 = tpu.reciprocal %91 {approx = true} : vector<16x1xf32> -> vector<16x1xf32>
    %93 = vector.broadcast %92 : vector<16x1xf32> to vector<16x16xf32>
    %94 = arith.mulf %89, %93 : vector<16x16xf32>
    %95 = arith.truncf %94 : vector<16x16xf32> to vector<16x16xbf16>
    %96 = vector.extract_strided_slice %14 {offsets = [0, 96], sizes = [16, 32], strides = [1, 1]} : vector<16x128xf32> to vector<16x32xf32>
    %97 = arith.truncf %96 : vector<16x32xf32> to vector<16x32xbf16>
    %cst_26 = arith.constant dense<0.000000e+00> : vector<16x32xf32>
    %98 = tpu.matmul %95, %97, %cst_26 {dimension_numbers = #tpu.dot_dimension_numbers<[1], [0], [0], [1], [0, 0, 1, 1], [], []>} : vector<16x16xbf16>, vector<16x32xbf16>, vector<16x32xf32> -> vector<16x32xf32>
    %99 = tpu.concatenate %35, %56, %77, %98 in 1 : vector<16x32xf32>, vector<16x32xf32>, vector<16x32xf32>, vector<16x32xf32> -> vector<16x128xf32>
    %100 = vector.extract_strided_slice %9 {offsets = [16, 0], sizes = [16, 128], strides = [1, 1]} : vector<64x128xf32> to vector<16x128xf32>
    %101 = vector.extract_strided_slice %10 {offsets = [16, 0], sizes = [16, 128], strides = [1, 1]} : vector<64x128xf32> to vector<16x128xf32>
    %102 = vector.extract_strided_slice %11 {offsets = [16, 0], sizes = [16, 128], strides = [1, 1]} : vector<64x128xf32> to vector<16x128xf32>
    %103 = vector.extract_strided_slice %100 {offsets = [0, 0], sizes = [16, 32], strides = [1, 1]} : vector<16x128xf32> to vector<16x32xf32>
    %104 = arith.truncf %103 : vector<16x32xf32> to vector<16x32xbf16>
    %105 = vector.extract_strided_slice %101 {offsets = [0, 0], sizes = [16, 32], strides = [1, 1]} : vector<16x128xf32> to vector<16x32xf32>
    %106 = arith.truncf %105 : vector<16x32xf32> to vector<16x32xbf16>
    %cst_27 = arith.constant dense<0.000000e+00> : vector<16x16xf32>
    %107 = tpu.matmul %104, %106, %cst_27 {dimension_numbers = #tpu.dot_dimension_numbers<[1], [1], [0], [0], [0, 0, 1, 0], [], []>} : vector<16x32xbf16>, vector<16x32xbf16>, vector<16x16xf32> -> vector<16x16xf32>
    %cst_28 = arith.constant 0.176776692 : f32
    %108 = vector.broadcast %cst_28 : f32 to vector<16x16xf32>
    %109 = arith.mulf %107, %108 : vector<16x16xf32>
    %cst_29 = arith.constant dense<0xFF800000> : vector<16xf32>
    %110 = vector.multi_reduction <maximumf>, %109, %cst_29 [1] : vector<16x16xf32> to vector<16xf32>
    %111 = vector.shape_cast %110 : vector<16xf32> to vector<16x1xf32>
    %112 = vector.broadcast %111 : vector<16x1xf32> to vector<16x16xf32>
    %113 = arith.subf %109, %112 : vector<16x16xf32>
    %114 = math.exp %113 : vector<16x16xf32>
    %cst_30 = arith.constant dense<0.000000e+00> : vector<16xf32>
    %115 = vector.multi_reduction <add>, %114, %cst_30 [1] : vector<16x16xf32> to vector<16xf32>
    %116 = vector.shape_cast %115 : vector<16xf32> to vector<16x1xf32>
    %117 = tpu.reciprocal %116 {approx = true} : vector<16x1xf32> -> vector<16x1xf32>
    %118 = vector.broadcast %117 : vector<16x1xf32> to vector<16x16xf32>
    %119 = arith.mulf %114, %118 : vector<16x16xf32>
    %120 = arith.truncf %119 : vector<16x16xf32> to vector<16x16xbf16>
    %121 = vector.extract_strided_slice %102 {offsets = [0, 0], sizes = [16, 32], strides = [1, 1]} : vector<16x128xf32> to vector<16x32xf32>
    %122 = arith.truncf %121 : vector<16x32xf32> to vector<16x32xbf16>
    %cst_31 = arith.constant dense<0.000000e+00> : vector<16x32xf32>
    %123 = tpu.matmul %120, %122, %cst_31 {dimension_numbers = #tpu.dot_dimension_numbers<[1], [0], [0], [1], [0, 0, 1, 1], [], []>} : vector<16x16xbf16>, vector<16x32xbf16>, vector<16x32xf32> -> vector<16x32xf32>
    %124 = vector.extract_strided_slice %100 {offsets = [0, 32], sizes = [16, 32], strides = [1, 1]} : vector<16x128xf32> to vector<16x32xf32>
    %125 = arith.truncf %124 : vector<16x32xf32> to vector<16x32xbf16>
    %126 = vector.extract_strided_slice %101 {offsets = [0, 32], sizes = [16, 32], strides = [1, 1]} : vector<16x128xf32> to vector<16x32xf32>
    %127 = arith.truncf %126 : vector<16x32xf32> to vector<16x32xbf16>
    %cst_32 = arith.constant dense<0.000000e+00> : vector<16x16xf32>
    %128 = tpu.matmul %125, %127, %cst_32 {dimension_numbers = #tpu.dot_dimension_numbers<[1], [1], [0], [0], [0, 0, 1, 0], [], []>} : vector<16x32xbf16>, vector<16x32xbf16>, vector<16x16xf32> -> vector<16x16xf32>
    %cst_33 = arith.constant 0.176776692 : f32
    %129 = vector.broadcast %cst_33 : f32 to vector<16x16xf32>
    %130 = arith.mulf %128, %129 : vector<16x16xf32>
    %cst_34 = arith.constant dense<0xFF800000> : vector<16xf32>
    %131 = vector.multi_reduction <maximumf>, %130, %cst_34 [1] : vector<16x16xf32> to vector<16xf32>
    %132 = vector.shape_cast %131 : vector<16xf32> to vector<16x1xf32>
    %133 = vector.broadcast %132 : vector<16x1xf32> to vector<16x16xf32>
    %134 = arith.subf %130, %133 : vector<16x16xf32>
    %135 = math.exp %134 : vector<16x16xf32>
    %cst_35 = arith.constant dense<0.000000e+00> : vector<16xf32>
    %136 = vector.multi_reduction <add>, %135, %cst_35 [1] : vector<16x16xf32> to vector<16xf32>
    %137 = vector.shape_cast %136 : vector<16xf32> to vector<16x1xf32>
    %138 = tpu.reciprocal %137 {approx = true} : vector<16x1xf32> -> vector<16x1xf32>
    %139 = vector.broadcast %138 : vector<16x1xf32> to vector<16x16xf32>
    %140 = arith.mulf %135, %139 : vector<16x16xf32>
    %141 = arith.truncf %140 : vector<16x16xf32> to vector<16x16xbf16>
    %142 = vector.extract_strided_slice %102 {offsets = [0, 32], sizes = [16, 32], strides = [1, 1]} : vector<16x128xf32> to vector<16x32xf32>
    %143 = arith.truncf %142 : vector<16x32xf32> to vector<16x32xbf16>
    %cst_36 = arith.constant dense<0.000000e+00> : vector<16x32xf32>
    %144 = tpu.matmul %141, %143, %cst_36 {dimension_numbers = #tpu.dot_dimension_numbers<[1], [0], [0], [1], [0, 0, 1, 1], [], []>} : vector<16x16xbf16>, vector<16x32xbf16>, vector<16x32xf32> -> vector<16x32xf32>
    %145 = vector.extract_strided_slice %100 {offsets = [0, 64], sizes = [16, 32], strides = [1, 1]} : vector<16x128xf32> to vector<16x32xf32>
    %146 = arith.truncf %145 : vector<16x32xf32> to vector<16x32xbf16>
    %147 = vector.extract_strided_slice %101 {offsets = [0, 64], sizes = [16, 32], strides = [1, 1]} : vector<16x128xf32> to vector<16x32xf32>
    %148 = arith.truncf %147 : vector<16x32xf32> to vector<16x32xbf16>
    %cst_37 = arith.constant dense<0.000000e+00> : vector<16x16xf32>
    %149 = tpu.matmul %146, %148, %cst_37 {dimension_numbers = #tpu.dot_dimension_numbers<[1], [1], [0], [0], [0, 0, 1, 0], [], []>} : vector<16x32xbf16>, vector<16x32xbf16>, vector<16x16xf32> -> vector<16x16xf32>
    %cst_38 = arith.constant 0.176776692 : f32
    %150 = vector.broadcast %cst_38 : f32 to vector<16x16xf32>
    %151 = arith.mulf %149, %150 : vector<16x16xf32>
    %cst_39 = arith.constant dense<0xFF800000> : vector<16xf32>
    %152 = vector.multi_reduction <maximumf>, %151, %cst_39 [1] : vector<16x16xf32> to vector<16xf32>
    %153 = vector.shape_cast %152 : vector<16xf32> to vector<16x1xf32>
    %154 = vector.broadcast %153 : vector<16x1xf32> to vector<16x16xf32>
    %155 = arith.subf %151, %154 : vector<16x16xf32>
    %156 = math.exp %155 : vector<16x16xf32>
    %cst_40 = arith.constant dense<0.000000e+00> : vector<16xf32>
    %157 = vector.multi_reduction <add>, %156, %cst_40 [1] : vector<16x16xf32> to vector<16xf32>
    %158 = vector.shape_cast %157 : vector<16xf32> to vector<16x1xf32>
    %159 = tpu.reciprocal %158 {approx = true} : vector<16x1xf32> -> vector<16x1xf32>
    %160 = vector.broadcast %159 : vector<16x1xf32> to vector<16x16xf32>
    %161 = arith.mulf %156, %160 : vector<16x16xf32>
    %162 = arith.truncf %161 : vector<16x16xf32> to vector<16x16xbf16>
    %163 = vector.extract_strided_slice %102 {offsets = [0, 64], sizes = [16, 32], strides = [1, 1]} : vector<16x128xf32> to vector<16x32xf32>
    %164 = arith.truncf %163 : vector<16x32xf32> to vector<16x32xbf16>
    %cst_41 = arith.constant dense<0.000000e+00> : vector<16x32xf32>
    %165 = tpu.matmul %162, %164, %cst_41 {dimension_numbers = #tpu.dot_dimension_numbers<[1], [0], [0], [1], [0, 0, 1, 1], [], []>} : vector<16x16xbf16>, vector<16x32xbf16>, vector<16x32xf32> -> vector<16x32xf32>
    %166 = vector.extract_strided_slice %100 {offsets = [0, 96], sizes = [16, 32], strides = [1, 1]} : vector<16x128xf32> to vector<16x32xf32>
    %167 = arith.truncf %166 : vector<16x32xf32> to vector<16x32xbf16>
    %168 = vector.extract_strided_slice %101 {offsets = [0, 96], sizes = [16, 32], strides = [1, 1]} : vector<16x128xf32> to vector<16x32xf32>
    %169 = arith.truncf %168 : vector<16x32xf32> to vector<16x32xbf16>
    %cst_42 = arith.constant dense<0.000000e+00> : vector<16x16xf32>
    %170 = tpu.matmul %167, %169, %cst_42 {dimension_numbers = #tpu.dot_dimension_numbers<[1], [1], [0], [0], [0, 0, 1, 0], [], []>} : vector<16x32xbf16>, vector<16x32xbf16>, vector<16x16xf32> -> vector<16x16xf32>
    %cst_43 = arith.constant 0.176776692 : f32
    %171 = vector.broadcast %cst_43 : f32 to vector<16x16xf32>
    %172 = arith.mulf %170, %171 : vector<16x16xf32>
    %cst_44 = arith.constant dense<0xFF800000> : vector<16xf32>
    %173 = vector.multi_reduction <maximumf>, %172, %cst_44 [1] : vector<16x16xf32> to vector<16xf32>
    %174 = vector.shape_cast %173 : vector<16xf32> to vector<16x1xf32>
    %175 = vector.broadcast %174 : vector<16x1xf32> to vector<16x16xf32>
    %176 = arith.subf %172, %175 : vector<16x16xf32>
    %177 = math.exp %176 : vector<16x16xf32>
    %cst_45 = arith.constant dense<0.000000e+00> : vector<16xf32>
    %178 = vector.multi_reduction <add>, %177, %cst_45 [1] : vector<16x16xf32> to vector<16xf32>
    %179 = vector.shape_cast %178 : vector<16xf32> to vector<16x1xf32>
    %180 = tpu.reciprocal %179 {approx = true} : vector<16x1xf32> -> vector<16x1xf32>
    %181 = vector.broadcast %180 : vector<16x1xf32> to vector<16x16xf32>
    %182 = arith.mulf %177, %181 : vector<16x16xf32>
    %183 = arith.truncf %182 : vector<16x16xf32> to vector<16x16xbf16>
    %184 = vector.extract_strided_slice %102 {offsets = [0, 96], sizes = [16, 32], strides = [1, 1]} : vector<16x128xf32> to vector<16x32xf32>
    %185 = arith.truncf %184 : vector<16x32xf32> to vector<16x32xbf16>
    %cst_46 = arith.constant dense<0.000000e+00> : vector<16x32xf32>
    %186 = tpu.matmul %183, %185, %cst_46 {dimension_numbers = #tpu.dot_dimension_numbers<[1], [0], [0], [1], [0, 0, 1, 1], [], []>} : vector<16x16xbf16>, vector<16x32xbf16>, vector<16x32xf32> -> vector<16x32xf32>
    %187 = tpu.concatenate %123, %144, %165, %186 in 1 : vector<16x32xf32>, vector<16x32xf32>, vector<16x32xf32>, vector<16x32xf32> -> vector<16x128xf32>
    %188 = vector.extract_strided_slice %9 {offsets = [32, 0], sizes = [16, 128], strides = [1, 1]} : vector<64x128xf32> to vector<16x128xf32>
    %189 = vector.extract_strided_slice %10 {offsets = [32, 0], sizes = [16, 128], strides = [1, 1]} : vector<64x128xf32> to vector<16x128xf32>
    %190 = vector.extract_strided_slice %11 {offsets = [32, 0], sizes = [16, 128], strides = [1, 1]} : vector<64x128xf32> to vector<16x128xf32>
    %191 = vector.extract_strided_slice %188 {offsets = [0, 0], sizes = [16, 32], strides = [1, 1]} : vector<16x128xf32> to vector<16x32xf32>
    %192 = arith.truncf %191 : vector<16x32xf32> to vector<16x32xbf16>
    %193 = vector.extract_strided_slice %189 {offsets = [0, 0], sizes = [16, 32], strides = [1, 1]} : vector<16x128xf32> to vector<16x32xf32>
    %194 = arith.truncf %193 : vector<16x32xf32> to vector<16x32xbf16>
    %cst_47 = arith.constant dense<0.000000e+00> : vector<16x16xf32>
    %195 = tpu.matmul %192, %194, %cst_47 {dimension_numbers = #tpu.dot_dimension_numbers<[1], [1], [0], [0], [0, 0, 1, 0], [], []>} : vector<16x32xbf16>, vector<16x32xbf16>, vector<16x16xf32> -> vector<16x16xf32>
    %cst_48 = arith.constant 0.176776692 : f32
    %196 = vector.broadcast %cst_48 : f32 to vector<16x16xf32>
    %197 = arith.mulf %195, %196 : vector<16x16xf32>
    %cst_49 = arith.constant dense<0xFF800000> : vector<16xf32>
    %198 = vector.multi_reduction <maximumf>, %197, %cst_49 [1] : vector<16x16xf32> to vector<16xf32>
    %199 = vector.shape_cast %198 : vector<16xf32> to vector<16x1xf32>
    %200 = vector.broadcast %199 : vector<16x1xf32> to vector<16x16xf32>
    %201 = arith.subf %197, %200 : vector<16x16xf32>
    %202 = math.exp %201 : vector<16x16xf32>
    %cst_50 = arith.constant dense<0.000000e+00> : vector<16xf32>
    %203 = vector.multi_reduction <add>, %202, %cst_50 [1] : vector<16x16xf32> to vector<16xf32>
    %204 = vector.shape_cast %203 : vector<16xf32> to vector<16x1xf32>
    %205 = tpu.reciprocal %204 {approx = true} : vector<16x1xf32> -> vector<16x1xf32>
    %206 = vector.broadcast %205 : vector<16x1xf32> to vector<16x16xf32>
    %207 = arith.mulf %202, %206 : vector<16x16xf32>
    %208 = arith.truncf %207 : vector<16x16xf32> to vector<16x16xbf16>
    %209 = vector.extract_strided_slice %190 {offsets = [0, 0], sizes = [16, 32], strides = [1, 1]} : vector<16x128xf32> to vector<16x32xf32>
    %210 = arith.truncf %209 : vector<16x32xf32> to vector<16x32xbf16>
    %cst_51 = arith.constant dense<0.000000e+00> : vector<16x32xf32>
    %211 = tpu.matmul %208, %210, %cst_51 {dimension_numbers = #tpu.dot_dimension_numbers<[1], [0], [0], [1], [0, 0, 1, 1], [], []>} : vector<16x16xbf16>, vector<16x32xbf16>, vector<16x32xf32> -> vector<16x32xf32>
    %212 = vector.extract_strided_slice %188 {offsets = [0, 32], sizes = [16, 32], strides = [1, 1]} : vector<16x128xf32> to vector<16x32xf32>
    %213 = arith.truncf %212 : vector<16x32xf32> to vector<16x32xbf16>
    %214 = vector.extract_strided_slice %189 {offsets = [0, 32], sizes = [16, 32], strides = [1, 1]} : vector<16x128xf32> to vector<16x32xf32>
    %215 = arith.truncf %214 : vector<16x32xf32> to vector<16x32xbf16>
    %cst_52 = arith.constant dense<0.000000e+00> : vector<16x16xf32>
    %216 = tpu.matmul %213, %215, %cst_52 {dimension_numbers = #tpu.dot_dimension_numbers<[1], [1], [0], [0], [0, 0, 1, 0], [], []>} : vector<16x32xbf16>, vector<16x32xbf16>, vector<16x16xf32> -> vector<16x16xf32>
    %cst_53 = arith.constant 0.176776692 : f32
    %217 = vector.broadcast %cst_53 : f32 to vector<16x16xf32>
    %218 = arith.mulf %216, %217 : vector<16x16xf32>
    %cst_54 = arith.constant dense<0xFF800000> : vector<16xf32>
    %219 = vector.multi_reduction <maximumf>, %218, %cst_54 [1] : vector<16x16xf32> to vector<16xf32>
    %220 = vector.shape_cast %219 : vector<16xf32> to vector<16x1xf32>
    %221 = vector.broadcast %220 : vector<16x1xf32> to vector<16x16xf32>
    %222 = arith.subf %218, %221 : vector<16x16xf32>
    %223 = math.exp %222 : vector<16x16xf32>
    %cst_55 = arith.constant dense<0.000000e+00> : vector<16xf32>
    %224 = vector.multi_reduction <add>, %223, %cst_55 [1] : vector<16x16xf32> to vector<16xf32>
    %225 = vector.shape_cast %224 : vector<16xf32> to vector<16x1xf32>
    %226 = tpu.reciprocal %225 {approx = true} : vector<16x1xf32> -> vector<16x1xf32>
    %227 = vector.broadcast %226 : vector<16x1xf32> to vector<16x16xf32>
    %228 = arith.mulf %223, %227 : vector<16x16xf32>
    %229 = arith.truncf %228 : vector<16x16xf32> to vector<16x16xbf16>
    %230 = vector.extract_strided_slice %190 {offsets = [0, 32], sizes = [16, 32], strides = [1, 1]} : vector<16x128xf32> to vector<16x32xf32>
    %231 = arith.truncf %230 : vector<16x32xf32> to vector<16x32xbf16>
    %cst_56 = arith.constant dense<0.000000e+00> : vector<16x32xf32>
    %232 = tpu.matmul %229, %231, %cst_56 {dimension_numbers = #tpu.dot_dimension_numbers<[1], [0], [0], [1], [0, 0, 1, 1], [], []>} : vector<16x16xbf16>, vector<16x32xbf16>, vector<16x32xf32> -> vector<16x32xf32>
    %233 = vector.extract_strided_slice %188 {offsets = [0, 64], sizes = [16, 32], strides = [1, 1]} : vector<16x128xf32> to vector<16x32xf32>
    %234 = arith.truncf %233 : vector<16x32xf32> to vector<16x32xbf16>
    %235 = vector.extract_strided_slice %189 {offsets = [0, 64], sizes = [16, 32], strides = [1, 1]} : vector<16x128xf32> to vector<16x32xf32>
    %236 = arith.truncf %235 : vector<16x32xf32> to vector<16x32xbf16>
    %cst_57 = arith.constant dense<0.000000e+00> : vector<16x16xf32>
    %237 = tpu.matmul %234, %236, %cst_57 {dimension_numbers = #tpu.dot_dimension_numbers<[1], [1], [0], [0], [0, 0, 1, 0], [], []>} : vector<16x32xbf16>, vector<16x32xbf16>, vector<16x16xf32> -> vector<16x16xf32>
    %cst_58 = arith.constant 0.176776692 : f32
    %238 = vector.broadcast %cst_58 : f32 to vector<16x16xf32>
    %239 = arith.mulf %237, %238 : vector<16x16xf32>
    %cst_59 = arith.constant dense<0xFF800000> : vector<16xf32>
    %240 = vector.multi_reduction <maximumf>, %239, %cst_59 [1] : vector<16x16xf32> to vector<16xf32>
    %241 = vector.shape_cast %240 : vector<16xf32> to vector<16x1xf32>
    %242 = vector.broadcast %241 : vector<16x1xf32> to vector<16x16xf32>
    %243 = arith.subf %239, %242 : vector<16x16xf32>
    %244 = math.exp %243 : vector<16x16xf32>
    %cst_60 = arith.constant dense<0.000000e+00> : vector<16xf32>
    %245 = vector.multi_reduction <add>, %244, %cst_60 [1] : vector<16x16xf32> to vector<16xf32>
    %246 = vector.shape_cast %245 : vector<16xf32> to vector<16x1xf32>
    %247 = tpu.reciprocal %246 {approx = true} : vector<16x1xf32> -> vector<16x1xf32>
    %248 = vector.broadcast %247 : vector<16x1xf32> to vector<16x16xf32>
    %249 = arith.mulf %244, %248 : vector<16x16xf32>
    %250 = arith.truncf %249 : vector<16x16xf32> to vector<16x16xbf16>
    %251 = vector.extract_strided_slice %190 {offsets = [0, 64], sizes = [16, 32], strides = [1, 1]} : vector<16x128xf32> to vector<16x32xf32>
    %252 = arith.truncf %251 : vector<16x32xf32> to vector<16x32xbf16>
    %cst_61 = arith.constant dense<0.000000e+00> : vector<16x32xf32>
    %253 = tpu.matmul %250, %252, %cst_61 {dimension_numbers = #tpu.dot_dimension_numbers<[1], [0], [0], [1], [0, 0, 1, 1], [], []>} : vector<16x16xbf16>, vector<16x32xbf16>, vector<16x32xf32> -> vector<16x32xf32>
    %254 = vector.extract_strided_slice %188 {offsets = [0, 96], sizes = [16, 32], strides = [1, 1]} : vector<16x128xf32> to vector<16x32xf32>
    %255 = arith.truncf %254 : vector<16x32xf32> to vector<16x32xbf16>
    %256 = vector.extract_strided_slice %189 {offsets = [0, 96], sizes = [16, 32], strides = [1, 1]} : vector<16x128xf32> to vector<16x32xf32>
    %257 = arith.truncf %256 : vector<16x32xf32> to vector<16x32xbf16>
    %cst_62 = arith.constant dense<0.000000e+00> : vector<16x16xf32>
    %258 = tpu.matmul %255, %257, %cst_62 {dimension_numbers = #tpu.dot_dimension_numbers<[1], [1], [0], [0], [0, 0, 1, 0], [], []>} : vector<16x32xbf16>, vector<16x32xbf16>, vector<16x16xf32> -> vector<16x16xf32>
    %cst_63 = arith.constant 0.176776692 : f32
    %259 = vector.broadcast %cst_63 : f32 to vector<16x16xf32>
    %260 = arith.mulf %258, %259 : vector<16x16xf32>
    %cst_64 = arith.constant dense<0xFF800000> : vector<16xf32>
    %261 = vector.multi_reduction <maximumf>, %260, %cst_64 [1] : vector<16x16xf32> to vector<16xf32>
    %262 = vector.shape_cast %261 : vector<16xf32> to vector<16x1xf32>
    %263 = vector.broadcast %262 : vector<16x1xf32> to vector<16x16xf32>
    %264 = arith.subf %260, %263 : vector<16x16xf32>
    %265 = math.exp %264 : vector<16x16xf32>
    %cst_65 = arith.constant dense<0.000000e+00> : vector<16xf32>
    %266 = vector.multi_reduction <add>, %265, %cst_65 [1] : vector<16x16xf32> to vector<16xf32>
    %267 = vector.shape_cast %266 : vector<16xf32> to vector<16x1xf32>
    %268 = tpu.reciprocal %267 {approx = true} : vector<16x1xf32> -> vector<16x1xf32>
    %269 = vector.broadcast %268 : vector<16x1xf32> to vector<16x16xf32>
    %270 = arith.mulf %265, %269 : vector<16x16xf32>
    %271 = arith.truncf %270 : vector<16x16xf32> to vector<16x16xbf16>
    %272 = vector.extract_strided_slice %190 {offsets = [0, 96], sizes = [16, 32], strides = [1, 1]} : vector<16x128xf32> to vector<16x32xf32>
    %273 = arith.truncf %272 : vector<16x32xf32> to vector<16x32xbf16>
    %cst_66 = arith.constant dense<0.000000e+00> : vector<16x32xf32>
    %274 = tpu.matmul %271, %273, %cst_66 {dimension_numbers = #tpu.dot_dimension_numbers<[1], [0], [0], [1], [0, 0, 1, 1], [], []>} : vector<16x16xbf16>, vector<16x32xbf16>, vector<16x32xf32> -> vector<16x32xf32>
    %275 = tpu.concatenate %211, %232, %253, %274 in 1 : vector<16x32xf32>, vector<16x32xf32>, vector<16x32xf32>, vector<16x32xf32> -> vector<16x128xf32>
    %276 = vector.extract_strided_slice %9 {offsets = [48, 0], sizes = [16, 128], strides = [1, 1]} : vector<64x128xf32> to vector<16x128xf32>
    %277 = vector.extract_strided_slice %10 {offsets = [48, 0], sizes = [16, 128], strides = [1, 1]} : vector<64x128xf32> to vector<16x128xf32>
    %278 = vector.extract_strided_slice %11 {offsets = [48, 0], sizes = [16, 128], strides = [1, 1]} : vector<64x128xf32> to vector<16x128xf32>
    %279 = vector.extract_strided_slice %276 {offsets = [0, 0], sizes = [16, 32], strides = [1, 1]} : vector<16x128xf32> to vector<16x32xf32>
    %280 = arith.truncf %279 : vector<16x32xf32> to vector<16x32xbf16>
    %281 = vector.extract_strided_slice %277 {offsets = [0, 0], sizes = [16, 32], strides = [1, 1]} : vector<16x128xf32> to vector<16x32xf32>
    %282 = arith.truncf %281 : vector<16x32xf32> to vector<16x32xbf16>
    %cst_67 = arith.constant dense<0.000000e+00> : vector<16x16xf32>
    %283 = tpu.matmul %280, %282, %cst_67 {dimension_numbers = #tpu.dot_dimension_numbers<[1], [1], [0], [0], [0, 0, 1, 0], [], []>} : vector<16x32xbf16>, vector<16x32xbf16>, vector<16x16xf32> -> vector<16x16xf32>
    %cst_68 = arith.constant 0.176776692 : f32
    %284 = vector.broadcast %cst_68 : f32 to vector<16x16xf32>
    %285 = arith.mulf %283, %284 : vector<16x16xf32>
    %cst_69 = arith.constant dense<0xFF800000> : vector<16xf32>
    %286 = vector.multi_reduction <maximumf>, %285, %cst_69 [1] : vector<16x16xf32> to vector<16xf32>
    %287 = vector.shape_cast %286 : vector<16xf32> to vector<16x1xf32>
    %288 = vector.broadcast %287 : vector<16x1xf32> to vector<16x16xf32>
    %289 = arith.subf %285, %288 : vector<16x16xf32>
    %290 = math.exp %289 : vector<16x16xf32>
    %cst_70 = arith.constant dense<0.000000e+00> : vector<16xf32>
    %291 = vector.multi_reduction <add>, %290, %cst_70 [1] : vector<16x16xf32> to vector<16xf32>
    %292 = vector.shape_cast %291 : vector<16xf32> to vector<16x1xf32>
    %293 = tpu.reciprocal %292 {approx = true} : vector<16x1xf32> -> vector<16x1xf32>
    %294 = vector.broadcast %293 : vector<16x1xf32> to vector<16x16xf32>
    %295 = arith.mulf %290, %294 : vector<16x16xf32>
    %296 = arith.truncf %295 : vector<16x16xf32> to vector<16x16xbf16>
    %297 = vector.extract_strided_slice %278 {offsets = [0, 0], sizes = [16, 32], strides = [1, 1]} : vector<16x128xf32> to vector<16x32xf32>
    %298 = arith.truncf %297 : vector<16x32xf32> to vector<16x32xbf16>
    %cst_71 = arith.constant dense<0.000000e+00> : vector<16x32xf32>
    %299 = tpu.matmul %296, %298, %cst_71 {dimension_numbers = #tpu.dot_dimension_numbers<[1], [0], [0], [1], [0, 0, 1, 1], [], []>} : vector<16x16xbf16>, vector<16x32xbf16>, vector<16x32xf32> -> vector<16x32xf32>
    %300 = vector.extract_strided_slice %276 {offsets = [0, 32], sizes = [16, 32], strides = [1, 1]} : vector<16x128xf32> to vector<16x32xf32>
    %301 = arith.truncf %300 : vector<16x32xf32> to vector<16x32xbf16>
    %302 = vector.extract_strided_slice %277 {offsets = [0, 32], sizes = [16, 32], strides = [1, 1]} : vector<16x128xf32> to vector<16x32xf32>
    %303 = arith.truncf %302 : vector<16x32xf32> to vector<16x32xbf16>
    %cst_72 = arith.constant dense<0.000000e+00> : vector<16x16xf32>
    %304 = tpu.matmul %301, %303, %cst_72 {dimension_numbers = #tpu.dot_dimension_numbers<[1], [1], [0], [0], [0, 0, 1, 0], [], []>} : vector<16x32xbf16>, vector<16x32xbf16>, vector<16x16xf32> -> vector<16x16xf32>
    %cst_73 = arith.constant 0.176776692 : f32
    %305 = vector.broadcast %cst_73 : f32 to vector<16x16xf32>
    %306 = arith.mulf %304, %305 : vector<16x16xf32>
    %cst_74 = arith.constant dense<0xFF800000> : vector<16xf32>
    %307 = vector.multi_reduction <maximumf>, %306, %cst_74 [1] : vector<16x16xf32> to vector<16xf32>
    %308 = vector.shape_cast %307 : vector<16xf32> to vector<16x1xf32>
    %309 = vector.broadcast %308 : vector<16x1xf32> to vector<16x16xf32>
    %310 = arith.subf %306, %309 : vector<16x16xf32>
    %311 = math.exp %310 : vector<16x16xf32>
    %cst_75 = arith.constant dense<0.000000e+00> : vector<16xf32>
    %312 = vector.multi_reduction <add>, %311, %cst_75 [1] : vector<16x16xf32> to vector<16xf32>
    %313 = vector.shape_cast %312 : vector<16xf32> to vector<16x1xf32>
    %314 = tpu.reciprocal %313 {approx = true} : vector<16x1xf32> -> vector<16x1xf32>
    %315 = vector.broadcast %314 : vector<16x1xf32> to vector<16x16xf32>
    %316 = arith.mulf %311, %315 : vector<16x16xf32>
    %317 = arith.truncf %316 : vector<16x16xf32> to vector<16x16xbf16>
    %318 = vector.extract_strided_slice %278 {offsets = [0, 32], sizes = [16, 32], strides = [1, 1]} : vector<16x128xf32> to vector<16x32xf32>
    %319 = arith.truncf %318 : vector<16x32xf32> to vector<16x32xbf16>
    %cst_76 = arith.constant dense<0.000000e+00> : vector<16x32xf32>
    %320 = tpu.matmul %317, %319, %cst_76 {dimension_numbers = #tpu.dot_dimension_numbers<[1], [0], [0], [1], [0, 0, 1, 1], [], []>} : vector<16x16xbf16>, vector<16x32xbf16>, vector<16x32xf32> -> vector<16x32xf32>
    %321 = vector.extract_strided_slice %276 {offsets = [0, 64], sizes = [16, 32], strides = [1, 1]} : vector<16x128xf32> to vector<16x32xf32>
    %322 = arith.truncf %321 : vector<16x32xf32> to vector<16x32xbf16>
    %323 = vector.extract_strided_slice %277 {offsets = [0, 64], sizes = [16, 32], strides = [1, 1]} : vector<16x128xf32> to vector<16x32xf32>
    %324 = arith.truncf %323 : vector<16x32xf32> to vector<16x32xbf16>
    %cst_77 = arith.constant dense<0.000000e+00> : vector<16x16xf32>
    %325 = tpu.matmul %322, %324, %cst_77 {dimension_numbers = #tpu.dot_dimension_numbers<[1], [1], [0], [0], [0, 0, 1, 0], [], []>} : vector<16x32xbf16>, vector<16x32xbf16>, vector<16x16xf32> -> vector<16x16xf32>
    %cst_78 = arith.constant 0.176776692 : f32
    %326 = vector.broadcast %cst_78 : f32 to vector<16x16xf32>
    %327 = arith.mulf %325, %326 : vector<16x16xf32>
    %cst_79 = arith.constant dense<0xFF800000> : vector<16xf32>
    %328 = vector.multi_reduction <maximumf>, %327, %cst_79 [1] : vector<16x16xf32> to vector<16xf32>
    %329 = vector.shape_cast %328 : vector<16xf32> to vector<16x1xf32>
    %330 = vector.broadcast %329 : vector<16x1xf32> to vector<16x16xf32>
    %331 = arith.subf %327, %330 : vector<16x16xf32>
    %332 = math.exp %331 : vector<16x16xf32>
    %cst_80 = arith.constant dense<0.000000e+00> : vector<16xf32>
    %333 = vector.multi_reduction <add>, %332, %cst_80 [1] : vector<16x16xf32> to vector<16xf32>
    %334 = vector.shape_cast %333 : vector<16xf32> to vector<16x1xf32>
    %335 = tpu.reciprocal %334 {approx = true} : vector<16x1xf32> -> vector<16x1xf32>
    %336 = vector.broadcast %335 : vector<16x1xf32> to vector<16x16xf32>
    %337 = arith.mulf %332, %336 : vector<16x16xf32>
    %338 = arith.truncf %337 : vector<16x16xf32> to vector<16x16xbf16>
    %339 = vector.extract_strided_slice %278 {offsets = [0, 64], sizes = [16, 32], strides = [1, 1]} : vector<16x128xf32> to vector<16x32xf32>
    %340 = arith.truncf %339 : vector<16x32xf32> to vector<16x32xbf16>
    %cst_81 = arith.constant dense<0.000000e+00> : vector<16x32xf32>
    %341 = tpu.matmul %338, %340, %cst_81 {dimension_numbers = #tpu.dot_dimension_numbers<[1], [0], [0], [1], [0, 0, 1, 1], [], []>} : vector<16x16xbf16>, vector<16x32xbf16>, vector<16x32xf32> -> vector<16x32xf32>
    %342 = vector.extract_strided_slice %276 {offsets = [0, 96], sizes = [16, 32], strides = [1, 1]} : vector<16x128xf32> to vector<16x32xf32>
    %343 = arith.truncf %342 : vector<16x32xf32> to vector<16x32xbf16>
    %344 = vector.extract_strided_slice %277 {offsets = [0, 96], sizes = [16, 32], strides = [1, 1]} : vector<16x128xf32> to vector<16x32xf32>
    %345 = arith.truncf %344 : vector<16x32xf32> to vector<16x32xbf16>
    %cst_82 = arith.constant dense<0.000000e+00> : vector<16x16xf32>
    %346 = tpu.matmul %343, %345, %cst_82 {dimension_numbers = #tpu.dot_dimension_numbers<[1], [1], [0], [0], [0, 0, 1, 0], [], []>} : vector<16x32xbf16>, vector<16x32xbf16>, vector<16x16xf32> -> vector<16x16xf32>
    %cst_83 = arith.constant 0.176776692 : f32
    %347 = vector.broadcast %cst_83 : f32 to vector<16x16xf32>
    %348 = arith.mulf %346, %347 : vector<16x16xf32>
    %cst_84 = arith.constant dense<0xFF800000> : vector<16xf32>
    %349 = vector.multi_reduction <maximumf>, %348, %cst_84 [1] : vector<16x16xf32> to vector<16xf32>
    %350 = vector.shape_cast %349 : vector<16xf32> to vector<16x1xf32>
    %351 = vector.broadcast %350 : vector<16x1xf32> to vector<16x16xf32>
    %352 = arith.subf %348, %351 : vector<16x16xf32>
    %353 = math.exp %352 : vector<16x16xf32>
    %cst_85 = arith.constant dense<0.000000e+00> : vector<16xf32>
    %354 = vector.multi_reduction <add>, %353, %cst_85 [1] : vector<16x16xf32> to vector<16xf32>
    %355 = vector.shape_cast %354 : vector<16xf32> to vector<16x1xf32>
    %356 = tpu.reciprocal %355 {approx = true} : vector<16x1xf32> -> vector<16x1xf32>
    %357 = vector.broadcast %356 : vector<16x1xf32> to vector<16x16xf32>
    %358 = arith.mulf %353, %357 : vector<16x16xf32>
    %359 = arith.truncf %358 : vector<16x16xf32> to vector<16x16xbf16>
    %360 = vector.extract_strided_slice %278 {offsets = [0, 96], sizes = [16, 32], strides = [1, 1]} : vector<16x128xf32> to vector<16x32xf32>
    %361 = arith.truncf %360 : vector<16x32xf32> to vector<16x32xbf16>
    %cst_86 = arith.constant dense<0.000000e+00> : vector<16x32xf32>
    %362 = tpu.matmul %359, %361, %cst_86 {dimension_numbers = #tpu.dot_dimension_numbers<[1], [0], [0], [1], [0, 0, 1, 1], [], []>} : vector<16x16xbf16>, vector<16x32xbf16>, vector<16x32xf32> -> vector<16x32xf32>
    %363 = tpu.concatenate %299, %320, %341, %362 in 1 : vector<16x32xf32>, vector<16x32xf32>, vector<16x32xf32>, vector<16x32xf32> -> vector<16x128xf32>
    %364 = tpu.concatenate %99, %187, %275, %363 in 0 : vector<16x128xf32>, vector<16x128xf32>, vector<16x128xf32>, vector<16x128xf32> -> vector<64x128xf32>
    %365 = arith.truncf %364 : vector<64x128xf32> to vector<64x128xbf16>
    %c0_87 = arith.constant 0 : index
    %c0_88 = arith.constant 0 : index
    %c0_89 = arith.constant 0 : index
    %366 = vector.load %arg3[%c0_87, %c0_88, %c0_89] : memref<2x128x128xbf16, #tpu.memory_space<vmem>>, vector<1x128x128xbf16>
    %367 = vector.shape_cast %366 : vector<1x128x128xbf16> to vector<128x128xbf16>
    %cst_90 = arith.constant dense<0.000000e+00> : vector<64x128xf32>
    %368 = tpu.matmul %365, %367, %cst_90 {dimension_numbers = #tpu.dot_dimension_numbers<[1], [0], [0], [1], [0, 0, 1, 1], [], []>} : vector<64x128xbf16>, vector<128x128xbf16>, vector<64x128xf32> -> vector<64x128xf32>
    %c0_91 = arith.constant 0 : index
    %c0_92 = arith.constant 0 : index
    %c0_93 = arith.constant 0 : index
    %369 = vector.load %arg4[%c0_91, %c0_92, %c0_93] : memref<2x1x128xf32, #tpu.memory_space<vmem>>, vector<1x1x128xf32>
    %370 = vector.shape_cast %369 : vector<1x1x128xf32> to vector<1x128xf32>
    %371 = vector.broadcast %370 : vector<1x128xf32> to vector<64x128xf32>
    %372 = arith.addf %368, %371 : vector<64x128xf32>
    %373 = arith.addf %0, %372 : vector<64x128xf32>
    %c0_94 = arith.constant 0 : index
    %c0_95 = arith.constant 0 : index
    %c0_96 = arith.constant 0 : index
    %374 = vector.load %arg5[%c0_94, %c0_95, %c0_96] : memref<2x1x128xf32, #tpu.memory_space<vmem>>, vector<1x1x128xf32>
    %375 = vector.shape_cast %374 : vector<1x1x128xf32> to vector<1x128xf32>
    %c0_97 = arith.constant 0 : index
    %c0_98 = arith.constant 0 : index
    %c0_99 = arith.constant 0 : index
    %376 = vector.load %arg6[%c0_97, %c0_98, %c0_99] : memref<2x1x128xf32, #tpu.memory_space<vmem>>, vector<1x1x128xf32>
    %377 = vector.shape_cast %376 : vector<1x1x128xf32> to vector<1x128xf32>
    %cst_100 = arith.constant dense<0.000000e+00> : vector<128xf32>
    %378 = vector.multi_reduction <add>, %373, %cst_100 [0] : vector<64x128xf32> to vector<128xf32>
    %379 = vector.shape_cast %378 : vector<128xf32> to vector<1x128xf32>
    %cst_101 = arith.constant 6.400000e+01 : f32
    %380 = vector.broadcast %cst_101 : f32 to vector<1x128xf32>
    %381 = arith.divf %379, %380 : vector<1x128xf32>
    %382 = vector.broadcast %381 : vector<1x128xf32> to vector<64x128xf32>
    %383 = arith.subf %373, %382 : vector<64x128xf32>
    %384 = arith.mulf %383, %383 : vector<64x128xf32>
    %cst_102 = arith.constant dense<0.000000e+00> : vector<128xf32>
    %385 = vector.multi_reduction <add>, %384, %cst_102 [0] : vector<64x128xf32> to vector<128xf32>
    %386 = vector.shape_cast %385 : vector<128xf32> to vector<1x128xf32>
    %cst_103 = arith.constant 6.400000e+01 : f32
    %387 = vector.broadcast %cst_103 : f32 to vector<1x128xf32>
    %388 = arith.divf %386, %387 : vector<1x128xf32>
    %cst_104 = arith.constant 9.99999974E-6 : f32
    %389 = vector.broadcast %cst_104 : f32 to vector<1x128xf32>
    %390 = arith.addf %388, %389 : vector<1x128xf32>
    %391 = math.rsqrt %390 : vector<1x128xf32>
    %392 = arith.mulf %375, %391 : vector<1x128xf32>
    %393 = vector.broadcast %392 : vector<1x128xf32> to vector<64x128xf32>
    %394 = arith.mulf %383, %393 : vector<64x128xf32>
    %395 = vector.broadcast %377 : vector<1x128xf32> to vector<64x128xf32>
    %396 = arith.addf %394, %395 : vector<64x128xf32>
    %397 = arith.truncf %396 : vector<64x128xf32> to vector<64x128xbf16>
    %c0_105 = arith.constant 0 : index
    %c0_106 = arith.constant 0 : index
    %c0_107 = arith.constant 0 : index
    %398 = vector.load %arg7[%c0_105, %c0_106, %c0_107] : memref<2x128x256xbf16, #tpu.memory_space<vmem>>, vector<1x128x256xbf16>
    %399 = vector.shape_cast %398 : vector<1x128x256xbf16> to vector<128x256xbf16>
    %cst_108 = arith.constant dense<0.000000e+00> : vector<64x256xf32>
    %400 = tpu.matmul %397, %399, %cst_108 {dimension_numbers = #tpu.dot_dimension_numbers<[1], [0], [0], [1], [0, 0, 1, 1], [], []>} : vector<64x128xbf16>, vector<128x256xbf16>, vector<64x256xf32> -> vector<64x256xf32>
    %c0_109 = arith.constant 0 : index
    %c0_110 = arith.constant 0 : index
    %c0_111 = arith.constant 0 : index
    %401 = vector.load %arg8[%c0_109, %c0_110, %c0_111] : memref<2x1x256xf32, #tpu.memory_space<vmem>>, vector<1x1x256xf32>
    %402 = vector.shape_cast %401 : vector<1x1x256xf32> to vector<1x256xf32>
    %403 = vector.broadcast %402 : vector<1x256xf32> to vector<64x256xf32>
    %404 = arith.addf %400, %403 : vector<64x256xf32>
    %cst_112 = arith.constant 5.000000e-01 : f32
    %405 = vector.broadcast %cst_112 : f32 to vector<64x256xf32>
    %406 = arith.mulf %405, %404 : vector<64x256xf32>
    %cst_113 = arith.constant 0.707106769 : f32
    %407 = vector.broadcast %cst_113 : f32 to vector<64x256xf32>
    %408 = arith.mulf %404, %407 : vector<64x256xf32>
    %409 = math.absf %408 : vector<64x256xf32>
    %cst_114 = arith.constant 0.327591091 : f32
    %410 = vector.broadcast %cst_114 : f32 to vector<64x256xf32>
    %411 = arith.mulf %410, %409 : vector<64x256xf32>
    %cst_115 = arith.constant 1.000000e+00 : f32
    %412 = vector.broadcast %cst_115 : f32 to vector<64x256xf32>
    %413 = arith.addf %412, %411 : vector<64x256xf32>
    %cst_116 = arith.constant 1.000000e+00 : f32
    %414 = vector.broadcast %cst_116 : f32 to vector<64x256xf32>
    %415 = arith.divf %414, %413 : vector<64x256xf32>
    %cst_117 = arith.constant 1.06140542 : f32
    %416 = vector.broadcast %cst_117 : f32 to vector<64x256xf32>
    %417 = arith.mulf %416, %415 : vector<64x256xf32>
    %cst_118 = arith.constant -1.45315206 : f32
    %418 = vector.broadcast %cst_118 : f32 to vector<64x256xf32>
    %419 = arith.addf %417, %418 : vector<64x256xf32>
    %420 = arith.mulf %419, %415 : vector<64x256xf32>
    %cst_119 = arith.constant 1.42141378 : f32
    %421 = vector.broadcast %cst_119 : f32 to vector<64x256xf32>
    %422 = arith.addf %420, %421 : vector<64x256xf32>
    %423 = arith.mulf %422, %415 : vector<64x256xf32>
    %cst_120 = arith.constant -0.284496725 : f32
    %424 = vector.broadcast %cst_120 : f32 to vector<64x256xf32>
    %425 = arith.addf %423, %424 : vector<64x256xf32>
    %426 = arith.mulf %425, %415 : vector<64x256xf32>
    %cst_121 = arith.constant 0.254829586 : f32
    %427 = vector.broadcast %cst_121 : f32 to vector<64x256xf32>
    %428 = arith.addf %426, %427 : vector<64x256xf32>
    %429 = arith.mulf %428, %415 : vector<64x256xf32>
    %cst_122 = arith.constant 0.000000e+00 : f32
    %430 = vector.broadcast %cst_122 : f32 to vector<64x256xf32>
    %431 = arith.subf %430, %409 : vector<64x256xf32>
    %432 = arith.mulf %431, %409 : vector<64x256xf32>
    %433 = math.exp %432 : vector<64x256xf32>
    %434 = arith.mulf %429, %433 : vector<64x256xf32>
    %cst_123 = arith.constant 1.000000e+00 : f32
    %435 = vector.broadcast %cst_123 : f32 to vector<64x256xf32>
    %436 = arith.subf %435, %434 : vector<64x256xf32>
    %cst_124 = arith.constant 0.000000e+00 : f32
    %437 = vector.broadcast %cst_124 : f32 to vector<64x256xf32>
    %438 = arith.cmpf oge, %408, %437 : vector<64x256xf32>
    %cst_125 = arith.constant 0.000000e+00 : f32
    %439 = vector.broadcast %cst_125 : f32 to vector<64x256xf32>
    %440 = arith.subf %439, %436 : vector<64x256xf32>
    %441 = arith.select %438, %436, %440 : vector<64x256xi1>, vector<64x256xf32>
    %cst_126 = arith.constant 1.000000e+00 : f32
    %442 = vector.broadcast %cst_126 : f32 to vector<64x256xf32>
    %443 = arith.addf %442, %441 : vector<64x256xf32>
    %444 = arith.mulf %406, %443 : vector<64x256xf32>
    %445 = arith.truncf %444 : vector<64x256xf32> to vector<64x256xbf16>
    %c0_127 = arith.constant 0 : index
    %c0_128 = arith.constant 0 : index
    %c0_129 = arith.constant 0 : index
    %446 = vector.load %arg9[%c0_127, %c0_128, %c0_129] : memref<2x256x128xbf16, #tpu.memory_space<vmem>>, vector<1x256x128xbf16>
    %447 = vector.shape_cast %446 : vector<1x256x128xbf16> to vector<256x128xbf16>
    %cst_130 = arith.constant dense<0.000000e+00> : vector<64x128xf32>
    %448 = tpu.matmul %445, %447, %cst_130 {dimension_numbers = #tpu.dot_dimension_numbers<[1], [0], [0], [1], [0, 0, 1, 1], [], []>} : vector<64x256xbf16>, vector<256x128xbf16>, vector<64x128xf32> -> vector<64x128xf32>
    %c0_131 = arith.constant 0 : index
    %c0_132 = arith.constant 0 : index
    %c0_133 = arith.constant 0 : index
    %449 = vector.load %arg10[%c0_131, %c0_132, %c0_133] : memref<2x1x128xf32, #tpu.memory_space<vmem>>, vector<1x1x128xf32>
    %450 = vector.shape_cast %449 : vector<1x1x128xf32> to vector<1x128xf32>
    %451 = vector.broadcast %450 : vector<1x128xf32> to vector<64x128xf32>
    %452 = arith.addf %448, %451 : vector<64x128xf32>
    %453 = arith.addf %396, %452 : vector<64x128xf32>
    %c0_134 = arith.constant 0 : index
    %c0_135 = arith.constant 0 : index
    %c0_136 = arith.constant 0 : index
    %454 = vector.load %arg11[%c0_134, %c0_135, %c0_136] : memref<2x1x128xf32, #tpu.memory_space<vmem>>, vector<1x1x128xf32>
    %455 = vector.shape_cast %454 : vector<1x1x128xf32> to vector<1x128xf32>
    %c0_137 = arith.constant 0 : index
    %c0_138 = arith.constant 0 : index
    %c0_139 = arith.constant 0 : index
    %456 = vector.load %arg12[%c0_137, %c0_138, %c0_139] : memref<2x1x128xf32, #tpu.memory_space<vmem>>, vector<1x1x128xf32>
    %457 = vector.shape_cast %456 : vector<1x1x128xf32> to vector<1x128xf32>
    %cst_140 = arith.constant dense<0.000000e+00> : vector<128xf32>
    %458 = vector.multi_reduction <add>, %453, %cst_140 [0] : vector<64x128xf32> to vector<128xf32>
    %459 = vector.shape_cast %458 : vector<128xf32> to vector<1x128xf32>
    %cst_141 = arith.constant 6.400000e+01 : f32
    %460 = vector.broadcast %cst_141 : f32 to vector<1x128xf32>
    %461 = arith.divf %459, %460 : vector<1x128xf32>
    %462 = vector.broadcast %461 : vector<1x128xf32> to vector<64x128xf32>
    %463 = arith.subf %453, %462 : vector<64x128xf32>
    %464 = arith.mulf %463, %463 : vector<64x128xf32>
    %cst_142 = arith.constant dense<0.000000e+00> : vector<128xf32>
    %465 = vector.multi_reduction <add>, %464, %cst_142 [0] : vector<64x128xf32> to vector<128xf32>
    %466 = vector.shape_cast %465 : vector<128xf32> to vector<1x128xf32>
    %cst_143 = arith.constant 6.400000e+01 : f32
    %467 = vector.broadcast %cst_143 : f32 to vector<1x128xf32>
    %468 = arith.divf %466, %467 : vector<1x128xf32>
    %cst_144 = arith.constant 9.99999974E-6 : f32
    %469 = vector.broadcast %cst_144 : f32 to vector<1x128xf32>
    %470 = arith.addf %468, %469 : vector<1x128xf32>
    %471 = math.rsqrt %470 : vector<1x128xf32>
    %472 = arith.mulf %455, %471 : vector<1x128xf32>
    %473 = vector.broadcast %472 : vector<1x128xf32> to vector<64x128xf32>
    %474 = arith.mulf %463, %473 : vector<64x128xf32>
    %475 = vector.broadcast %457 : vector<1x128xf32> to vector<64x128xf32>
    %476 = arith.addf %474, %475 : vector<64x128xf32>
    %477 = arith.truncf %476 : vector<64x128xf32> to vector<64x128xbf16>
    %c1 = arith.constant 1 : index
    %c0_145 = arith.constant 0 : index
    %c0_146 = arith.constant 0 : index
    %478 = vector.load %arg1[%c1, %c0_145, %c0_146] : memref<2x128x384xbf16, #tpu.memory_space<vmem>>, vector<1x128x384xbf16>
    %479 = vector.shape_cast %478 : vector<1x128x384xbf16> to vector<128x384xbf16>
    %cst_147 = arith.constant dense<0.000000e+00> : vector<64x384xf32>
    %480 = tpu.matmul %477, %479, %cst_147 {dimension_numbers = #tpu.dot_dimension_numbers<[1], [0], [0], [1], [0, 0, 1, 1], [], []>} : vector<64x128xbf16>, vector<128x384xbf16>, vector<64x384xf32> -> vector<64x384xf32>
    %c1_148 = arith.constant 1 : index
    %c0_149 = arith.constant 0 : index
    %c0_150 = arith.constant 0 : index
    %481 = vector.load %arg2[%c1_148, %c0_149, %c0_150] : memref<2x1x384xf32, #tpu.memory_space<vmem>>, vector<1x1x384xf32>
    %482 = vector.shape_cast %481 : vector<1x1x384xf32> to vector<1x384xf32>
    %483 = vector.broadcast %482 : vector<1x384xf32> to vector<64x384xf32>
    %484 = arith.addf %480, %483 : vector<64x384xf32>
    %485 = vector.extract_strided_slice %484 {offsets = [0, 0], sizes = [64, 128], strides = [1, 1]} : vector<64x384xf32> to vector<64x128xf32>
    %486 = vector.extract_strided_slice %484 {offsets = [0, 128], sizes = [64, 128], strides = [1, 1]} : vector<64x384xf32> to vector<64x128xf32>
    %487 = vector.extract_strided_slice %484 {offsets = [0, 256], sizes = [64, 128], strides = [1, 1]} : vector<64x384xf32> to vector<64x128xf32>
    %488 = vector.extract_strided_slice %485 {offsets = [0, 0], sizes = [16, 128], strides = [1, 1]} : vector<64x128xf32> to vector<16x128xf32>
    %489 = vector.extract_strided_slice %486 {offsets = [0, 0], sizes = [16, 128], strides = [1, 1]} : vector<64x128xf32> to vector<16x128xf32>
    %490 = vector.extract_strided_slice %487 {offsets = [0, 0], sizes = [16, 128], strides = [1, 1]} : vector<64x128xf32> to vector<16x128xf32>
    %491 = vector.extract_strided_slice %488 {offsets = [0, 0], sizes = [16, 32], strides = [1, 1]} : vector<16x128xf32> to vector<16x32xf32>
    %492 = arith.truncf %491 : vector<16x32xf32> to vector<16x32xbf16>
    %493 = vector.extract_strided_slice %489 {offsets = [0, 0], sizes = [16, 32], strides = [1, 1]} : vector<16x128xf32> to vector<16x32xf32>
    %494 = arith.truncf %493 : vector<16x32xf32> to vector<16x32xbf16>
    %cst_151 = arith.constant dense<0.000000e+00> : vector<16x16xf32>
    %495 = tpu.matmul %492, %494, %cst_151 {dimension_numbers = #tpu.dot_dimension_numbers<[1], [1], [0], [0], [0, 0, 1, 0], [], []>} : vector<16x32xbf16>, vector<16x32xbf16>, vector<16x16xf32> -> vector<16x16xf32>
    %cst_152 = arith.constant 0.176776692 : f32
    %496 = vector.broadcast %cst_152 : f32 to vector<16x16xf32>
    %497 = arith.mulf %495, %496 : vector<16x16xf32>
    %cst_153 = arith.constant dense<0xFF800000> : vector<16xf32>
    %498 = vector.multi_reduction <maximumf>, %497, %cst_153 [1] : vector<16x16xf32> to vector<16xf32>
    %499 = vector.shape_cast %498 : vector<16xf32> to vector<16x1xf32>
    %500 = vector.broadcast %499 : vector<16x1xf32> to vector<16x16xf32>
    %501 = arith.subf %497, %500 : vector<16x16xf32>
    %502 = math.exp %501 : vector<16x16xf32>
    %cst_154 = arith.constant dense<0.000000e+00> : vector<16xf32>
    %503 = vector.multi_reduction <add>, %502, %cst_154 [1] : vector<16x16xf32> to vector<16xf32>
    %504 = vector.shape_cast %503 : vector<16xf32> to vector<16x1xf32>
    %505 = tpu.reciprocal %504 {approx = true} : vector<16x1xf32> -> vector<16x1xf32>
    %506 = vector.broadcast %505 : vector<16x1xf32> to vector<16x16xf32>
    %507 = arith.mulf %502, %506 : vector<16x16xf32>
    %508 = arith.truncf %507 : vector<16x16xf32> to vector<16x16xbf16>
    %509 = vector.extract_strided_slice %490 {offsets = [0, 0], sizes = [16, 32], strides = [1, 1]} : vector<16x128xf32> to vector<16x32xf32>
    %510 = arith.truncf %509 : vector<16x32xf32> to vector<16x32xbf16>
    %cst_155 = arith.constant dense<0.000000e+00> : vector<16x32xf32>
    %511 = tpu.matmul %508, %510, %cst_155 {dimension_numbers = #tpu.dot_dimension_numbers<[1], [0], [0], [1], [0, 0, 1, 1], [], []>} : vector<16x16xbf16>, vector<16x32xbf16>, vector<16x32xf32> -> vector<16x32xf32>
    %512 = vector.extract_strided_slice %488 {offsets = [0, 32], sizes = [16, 32], strides = [1, 1]} : vector<16x128xf32> to vector<16x32xf32>
    %513 = arith.truncf %512 : vector<16x32xf32> to vector<16x32xbf16>
    %514 = vector.extract_strided_slice %489 {offsets = [0, 32], sizes = [16, 32], strides = [1, 1]} : vector<16x128xf32> to vector<16x32xf32>
    %515 = arith.truncf %514 : vector<16x32xf32> to vector<16x32xbf16>
    %cst_156 = arith.constant dense<0.000000e+00> : vector<16x16xf32>
    %516 = tpu.matmul %513, %515, %cst_156 {dimension_numbers = #tpu.dot_dimension_numbers<[1], [1], [0], [0], [0, 0, 1, 0], [], []>} : vector<16x32xbf16>, vector<16x32xbf16>, vector<16x16xf32> -> vector<16x16xf32>
    %cst_157 = arith.constant 0.176776692 : f32
    %517 = vector.broadcast %cst_157 : f32 to vector<16x16xf32>
    %518 = arith.mulf %516, %517 : vector<16x16xf32>
    %cst_158 = arith.constant dense<0xFF800000> : vector<16xf32>
    %519 = vector.multi_reduction <maximumf>, %518, %cst_158 [1] : vector<16x16xf32> to vector<16xf32>
    %520 = vector.shape_cast %519 : vector<16xf32> to vector<16x1xf32>
    %521 = vector.broadcast %520 : vector<16x1xf32> to vector<16x16xf32>
    %522 = arith.subf %518, %521 : vector<16x16xf32>
    %523 = math.exp %522 : vector<16x16xf32>
    %cst_159 = arith.constant dense<0.000000e+00> : vector<16xf32>
    %524 = vector.multi_reduction <add>, %523, %cst_159 [1] : vector<16x16xf32> to vector<16xf32>
    %525 = vector.shape_cast %524 : vector<16xf32> to vector<16x1xf32>
    %526 = tpu.reciprocal %525 {approx = true} : vector<16x1xf32> -> vector<16x1xf32>
    %527 = vector.broadcast %526 : vector<16x1xf32> to vector<16x16xf32>
    %528 = arith.mulf %523, %527 : vector<16x16xf32>
    %529 = arith.truncf %528 : vector<16x16xf32> to vector<16x16xbf16>
    %530 = vector.extract_strided_slice %490 {offsets = [0, 32], sizes = [16, 32], strides = [1, 1]} : vector<16x128xf32> to vector<16x32xf32>
    %531 = arith.truncf %530 : vector<16x32xf32> to vector<16x32xbf16>
    %cst_160 = arith.constant dense<0.000000e+00> : vector<16x32xf32>
    %532 = tpu.matmul %529, %531, %cst_160 {dimension_numbers = #tpu.dot_dimension_numbers<[1], [0], [0], [1], [0, 0, 1, 1], [], []>} : vector<16x16xbf16>, vector<16x32xbf16>, vector<16x32xf32> -> vector<16x32xf32>
    %533 = vector.extract_strided_slice %488 {offsets = [0, 64], sizes = [16, 32], strides = [1, 1]} : vector<16x128xf32> to vector<16x32xf32>
    %534 = arith.truncf %533 : vector<16x32xf32> to vector<16x32xbf16>
    %535 = vector.extract_strided_slice %489 {offsets = [0, 64], sizes = [16, 32], strides = [1, 1]} : vector<16x128xf32> to vector<16x32xf32>
    %536 = arith.truncf %535 : vector<16x32xf32> to vector<16x32xbf16>
    %cst_161 = arith.constant dense<0.000000e+00> : vector<16x16xf32>
    %537 = tpu.matmul %534, %536, %cst_161 {dimension_numbers = #tpu.dot_dimension_numbers<[1], [1], [0], [0], [0, 0, 1, 0], [], []>} : vector<16x32xbf16>, vector<16x32xbf16>, vector<16x16xf32> -> vector<16x16xf32>
    %cst_162 = arith.constant 0.176776692 : f32
    %538 = vector.broadcast %cst_162 : f32 to vector<16x16xf32>
    %539 = arith.mulf %537, %538 : vector<16x16xf32>
    %cst_163 = arith.constant dense<0xFF800000> : vector<16xf32>
    %540 = vector.multi_reduction <maximumf>, %539, %cst_163 [1] : vector<16x16xf32> to vector<16xf32>
    %541 = vector.shape_cast %540 : vector<16xf32> to vector<16x1xf32>
    %542 = vector.broadcast %541 : vector<16x1xf32> to vector<16x16xf32>
    %543 = arith.subf %539, %542 : vector<16x16xf32>
    %544 = math.exp %543 : vector<16x16xf32>
    %cst_164 = arith.constant dense<0.000000e+00> : vector<16xf32>
    %545 = vector.multi_reduction <add>, %544, %cst_164 [1] : vector<16x16xf32> to vector<16xf32>
    %546 = vector.shape_cast %545 : vector<16xf32> to vector<16x1xf32>
    %547 = tpu.reciprocal %546 {approx = true} : vector<16x1xf32> -> vector<16x1xf32>
    %548 = vector.broadcast %547 : vector<16x1xf32> to vector<16x16xf32>
    %549 = arith.mulf %544, %548 : vector<16x16xf32>
    %550 = arith.truncf %549 : vector<16x16xf32> to vector<16x16xbf16>
    %551 = vector.extract_strided_slice %490 {offsets = [0, 64], sizes = [16, 32], strides = [1, 1]} : vector<16x128xf32> to vector<16x32xf32>
    %552 = arith.truncf %551 : vector<16x32xf32> to vector<16x32xbf16>
    %cst_165 = arith.constant dense<0.000000e+00> : vector<16x32xf32>
    %553 = tpu.matmul %550, %552, %cst_165 {dimension_numbers = #tpu.dot_dimension_numbers<[1], [0], [0], [1], [0, 0, 1, 1], [], []>} : vector<16x16xbf16>, vector<16x32xbf16>, vector<16x32xf32> -> vector<16x32xf32>
    %554 = vector.extract_strided_slice %488 {offsets = [0, 96], sizes = [16, 32], strides = [1, 1]} : vector<16x128xf32> to vector<16x32xf32>
    %555 = arith.truncf %554 : vector<16x32xf32> to vector<16x32xbf16>
    %556 = vector.extract_strided_slice %489 {offsets = [0, 96], sizes = [16, 32], strides = [1, 1]} : vector<16x128xf32> to vector<16x32xf32>
    %557 = arith.truncf %556 : vector<16x32xf32> to vector<16x32xbf16>
    %cst_166 = arith.constant dense<0.000000e+00> : vector<16x16xf32>
    %558 = tpu.matmul %555, %557, %cst_166 {dimension_numbers = #tpu.dot_dimension_numbers<[1], [1], [0], [0], [0, 0, 1, 0], [], []>} : vector<16x32xbf16>, vector<16x32xbf16>, vector<16x16xf32> -> vector<16x16xf32>
    %cst_167 = arith.constant 0.176776692 : f32
    %559 = vector.broadcast %cst_167 : f32 to vector<16x16xf32>
    %560 = arith.mulf %558, %559 : vector<16x16xf32>
    %cst_168 = arith.constant dense<0xFF800000> : vector<16xf32>
    %561 = vector.multi_reduction <maximumf>, %560, %cst_168 [1] : vector<16x16xf32> to vector<16xf32>
    %562 = vector.shape_cast %561 : vector<16xf32> to vector<16x1xf32>
    %563 = vector.broadcast %562 : vector<16x1xf32> to vector<16x16xf32>
    %564 = arith.subf %560, %563 : vector<16x16xf32>
    %565 = math.exp %564 : vector<16x16xf32>
    %cst_169 = arith.constant dense<0.000000e+00> : vector<16xf32>
    %566 = vector.multi_reduction <add>, %565, %cst_169 [1] : vector<16x16xf32> to vector<16xf32>
    %567 = vector.shape_cast %566 : vector<16xf32> to vector<16x1xf32>
    %568 = tpu.reciprocal %567 {approx = true} : vector<16x1xf32> -> vector<16x1xf32>
    %569 = vector.broadcast %568 : vector<16x1xf32> to vector<16x16xf32>
    %570 = arith.mulf %565, %569 : vector<16x16xf32>
    %571 = arith.truncf %570 : vector<16x16xf32> to vector<16x16xbf16>
    %572 = vector.extract_strided_slice %490 {offsets = [0, 96], sizes = [16, 32], strides = [1, 1]} : vector<16x128xf32> to vector<16x32xf32>
    %573 = arith.truncf %572 : vector<16x32xf32> to vector<16x32xbf16>
    %cst_170 = arith.constant dense<0.000000e+00> : vector<16x32xf32>
    %574 = tpu.matmul %571, %573, %cst_170 {dimension_numbers = #tpu.dot_dimension_numbers<[1], [0], [0], [1], [0, 0, 1, 1], [], []>} : vector<16x16xbf16>, vector<16x32xbf16>, vector<16x32xf32> -> vector<16x32xf32>
    %575 = tpu.concatenate %511, %532, %553, %574 in 1 : vector<16x32xf32>, vector<16x32xf32>, vector<16x32xf32>, vector<16x32xf32> -> vector<16x128xf32>
    %576 = vector.extract_strided_slice %485 {offsets = [16, 0], sizes = [16, 128], strides = [1, 1]} : vector<64x128xf32> to vector<16x128xf32>
    %577 = vector.extract_strided_slice %486 {offsets = [16, 0], sizes = [16, 128], strides = [1, 1]} : vector<64x128xf32> to vector<16x128xf32>
    %578 = vector.extract_strided_slice %487 {offsets = [16, 0], sizes = [16, 128], strides = [1, 1]} : vector<64x128xf32> to vector<16x128xf32>
    %579 = vector.extract_strided_slice %576 {offsets = [0, 0], sizes = [16, 32], strides = [1, 1]} : vector<16x128xf32> to vector<16x32xf32>
    %580 = arith.truncf %579 : vector<16x32xf32> to vector<16x32xbf16>
    %581 = vector.extract_strided_slice %577 {offsets = [0, 0], sizes = [16, 32], strides = [1, 1]} : vector<16x128xf32> to vector<16x32xf32>
    %582 = arith.truncf %581 : vector<16x32xf32> to vector<16x32xbf16>
    %cst_171 = arith.constant dense<0.000000e+00> : vector<16x16xf32>
    %583 = tpu.matmul %580, %582, %cst_171 {dimension_numbers = #tpu.dot_dimension_numbers<[1], [1], [0], [0], [0, 0, 1, 0], [], []>} : vector<16x32xbf16>, vector<16x32xbf16>, vector<16x16xf32> -> vector<16x16xf32>
    %cst_172 = arith.constant 0.176776692 : f32
    %584 = vector.broadcast %cst_172 : f32 to vector<16x16xf32>
    %585 = arith.mulf %583, %584 : vector<16x16xf32>
    %cst_173 = arith.constant dense<0xFF800000> : vector<16xf32>
    %586 = vector.multi_reduction <maximumf>, %585, %cst_173 [1] : vector<16x16xf32> to vector<16xf32>
    %587 = vector.shape_cast %586 : vector<16xf32> to vector<16x1xf32>
    %588 = vector.broadcast %587 : vector<16x1xf32> to vector<16x16xf32>
    %589 = arith.subf %585, %588 : vector<16x16xf32>
    %590 = math.exp %589 : vector<16x16xf32>
    %cst_174 = arith.constant dense<0.000000e+00> : vector<16xf32>
    %591 = vector.multi_reduction <add>, %590, %cst_174 [1] : vector<16x16xf32> to vector<16xf32>
    %592 = vector.shape_cast %591 : vector<16xf32> to vector<16x1xf32>
    %593 = tpu.reciprocal %592 {approx = true} : vector<16x1xf32> -> vector<16x1xf32>
    %594 = vector.broadcast %593 : vector<16x1xf32> to vector<16x16xf32>
    %595 = arith.mulf %590, %594 : vector<16x16xf32>
    %596 = arith.truncf %595 : vector<16x16xf32> to vector<16x16xbf16>
    %597 = vector.extract_strided_slice %578 {offsets = [0, 0], sizes = [16, 32], strides = [1, 1]} : vector<16x128xf32> to vector<16x32xf32>
    %598 = arith.truncf %597 : vector<16x32xf32> to vector<16x32xbf16>
    %cst_175 = arith.constant dense<0.000000e+00> : vector<16x32xf32>
    %599 = tpu.matmul %596, %598, %cst_175 {dimension_numbers = #tpu.dot_dimension_numbers<[1], [0], [0], [1], [0, 0, 1, 1], [], []>} : vector<16x16xbf16>, vector<16x32xbf16>, vector<16x32xf32> -> vector<16x32xf32>
    %600 = vector.extract_strided_slice %576 {offsets = [0, 32], sizes = [16, 32], strides = [1, 1]} : vector<16x128xf32> to vector<16x32xf32>
    %601 = arith.truncf %600 : vector<16x32xf32> to vector<16x32xbf16>
    %602 = vector.extract_strided_slice %577 {offsets = [0, 32], sizes = [16, 32], strides = [1, 1]} : vector<16x128xf32> to vector<16x32xf32>
    %603 = arith.truncf %602 : vector<16x32xf32> to vector<16x32xbf16>
    %cst_176 = arith.constant dense<0.000000e+00> : vector<16x16xf32>
    %604 = tpu.matmul %601, %603, %cst_176 {dimension_numbers = #tpu.dot_dimension_numbers<[1], [1], [0], [0], [0, 0, 1, 0], [], []>} : vector<16x32xbf16>, vector<16x32xbf16>, vector<16x16xf32> -> vector<16x16xf32>
    %cst_177 = arith.constant 0.176776692 : f32
    %605 = vector.broadcast %cst_177 : f32 to vector<16x16xf32>
    %606 = arith.mulf %604, %605 : vector<16x16xf32>
    %cst_178 = arith.constant dense<0xFF800000> : vector<16xf32>
    %607 = vector.multi_reduction <maximumf>, %606, %cst_178 [1] : vector<16x16xf32> to vector<16xf32>
    %608 = vector.shape_cast %607 : vector<16xf32> to vector<16x1xf32>
    %609 = vector.broadcast %608 : vector<16x1xf32> to vector<16x16xf32>
    %610 = arith.subf %606, %609 : vector<16x16xf32>
    %611 = math.exp %610 : vector<16x16xf32>
    %cst_179 = arith.constant dense<0.000000e+00> : vector<16xf32>
    %612 = vector.multi_reduction <add>, %611, %cst_179 [1] : vector<16x16xf32> to vector<16xf32>
    %613 = vector.shape_cast %612 : vector<16xf32> to vector<16x1xf32>
    %614 = tpu.reciprocal %613 {approx = true} : vector<16x1xf32> -> vector<16x1xf32>
    %615 = vector.broadcast %614 : vector<16x1xf32> to vector<16x16xf32>
    %616 = arith.mulf %611, %615 : vector<16x16xf32>
    %617 = arith.truncf %616 : vector<16x16xf32> to vector<16x16xbf16>
    %618 = vector.extract_strided_slice %578 {offsets = [0, 32], sizes = [16, 32], strides = [1, 1]} : vector<16x128xf32> to vector<16x32xf32>
    %619 = arith.truncf %618 : vector<16x32xf32> to vector<16x32xbf16>
    %cst_180 = arith.constant dense<0.000000e+00> : vector<16x32xf32>
    %620 = tpu.matmul %617, %619, %cst_180 {dimension_numbers = #tpu.dot_dimension_numbers<[1], [0], [0], [1], [0, 0, 1, 1], [], []>} : vector<16x16xbf16>, vector<16x32xbf16>, vector<16x32xf32> -> vector<16x32xf32>
    %621 = vector.extract_strided_slice %576 {offsets = [0, 64], sizes = [16, 32], strides = [1, 1]} : vector<16x128xf32> to vector<16x32xf32>
    %622 = arith.truncf %621 : vector<16x32xf32> to vector<16x32xbf16>
    %623 = vector.extract_strided_slice %577 {offsets = [0, 64], sizes = [16, 32], strides = [1, 1]} : vector<16x128xf32> to vector<16x32xf32>
    %624 = arith.truncf %623 : vector<16x32xf32> to vector<16x32xbf16>
    %cst_181 = arith.constant dense<0.000000e+00> : vector<16x16xf32>
    %625 = tpu.matmul %622, %624, %cst_181 {dimension_numbers = #tpu.dot_dimension_numbers<[1], [1], [0], [0], [0, 0, 1, 0], [], []>} : vector<16x32xbf16>, vector<16x32xbf16>, vector<16x16xf32> -> vector<16x16xf32>
    %cst_182 = arith.constant 0.176776692 : f32
    %626 = vector.broadcast %cst_182 : f32 to vector<16x16xf32>
    %627 = arith.mulf %625, %626 : vector<16x16xf32>
    %cst_183 = arith.constant dense<0xFF800000> : vector<16xf32>
    %628 = vector.multi_reduction <maximumf>, %627, %cst_183 [1] : vector<16x16xf32> to vector<16xf32>
    %629 = vector.shape_cast %628 : vector<16xf32> to vector<16x1xf32>
    %630 = vector.broadcast %629 : vector<16x1xf32> to vector<16x16xf32>
    %631 = arith.subf %627, %630 : vector<16x16xf32>
    %632 = math.exp %631 : vector<16x16xf32>
    %cst_184 = arith.constant dense<0.000000e+00> : vector<16xf32>
    %633 = vector.multi_reduction <add>, %632, %cst_184 [1] : vector<16x16xf32> to vector<16xf32>
    %634 = vector.shape_cast %633 : vector<16xf32> to vector<16x1xf32>
    %635 = tpu.reciprocal %634 {approx = true} : vector<16x1xf32> -> vector<16x1xf32>
    %636 = vector.broadcast %635 : vector<16x1xf32> to vector<16x16xf32>
    %637 = arith.mulf %632, %636 : vector<16x16xf32>
    %638 = arith.truncf %637 : vector<16x16xf32> to vector<16x16xbf16>
    %639 = vector.extract_strided_slice %578 {offsets = [0, 64], sizes = [16, 32], strides = [1, 1]} : vector<16x128xf32> to vector<16x32xf32>
    %640 = arith.truncf %639 : vector<16x32xf32> to vector<16x32xbf16>
    %cst_185 = arith.constant dense<0.000000e+00> : vector<16x32xf32>
    %641 = tpu.matmul %638, %640, %cst_185 {dimension_numbers = #tpu.dot_dimension_numbers<[1], [0], [0], [1], [0, 0, 1, 1], [], []>} : vector<16x16xbf16>, vector<16x32xbf16>, vector<16x32xf32> -> vector<16x32xf32>
    %642 = vector.extract_strided_slice %576 {offsets = [0, 96], sizes = [16, 32], strides = [1, 1]} : vector<16x128xf32> to vector<16x32xf32>
    %643 = arith.truncf %642 : vector<16x32xf32> to vector<16x32xbf16>
    %644 = vector.extract_strided_slice %577 {offsets = [0, 96], sizes = [16, 32], strides = [1, 1]} : vector<16x128xf32> to vector<16x32xf32>
    %645 = arith.truncf %644 : vector<16x32xf32> to vector<16x32xbf16>
    %cst_186 = arith.constant dense<0.000000e+00> : vector<16x16xf32>
    %646 = tpu.matmul %643, %645, %cst_186 {dimension_numbers = #tpu.dot_dimension_numbers<[1], [1], [0], [0], [0, 0, 1, 0], [], []>} : vector<16x32xbf16>, vector<16x32xbf16>, vector<16x16xf32> -> vector<16x16xf32>
    %cst_187 = arith.constant 0.176776692 : f32
    %647 = vector.broadcast %cst_187 : f32 to vector<16x16xf32>
    %648 = arith.mulf %646, %647 : vector<16x16xf32>
    %cst_188 = arith.constant dense<0xFF800000> : vector<16xf32>
    %649 = vector.multi_reduction <maximumf>, %648, %cst_188 [1] : vector<16x16xf32> to vector<16xf32>
    %650 = vector.shape_cast %649 : vector<16xf32> to vector<16x1xf32>
    %651 = vector.broadcast %650 : vector<16x1xf32> to vector<16x16xf32>
    %652 = arith.subf %648, %651 : vector<16x16xf32>
    %653 = math.exp %652 : vector<16x16xf32>
    %cst_189 = arith.constant dense<0.000000e+00> : vector<16xf32>
    %654 = vector.multi_reduction <add>, %653, %cst_189 [1] : vector<16x16xf32> to vector<16xf32>
    %655 = vector.shape_cast %654 : vector<16xf32> to vector<16x1xf32>
    %656 = tpu.reciprocal %655 {approx = true} : vector<16x1xf32> -> vector<16x1xf32>
    %657 = vector.broadcast %656 : vector<16x1xf32> to vector<16x16xf32>
    %658 = arith.mulf %653, %657 : vector<16x16xf32>
    %659 = arith.truncf %658 : vector<16x16xf32> to vector<16x16xbf16>
    %660 = vector.extract_strided_slice %578 {offsets = [0, 96], sizes = [16, 32], strides = [1, 1]} : vector<16x128xf32> to vector<16x32xf32>
    %661 = arith.truncf %660 : vector<16x32xf32> to vector<16x32xbf16>
    %cst_190 = arith.constant dense<0.000000e+00> : vector<16x32xf32>
    %662 = tpu.matmul %659, %661, %cst_190 {dimension_numbers = #tpu.dot_dimension_numbers<[1], [0], [0], [1], [0, 0, 1, 1], [], []>} : vector<16x16xbf16>, vector<16x32xbf16>, vector<16x32xf32> -> vector<16x32xf32>
    %663 = tpu.concatenate %599, %620, %641, %662 in 1 : vector<16x32xf32>, vector<16x32xf32>, vector<16x32xf32>, vector<16x32xf32> -> vector<16x128xf32>
    %664 = vector.extract_strided_slice %485 {offsets = [32, 0], sizes = [16, 128], strides = [1, 1]} : vector<64x128xf32> to vector<16x128xf32>
    %665 = vector.extract_strided_slice %486 {offsets = [32, 0], sizes = [16, 128], strides = [1, 1]} : vector<64x128xf32> to vector<16x128xf32>
    %666 = vector.extract_strided_slice %487 {offsets = [32, 0], sizes = [16, 128], strides = [1, 1]} : vector<64x128xf32> to vector<16x128xf32>
    %667 = vector.extract_strided_slice %664 {offsets = [0, 0], sizes = [16, 32], strides = [1, 1]} : vector<16x128xf32> to vector<16x32xf32>
    %668 = arith.truncf %667 : vector<16x32xf32> to vector<16x32xbf16>
    %669 = vector.extract_strided_slice %665 {offsets = [0, 0], sizes = [16, 32], strides = [1, 1]} : vector<16x128xf32> to vector<16x32xf32>
    %670 = arith.truncf %669 : vector<16x32xf32> to vector<16x32xbf16>
    %cst_191 = arith.constant dense<0.000000e+00> : vector<16x16xf32>
    %671 = tpu.matmul %668, %670, %cst_191 {dimension_numbers = #tpu.dot_dimension_numbers<[1], [1], [0], [0], [0, 0, 1, 0], [], []>} : vector<16x32xbf16>, vector<16x32xbf16>, vector<16x16xf32> -> vector<16x16xf32>
    %cst_192 = arith.constant 0.176776692 : f32
    %672 = vector.broadcast %cst_192 : f32 to vector<16x16xf32>
    %673 = arith.mulf %671, %672 : vector<16x16xf32>
    %cst_193 = arith.constant dense<0xFF800000> : vector<16xf32>
    %674 = vector.multi_reduction <maximumf>, %673, %cst_193 [1] : vector<16x16xf32> to vector<16xf32>
    %675 = vector.shape_cast %674 : vector<16xf32> to vector<16x1xf32>
    %676 = vector.broadcast %675 : vector<16x1xf32> to vector<16x16xf32>
    %677 = arith.subf %673, %676 : vector<16x16xf32>
    %678 = math.exp %677 : vector<16x16xf32>
    %cst_194 = arith.constant dense<0.000000e+00> : vector<16xf32>
    %679 = vector.multi_reduction <add>, %678, %cst_194 [1] : vector<16x16xf32> to vector<16xf32>
    %680 = vector.shape_cast %679 : vector<16xf32> to vector<16x1xf32>
    %681 = tpu.reciprocal %680 {approx = true} : vector<16x1xf32> -> vector<16x1xf32>
    %682 = vector.broadcast %681 : vector<16x1xf32> to vector<16x16xf32>
    %683 = arith.mulf %678, %682 : vector<16x16xf32>
    %684 = arith.truncf %683 : vector<16x16xf32> to vector<16x16xbf16>
    %685 = vector.extract_strided_slice %666 {offsets = [0, 0], sizes = [16, 32], strides = [1, 1]} : vector<16x128xf32> to vector<16x32xf32>
    %686 = arith.truncf %685 : vector<16x32xf32> to vector<16x32xbf16>
    %cst_195 = arith.constant dense<0.000000e+00> : vector<16x32xf32>
    %687 = tpu.matmul %684, %686, %cst_195 {dimension_numbers = #tpu.dot_dimension_numbers<[1], [0], [0], [1], [0, 0, 1, 1], [], []>} : vector<16x16xbf16>, vector<16x32xbf16>, vector<16x32xf32> -> vector<16x32xf32>
    %688 = vector.extract_strided_slice %664 {offsets = [0, 32], sizes = [16, 32], strides = [1, 1]} : vector<16x128xf32> to vector<16x32xf32>
    %689 = arith.truncf %688 : vector<16x32xf32> to vector<16x32xbf16>
    %690 = vector.extract_strided_slice %665 {offsets = [0, 32], sizes = [16, 32], strides = [1, 1]} : vector<16x128xf32> to vector<16x32xf32>
    %691 = arith.truncf %690 : vector<16x32xf32> to vector<16x32xbf16>
    %cst_196 = arith.constant dense<0.000000e+00> : vector<16x16xf32>
    %692 = tpu.matmul %689, %691, %cst_196 {dimension_numbers = #tpu.dot_dimension_numbers<[1], [1], [0], [0], [0, 0, 1, 0], [], []>} : vector<16x32xbf16>, vector<16x32xbf16>, vector<16x16xf32> -> vector<16x16xf32>
    %cst_197 = arith.constant 0.176776692 : f32
    %693 = vector.broadcast %cst_197 : f32 to vector<16x16xf32>
    %694 = arith.mulf %692, %693 : vector<16x16xf32>
    %cst_198 = arith.constant dense<0xFF800000> : vector<16xf32>
    %695 = vector.multi_reduction <maximumf>, %694, %cst_198 [1] : vector<16x16xf32> to vector<16xf32>
    %696 = vector.shape_cast %695 : vector<16xf32> to vector<16x1xf32>
    %697 = vector.broadcast %696 : vector<16x1xf32> to vector<16x16xf32>
    %698 = arith.subf %694, %697 : vector<16x16xf32>
    %699 = math.exp %698 : vector<16x16xf32>
    %cst_199 = arith.constant dense<0.000000e+00> : vector<16xf32>
    %700 = vector.multi_reduction <add>, %699, %cst_199 [1] : vector<16x16xf32> to vector<16xf32>
    %701 = vector.shape_cast %700 : vector<16xf32> to vector<16x1xf32>
    %702 = tpu.reciprocal %701 {approx = true} : vector<16x1xf32> -> vector<16x1xf32>
    %703 = vector.broadcast %702 : vector<16x1xf32> to vector<16x16xf32>
    %704 = arith.mulf %699, %703 : vector<16x16xf32>
    %705 = arith.truncf %704 : vector<16x16xf32> to vector<16x16xbf16>
    %706 = vector.extract_strided_slice %666 {offsets = [0, 32], sizes = [16, 32], strides = [1, 1]} : vector<16x128xf32> to vector<16x32xf32>
    %707 = arith.truncf %706 : vector<16x32xf32> to vector<16x32xbf16>
    %cst_200 = arith.constant dense<0.000000e+00> : vector<16x32xf32>
    %708 = tpu.matmul %705, %707, %cst_200 {dimension_numbers = #tpu.dot_dimension_numbers<[1], [0], [0], [1], [0, 0, 1, 1], [], []>} : vector<16x16xbf16>, vector<16x32xbf16>, vector<16x32xf32> -> vector<16x32xf32>
    %709 = vector.extract_strided_slice %664 {offsets = [0, 64], sizes = [16, 32], strides = [1, 1]} : vector<16x128xf32> to vector<16x32xf32>
    %710 = arith.truncf %709 : vector<16x32xf32> to vector<16x32xbf16>
    %711 = vector.extract_strided_slice %665 {offsets = [0, 64], sizes = [16, 32], strides = [1, 1]} : vector<16x128xf32> to vector<16x32xf32>
    %712 = arith.truncf %711 : vector<16x32xf32> to vector<16x32xbf16>
    %cst_201 = arith.constant dense<0.000000e+00> : vector<16x16xf32>
    %713 = tpu.matmul %710, %712, %cst_201 {dimension_numbers = #tpu.dot_dimension_numbers<[1], [1], [0], [0], [0, 0, 1, 0], [], []>} : vector<16x32xbf16>, vector<16x32xbf16>, vector<16x16xf32> -> vector<16x16xf32>
    %cst_202 = arith.constant 0.176776692 : f32
    %714 = vector.broadcast %cst_202 : f32 to vector<16x16xf32>
    %715 = arith.mulf %713, %714 : vector<16x16xf32>
    %cst_203 = arith.constant dense<0xFF800000> : vector<16xf32>
    %716 = vector.multi_reduction <maximumf>, %715, %cst_203 [1] : vector<16x16xf32> to vector<16xf32>
    %717 = vector.shape_cast %716 : vector<16xf32> to vector<16x1xf32>
    %718 = vector.broadcast %717 : vector<16x1xf32> to vector<16x16xf32>
    %719 = arith.subf %715, %718 : vector<16x16xf32>
    %720 = math.exp %719 : vector<16x16xf32>
    %cst_204 = arith.constant dense<0.000000e+00> : vector<16xf32>
    %721 = vector.multi_reduction <add>, %720, %cst_204 [1] : vector<16x16xf32> to vector<16xf32>
    %722 = vector.shape_cast %721 : vector<16xf32> to vector<16x1xf32>
    %723 = tpu.reciprocal %722 {approx = true} : vector<16x1xf32> -> vector<16x1xf32>
    %724 = vector.broadcast %723 : vector<16x1xf32> to vector<16x16xf32>
    %725 = arith.mulf %720, %724 : vector<16x16xf32>
    %726 = arith.truncf %725 : vector<16x16xf32> to vector<16x16xbf16>
    %727 = vector.extract_strided_slice %666 {offsets = [0, 64], sizes = [16, 32], strides = [1, 1]} : vector<16x128xf32> to vector<16x32xf32>
    %728 = arith.truncf %727 : vector<16x32xf32> to vector<16x32xbf16>
    %cst_205 = arith.constant dense<0.000000e+00> : vector<16x32xf32>
    %729 = tpu.matmul %726, %728, %cst_205 {dimension_numbers = #tpu.dot_dimension_numbers<[1], [0], [0], [1], [0, 0, 1, 1], [], []>} : vector<16x16xbf16>, vector<16x32xbf16>, vector<16x32xf32> -> vector<16x32xf32>
    %730 = vector.extract_strided_slice %664 {offsets = [0, 96], sizes = [16, 32], strides = [1, 1]} : vector<16x128xf32> to vector<16x32xf32>
    %731 = arith.truncf %730 : vector<16x32xf32> to vector<16x32xbf16>
    %732 = vector.extract_strided_slice %665 {offsets = [0, 96], sizes = [16, 32], strides = [1, 1]} : vector<16x128xf32> to vector<16x32xf32>
    %733 = arith.truncf %732 : vector<16x32xf32> to vector<16x32xbf16>
    %cst_206 = arith.constant dense<0.000000e+00> : vector<16x16xf32>
    %734 = tpu.matmul %731, %733, %cst_206 {dimension_numbers = #tpu.dot_dimension_numbers<[1], [1], [0], [0], [0, 0, 1, 0], [], []>} : vector<16x32xbf16>, vector<16x32xbf16>, vector<16x16xf32> -> vector<16x16xf32>
    %cst_207 = arith.constant 0.176776692 : f32
    %735 = vector.broadcast %cst_207 : f32 to vector<16x16xf32>
    %736 = arith.mulf %734, %735 : vector<16x16xf32>
    %cst_208 = arith.constant dense<0xFF800000> : vector<16xf32>
    %737 = vector.multi_reduction <maximumf>, %736, %cst_208 [1] : vector<16x16xf32> to vector<16xf32>
    %738 = vector.shape_cast %737 : vector<16xf32> to vector<16x1xf32>
    %739 = vector.broadcast %738 : vector<16x1xf32> to vector<16x16xf32>
    %740 = arith.subf %736, %739 : vector<16x16xf32>
    %741 = math.exp %740 : vector<16x16xf32>
    %cst_209 = arith.constant dense<0.000000e+00> : vector<16xf32>
    %742 = vector.multi_reduction <add>, %741, %cst_209 [1] : vector<16x16xf32> to vector<16xf32>
    %743 = vector.shape_cast %742 : vector<16xf32> to vector<16x1xf32>
    %744 = tpu.reciprocal %743 {approx = true} : vector<16x1xf32> -> vector<16x1xf32>
    %745 = vector.broadcast %744 : vector<16x1xf32> to vector<16x16xf32>
    %746 = arith.mulf %741, %745 : vector<16x16xf32>
    %747 = arith.truncf %746 : vector<16x16xf32> to vector<16x16xbf16>
    %748 = vector.extract_strided_slice %666 {offsets = [0, 96], sizes = [16, 32], strides = [1, 1]} : vector<16x128xf32> to vector<16x32xf32>
    %749 = arith.truncf %748 : vector<16x32xf32> to vector<16x32xbf16>
    %cst_210 = arith.constant dense<0.000000e+00> : vector<16x32xf32>
    %750 = tpu.matmul %747, %749, %cst_210 {dimension_numbers = #tpu.dot_dimension_numbers<[1], [0], [0], [1], [0, 0, 1, 1], [], []>} : vector<16x16xbf16>, vector<16x32xbf16>, vector<16x32xf32> -> vector<16x32xf32>
    %751 = tpu.concatenate %687, %708, %729, %750 in 1 : vector<16x32xf32>, vector<16x32xf32>, vector<16x32xf32>, vector<16x32xf32> -> vector<16x128xf32>
    %752 = vector.extract_strided_slice %485 {offsets = [48, 0], sizes = [16, 128], strides = [1, 1]} : vector<64x128xf32> to vector<16x128xf32>
    %753 = vector.extract_strided_slice %486 {offsets = [48, 0], sizes = [16, 128], strides = [1, 1]} : vector<64x128xf32> to vector<16x128xf32>
    %754 = vector.extract_strided_slice %487 {offsets = [48, 0], sizes = [16, 128], strides = [1, 1]} : vector<64x128xf32> to vector<16x128xf32>
    %755 = vector.extract_strided_slice %752 {offsets = [0, 0], sizes = [16, 32], strides = [1, 1]} : vector<16x128xf32> to vector<16x32xf32>
    %756 = arith.truncf %755 : vector<16x32xf32> to vector<16x32xbf16>
    %757 = vector.extract_strided_slice %753 {offsets = [0, 0], sizes = [16, 32], strides = [1, 1]} : vector<16x128xf32> to vector<16x32xf32>
    %758 = arith.truncf %757 : vector<16x32xf32> to vector<16x32xbf16>
    %cst_211 = arith.constant dense<0.000000e+00> : vector<16x16xf32>
    %759 = tpu.matmul %756, %758, %cst_211 {dimension_numbers = #tpu.dot_dimension_numbers<[1], [1], [0], [0], [0, 0, 1, 0], [], []>} : vector<16x32xbf16>, vector<16x32xbf16>, vector<16x16xf32> -> vector<16x16xf32>
    %cst_212 = arith.constant 0.176776692 : f32
    %760 = vector.broadcast %cst_212 : f32 to vector<16x16xf32>
    %761 = arith.mulf %759, %760 : vector<16x16xf32>
    %cst_213 = arith.constant dense<0xFF800000> : vector<16xf32>
    %762 = vector.multi_reduction <maximumf>, %761, %cst_213 [1] : vector<16x16xf32> to vector<16xf32>
    %763 = vector.shape_cast %762 : vector<16xf32> to vector<16x1xf32>
    %764 = vector.broadcast %763 : vector<16x1xf32> to vector<16x16xf32>
    %765 = arith.subf %761, %764 : vector<16x16xf32>
    %766 = math.exp %765 : vector<16x16xf32>
    %cst_214 = arith.constant dense<0.000000e+00> : vector<16xf32>
    %767 = vector.multi_reduction <add>, %766, %cst_214 [1] : vector<16x16xf32> to vector<16xf32>
    %768 = vector.shape_cast %767 : vector<16xf32> to vector<16x1xf32>
    %769 = tpu.reciprocal %768 {approx = true} : vector<16x1xf32> -> vector<16x1xf32>
    %770 = vector.broadcast %769 : vector<16x1xf32> to vector<16x16xf32>
    %771 = arith.mulf %766, %770 : vector<16x16xf32>
    %772 = arith.truncf %771 : vector<16x16xf32> to vector<16x16xbf16>
    %773 = vector.extract_strided_slice %754 {offsets = [0, 0], sizes = [16, 32], strides = [1, 1]} : vector<16x128xf32> to vector<16x32xf32>
    %774 = arith.truncf %773 : vector<16x32xf32> to vector<16x32xbf16>
    %cst_215 = arith.constant dense<0.000000e+00> : vector<16x32xf32>
    %775 = tpu.matmul %772, %774, %cst_215 {dimension_numbers = #tpu.dot_dimension_numbers<[1], [0], [0], [1], [0, 0, 1, 1], [], []>} : vector<16x16xbf16>, vector<16x32xbf16>, vector<16x32xf32> -> vector<16x32xf32>
    %776 = vector.extract_strided_slice %752 {offsets = [0, 32], sizes = [16, 32], strides = [1, 1]} : vector<16x128xf32> to vector<16x32xf32>
    %777 = arith.truncf %776 : vector<16x32xf32> to vector<16x32xbf16>
    %778 = vector.extract_strided_slice %753 {offsets = [0, 32], sizes = [16, 32], strides = [1, 1]} : vector<16x128xf32> to vector<16x32xf32>
    %779 = arith.truncf %778 : vector<16x32xf32> to vector<16x32xbf16>
    %cst_216 = arith.constant dense<0.000000e+00> : vector<16x16xf32>
    %780 = tpu.matmul %777, %779, %cst_216 {dimension_numbers = #tpu.dot_dimension_numbers<[1], [1], [0], [0], [0, 0, 1, 0], [], []>} : vector<16x32xbf16>, vector<16x32xbf16>, vector<16x16xf32> -> vector<16x16xf32>
    %cst_217 = arith.constant 0.176776692 : f32
    %781 = vector.broadcast %cst_217 : f32 to vector<16x16xf32>
    %782 = arith.mulf %780, %781 : vector<16x16xf32>
    %cst_218 = arith.constant dense<0xFF800000> : vector<16xf32>
    %783 = vector.multi_reduction <maximumf>, %782, %cst_218 [1] : vector<16x16xf32> to vector<16xf32>
    %784 = vector.shape_cast %783 : vector<16xf32> to vector<16x1xf32>
    %785 = vector.broadcast %784 : vector<16x1xf32> to vector<16x16xf32>
    %786 = arith.subf %782, %785 : vector<16x16xf32>
    %787 = math.exp %786 : vector<16x16xf32>
    %cst_219 = arith.constant dense<0.000000e+00> : vector<16xf32>
    %788 = vector.multi_reduction <add>, %787, %cst_219 [1] : vector<16x16xf32> to vector<16xf32>
    %789 = vector.shape_cast %788 : vector<16xf32> to vector<16x1xf32>
    %790 = tpu.reciprocal %789 {approx = true} : vector<16x1xf32> -> vector<16x1xf32>
    %791 = vector.broadcast %790 : vector<16x1xf32> to vector<16x16xf32>
    %792 = arith.mulf %787, %791 : vector<16x16xf32>
    %793 = arith.truncf %792 : vector<16x16xf32> to vector<16x16xbf16>
    %794 = vector.extract_strided_slice %754 {offsets = [0, 32], sizes = [16, 32], strides = [1, 1]} : vector<16x128xf32> to vector<16x32xf32>
    %795 = arith.truncf %794 : vector<16x32xf32> to vector<16x32xbf16>
    %cst_220 = arith.constant dense<0.000000e+00> : vector<16x32xf32>
    %796 = tpu.matmul %793, %795, %cst_220 {dimension_numbers = #tpu.dot_dimension_numbers<[1], [0], [0], [1], [0, 0, 1, 1], [], []>} : vector<16x16xbf16>, vector<16x32xbf16>, vector<16x32xf32> -> vector<16x32xf32>
    %797 = vector.extract_strided_slice %752 {offsets = [0, 64], sizes = [16, 32], strides = [1, 1]} : vector<16x128xf32> to vector<16x32xf32>
    %798 = arith.truncf %797 : vector<16x32xf32> to vector<16x32xbf16>
    %799 = vector.extract_strided_slice %753 {offsets = [0, 64], sizes = [16, 32], strides = [1, 1]} : vector<16x128xf32> to vector<16x32xf32>
    %800 = arith.truncf %799 : vector<16x32xf32> to vector<16x32xbf16>
    %cst_221 = arith.constant dense<0.000000e+00> : vector<16x16xf32>
    %801 = tpu.matmul %798, %800, %cst_221 {dimension_numbers = #tpu.dot_dimension_numbers<[1], [1], [0], [0], [0, 0, 1, 0], [], []>} : vector<16x32xbf16>, vector<16x32xbf16>, vector<16x16xf32> -> vector<16x16xf32>
    %cst_222 = arith.constant 0.176776692 : f32
    %802 = vector.broadcast %cst_222 : f32 to vector<16x16xf32>
    %803 = arith.mulf %801, %802 : vector<16x16xf32>
    %cst_223 = arith.constant dense<0xFF800000> : vector<16xf32>
    %804 = vector.multi_reduction <maximumf>, %803, %cst_223 [1] : vector<16x16xf32> to vector<16xf32>
    %805 = vector.shape_cast %804 : vector<16xf32> to vector<16x1xf32>
    %806 = vector.broadcast %805 : vector<16x1xf32> to vector<16x16xf32>
    %807 = arith.subf %803, %806 : vector<16x16xf32>
    %808 = math.exp %807 : vector<16x16xf32>
    %cst_224 = arith.constant dense<0.000000e+00> : vector<16xf32>
    %809 = vector.multi_reduction <add>, %808, %cst_224 [1] : vector<16x16xf32> to vector<16xf32>
    %810 = vector.shape_cast %809 : vector<16xf32> to vector<16x1xf32>
    %811 = tpu.reciprocal %810 {approx = true} : vector<16x1xf32> -> vector<16x1xf32>
    %812 = vector.broadcast %811 : vector<16x1xf32> to vector<16x16xf32>
    %813 = arith.mulf %808, %812 : vector<16x16xf32>
    %814 = arith.truncf %813 : vector<16x16xf32> to vector<16x16xbf16>
    %815 = vector.extract_strided_slice %754 {offsets = [0, 64], sizes = [16, 32], strides = [1, 1]} : vector<16x128xf32> to vector<16x32xf32>
    %816 = arith.truncf %815 : vector<16x32xf32> to vector<16x32xbf16>
    %cst_225 = arith.constant dense<0.000000e+00> : vector<16x32xf32>
    %817 = tpu.matmul %814, %816, %cst_225 {dimension_numbers = #tpu.dot_dimension_numbers<[1], [0], [0], [1], [0, 0, 1, 1], [], []>} : vector<16x16xbf16>, vector<16x32xbf16>, vector<16x32xf32> -> vector<16x32xf32>
    %818 = vector.extract_strided_slice %752 {offsets = [0, 96], sizes = [16, 32], strides = [1, 1]} : vector<16x128xf32> to vector<16x32xf32>
    %819 = arith.truncf %818 : vector<16x32xf32> to vector<16x32xbf16>
    %820 = vector.extract_strided_slice %753 {offsets = [0, 96], sizes = [16, 32], strides = [1, 1]} : vector<16x128xf32> to vector<16x32xf32>
    %821 = arith.truncf %820 : vector<16x32xf32> to vector<16x32xbf16>
    %cst_226 = arith.constant dense<0.000000e+00> : vector<16x16xf32>
    %822 = tpu.matmul %819, %821, %cst_226 {dimension_numbers = #tpu.dot_dimension_numbers<[1], [1], [0], [0], [0, 0, 1, 0], [], []>} : vector<16x32xbf16>, vector<16x32xbf16>, vector<16x16xf32> -> vector<16x16xf32>
    %cst_227 = arith.constant 0.176776692 : f32
    %823 = vector.broadcast %cst_227 : f32 to vector<16x16xf32>
    %824 = arith.mulf %822, %823 : vector<16x16xf32>
    %cst_228 = arith.constant dense<0xFF800000> : vector<16xf32>
    %825 = vector.multi_reduction <maximumf>, %824, %cst_228 [1] : vector<16x16xf32> to vector<16xf32>
    %826 = vector.shape_cast %825 : vector<16xf32> to vector<16x1xf32>
    %827 = vector.broadcast %826 : vector<16x1xf32> to vector<16x16xf32>
    %828 = arith.subf %824, %827 : vector<16x16xf32>
    %829 = math.exp %828 : vector<16x16xf32>
    %cst_229 = arith.constant dense<0.000000e+00> : vector<16xf32>
    %830 = vector.multi_reduction <add>, %829, %cst_229 [1] : vector<16x16xf32> to vector<16xf32>
    %831 = vector.shape_cast %830 : vector<16xf32> to vector<16x1xf32>
    %832 = tpu.reciprocal %831 {approx = true} : vector<16x1xf32> -> vector<16x1xf32>
    %833 = vector.broadcast %832 : vector<16x1xf32> to vector<16x16xf32>
    %834 = arith.mulf %829, %833 : vector<16x16xf32>
    %835 = arith.truncf %834 : vector<16x16xf32> to vector<16x16xbf16>
    %836 = vector.extract_strided_slice %754 {offsets = [0, 96], sizes = [16, 32], strides = [1, 1]} : vector<16x128xf32> to vector<16x32xf32>
    %837 = arith.truncf %836 : vector<16x32xf32> to vector<16x32xbf16>
    %cst_230 = arith.constant dense<0.000000e+00> : vector<16x32xf32>
    %838 = tpu.matmul %835, %837, %cst_230 {dimension_numbers = #tpu.dot_dimension_numbers<[1], [0], [0], [1], [0, 0, 1, 1], [], []>} : vector<16x16xbf16>, vector<16x32xbf16>, vector<16x32xf32> -> vector<16x32xf32>
    %839 = tpu.concatenate %775, %796, %817, %838 in 1 : vector<16x32xf32>, vector<16x32xf32>, vector<16x32xf32>, vector<16x32xf32> -> vector<16x128xf32>
    %840 = tpu.concatenate %575, %663, %751, %839 in 0 : vector<16x128xf32>, vector<16x128xf32>, vector<16x128xf32>, vector<16x128xf32> -> vector<64x128xf32>
    %841 = arith.truncf %840 : vector<64x128xf32> to vector<64x128xbf16>
    %c1_231 = arith.constant 1 : index
    %c0_232 = arith.constant 0 : index
    %c0_233 = arith.constant 0 : index
    %842 = vector.load %arg3[%c1_231, %c0_232, %c0_233] : memref<2x128x128xbf16, #tpu.memory_space<vmem>>, vector<1x128x128xbf16>
    %843 = vector.shape_cast %842 : vector<1x128x128xbf16> to vector<128x128xbf16>
    %cst_234 = arith.constant dense<0.000000e+00> : vector<64x128xf32>
    %844 = tpu.matmul %841, %843, %cst_234 {dimension_numbers = #tpu.dot_dimension_numbers<[1], [0], [0], [1], [0, 0, 1, 1], [], []>} : vector<64x128xbf16>, vector<128x128xbf16>, vector<64x128xf32> -> vector<64x128xf32>
    %c1_235 = arith.constant 1 : index
    %c0_236 = arith.constant 0 : index
    %c0_237 = arith.constant 0 : index
    %845 = vector.load %arg4[%c1_235, %c0_236, %c0_237] : memref<2x1x128xf32, #tpu.memory_space<vmem>>, vector<1x1x128xf32>
    %846 = vector.shape_cast %845 : vector<1x1x128xf32> to vector<1x128xf32>
    %847 = vector.broadcast %846 : vector<1x128xf32> to vector<64x128xf32>
    %848 = arith.addf %844, %847 : vector<64x128xf32>
    %849 = arith.addf %476, %848 : vector<64x128xf32>
    %c1_238 = arith.constant 1 : index
    %c0_239 = arith.constant 0 : index
    %c0_240 = arith.constant 0 : index
    %850 = vector.load %arg5[%c1_238, %c0_239, %c0_240] : memref<2x1x128xf32, #tpu.memory_space<vmem>>, vector<1x1x128xf32>
    %851 = vector.shape_cast %850 : vector<1x1x128xf32> to vector<1x128xf32>
    %c1_241 = arith.constant 1 : index
    %c0_242 = arith.constant 0 : index
    %c0_243 = arith.constant 0 : index
    %852 = vector.load %arg6[%c1_241, %c0_242, %c0_243] : memref<2x1x128xf32, #tpu.memory_space<vmem>>, vector<1x1x128xf32>
    %853 = vector.shape_cast %852 : vector<1x1x128xf32> to vector<1x128xf32>
    %cst_244 = arith.constant dense<0.000000e+00> : vector<128xf32>
    %854 = vector.multi_reduction <add>, %849, %cst_244 [0] : vector<64x128xf32> to vector<128xf32>
    %855 = vector.shape_cast %854 : vector<128xf32> to vector<1x128xf32>
    %cst_245 = arith.constant 6.400000e+01 : f32
    %856 = vector.broadcast %cst_245 : f32 to vector<1x128xf32>
    %857 = arith.divf %855, %856 : vector<1x128xf32>
    %858 = vector.broadcast %857 : vector<1x128xf32> to vector<64x128xf32>
    %859 = arith.subf %849, %858 : vector<64x128xf32>
    %860 = arith.mulf %859, %859 : vector<64x128xf32>
    %cst_246 = arith.constant dense<0.000000e+00> : vector<128xf32>
    %861 = vector.multi_reduction <add>, %860, %cst_246 [0] : vector<64x128xf32> to vector<128xf32>
    %862 = vector.shape_cast %861 : vector<128xf32> to vector<1x128xf32>
    %cst_247 = arith.constant 6.400000e+01 : f32
    %863 = vector.broadcast %cst_247 : f32 to vector<1x128xf32>
    %864 = arith.divf %862, %863 : vector<1x128xf32>
    %cst_248 = arith.constant 9.99999974E-6 : f32
    %865 = vector.broadcast %cst_248 : f32 to vector<1x128xf32>
    %866 = arith.addf %864, %865 : vector<1x128xf32>
    %867 = math.rsqrt %866 : vector<1x128xf32>
    %868 = arith.mulf %851, %867 : vector<1x128xf32>
    %869 = vector.broadcast %868 : vector<1x128xf32> to vector<64x128xf32>
    %870 = arith.mulf %859, %869 : vector<64x128xf32>
    %871 = vector.broadcast %853 : vector<1x128xf32> to vector<64x128xf32>
    %872 = arith.addf %870, %871 : vector<64x128xf32>
    %873 = arith.truncf %872 : vector<64x128xf32> to vector<64x128xbf16>
    %c1_249 = arith.constant 1 : index
    %c0_250 = arith.constant 0 : index
    %c0_251 = arith.constant 0 : index
    %874 = vector.load %arg7[%c1_249, %c0_250, %c0_251] : memref<2x128x256xbf16, #tpu.memory_space<vmem>>, vector<1x128x256xbf16>
    %875 = vector.shape_cast %874 : vector<1x128x256xbf16> to vector<128x256xbf16>
    %cst_252 = arith.constant dense<0.000000e+00> : vector<64x256xf32>
    %876 = tpu.matmul %873, %875, %cst_252 {dimension_numbers = #tpu.dot_dimension_numbers<[1], [0], [0], [1], [0, 0, 1, 1], [], []>} : vector<64x128xbf16>, vector<128x256xbf16>, vector<64x256xf32> -> vector<64x256xf32>
    %c1_253 = arith.constant 1 : index
    %c0_254 = arith.constant 0 : index
    %c0_255 = arith.constant 0 : index
    %877 = vector.load %arg8[%c1_253, %c0_254, %c0_255] : memref<2x1x256xf32, #tpu.memory_space<vmem>>, vector<1x1x256xf32>
    %878 = vector.shape_cast %877 : vector<1x1x256xf32> to vector<1x256xf32>
    %879 = vector.broadcast %878 : vector<1x256xf32> to vector<64x256xf32>
    %880 = arith.addf %876, %879 : vector<64x256xf32>
    %cst_256 = arith.constant 5.000000e-01 : f32
    %881 = vector.broadcast %cst_256 : f32 to vector<64x256xf32>
    %882 = arith.mulf %881, %880 : vector<64x256xf32>
    %cst_257 = arith.constant 0.707106769 : f32
    %883 = vector.broadcast %cst_257 : f32 to vector<64x256xf32>
    %884 = arith.mulf %880, %883 : vector<64x256xf32>
    %885 = math.absf %884 : vector<64x256xf32>
    %cst_258 = arith.constant 0.327591091 : f32
    %886 = vector.broadcast %cst_258 : f32 to vector<64x256xf32>
    %887 = arith.mulf %886, %885 : vector<64x256xf32>
    %cst_259 = arith.constant 1.000000e+00 : f32
    %888 = vector.broadcast %cst_259 : f32 to vector<64x256xf32>
    %889 = arith.addf %888, %887 : vector<64x256xf32>
    %cst_260 = arith.constant 1.000000e+00 : f32
    %890 = vector.broadcast %cst_260 : f32 to vector<64x256xf32>
    %891 = arith.divf %890, %889 : vector<64x256xf32>
    %cst_261 = arith.constant 1.06140542 : f32
    %892 = vector.broadcast %cst_261 : f32 to vector<64x256xf32>
    %893 = arith.mulf %892, %891 : vector<64x256xf32>
    %cst_262 = arith.constant -1.45315206 : f32
    %894 = vector.broadcast %cst_262 : f32 to vector<64x256xf32>
    %895 = arith.addf %893, %894 : vector<64x256xf32>
    %896 = arith.mulf %895, %891 : vector<64x256xf32>
    %cst_263 = arith.constant 1.42141378 : f32
    %897 = vector.broadcast %cst_263 : f32 to vector<64x256xf32>
    %898 = arith.addf %896, %897 : vector<64x256xf32>
    %899 = arith.mulf %898, %891 : vector<64x256xf32>
    %cst_264 = arith.constant -0.284496725 : f32
    %900 = vector.broadcast %cst_264 : f32 to vector<64x256xf32>
    %901 = arith.addf %899, %900 : vector<64x256xf32>
    %902 = arith.mulf %901, %891 : vector<64x256xf32>
    %cst_265 = arith.constant 0.254829586 : f32
    %903 = vector.broadcast %cst_265 : f32 to vector<64x256xf32>
    %904 = arith.addf %902, %903 : vector<64x256xf32>
    %905 = arith.mulf %904, %891 : vector<64x256xf32>
    %cst_266 = arith.constant 0.000000e+00 : f32
    %906 = vector.broadcast %cst_266 : f32 to vector<64x256xf32>
    %907 = arith.subf %906, %885 : vector<64x256xf32>
    %908 = arith.mulf %907, %885 : vector<64x256xf32>
    %909 = math.exp %908 : vector<64x256xf32>
    %910 = arith.mulf %905, %909 : vector<64x256xf32>
    %cst_267 = arith.constant 1.000000e+00 : f32
    %911 = vector.broadcast %cst_267 : f32 to vector<64x256xf32>
    %912 = arith.subf %911, %910 : vector<64x256xf32>
    %cst_268 = arith.constant 0.000000e+00 : f32
    %913 = vector.broadcast %cst_268 : f32 to vector<64x256xf32>
    %914 = arith.cmpf oge, %884, %913 : vector<64x256xf32>
    %cst_269 = arith.constant 0.000000e+00 : f32
    %915 = vector.broadcast %cst_269 : f32 to vector<64x256xf32>
    %916 = arith.subf %915, %912 : vector<64x256xf32>
    %917 = arith.select %914, %912, %916 : vector<64x256xi1>, vector<64x256xf32>
    %cst_270 = arith.constant 1.000000e+00 : f32
    %918 = vector.broadcast %cst_270 : f32 to vector<64x256xf32>
    %919 = arith.addf %918, %917 : vector<64x256xf32>
    %920 = arith.mulf %882, %919 : vector<64x256xf32>
    %921 = arith.truncf %920 : vector<64x256xf32> to vector<64x256xbf16>
    %c1_271 = arith.constant 1 : index
    %c0_272 = arith.constant 0 : index
    %c0_273 = arith.constant 0 : index
    %922 = vector.load %arg9[%c1_271, %c0_272, %c0_273] : memref<2x256x128xbf16, #tpu.memory_space<vmem>>, vector<1x256x128xbf16>
    %923 = vector.shape_cast %922 : vector<1x256x128xbf16> to vector<256x128xbf16>
    %cst_274 = arith.constant dense<0.000000e+00> : vector<64x128xf32>
    %924 = tpu.matmul %921, %923, %cst_274 {dimension_numbers = #tpu.dot_dimension_numbers<[1], [0], [0], [1], [0, 0, 1, 1], [], []>} : vector<64x256xbf16>, vector<256x128xbf16>, vector<64x128xf32> -> vector<64x128xf32>
    %c1_275 = arith.constant 1 : index
    %c0_276 = arith.constant 0 : index
    %c0_277 = arith.constant 0 : index
    %925 = vector.load %arg10[%c1_275, %c0_276, %c0_277] : memref<2x1x128xf32, #tpu.memory_space<vmem>>, vector<1x1x128xf32>
    %926 = vector.shape_cast %925 : vector<1x1x128xf32> to vector<1x128xf32>
    %927 = vector.broadcast %926 : vector<1x128xf32> to vector<64x128xf32>
    %928 = arith.addf %924, %927 : vector<64x128xf32>
    %929 = arith.addf %872, %928 : vector<64x128xf32>
    %c1_278 = arith.constant 1 : index
    %c0_279 = arith.constant 0 : index
    %c0_280 = arith.constant 0 : index
    %930 = vector.load %arg11[%c1_278, %c0_279, %c0_280] : memref<2x1x128xf32, #tpu.memory_space<vmem>>, vector<1x1x128xf32>
    %931 = vector.shape_cast %930 : vector<1x1x128xf32> to vector<1x128xf32>
    %c1_281 = arith.constant 1 : index
    %c0_282 = arith.constant 0 : index
    %c0_283 = arith.constant 0 : index
    %932 = vector.load %arg12[%c1_281, %c0_282, %c0_283] : memref<2x1x128xf32, #tpu.memory_space<vmem>>, vector<1x1x128xf32>
    %933 = vector.shape_cast %932 : vector<1x1x128xf32> to vector<1x128xf32>
    %cst_284 = arith.constant dense<0.000000e+00> : vector<128xf32>
    %934 = vector.multi_reduction <add>, %929, %cst_284 [0] : vector<64x128xf32> to vector<128xf32>
    %935 = vector.shape_cast %934 : vector<128xf32> to vector<1x128xf32>
    %cst_285 = arith.constant 6.400000e+01 : f32
    %936 = vector.broadcast %cst_285 : f32 to vector<1x128xf32>
    %937 = arith.divf %935, %936 : vector<1x128xf32>
    %938 = vector.broadcast %937 : vector<1x128xf32> to vector<64x128xf32>
    %939 = arith.subf %929, %938 : vector<64x128xf32>
    %940 = arith.mulf %939, %939 : vector<64x128xf32>
    %cst_286 = arith.constant dense<0.000000e+00> : vector<128xf32>
    %941 = vector.multi_reduction <add>, %940, %cst_286 [0] : vector<64x128xf32> to vector<128xf32>
    %942 = vector.shape_cast %941 : vector<128xf32> to vector<1x128xf32>
    %cst_287 = arith.constant 6.400000e+01 : f32
    %943 = vector.broadcast %cst_287 : f32 to vector<1x128xf32>
    %944 = arith.divf %942, %943 : vector<1x128xf32>
    %cst_288 = arith.constant 9.99999974E-6 : f32
    %945 = vector.broadcast %cst_288 : f32 to vector<1x128xf32>
    %946 = arith.addf %944, %945 : vector<1x128xf32>
    %947 = math.rsqrt %946 : vector<1x128xf32>
    %948 = arith.mulf %931, %947 : vector<1x128xf32>
    %949 = vector.broadcast %948 : vector<1x128xf32> to vector<64x128xf32>
    %950 = arith.mulf %939, %949 : vector<64x128xf32>
    %951 = vector.broadcast %933 : vector<1x128xf32> to vector<64x128xf32>
    %952 = arith.addf %950, %951 : vector<64x128xf32>
    %953 = arith.truncf %952 : vector<64x128xf32> to vector<64x128xbf16>
    %c0_289 = arith.constant 0 : index
    %c0_290 = arith.constant 0 : index
    %954 = vector.load %arg13[%c0_289, %c0_290] : memref<128x64xbf16, #tpu.memory_space<vmem>>, vector<128x64xbf16>
    %cst_291 = arith.constant dense<0.000000e+00> : vector<64x64xf32>
    %955 = tpu.matmul %953, %954, %cst_291 {dimension_numbers = #tpu.dot_dimension_numbers<[1], [0], [0], [1], [0, 0, 1, 1], [], []>} : vector<64x128xbf16>, vector<128x64xbf16>, vector<64x64xf32> -> vector<64x64xf32>
    %c0_292 = arith.constant 0 : index
    %c0_293 = arith.constant 0 : index
    %956 = vector.load %arg14[%c0_292, %c0_293] : memref<1x64xf32, #tpu.memory_space<vmem>>, vector<1x64xf32>
    %957 = vector.broadcast %956 : vector<1x64xf32> to vector<64x64xf32>
    %958 = arith.addf %955, %957 : vector<64x64xf32>
    %c0_294 = arith.constant 0 : index
    %c0_295 = arith.constant 0 : index
    %959 = vector.load %arg15[%c0_294, %c0_295] : memref<16x1xf32, #tpu.memory_space<vmem>>, vector<16x1xf32>
    %960 = vector.extract_strided_slice %958 {offsets = [0, 0], sizes = [16, 64], strides = [1, 1]} : vector<64x64xf32> to vector<16x64xf32>
    %c0_296 = arith.constant 0 : index
    %c0_297 = arith.constant 0 : index
    %c0_298 = arith.constant 0 : index
    %961 = vector.load %arg17[%c0_296, %c0_297, %c0_298] : memref<4x16x64xf32, #tpu.memory_space<vmem>>, vector<1x16x64xf32>
    %962 = vector.shape_cast %961 : vector<1x16x64xf32> to vector<16x64xf32>
    %963 = vector.shape_cast %960 : vector<16x64xf32> to vector<1x16x64xf32>
    tpu.vector_store %arg17[%c0_296, %c0_297, %c0_298], %963 {strides = array<i32>} : memref<4x16x64xf32, #tpu.memory_space<vmem>>, vector<1x16x64xf32>,
    %964 = vector.broadcast %959 : vector<16x1xf32> to vector<16x64xf32>
    %965 = arith.mulf %960, %964 : vector<16x64xf32>
    %cst_299 = arith.constant dense<0.000000e+00> : vector<64xf32>
    %966 = vector.multi_reduction <add>, %965, %cst_299 [0] : vector<16x64xf32> to vector<64xf32>
    %967 = vector.shape_cast %966 : vector<64xf32> to vector<1x64xf32>
    %968 = vector.extract_strided_slice %958 {offsets = [16, 0], sizes = [16, 64], strides = [1, 1]} : vector<64x64xf32> to vector<16x64xf32>
    %c1_300 = arith.constant 1 : index
    %c0_301 = arith.constant 0 : index
    %c0_302 = arith.constant 0 : index
    %969 = vector.load %arg17[%c1_300, %c0_301, %c0_302] : memref<4x16x64xf32, #tpu.memory_space<vmem>>, vector<1x16x64xf32>
    %970 = vector.shape_cast %969 : vector<1x16x64xf32> to vector<16x64xf32>
    %971 = vector.shape_cast %968 : vector<16x64xf32> to vector<1x16x64xf32>
    tpu.vector_store %arg17[%c1_300, %c0_301, %c0_302], %971 {strides = array<i32>} : memref<4x16x64xf32, #tpu.memory_space<vmem>>, vector<1x16x64xf32>,
    %972 = vector.broadcast %959 : vector<16x1xf32> to vector<16x64xf32>
    %973 = arith.mulf %968, %972 : vector<16x64xf32>
    %cst_303 = arith.constant dense<0.000000e+00> : vector<64xf32>
    %974 = vector.multi_reduction <add>, %973, %cst_303 [0] : vector<16x64xf32> to vector<64xf32>
    %975 = vector.shape_cast %974 : vector<64xf32> to vector<1x64xf32>
    %976 = vector.extract_strided_slice %958 {offsets = [32, 0], sizes = [16, 64], strides = [1, 1]} : vector<64x64xf32> to vector<16x64xf32>
    %c2 = arith.constant 2 : index
    %c0_304 = arith.constant 0 : index
    %c0_305 = arith.constant 0 : index
    %977 = vector.load %arg17[%c2, %c0_304, %c0_305] : memref<4x16x64xf32, #tpu.memory_space<vmem>>, vector<1x16x64xf32>
    %978 = vector.shape_cast %977 : vector<1x16x64xf32> to vector<16x64xf32>
    %979 = vector.shape_cast %976 : vector<16x64xf32> to vector<1x16x64xf32>
    tpu.vector_store %arg17[%c2, %c0_304, %c0_305], %979 {strides = array<i32>} : memref<4x16x64xf32, #tpu.memory_space<vmem>>, vector<1x16x64xf32>,
    %980 = vector.broadcast %959 : vector<16x1xf32> to vector<16x64xf32>
    %981 = arith.mulf %976, %980 : vector<16x64xf32>
    %cst_306 = arith.constant dense<0.000000e+00> : vector<64xf32>
    %982 = vector.multi_reduction <add>, %981, %cst_306 [0] : vector<16x64xf32> to vector<64xf32>
    %983 = vector.shape_cast %982 : vector<64xf32> to vector<1x64xf32>
    %984 = vector.extract_strided_slice %958 {offsets = [48, 0], sizes = [16, 64], strides = [1, 1]} : vector<64x64xf32> to vector<16x64xf32>
    %c3 = arith.constant 3 : index
    %c0_307 = arith.constant 0 : index
    %c0_308 = arith.constant 0 : index
    %985 = vector.load %arg17[%c3, %c0_307, %c0_308] : memref<4x16x64xf32, #tpu.memory_space<vmem>>, vector<1x16x64xf32>
    %986 = vector.shape_cast %985 : vector<1x16x64xf32> to vector<16x64xf32>
    %987 = vector.shape_cast %984 : vector<16x64xf32> to vector<1x16x64xf32>
    tpu.vector_store %arg17[%c3, %c0_307, %c0_308], %987 {strides = array<i32>} : memref<4x16x64xf32, #tpu.memory_space<vmem>>, vector<1x16x64xf32>,
    %988 = vector.broadcast %959 : vector<16x1xf32> to vector<16x64xf32>
    %989 = arith.mulf %984, %988 : vector<16x64xf32>
    %cst_309 = arith.constant dense<0.000000e+00> : vector<64xf32>
    %990 = vector.multi_reduction <add>, %989, %cst_309 [0] : vector<16x64xf32> to vector<64xf32>
    %991 = vector.shape_cast %990 : vector<64xf32> to vector<1x64xf32>
    %992 = tpu.concatenate %967, %975, %983, %991 in 0 : vector<1x64xf32>, vector<1x64xf32>, vector<1x64xf32>, vector<1x64xf32> -> vector<4x64xf32>
    %c0_310 = arith.constant 0 : index
    %993 = memref.load %arg16[%c0_310] : memref<1xf32, #tpu.memory_space<smem>>
    %994 = vector.broadcast %993 : f32 to vector<4x64xf32>
    %995 = arith.addf %992, %994 : vector<4x64xf32>
    %cst_311 = arith.constant 0.000000e+00 : f32
    %996 = vector.broadcast %cst_311 : f32 to vector<4x64xf32>
    %997 = arith.subf %996, %995 : vector<4x64xf32>
    %998 = math.exp %997 : vector<4x64xf32>
    %cst_312 = arith.constant 1.000000e+00 : f32
    %999 = vector.broadcast %cst_312 : f32 to vector<4x64xf32>
    %1000 = arith.addf %999, %998 : vector<4x64xf32>
    %cst_313 = arith.constant 1.000000e+00 : f32
    %1001 = vector.broadcast %cst_313 : f32 to vector<4x64xf32>
    %1002 = arith.divf %1001, %1000 : vector<4x64xf32>
    %c0_314 = arith.constant 0 : index
    %c0_315 = arith.constant 0 : index
    %1003 = vector.load %arg18[%c0_314, %c0_315] : memref<4x64xf32, #tpu.memory_space<vmem>>, vector<4x64xf32>
    tpu.vector_store %arg18[%c0_314, %c0_315], %1002 {strides = array<i32>} : memref<4x64xf32, #tpu.memory_space<vmem>>, vector<4x64xf32>,
    return
  }
}

</mosaic_0001>

<bundles_post_ra>
// kernel: ts_transformer_forward.2
= control target key start
LH: loop header
LB: loop body
LE: loop exit
PB: predicated region body
PF: predicated region fallthrough
CT: control target
= control target key end

     0   :  { %8 = vsyncpa [#allocation3], 0  ;;  %s1412_s12 = smov [#allocation2]   ;;  %s1509_s0 = inlined_call_operand.vmem [shape: f32[4,128], index: 0, kind: input, shape index: {}]   ;;  %s1510_s1 = inlined_call_operand.hbm [shape: bf16[128,2048], index: 1, kind: input, shape index: {}]   ;;  %s1511_s2 = inlined_call_operand.vmem [shape: f32[1,2048], index: 2, kind: input, shape index: {}]   ;;  %s1512_s3 = inlined_call_operand.vmem [shape: f32[4,2048], index: 3, kind: output, shape index: {}]  }
   0x1   :  { %s16_s13 = sshll.u32 %s1412_s12, 4  ;;  %s1388_s16 = scalar_lea.hbm %s1510_s1, 16384  ;;  %s17_s13 = int_to_ptr.vmem [resolvable:$true] %s16_s13 }
   0x2   :  { %p1389_p0 = scmp.ne.s32.totalorder %s1510_s1, %s1388_s16  ;;  %p1392_p1 = scmp.lt.u32.totalorder %s1388_s16, %s1510_s1 }
   0x4   :  { %p1394_p2 = pnand %p1392_p1, %p1389_p0 }
   0x6   :  { %1397 = shalt.err (!%p1394_p2)
}
   0x7   :  { %s1398_s21 = scalar_lea.vmem %s17_s13, 16384  ;;  %p1403_p4 = scmp.lt.s32.totalorder %s17_s13, %s17_s13 }
   0x8   :  { %p1399_p3 = scmp.ne.s32.totalorder %s17_s13, %s1398_s21  ;;  %p1404_p5 = scmp.lt.s32.totalorder %s1398_s21, %s1398_s21 }
   0xa   :  { %p1405_p6 = por %p1404_p5, %p1403_p4 }
   0xc   :  { %p1406_p7 = pnand %p1405_p6, %p1399_p3 }
   0xe   :  { %1409 = shalt.err (!%p1406_p7)
}
   0xf   :  { %s1413_s22 = smov 1024   ;;  %s1414_s23 = smov 64  }
  0x10   :  { %22 = dma.hbm_to_vmem [thread:$0]  %s1510_s1, 16384, %s17_s13, [#allocation3], %s1413_s22, %s1413_s22, %s1414_s23  }
  0x11   :  { %1410 = dma.done.wait [#allocation3], 16384  }
  0x12   :  { %1411 = vsyncadd [#allocation3], 4294950912  ;;  %v1415_v0 = vmov 0   ;;  %v31_v1 = vld [vmem:[#allocation2] sm:$0xff]  ;;  %v32_v3 = vld [vmem:[#allocation2 + $0x8] sm:$0xff] }
  0x13   :  { %915 = vmatprep.mubr.bf16.mxu0 %v1415_v0  ;;  %956 = vmatprep.mubr.bf16.mxu1 %v1415_v0  ;;  %v39_v2 = vld [vmem:[#allocation2 + $0x40] sm:$0xff]  ;;  %v40_v5 = vld [vmem:[#allocation2 + $0x48] sm:$0xff]  ;;  %v33_v63 = vld [vmem:[#allocation2 + $0x10] sm:$0xff] }
  0x14   :  { %v1257_v4 = vcombine.high %v31_v1, %v39_v2  ;;  %v1256_v6 = vcombine.low %v31_v1, %v39_v2  ;;  %v47_v7 = vld [vmem:[#allocation2 + $0x80] sm:$0xff]  ;;  %v1259_v9 = vcombine.high %v32_v3, %v40_v5  ;;  %v1258_v10 = vcombine.low %v32_v3, %v40_v5  ;;  %v48_v12 = vld [vmem:[#allocation2 + $0x88] sm:$0xff]  ;;  %v41_v1 = vld [vmem:[#allocation2 + $0x50] sm:$0xff] }
  0x15   :  { %v55_v8 = vld [vmem:[#allocation2 + $0xc0] sm:$0xff]  ;;  %v56_v13 = vld [vmem:[#allocation2 + $0xc8] sm:$0xff]  ;;  %v34_v2 = vld [vmem:[#allocation2 + $0x18] sm:$0xff] }
  0x16   :  { %v1273_v11 = vcombine.high %v47_v7, %v55_v8  ;;  %v63_v14 = vld [vmem:[#allocation2 + $0x100] sm:$0xff]  ;;  %883 = vmatprep.subr.bf16.mxu0 %v1257_v4  ;;  %v1275_v15 = vcombine.high %v48_v12, %v56_v13  ;;  %v64_v17 = vld [vmem:[#allocation2 + $0x108] sm:$0xff]  ;;  %924 = vmatprep.subr.bf16.mxu1 %v1259_v9  ;;  %v1272_v19 = vcombine.low %v47_v7, %v55_v8  ;;  %v42_v3 = vld [vmem:[#allocation2 + $0x58] sm:$0xff] }
  0x17   :  { %v71_v16 = vld [vmem:[#allocation2 + $0x140] sm:$0xff]  ;;  %v72_v18 = vld [vmem:[#allocation2 + $0x148] sm:$0xff]  ;;  %884 = vmatpush1.bf16.msra.mxu0 %v1256_v6  ;;  %925 = vmatpush1.bf16.msra.mxu1 %v1258_v10  ;;  %v1274_v20 = vcombine.low %v48_v12, %v56_v13  ;;  %v1261_v7 = vcombine.high %v33_v63, %v41_v1  ;;  %v1263_v8 = vcombine.high %v34_v2, %v42_v3  ;;  %v49_v9 = vld [vmem:[#allocation2 + $0x90] sm:$0xff] }
  0x18   :  { %885 = vmatprep.subr.bf16.mxu0 %v1273_v11  ;;  %v1289_v21 = vcombine.high %v63_v14, %v71_v16  ;;  %926 = vmatprep.subr.bf16.mxu1 %v1275_v15  ;;  %v1291_v22 = vcombine.high %v64_v17, %v72_v18  ;;  %v79_v23 = vld [vmem:[#allocation2 + $0x180] sm:$0xff]  ;;  %v80_v25 = vld [vmem:[#allocation2 + $0x188] sm:$0xff]  ;;  %v1288_v27 = vcombine.low %v63_v14, %v71_v16  ;;  %v57_v10 = vld [vmem:[#allocation2 + $0xd0] sm:$0xff] }
  0x19   :  { %v87_v24 = vld [vmem:[#allocation2 + $0x1c0] sm:$0xff]  ;;  %v88_v26 = vld [vmem:[#allocation2 + $0x1c8] sm:$0xff]  ;;  %v1290_v28 = vcombine.low %v64_v17, %v72_v18  ;;  %v50_v12 = vld [vmem:[#allocation2 + $0x98] sm:$0xff]  ;;  %v1260_v14 = vcombine.low %v33_v63, %v41_v1  ;;  %v1262_v15 = vcombine.low %v34_v2, %v42_v3  ;;  %v1277_v16 = vcombine.high %v49_v9, %v57_v10 }
  0x1a   :  { %v1305_v29 = vcombine.high %v79_v23, %v87_v24  ;;  %v1307_v30 = vcombine.high %v80_v25, %v88_v26  ;;  %v95_v31 = vld [vmem:[#allocation2 + $0x200] sm:$0xff]  ;;  %v96_v33 = vld [vmem:[#allocation2 + $0x208] sm:$0xff]  ;;  %v1304_v35 = vcombine.low %v79_v23, %v87_v24  ;;  %v1306_v36 = vcombine.low %v80_v25, %v88_v26  ;;  %v58_v13 = vld [vmem:[#allocation2 + $0xd8] sm:$0xff] }
  0x1b   :  { %886 = vmatpush1.bf16.msra.mxu0 %v1272_v19  ;;  %927 = vmatpush1.bf16.msra.mxu1 %v1274_v20  ;;  %v103_v32 = vld [vmem:[#allocation2 + $0x240] sm:$0xff]  ;;  %v104_v34 = vld [vmem:[#allocation2 + $0x248] sm:$0xff]  ;;  %v1279_v17 = vcombine.high %v50_v12, %v58_v13  ;;  %v65_v18 = vld [vmem:[#allocation2 + $0x110] sm:$0xff]  ;;  %v1278_v23 = vcombine.low %v50_v12, %v58_v13 }
  0x1c   :  { %887 = vmatprep.subr.bf16.mxu0 %v1289_v21  ;;  %928 = vmatprep.subr.bf16.mxu1 %v1291_v22  ;;  %v1321_v37 = vcombine.high %v95_v31, %v103_v32  ;;  %v1323_v38 = vcombine.high %v96_v33, %v104_v34  ;;  %v111_v39 = vld [vmem:[#allocation2 + $0x280] sm:$0xff]  ;;  %v112_v41 = vld [vmem:[#allocation2 + $0x288] sm:$0xff]  ;;  %v1320_v43 = vcombine.low %v95_v31, %v103_v32  ;;  %v73_v19 = vld [vmem:[#allocation2 + $0x150] sm:$0xff] }
  0x1d   :  { %v119_v40 = vld [vmem:[#allocation2 + $0x2c0] sm:$0xff]  ;;  %v120_v42 = vld [vmem:[#allocation2 + $0x2c8] sm:$0xff]  ;;  %v1322_v44 = vcombine.low %v96_v33, %v104_v34  ;;  %v66_v20 = vld [vmem:[#allocation2 + $0x118] sm:$0xff]  ;;  %v1276_v22 = vcombine.low %v49_v9, %v57_v10  ;;  %v1293_v24 = vcombine.high %v65_v18, %v73_v19 }
  0x1e   :  { %v1337_v45 = vcombine.high %v111_v39, %v119_v40  ;;  %v1339_v46 = vcombine.high %v112_v41, %v120_v42  ;;  %v127_v47 = vld [vmem:[#allocation2 + $0x300] sm:$0xff]  ;;  %v128_v49 = vld [vmem:[#allocation2 + $0x308] sm:$0xff]  ;;  %v1336_v51 = vcombine.low %v111_v39, %v119_v40  ;;  %v1338_v52 = vcombine.low %v112_v41, %v120_v42  ;;  %v74_v21 = vld [vmem:[#allocation2 + $0x158] sm:$0xff] }
  0x1f   :  { %888 = vmatpush1.bf16.msra.mxu0 %v1288_v27  ;;  %929 = vmatpush1.bf16.msra.mxu1 %v1290_v28  ;;  %v135_v48 = vld [vmem:[#allocation2 + $0x340] sm:$0xff]  ;;  %v136_v50 = vld [vmem:[#allocation2 + $0x348] sm:$0xff]  ;;  %v1295_v25 = vcombine.high %v66_v20, %v74_v21  ;;  %v81_v26 = vld [vmem:[#allocation2 + $0x190] sm:$0xff]  ;;  %v1294_v31 = vcombine.low %v66_v20, %v74_v21 }
  0x20   :  { %889 = vmatprep.subr.bf16.mxu0 %v1305_v29  ;;  %930 = vmatprep.subr.bf16.mxu1 %v1307_v30  ;;  %v1353_v53 = vcombine.high %v127_v47, %v135_v48  ;;  %v1355_v54 = vcombine.high %v128_v49, %v136_v50  ;;  %v143_v55 = vld [vmem:[#allocation2 + $0x380] sm:$0xff]  ;;  %v144_v57 = vld [vmem:[#allocation2 + $0x388] sm:$0xff]  ;;  %v1352_v59 = vcombine.low %v127_v47, %v135_v48  ;;  %v89_v27 = vld [vmem:[#allocation2 + $0x1d0] sm:$0xff] }
  0x21   :  { %v151_v56 = vld [vmem:[#allocation2 + $0x3c0] sm:$0xff]  ;;  %v152_v58 = vld [vmem:[#allocation2 + $0x3c8] sm:$0xff]  ;;  %v1354_v60 = vcombine.low %v128_v49, %v136_v50  ;;  %v82_v28 = vld [vmem:[#allocation2 + $0x198] sm:$0xff]  ;;  %v1292_v30 = vcombine.low %v65_v18, %v73_v19  ;;  %v1309_v32 = vcombine.high %v81_v26, %v89_v27 }
  0x22   :  { %v1369_v61 = vcombine.high %v143_v55, %v151_v56  ;;  %v1371_v62 = vcombine.high %v144_v57, %v152_v58  ;;  %v1368_v4 = vcombine.low %v143_v55, %v151_v56  ;;  %v29_v5 = vld [vmem:[%s1509_s0] sm:$0xf]  ;;  %v1370_v6 = vcombine.low %v144_v57, %v152_v58  ;;  %v90_v29 = vld [vmem:[#allocation2 + $0x1d8] sm:$0xff]  ;;  %v97_v34 = vld [vmem:[#allocation2 + $0x210] sm:$0xff] }
  0x23   :  { %890 = vmatpush1.bf16.msra.mxu0 %v1304_v35  ;;  %931 = vmatpush1.bf16.msra.mxu1 %v1306_v36  ;;  %v1453_v11 = vpack.c.bf16 %v29_v5, %v29_v5  ;;  %v1311_v33 = vcombine.high %v82_v28, %v90_v29  ;;  %v105_v35 = vld [vmem:[#allocation2 + $0x250] sm:$0xff]  ;;  %v98_v36 = vld [vmem:[#allocation2 + $0x218] sm:$0xff]  ;;  %v1310_v39 = vcombine.low %v82_v28, %v90_v29  ;;  %v35_v3 = vld [vmem:[#allocation2 + $0x20] sm:$0xff] }
  0x24   :  { %891 = vmatprep.subr.bf16.mxu0 %v1321_v37  ;;  %932 = vmatprep.subr.bf16.mxu1 %v1323_v38  ;;  %v106_v37 = vld [vmem:[#allocation2 + $0x258] sm:$0xff]  ;;  %v1308_v38 = vcombine.low %v81_v26, %v89_v27  ;;  %v1325_v40 = vcombine.high %v97_v34, %v105_v35  ;;  %v113_v42 = vld [vmem:[#allocation2 + $0x290] sm:$0xff]  ;;  %v36_v5 = vld [vmem:[#allocation2 + $0x28] sm:$0xff] }
  0x25   :  { %v1327_v41 = vcombine.high %v98_v36, %v106_v37  ;;  %v1326_v47 = vcombine.low %v98_v36, %v106_v37  ;;  %v129_v50 = vld [vmem:[#allocation2 + $0x310] sm:$0xff]  ;;  %v51_v12 = vld [vmem:[#allocation2 + $0xa0] sm:$0xff] }
  0x26   :  { %v145_v58 = vld [vmem:[#allocation2 + $0x390] sm:$0xff]  ;;  %v59_v13 = vld [vmem:[#allocation2 + $0xe0] sm:$0xff] }
  0x27   :  { %892 = vmatpush1.bf16.msra.mxu0 %v1320_v43  ;;  %933 = vmatpush1.bf16.msra.mxu1 %v1322_v44  ;;  %v121_v43 = vld [vmem:[#allocation2 + $0x2d0] sm:$0xff]  ;;  %v114_v44 = vld [vmem:[#allocation2 + $0x298] sm:$0xff]  ;;  %v1281_v18 = vcombine.high %v51_v12, %v59_v13  ;;  %v67_v20 = vld [vmem:[#allocation2 + $0x120] sm:$0xff] }
  0x28   :  { %893 = vmatprep.subr.bf16.mxu0 %v1337_v45  ;;  %934 = vmatprep.subr.bf16.mxu1 %v1339_v46  ;;  %v122_v45 = vld [vmem:[#allocation2 + $0x2d8] sm:$0xff]  ;;  %v1324_v46 = vcombine.low %v97_v34, %v105_v35  ;;  %v1341_v48 = vcombine.high %v113_v42, %v121_v43  ;;  %v75_v21 = vld [vmem:[#allocation2 + $0x160] sm:$0xff] }
  0x29   :  { %v1343_v49 = vcombine.high %v114_v44, %v122_v45  ;;  %v1342_v55 = vcombine.low %v114_v44, %v122_v45  ;;  %v1297_v26 = vcombine.high %v67_v20, %v75_v21  ;;  %v83_v28 = vld [vmem:[#allocation2 + $0x1a0] sm:$0xff] }
  0x2a   :  { %v91_v29 = vld [vmem:[#allocation2 + $0x1e0] sm:$0xff] }
  0x2b   :  { %894 = vmatpush1.bf16.msra.mxu0 %v1336_v51  ;;  %935 = vmatpush1.bf16.msra.mxu1 %v1338_v52  ;;  %v137_v51 = vld [vmem:[#allocation2 + $0x350] sm:$0xff]  ;;  %v130_v52 = vld [vmem:[#allocation2 + $0x318] sm:$0xff]  ;;  %v1313_v34 = vcombine.high %v83_v28, %v91_v29  ;;  %v99_v36 = vld [vmem:[#allocation2 + $0x220] sm:$0xff] }
  0x2c   :  { %895 = vmatprep.subr.bf16.mxu0 %v1353_v53  ;;  %936 = vmatprep.subr.bf16.mxu1 %v1355_v54  ;;  %v138_v53 = vld [vmem:[#allocation2 + $0x358] sm:$0xff]  ;;  %v1340_v54 = vcombine.low %v113_v42, %v121_v43  ;;  %v1357_v56 = vcombine.high %v129_v50, %v137_v51  ;;  %v107_v37 = vld [vmem:[#allocation2 + $0x260] sm:$0xff] }
  0x2d   :  { %v1359_v57 = vcombine.high %v130_v52, %v138_v53  ;;  %v1358_v63 = vcombine.low %v130_v52, %v138_v53  ;;  %v1329_v42 = vcombine.high %v99_v36, %v107_v37  ;;  %v115_v44 = vld [vmem:[#allocation2 + $0x2a0] sm:$0xff] }
  0x2e   :  { %v123_v45 = vld [vmem:[#allocation2 + $0x2e0] sm:$0xff] }
  0x2f   :  { %896 = vmatpush1.bf16.msra.mxu0 %v1352_v59  ;;  %937 = vmatpush1.bf16.msra.mxu1 %v1354_v60  ;;  %v153_v59 = vld [vmem:[#allocation2 + $0x3d0] sm:$0xff]  ;;  %v146_v60 = vld [vmem:[#allocation2 + $0x398] sm:$0xff]  ;;  %v131_v52 = vld [vmem:[#allocation2 + $0x320] sm:$0xff] }
  0x30   :  { %897 = vmatprep.subr.bf16.mxu0 %v1369_v61  ;;  %938 = vmatprep.subr.bf16.mxu1 %v1371_v62  ;;  %v154_v61 = vld [vmem:[#allocation2 + $0x3d8] sm:$0xff]  ;;  %v1356_v62 = vcombine.low %v129_v50, %v137_v51  ;;  %v1373_v1 = vcombine.high %v145_v58, %v153_v59  ;;  %v1345_v50 = vcombine.high %v115_v44, %v123_v45  ;;  %v139_v53 = vld [vmem:[#allocation2 + $0x360] sm:$0xff] }
  0x31   :  { %v1375_v2 = vcombine.high %v146_v60, %v154_v61 }
  0x33   :  { %898 = vmatpush1.bf16.msra.mxu0 %v1368_v4  ;;  %939 = vmatpush1.bf16.msra.mxu1 %v1370_v6  ;;  %v43_v4 = vld [vmem:[#allocation2 + $0x60] sm:$0xff]  ;;  %v44_v6 = vld [vmem:[#allocation2 + $0x68] sm:$0xff] }
  0x34   :  { %965 = vmatprep.subr.bf16.mxu0 %v1261_v7  ;;  %1006 = vmatprep.subr.bf16.mxu1 %v1263_v8  ;;  %v1372_v7 = vcombine.low %v145_v58, %v153_v59  ;;  %v1374_v8 = vcombine.low %v146_v60, %v154_v61  ;;  %v1265_v9 = vcombine.high %v35_v3, %v43_v4  ;;  %v147_v60 = vld [vmem:[#allocation2 + $0x3a0] sm:$0xff] }
  0x35   :  { %v1267_v10 = vcombine.high %v36_v5, %v44_v6  ;;  %v1361_v58 = vcombine.high %v131_v52, %v139_v53  ;;  %v155_v61 = vld [vmem:[#allocation2 + $0x3e0] sm:$0xff] }
  0x36   :  { %916 = vmatmul.mubr.bf16.vlgmr.msra.gmra.mrb[0].mxu0 %v1453_v11  ;;  %957 = vmatmul.mubr.bf16.vlgmr.msra.gmra.mrb[0].mxu1 %v1453_v11 }
  0x37   :  { %966 = vmatpush1.bf16.msra.mxu0 %v1260_v14  ;;  %1007 = vmatpush1.bf16.msra.mxu1 %v1262_v15  ;;  %v52_v14 = vld [vmem:[#allocation2 + $0xa8] sm:$0xff] }
  0x38   :  { %967 = vmatprep.subr.bf16.mxu0 %v1277_v16  ;;  %1008 = vmatprep.subr.bf16.mxu1 %v1279_v17  ;;  %v60_v15 = vld [vmem:[#allocation2 + $0xe8] sm:$0xff]  ;;  %v1264_v16 = vcombine.low %v35_v3, %v43_v4  ;;  %v1266_v17 = vcombine.low %v36_v5, %v44_v6  ;;  %v1377_v3 = vcombine.high %v147_v60, %v155_v61  ;;  %v37_v5 = vld [vmem:[#allocation2 + $0x30] sm:$0xff] }
  0x39   :  { %997 = vmatprep.mubr.bf16.mxu0 %v1415_v0  ;;  %1038 = vmatprep.mubr.bf16.mxu1 %v1415_v0  ;;  %v1283_v19 = vcombine.high %v52_v14, %v60_v15  ;;  %v45_v6 = vld [vmem:[#allocation2 + $0x70] sm:$0xff] }
  0x3b   :  { %968 = vmatpush1.bf16.msra.mxu0 %v1276_v22  ;;  %1009 = vmatpush1.bf16.msra.mxu1 %v1278_v23  ;;  %v68_v22 = vld [vmem:[#allocation2 + $0x128] sm:$0xff] }
  0x3c   :  { %969 = vmatprep.subr.bf16.mxu0 %v1293_v24  ;;  %1010 = vmatprep.subr.bf16.mxu1 %v1295_v25  ;;  %v76_v23 = vld [vmem:[#allocation2 + $0x168] sm:$0xff]  ;;  %v1280_v24 = vcombine.low %v51_v12, %v59_v13  ;;  %v1282_v25 = vcombine.low %v52_v14, %v60_v15  ;;  %v1269_v12 = vcombine.high %v37_v5, %v45_v6  ;;  %v53_v14 = vld [vmem:[#allocation2 + $0xb0] sm:$0xff] }
  0x3d   :  { %v1299_v27 = vcombine.high %v68_v22, %v76_v23  ;;  %v61_v15 = vld [vmem:[#allocation2 + $0xf0] sm:$0xff] }
  0x3f   :  { %970 = vmatpush1.bf16.msra.mxu0 %v1292_v30  ;;  %1011 = vmatpush1.bf16.msra.mxu1 %v1294_v31  ;;  %v84_v30 = vld [vmem:[#allocation2 + $0x1a8] sm:$0xff] }
  0x40   :  { %971 = vmatprep.subr.bf16.mxu0 %v1309_v32  ;;  %1012 = vmatprep.subr.bf16.mxu1 %v1311_v33  ;;  %v92_v31 = vld [vmem:[#allocation2 + $0x1e8] sm:$0xff]  ;;  %v1296_v32 = vcombine.low %v67_v20, %v75_v21  ;;  %v1298_v33 = vcombine.low %v68_v22, %v76_v23  ;;  %v1285_v20 = vcombine.high %v53_v14, %v61_v15  ;;  %v69_v22 = vld [vmem:[#allocation2 + $0x130] sm:$0xff] }
  0x41   :  { %v1315_v35 = vcombine.high %v84_v30, %v92_v31  ;;  %v77_v23 = vld [vmem:[#allocation2 + $0x170] sm:$0xff] }
  0x43   :  { %972 = vmatpush1.bf16.msra.mxu0 %v1308_v38  ;;  %1013 = vmatpush1.bf16.msra.mxu1 %v1310_v39  ;;  %v100_v38 = vld [vmem:[#allocation2 + $0x228] sm:$0xff] }
  0x44   :  { %973 = vmatprep.subr.bf16.mxu0 %v1325_v40  ;;  %1014 = vmatprep.subr.bf16.mxu1 %v1327_v41  ;;  %v108_v39 = vld [vmem:[#allocation2 + $0x268] sm:$0xff]  ;;  %v1312_v40 = vcombine.low %v83_v28, %v91_v29  ;;  %v1314_v41 = vcombine.low %v84_v30, %v92_v31  ;;  %v1301_v28 = vcombine.high %v69_v22, %v77_v23  ;;  %v85_v30 = vld [vmem:[#allocation2 + $0x1b0] sm:$0xff] }
  0x45   :  { %v1331_v43 = vcombine.high %v100_v38, %v108_v39  ;;  %v93_v31 = vld [vmem:[#allocation2 + $0x1f0] sm:$0xff] }
  0x47   :  { %974 = vmatpush1.bf16.msra.mxu0 %v1324_v46  ;;  %1015 = vmatpush1.bf16.msra.mxu1 %v1326_v47  ;;  %v116_v46 = vld [vmem:[#allocation2 + $0x2a8] sm:$0xff] }
  0x48   :  { %975 = vmatprep.subr.bf16.mxu0 %v1341_v48  ;;  %1016 = vmatprep.subr.bf16.mxu1 %v1343_v49  ;;  %v124_v47 = vld [vmem:[#allocation2 + $0x2e8] sm:$0xff]  ;;  %v1328_v48 = vcombine.low %v99_v36, %v107_v37  ;;  %v1330_v49 = vcombine.low %v100_v38, %v108_v39  ;;  %v1317_v36 = vcombine.high %v85_v30, %v93_v31  ;;  %v101_v38 = vld [vmem:[#allocation2 + $0x230] sm:$0xff] }
  0x49   :  { %v1347_v51 = vcombine.high %v116_v46, %v124_v47  ;;  %v109_v39 = vld [vmem:[#allocation2 + $0x270] sm:$0xff] }
  0x4b   :  { %976 = vmatpush1.bf16.msra.mxu0 %v1340_v54  ;;  %1017 = vmatpush1.bf16.msra.mxu1 %v1342_v55  ;;  %v132_v54 = vld [vmem:[#allocation2 + $0x328] sm:$0xff] }
  0x4c   :  { %977 = vmatprep.subr.bf16.mxu0 %v1357_v56  ;;  %1018 = vmatprep.subr.bf16.mxu1 %v1359_v57  ;;  %v140_v55 = vld [vmem:[#allocation2 + $0x368] sm:$0xff]  ;;  %v1344_v56 = vcombine.low %v115_v44, %v123_v45  ;;  %v1346_v57 = vcombine.low %v116_v46, %v124_v47  ;;  %v1333_v44 = vcombine.high %v101_v38, %v109_v39  ;;  %v117_v45 = vld [vmem:[#allocation2 + $0x2b0] sm:$0xff]  ;;  %v118_v47 = vld [vmem:[#allocation2 + $0x2b8] sm:$0xff] }
  0x4d   :  { %v1363_v59 = vcombine.high %v132_v54, %v140_v55  ;;  %v125_v46 = vld [vmem:[#allocation2 + $0x2f0] sm:$0xff] }
  0x4f   :  { %978 = vmatpush1.bf16.msra.mxu0 %v1356_v62  ;;  %1019 = vmatpush1.bf16.msra.mxu1 %v1358_v63  ;;  %v148_v62 = vld [vmem:[#allocation2 + $0x3a8] sm:$0xff] }
  0x50   :  { %979 = vmatprep.subr.bf16.mxu0 %v1373_v1  ;;  %1020 = vmatprep.subr.bf16.mxu1 %v1375_v2  ;;  %v156_v63 = vld [vmem:[#allocation2 + $0x3e8] sm:$0xff]  ;;  %v1360_v1 = vcombine.low %v131_v52, %v139_v53  ;;  %v1362_v2 = vcombine.low %v132_v54, %v140_v55  ;;  %v133_v53 = vld [vmem:[#allocation2 + $0x330] sm:$0xff]  ;;  %v134_v55 = vld [vmem:[#allocation2 + $0x338] sm:$0xff] }
  0x51   :  { %v1379_v4 = vcombine.high %v148_v62, %v156_v63  ;;  %v141_v54 = vld [vmem:[#allocation2 + $0x370] sm:$0xff] }
  0x53   :  { %980 = vmatpush1.bf16.msra.mxu0 %v1372_v7  ;;  %1021 = vmatpush1.bf16.msra.mxu1 %v1374_v8  ;;  %v38_v7 = vld [vmem:[#allocation2 + $0x38] sm:$0xff] }
  0x54   :  { %1047 = vmatprep.subr.bf16.mxu0 %v1265_v9  ;;  %1088 = vmatprep.subr.bf16.mxu1 %v1267_v10  ;;  %v46_v8 = vld [vmem:[#allocation2 + $0x78] sm:$0xff]  ;;  %v1376_v9 = vcombine.low %v147_v60, %v155_v61  ;;  %v1378_v10 = vcombine.low %v148_v62, %v156_v63  ;;  %v149_v61 = vld [vmem:[#allocation2 + $0x3b0] sm:$0xff] }
  0x55   :  { %v1271_v13 = vcombine.high %v38_v7, %v46_v8  ;;  %v157_v62 = vld [vmem:[#allocation2 + $0x3f0] sm:$0xff]  ;;  %v150_v63 = vld [vmem:[#allocation2 + $0x3b8] sm:$0xff] }
  0x56   :  { %998 = vmatmul.mubr.bf16.vlgmr.msra.gmra.mrb[4].mxu0 %v1453_v11  ;;  %1039 = vmatmul.mubr.bf16.vlgmr.msra.gmra.mrb[4].mxu1 %v1453_v11 }
  0x57   :  { %1048 = vmatpush1.bf16.msra.mxu0 %v1264_v16  ;;  %1089 = vmatpush1.bf16.msra.mxu1 %v1266_v17  ;;  %v54_v16 = vld [vmem:[#allocation2 + $0xb8] sm:$0xff] }
  0x58   :  { %1049 = vmatprep.subr.bf16.mxu0 %v1281_v18  ;;  %1090 = vmatprep.subr.bf16.mxu1 %v1283_v19  ;;  %v62_v17 = vld [vmem:[#allocation2 + $0xf8] sm:$0xff]  ;;  %v1268_v18 = vcombine.low %v37_v5, %v45_v6  ;;  %v1270_v19 = vcombine.low %v38_v7, %v46_v8  ;;  %v1380_v6 = vcombine.low %v149_v61, %v157_v62  ;;  %v163_v8 = vlaneseq }
  0x59   :  { %1079 = vmatprep.mubr.bf16.mxu0 %v1415_v0  ;;  %1120 = vmatprep.mubr.bf16.mxu1 %v1415_v0  ;;  %v1287_v21 = vcombine.high %v54_v16, %v62_v17 }
  0x5b   :  { %1050 = vmatpush1.bf16.msra.mxu0 %v1280_v24  ;;  %1091 = vmatpush1.bf16.msra.mxu1 %v1282_v25  ;;  %v70_v24 = vld [vmem:[#allocation2 + $0x138] sm:$0xff] }
  0x5c   :  { %1051 = vmatprep.subr.bf16.mxu0 %v1297_v26  ;;  %1092 = vmatprep.subr.bf16.mxu1 %v1299_v27  ;;  %v78_v25 = vld [vmem:[#allocation2 + $0x178] sm:$0xff]  ;;  %v1284_v26 = vcombine.low %v53_v14, %v61_v15  ;;  %v1286_v27 = vcombine.low %v54_v16, %v62_v17 }
  0x5d   :  { %v1303_v29 = vcombine.high %v70_v24, %v78_v25 }
  0x5f   :  { %1052 = vmatpush1.bf16.msra.mxu0 %v1296_v32  ;;  %1093 = vmatpush1.bf16.msra.mxu1 %v1298_v33  ;;  %v86_v32 = vld [vmem:[#allocation2 + $0x1b8] sm:$0xff] }
  0x60   :  { %1053 = vmatprep.subr.bf16.mxu0 %v1313_v34  ;;  %1094 = vmatprep.subr.bf16.mxu1 %v1315_v35  ;;  %v94_v33 = vld [vmem:[#allocation2 + $0x1f8] sm:$0xff]  ;;  %v1300_v34 = vcombine.low %v69_v22, %v77_v23  ;;  %v1302_v35 = vcombine.low %v70_v24, %v78_v25 }
  0x61   :  { %v1319_v37 = vcombine.high %v86_v32, %v94_v33 }
  0x63   :  { %1054 = vmatpush1.bf16.msra.mxu0 %v1312_v40  ;;  %1095 = vmatpush1.bf16.msra.mxu1 %v1314_v41  ;;  %v102_v40 = vld [vmem:[#allocation2 + $0x238] sm:$0xff] }
  0x64   :  { %1055 = vmatprep.subr.bf16.mxu0 %v1329_v42  ;;  %1096 = vmatprep.subr.bf16.mxu1 %v1331_v43  ;;  %v110_v41 = vld [vmem:[#allocation2 + $0x278] sm:$0xff]  ;;  %v1316_v42 = vcombine.low %v85_v30, %v93_v31  ;;  %v1318_v43 = vcombine.low %v86_v32, %v94_v33 }
  0x67   :  { %1056 = vmatpush1.bf16.msra.mxu0 %v1328_v48  ;;  %1097 = vmatpush1.bf16.msra.mxu1 %v1330_v49  ;;  %v126_v48 = vld [vmem:[#allocation2 + $0x2f8] sm:$0xff]  ;;  %v1332_v49 = vcombine.low %v101_v38, %v109_v39 }
  0x68   :  { %1057 = vmatprep.subr.bf16.mxu0 %v1345_v50  ;;  %1098 = vmatprep.subr.bf16.mxu1 %v1347_v51  ;;  %v1334_v50 = vcombine.low %v102_v40, %v110_v41  ;;  %v1349_v51 = vcombine.high %v117_v45, %v125_v46  ;;  %v1351_v52 = vcombine.high %v118_v47, %v126_v48 }
  0x6b   :  { %1058 = vmatpush1.bf16.msra.mxu0 %v1344_v56  ;;  %1099 = vmatpush1.bf16.msra.mxu1 %v1346_v57  ;;  %v142_v56 = vld [vmem:[#allocation2 + $0x378] sm:$0xff]  ;;  %v1348_v57 = vcombine.low %v117_v45, %v125_v46 }
  0x6c   :  { %1059 = vmatprep.subr.bf16.mxu0 %v1361_v58  ;;  %1100 = vmatprep.subr.bf16.mxu1 %v1363_v59  ;;  %v1350_v58 = vcombine.low %v118_v47, %v126_v48  ;;  %v1365_v59 = vcombine.high %v133_v53, %v141_v54  ;;  %v1367_v60 = vcombine.high %v134_v55, %v142_v56 }
  0x6f   :  { %1060 = vmatpush1.bf16.msra.mxu0 %v1360_v1  ;;  %1101 = vmatpush1.bf16.msra.mxu1 %v1362_v2  ;;  %v158_v1 = vld [vmem:[#allocation2 + $0x3f8] sm:$0xff]  ;;  %v1364_v2 = vcombine.low %v133_v53, %v141_v54  ;;  %v160_v54 = vld [vmem:[%s1511_s2 + $0x8] sm:$0xff] }
  0x70   :  { %1061 = vmatprep.subr.bf16.mxu0 %v1377_v3  ;;  %1102 = vmatprep.subr.bf16.mxu1 %v1379_v4  ;;  %v1366_v3 = vcombine.low %v134_v55, %v142_v56  ;;  %v1381_v4 = vcombine.high %v149_v61, %v157_v62  ;;  %v1383_v5 = vcombine.high %v150_v63, %v158_v1 }
  0x71   :  { %v1382_v7 = vcombine.low %v150_v63, %v158_v1 }
  0x73   :  { %1062 = vmatpush1.bf16.msra.mxu0 %v1376_v9  ;;  %1103 = vmatpush1.bf16.msra.mxu1 %v1378_v10  ;;  %v1469_v9 = vshrl.u32 %v163_v8, 7 }
  0x74   :  { %1129 = vmatprep.subr.bf16.mxu0 %v1269_v12  ;;  %1170 = vmatprep.subr.bf16.mxu1 %v1271_v13  ;;  %v159_v12 = vld [vmem:[%s1511_s2] sm:$0xff] }
  0x75   :  { %v165_v10 = vsub.s32 0, %v1469_v9  ;;  %v173_v13 = vsub.s32 2, %v1469_v9  ;;  %v169_v14 = vsub.s32 1, %v1469_v9  ;;  %v177_v15 = vsub.s32 3, %v1469_v9 }
  0x76   :  { %1080 = vmatmul.mubr.bf16.vlgmr.msra.gmra.mrb[8].mxu0 %v1453_v11  ;;  %1121 = vmatmul.mubr.bf16.vlgmr.msra.gmra.mrb[8].mxu1 %v1453_v11  ;;  %v181_v33 = vsub.s32 4, %v1469_v9 }
  0x77   :  { %1130 = vmatpush1.bf16.msra.mxu0 %v1268_v18  ;;  %1171 = vmatpush1.bf16.msra.mxu1 %v1270_v19  ;;  %v166_v16 = vrot.slane %v159_v12, %v165_v10  ;;  %v174_v17 = vrot.slane %v159_v12, %v173_v13  ;;  %v170_v18 = vrot.slane %v159_v12, %v169_v14 }
  0x78   :  { %1131 = vmatprep.subr.bf16.mxu0 %v1285_v20  ;;  %1172 = vmatprep.subr.bf16.mxu1 %v1287_v21  ;;  %v178_v19 = vrot.slane %v159_v12, %v177_v15  ;;  %v198_v55 = vrot.slane %v160_v54, %v165_v10  ;;  %v206_v56 = vrot.slane %v160_v54, %v173_v13 }
  0x79   :  { %1161 = vmatprep.mubr.bf16.mxu0 %v1415_v0  ;;  %1202 = vmatprep.mubr.bf16.mxu1 %v1415_v0  ;;  %v1335_v0 = vcombine.high %v102_v40, %v110_v41  ;;  %v214_v10 = vrot.slane %v160_v54, %v181_v33 }
  0x7b   :  { %1132 = vmatpush1.bf16.msra.mxu0 %v1284_v26  ;;  %1173 = vmatpush1.bf16.msra.mxu1 %v1286_v27 }
  0x7c   :  { %1133 = vmatprep.subr.bf16.mxu0 %v1301_v28  ;;  %1174 = vmatprep.subr.bf16.mxu1 %v1303_v29 }
  0x7f   :  { %1134 = vmatpush1.bf16.msra.mxu0 %v1300_v34  ;;  %1175 = vmatpush1.bf16.msra.mxu1 %v1302_v35  ;;  %v189_v34 = vsub.s32 6, %v1469_v9  ;;  %v185_v35 = vsub.s32 5, %v1469_v9 }
  0x80   :  { %1135 = vmatprep.subr.bf16.mxu0 %v1317_v36  ;;  %1176 = vmatprep.subr.bf16.mxu1 %v1319_v37  ;;  %v193_v36 = vsub.s32 7, %v1469_v9  ;;  %v182_v37 = vrot.slane %v159_v12, %v181_v33 }
  0x81   :  { %v190_v38 = vrot.slane %v159_v12, %v189_v34  ;;  %v186_v39 = vrot.slane %v159_v12, %v185_v35  ;;  %v218_v13 = vrot.slane %v160_v54, %v185_v35 }
  0x82   :  { %v194_v40 = vrot.slane %v159_v12, %v193_v36  ;;  %v222_v12 = vrot.slane %v160_v54, %v189_v34 }
  0x83   :  { %1136 = vmatpush1.bf16.msra.mxu0 %v1316_v42  ;;  %1177 = vmatpush1.bf16.msra.mxu1 %v1318_v43 }
  0x84   :  { %1137 = vmatprep.subr.bf16.mxu0 %v1333_v44  ;;  %1178 = vmatprep.subr.bf16.mxu1 %v1335_v0 }
  0x87   :  { %1138 = vmatpush1.bf16.msra.mxu0 %v1332_v49  ;;  %1179 = vmatpush1.bf16.msra.mxu1 %v1334_v50 }
  0x88   :  { %1139 = vmatprep.subr.bf16.mxu0 %v1349_v51  ;;  %1180 = vmatprep.subr.bf16.mxu1 %v1351_v52 }
  0x8b   :  { %1140 = vmatpush1.bf16.msra.mxu0 %v1348_v57  ;;  %1181 = vmatpush1.bf16.msra.mxu1 %v1350_v58  ;;  %v202_v57 = vrot.slane %v160_v54, %v169_v14  ;;  %v210_v58 = vrot.slane %v160_v54, %v177_v15  ;;  %v226_v14 = vrot.slane %v160_v54, %v193_v36 }
  0x8c   :  { %1141 = vmatprep.subr.bf16.mxu0 %v1365_v59  ;;  %1182 = vmatprep.subr.bf16.mxu1 %v1367_v60 }
  0x8f   :  { %1142 = vmatpush1.bf16.msra.mxu0 %v1364_v2  ;;  %1183 = vmatpush1.bf16.msra.mxu1 %v1366_v3 }
  0x90   :  { %1143 = vmatprep.subr.bf16.mxu0 %v1381_v4  ;;  %1184 = vmatprep.subr.bf16.mxu1 %v1383_v5 }
  0x93   :  { %1144 = vmatpush1.bf16.msra.mxu0 %v1380_v6  ;;  %1185 = vmatpush1.bf16.msra.mxu1 %v1382_v7 }
  0x96   :  { %1162 = vmatmul.mubr.bf16.vlgmr.msra.gmra.mrb[12].mxu0 %v1453_v11  ;;  %1203 = vmatmul.mubr.bf16.vlgmr.msra.gmra.mrb[12].mxu1 %v1453_v11 }
 0x109   :  { %v917_v11 = vpop.f32.mrb[0].mxu0  ;;  %v958_v21 = vpop.f32.mrb[0].mxu1 }
 0x10a   :  { %v918_v20 = vadd.f32 %v917_v11, %v166_v16  ;;  %v919_v22 = vpop.f32.mrb[1].mxu0  ;;  %v959_v23 = vadd.f32 %v958_v21, %v174_v17  ;;  %v960_v25 = vpop.f32.mrb[1].mxu1 }
 0x10b   :  { %v920_v24 = vadd.f32 %v919_v22, %v170_v18  ;;  %v921_v26 = vpop.f32.mrb[2].mxu0  ;;  %v961_v27 = vadd.f32 %v960_v25, %v178_v19  ;;  %v962_v28 = vpop.f32.mrb[2].mxu1 }
 0x10c   :  { %v922_v29 = vpop.f32.mrb[3].mxu0  ;;  %v963_v31 = vpop.f32.mrb[3].mxu1 }
 0x10d   :  { %v1227_v30 = vcombine.low %v918_v20, %v920_v24  ;;  %v1228_v32 = vcombine.low %v959_v23, %v961_v27 }
 0x10f   :  { %1243 = vst [vmem:[%s1512_s3] sm:$0xff] %v1227_v30  ;;  %1244 = vst [vmem:[%s1512_s3 + $0x8] sm:$0xff] %v1228_v32 }
 0x129   :  { %v999_v41 = vpop.f32.mrb[4].mxu0  ;;  %v1040_v43 = vpop.f32.mrb[4].mxu1 }
 0x12a   :  { %v1000_v42 = vadd.f32 %v999_v41, %v182_v37  ;;  %v1001_v44 = vpop.f32.mrb[5].mxu0  ;;  %v1041_v0 = vadd.f32 %v1040_v43, %v190_v38  ;;  %v1042_v46 = vpop.f32.mrb[5].mxu1 }
 0x12b   :  { %v1002_v45 = vadd.f32 %v1001_v44, %v186_v39  ;;  %v1003_v47 = vpop.f32.mrb[6].mxu0  ;;  %v1043_v48 = vadd.f32 %v1042_v46, %v194_v40  ;;  %v1044_v49 = vpop.f32.mrb[6].mxu1 }
 0x12c   :  { %v1004_v50 = vpop.f32.mrb[7].mxu0  ;;  %v1045_v52 = vpop.f32.mrb[7].mxu1 }
 0x12d   :  { %v1229_v51 = vcombine.low %v1000_v42, %v1002_v45  ;;  %v1230_v53 = vcombine.low %v1041_v0, %v1043_v48 }
 0x12f   :  { %1245 = vst [vmem:[%s1512_s3 + $0x10] sm:$0xff] %v1229_v51  ;;  %1246 = vst [vmem:[%s1512_s3 + $0x18] sm:$0xff] %v1230_v53 }
 0x149   :  { %v1081_v59 = vpop.f32.mrb[8].mxu0  ;;  %v1122_v61 = vpop.f32.mrb[8].mxu1 }
 0x14a   :  { %v1082_v60 = vadd.f32 %v1081_v59, %v198_v55  ;;  %v1083_v62 = vpop.f32.mrb[9].mxu0  ;;  %v1123_v63 = vadd.f32 %v1122_v61, %v206_v56  ;;  %v1124_v2 = vpop.f32.mrb[9].mxu1 }
 0x14b   :  { %v1084_v1 = vadd.f32 %v1083_v62, %v202_v57  ;;  %v1085_v3 = vpop.f32.mrb[10].mxu0  ;;  %v1125_v4 = vadd.f32 %v1124_v2, %v210_v58  ;;  %v1126_v5 = vpop.f32.mrb[10].mxu1 }
 0x14c   :  { %v1086_v6 = vpop.f32.mrb[11].mxu0  ;;  %v1127_v8 = vpop.f32.mrb[11].mxu1 }
 0x14d   :  { %v1231_v7 = vcombine.low %v1082_v60, %v1084_v1  ;;  %v1232_v9 = vcombine.low %v1123_v63, %v1125_v4 }
 0x14f   :  { %1247 = vst [vmem:[%s1512_s3 + $0x20] sm:$0xff] %v1231_v7  ;;  %1248 = vst [vmem:[%s1512_s3 + $0x28] sm:$0xff] %v1232_v9 }
 0x169   :  { %v1163_v15 = vpop.f32.mrb[12].mxu0  ;;  %v1204_v17 = vpop.f32.mrb[12].mxu1 }
 0x16a   :  { %v1164_v16 = vadd.f32 %v1163_v15, %v214_v10  ;;  %v1165_v18 = vpop.f32.mrb[13].mxu0  ;;  %v1205_v19 = vadd.f32 %v1204_v17, %v222_v12  ;;  %v1206_v20 = vpop.f32.mrb[13].mxu1 }
 0x16b   :  { %v1166_v11 = vadd.f32 %v1165_v18, %v218_v13  ;;  %v1167_v21 = vpop.f32.mrb[14].mxu0  ;;  %v1207_v22 = vadd.f32 %v1206_v20, %v226_v14  ;;  %v1208_v23 = vpop.f32.mrb[14].mxu1 }
 0x16c   :  { %v1168_v24 = vpop.f32.mrb[15].mxu0  ;;  %v1209_v26 = vpop.f32.mrb[15].mxu1 }
 0x16d   :  { %v1233_v25 = vcombine.low %v1164_v16, %v1166_v11  ;;  %v1234_v27 = vcombine.low %v1205_v19, %v1207_v22 }
 0x16f   :  { %1249 = vst [vmem:[%s1512_s3 + $0x30] sm:$0xff] %v1233_v25  ;;  %1250 = vst [vmem:[%s1512_s3 + $0x38] sm:$0xff] %v1234_v27 }
 0x170   :  { %1255 = vsyncpa [#allocation3], 1 }

// kernel: ts_transformer_forward.3
= control target key start
LH: loop header
LB: loop body
LE: loop exit
PB: predicated region body
PF: predicated region fallthrough
CT: control target
= control target key end

     0   :  { %s12159_s0 = inlined_call_operand.vmem [shape: f32[64,128], index: 0, kind: input, shape index: {}]   ;;  %s12160_s1 = inlined_call_operand.vmem [shape: bf16[2,128,384], index: 1, kind: input, shape index: {}]   ;;  %s12161_s2 = inlined_call_operand.vmem [shape: f32[2,1,384], index: 2, kind: input, shape index: {}]   ;;  %s12162_s3 = inlined_call_operand.vmem [shape: bf16[2,128,128], index: 3, kind: input, shape index: {}]   ;;  %s12163_s4 = inlined_call_operand.vmem [shape: f32[2,1,128], index: 4, kind: input, shape index: {}]   ;;  %s12164_s5 = inlined_call_operand.vmem [shape: f32[2,1,128], index: 5, kind: input, shape index: {}]   ;;  %s12165_s6 = inlined_call_operand.vmem [shape: f32[2,1,128], index: 6, kind: input, shape index: {}]   ;;  %s12166_s7 = inlined_call_operand.vmem [shape: bf16[2,128,256], index: 7, kind: input, shape index: {}]   ;;  %s12167_s8 = inlined_call_operand.vmem [shape: f32[2,1,256], index: 8, kind: input, shape index: {}]   ;;  %s12168_s9 = inlined_call_operand.vmem [shape: bf16[2,256,128], index: 9, kind: input, shape index: {}]   ;;  %s12169_s10 = inlined_call_operand.vmem [shape: f32[2,1,128], index: 10, kind: input, shape index: {}]   ;;  %s12170_s11 = inlined_call_operand.vmem [shape: f32[2,1,128], index: 11, kind: input, shape index: {}]   ;;  %s12171_s12 = inlined_call_operand.vmem [shape: f32[2,1,128], index: 12, kind: input, shape index: {}]   ;;  %s12172_s13 = inlined_call_operand.vmem [shape: bf16[128,64], index: 13, kind: input, shape index: {}]   ;;  %s12173_s14 = inlined_call_operand.vmem [shape: f32[1,64], index: 14, kind: input, shape index: {}]   ;;  %s12174_s15 = inlined_call_operand.vmem [shape: f32[16,1], index: 15, kind: input, shape index: {}]   ;;  %s12175_s16 = inlined_call_operand.<no memory space> [shape: f32[1], index: 16, kind: input, shape index: {}]   ;;  %s12176_s17 = inlined_call_operand.hbm [shape: f32[4,16,64], index: 17, kind: output, shape index: {0}]   ;;  %s12177_s18 = inlined_call_operand.hbm [shape: f32[4,64], index: 18, kind: output, shape index: {1}]  }
   0x1   :  { %12214 = sst [smem:[#allocation20_spill]] %s12159_s0 }
   0x2   :  { %12215 = sst [smem:[#allocation21_spill]] %s12160_s1 }
   0x3   :  { %12216 = sst [smem:[#allocation22_spill]] %s12161_s2 }
   0x4   :  { %25 = vsyncpa [#allocation4], 0  ;;  %s12217_s29 = sld [smem:[#allocation21_spill]]  ;;  %v12182_v2 = vmov 0   ;;  %s12218_s20 = sld [smem:[#allocation20_spill]] }
   0x5   :  { %283 = vmatprep.mubr.bf16.mxu0 %v12182_v2  ;;  %8632 = vset.pattern.permute.xlu0 %v12182_v2 }
   0x6   :  { %8633 = vset.pattern.permute.xlu1 %v12182_v2 }
   0xa   :  { %v8634_v0 = vld [vmem:[%s12217_s29 + $0x4] ss:$12 sps:$4 sm:$0xff]   ;;  %v8636_v1 = vld [vmem:[%s12217_s29] ss:$12 sps:$4 sm:$0xff]   ;;  %v8637_v3 = vld [vmem:[%s12217_s29 + $0x1c] ss:$12 sps:$4 sm:$0xff]  }
   0xb   :  { %251 = vmatprep.subr.bf16.mxu0 %v8634_v0  ;;  %v8639_v4 = vld [vmem:[%s12217_s29 + $0x18] ss:$12 sps:$4 sm:$0xff]   ;;  %v8640_v5 = vld [vmem:[%s12217_s29 + $0x34] ss:$12 sps:$4 sm:$0xff]   ;;  %v8642_v6 = vld [vmem:[%s12217_s29 + $0x30] ss:$12 sps:$4 sm:$0xff]  }
   0xc   :  { %252 = vmatpush1.bf16.msra.mxu0 %v8636_v1  ;;  %v8643_v7 = vld [vmem:[%s12217_s29 + $0x4c] ss:$12 sps:$4 sm:$0xff]   ;;  %v8645_v8 = vld [vmem:[%s12217_s29 + $0x48] ss:$12 sps:$4 sm:$0xff]   ;;  %v8646_v9 = vld [vmem:[%s12217_s29 + $0x64] ss:$12 sps:$4 sm:$0xff]  }
   0xd   :  { %253 = vmatprep.subr.bf16.mxu0 %v8637_v3  ;;  %v62_v10 = vld [vmem:[%s12218_s20] sm:$0xff]  ;;  %v63_v11 = vld [vmem:[%s12218_s20 + $0x8] sm:$0xff]  ;;  %v8661_v20 = vld [vmem:[%s12217_s29 + $0x50] ss:$12 sps:$4 sm:$0xff]  }
   0xe   :  { %v70_v12 = vpack.c.bf16 %v63_v11, %v62_v10  ;;  %v8658_v13 = vld [vmem:[%s12217_s29 + $0x8] ss:$12 sps:$4 sm:$0xff]   ;;  %v8659_v14 = vld [vmem:[%s12217_s29 + $0x20] ss:$12 sps:$4 sm:$0xff]   ;;  %v8660_v17 = vld [vmem:[%s12217_s29 + $0x38] ss:$12 sps:$4 sm:$0xff]  }
   0xf   :  { %v8648_v15 = vld [vmem:[%s12217_s29 + $0x60] ss:$12 sps:$4 sm:$0xff]   ;;  %7998 = vmatprep.subr.bf16.mxu1 %v8658_v13  ;;  %v8649_v16 = vld [vmem:[%s12217_s29 + $0x7c] ss:$12 sps:$4 sm:$0xff]   ;;  %v8651_v18 = vld [vmem:[%s12217_s29 + $0x78] ss:$12 sps:$4 sm:$0xff]  }
  0x10   :  { %254 = vmatpush1.bf16.msra.mxu0 %v8639_v4  ;;  %8014 = vmatprep.mubr.bf16.mxu1 %v70_v12  ;;  %v8652_v19 = vld [vmem:[%s12217_s29 + $0x94] ss:$12 sps:$4 sm:$0xff]   ;;  %v8654_v21 = vld [vmem:[%s12217_s29 + $0x90] ss:$12 sps:$4 sm:$0xff]   ;;  %v8655_v22 = vld [vmem:[%s12217_s29 + $0xac] ss:$12 sps:$4 sm:$0xff]  }
  0x11   :  { %255 = vmatprep.subr.bf16.mxu0 %v8640_v5  ;;  %7999 = vmatpush3.bf16.msra.mxu1 %v8658_v13  ;;  %v8662_v23 = vld [vmem:[%s12217_s29 + $0x68] ss:$12 sps:$4 sm:$0xff]   ;;  %v8663_v25 = vld [vmem:[%s12217_s29 + $0x80] ss:$12 sps:$4 sm:$0xff]   ;;  %v8664_v26 = vld [vmem:[%s12217_s29 + $0x98] ss:$12 sps:$4 sm:$0xff]  }
  0x12   :  { %8000 = vmatprep.subr.bf16.mxu1 %v8659_v14  ;;  %v8657_v24 = vld [vmem:[%s12217_s29 + $0xa8] ss:$12 sps:$4 sm:$0xff]   ;;  %v8665_v27 = vld [vmem:[%s12217_s29 + $0xb0] ss:$12 sps:$4 sm:$0xff]  }
  0x13   :  { %v64_v28 = vld [vmem:[%s12218_s20 + $0x10] sm:$0xff]  ;;  %v65_v29 = vld [vmem:[%s12218_s20 + $0x18] sm:$0xff] }
  0x14   :  { %256 = vmatpush1.bf16.msra.mxu0 %v8642_v6  ;;  %v71_v30 = vpack.c.bf16 %v65_v29, %v64_v28 }
  0x15   :  { %257 = vmatprep.subr.bf16.mxu0 %v8643_v7  ;;  %8001 = vmatpush3.bf16.msra.mxu1 %v8659_v14 }
  0x16   :  { %8002 = vmatprep.subr.bf16.mxu1 %v8660_v17 }
  0x18   :  { %258 = vmatpush1.bf16.msra.mxu0 %v8645_v8 }
  0x19   :  { %259 = vmatprep.subr.bf16.mxu0 %v8646_v9  ;;  %8003 = vmatpush3.bf16.msra.mxu1 %v8660_v17 }
  0x1a   :  { %8004 = vmatprep.subr.bf16.mxu1 %v8661_v20 }
  0x1c   :  { %260 = vmatpush1.bf16.msra.mxu0 %v8648_v15 }
  0x1d   :  { %261 = vmatprep.subr.bf16.mxu0 %v8649_v16  ;;  %8005 = vmatpush3.bf16.msra.mxu1 %v8661_v20 }
  0x1e   :  { %8006 = vmatprep.subr.bf16.mxu1 %v8662_v23 }
  0x20   :  { %262 = vmatpush1.bf16.msra.mxu0 %v8651_v18 }
  0x21   :  { %263 = vmatprep.subr.bf16.mxu0 %v8652_v19  ;;  %8007 = vmatpush3.bf16.msra.mxu1 %v8662_v23 }
  0x22   :  { %8008 = vmatprep.subr.bf16.mxu1 %v8663_v25 }
  0x24   :  { %264 = vmatpush1.bf16.msra.mxu0 %v8654_v21 }
  0x25   :  { %265 = vmatprep.subr.bf16.mxu0 %v8655_v22  ;;  %8009 = vmatpush3.bf16.msra.mxu1 %v8663_v25 }
  0x26   :  { %8010 = vmatprep.subr.bf16.mxu1 %v8664_v26 }
  0x28   :  { %266 = vmatpush1.bf16.msra.mxu0 %v8657_v24 }
  0x29   :  { %8011 = vmatpush3.bf16.msra.mxu1 %v8664_v26 }
  0x2a   :  { %8012 = vmatprep.subr.bf16.mxu1 %v8665_v27 }
  0x2b   :  { %284 = vmatmul.mubr.bf16.vlgmr.msra.gmra.mrb[0].mxu0 %v70_v12 }
  0x2c   :  { %293 = vmatprep.mubr.bf16.mxu0 %v12182_v2 }
  0x2d   :  { %8013 = vmatpush3.bf16.msra.mxu1 %v8665_v27 }
  0x30   :  { %8015 = vmatmul.mubr.bf16.vlgmr.msra.gmra.mrb[0].mxu1 %v71_v30 }
  0x33   :  { %294 = vmatmul.mubr.bf16.gmra.mrb[4].mxu0 %v71_v30 }
  0x34   :  { %303 = vmatprep.mubr.bf16.mxu0 %v12182_v2 }
  0x35   :  { %26 = vsyncpa [#allocation6], 0  ;;  %v66_v31 = vld [vmem:[%s12218_s20 + $0x20] sm:$0xff]  ;;  %v67_v32 = vld [vmem:[%s12218_s20 + $0x28] sm:$0xff]  ;;  %v12184_v37 = vmov 0.0   ;;  %vm9256_vm0 = vmmov 0   ;;  %v108_v38 = vlaneseq }
  0x36   :  { %v72_v33 = vpack.c.bf16 %v67_v32, %v66_v31  ;;  %v68_v34 = vld [vmem:[%s12218_s20 + $0x30] sm:$0xff]  ;;  %v69_v35 = vld [vmem:[%s12218_s20 + $0x38] sm:$0xff]  ;;  %8022 = vmatprep.subr.bf16.mxu1 %v12184_v37  ;;  %8046 = vmatprep.subr.bf16.mxu0 %v12184_v37  ;;  %s12221_s27 = sld [smem:[#allocation22_spill]]  ;;  %vm391_vm1 = vcmask 261120   ;;  %vm441_vm2 = vcmask 130048   ;;  %s9257_s28 = smov 96  }
  0x37   :  { %v73_v36 = vpack.c.bf16 %v69_v35, %v68_v34  ;;  %v9467_v39 = vshrl.u32 %v108_v38, 7  ;;  %s12191_s30 = smov 32   ;;  %s9259_s0 = smov 64   ;;  %vm908_vm3 = vcmask 523264   ;;  %vm911_vm4 = vcmask 785408  }
  0x38   :  { %8018 = vmatprep.mubr.bf16.mxu1 %v72_v33 }
  0x39   :  { %8019 = vmatmul.mubr.bf16.gmra.mrb[4].mxu1 %v73_v36  ;;  %12219 = vst [vmem:[#allocation9_spill] sm:$0xff] %v9467_v39  ;;  %v9470_v40 = vsub.s32 0, %v9467_v39  ;;  %v9476_v42 = vsub.s32 1, %v9467_v39  ;;  %v12181_v54 = vsub.s32 2, %v9467_v39 }
  0x3a   :  { %8024 = vmatprep.mubr.msk.bf16.mxu1 %vm9256_vm0, %v12184_v37 }
  0x3b   :  { %304 = vmatmul.mubr.bf16.gmra.mrb[8].mxu0 %v72_v33  ;;  %12220 = vst [vmem:[#allocation10_spill] sm:$0xff] %v9470_v40  ;;  %12222 = vst [vmem:[#allocation11_spill] sm:$0xff] %v9476_v42 }
  0x3c   :  { %313 = vmatprep.mubr.bf16.mxu0 %v12182_v2  ;;  %v106_v41 = vld [vmem:[%s12221_s27] sm:$0x7] }
  0x3d   :  { %v9479_v43 = vrot.slane %v106_v41, %v9470_v40  ;;  %v9482_v45 = vrot.slane %v106_v41, %v9476_v42  ;;  %v119_v57 = vrot.slane %v106_v41, %v12181_v54 }
  0x43   :  { %314 = vmatmul.mubr.bf16.gmra.mrb[12].mxu0 %v73_v36 }
  0x44   :  { %8048 = vmatprep.mubr.msk.bf16.mxu0 %vm9256_vm0, %v12184_v37 }
  0xfe   :  { %v285_v44 = vpop.f32.mrb[0].mxu0 }
  0xff   :  { %v287_v46 = vpop.f32.mrb[1].mxu0  ;;  %v286_v48 = vadd.f32 %v285_v44, %v9479_v43 }
 0x100   :  { %v289_v47 = vpop.f32.mrb[2].mxu0  ;;  %v288_v51 = vadd.f32 %v287_v46, %v9482_v45 }
 0x101   :  { %v290_v49 = vadd.f32 %v289_v47, %v9479_v43  ;;  %v291_v50 = vpop.f32.mrb[3].mxu0 }
 0x102   :  { %v292_v52 = vadd.f32 %v291_v50, %v9482_v45 }
 0x103   :  { %v9488_v53 = vpack.c.bf16 %v290_v49, %v286_v48  ;;  %v8016_v58 = vpop.f32.mrb[0].mxu1 }
 0x104   :  { %v9491_v55 = vpack.c.bf16 %v292_v52, %v288_v51  ;;  %v367_v59 = vadd.f32 %v8016_v58, %v119_v57  ;;  %v358_v60 = vpop.f32.mrb[1].mxu1 }
 0x105   :  { %v359_v61 = vadd.f32 %v358_v60, %v119_v57  ;;  %v8017_v62 = vpop.f32.mrb[2].mxu1 }
 0x106   :  { %v396_v56 = vsel %vm391_vm1, %v9491_v55, 0  ;;  %v370_v63 = vadd.f32 %v8017_v62, %v119_v57  ;;  %v361_v0 = vpop.f32.mrb[3].mxu1  ;;  %v295_v23 = vpop.f32.mrb[4].mxu0 }
 0x107   :  { %8023 = vmatpush3.bf16.xpose.msra.mxu1 %v396_v56  ;;  %v362_v1 = vadd.f32 %v361_v0, %v119_v57  ;;  %v296_v24 = vadd.f32 %v295_v23, %v9479_v43  ;;  %v297_v25 = vpop.f32.mrb[5].mxu0 }
 0x108   :  { %8028 = vmatprep.subr.bf16.mxu1 %v12184_v37  ;;  %v9500_v3 = vpack.c.bf16 %v370_v63, %v367_v59  ;;  %v298_v26 = vadd.f32 %v297_v25, %v9482_v45  ;;  %v299_v27 = vpop.f32.mrb[6].mxu0 }
 0x109   :  { %v9504_v4 = vpack.c.bf16 %v362_v1, %v359_v61  ;;  %v300_v28 = vadd.f32 %v299_v27, %v9479_v43  ;;  %v301_v29 = vpop.f32.mrb[7].mxu0 }
 0x10a   :  { %v302_v30 = vadd.f32 %v301_v29, %v9482_v45 }
 0x10b   :  { %v9522_v31 = vpack.c.bf16 %v300_v28, %v296_v24 }
 0x10c   :  { %v8020_v5 = vpop.f32.mrb[4].mxu1  ;;  %v9524_v32 = vpack.c.bf16 %v302_v30, %v298_v26 }
 0x10d   :  { %v383_v6 = vadd.f32 %v8020_v5, %v119_v57  ;;  %v374_v7 = vpop.f32.mrb[5].mxu1 }
 0x10e   :  { %8025 = vmatmul.mubr.msk.bf16.vlgmr.msra.gmra.mrb[8].mxu1 %vm391_vm1, %v9488_v53  ;;  %v375_v8 = vadd.f32 %v374_v7, %v119_v57  ;;  %v8021_v9 = vpop.f32.mrb[6].mxu1  ;;  %v305_v33 = vpop.f32.mrb[8].mxu0  ;;  %v920_v25 = vsel %vm391_vm1, %v9524_v32, 0 }
 0x10f   :  { %8030 = vmatprep.mubr.msk.bf16.mxu1 %vm9256_vm0, %v12184_v37  ;;  %8029 = vmatpush3.bf16.msra.mxu1 %v9504_v4  ;;  %v386_v10 = vadd.f32 %v8021_v9, %v119_v57  ;;  %v377_v11 = vpop.f32.mrb[7].mxu1  ;;  %v306_v34 = vadd.f32 %v305_v33, %v9479_v43  ;;  %v307_v35 = vpop.f32.mrb[9].mxu0 }
 0x110   :  { %8034 = vmatprep.subr.bf16.mxu1 %v12184_v37  ;;  %v378_v12 = vadd.f32 %v377_v11, %v119_v57  ;;  %v308_v36 = vadd.f32 %v307_v35, %v9482_v45  ;;  %v309_v38 = vpop.f32.mrb[10].mxu0 }
 0x111   :  { %v9508_v13 = vpack.c.bf16 %v386_v10, %v383_v6  ;;  %v310_v41 = vadd.f32 %v309_v38, %v9479_v43  ;;  %v311_v44 = vpop.f32.mrb[11].mxu0 }
 0x112   :  { %v9510_v14 = vpack.c.bf16 %v378_v12, %v375_v8  ;;  %v312_v46 = vadd.f32 %v311_v44, %v9482_v45 }
 0x113   :  { %v9536_v47 = vpack.c.bf16 %v310_v41, %v306_v34 }
 0x114   :  { %v9538_v48 = vpack.c.bf16 %v312_v46, %v308_v36 }
 0x116   :  { %v315_v49 = vpop.f32.mrb[12].mxu0  ;;  %v1441_v35 = vsel %vm391_vm1, %v9538_v48, 0 }
 0x117   :  { %v316_v50 = vadd.f32 %v315_v49, %v9479_v43  ;;  %v317_v51 = vpop.f32.mrb[13].mxu0 }
 0x118   :  { %v318_v52 = vadd.f32 %v317_v51, %v9482_v45  ;;  %v319_v56 = vpop.f32.mrb[14].mxu0 }
 0x119   :  { %v320_v57 = vadd.f32 %v319_v56, %v9479_v43  ;;  %v321_v58 = vpop.f32.mrb[15].mxu0 }
 0x11a   :  { %v322_v59 = vadd.f32 %v321_v58, %v9482_v45 }
 0x11b   :  { %v9550_v60 = vpack.c.bf16 %v320_v57, %v316_v50 }
 0x11c   :  { %v9552_v61 = vpack.c.bf16 %v322_v59, %v318_v52 }
 0x11e   :  { %v1962_v51 = vsel %vm391_vm1, %v9552_v61, 0 }
 0x1e1   :  { %v432_v15 = vpop.f32.mrb[8].mxu1 }
 0x1e2   :  { %v439_v16 = vmul.f32 0.17677669, %v432_v15  ;;  %v8026_v17 = vpop.f32.mrb[9].mxu1 }
 0x1e3   :  { %v435_v18 = vpop.f32.mrb[10].mxu1 }
 0x1e4   :  { %v440_v19 = vmul.f32 0.17677669, %v435_v18  ;;  %v8027_v20 = vpop.f32.mrb[11].mxu1  ;;  %v442_v21 = vsel %vm441_vm2, %v439_v16, -inf }
 0x1e5   :  { %443 = vmax.xlane.f32.xlu0 %v442_v21 }
 0x1e6   :  { %v445_v22 = vsel %vm441_vm2, %v440_v19, -inf }
 0x1e9   :  { %446 = vmax.xlane.f32.xlu0 %v445_v22 }
 0x1ff   :  { %514 = vrot.lane.b32.xlu0 %v9491_v55, %s9257_s28 }
 0x203   :  { %761 = vrot.lane.b32.xlu0 %v9491_v55, %s12191_s30 }
 0x207   :  { %1037 = vrot.lane.b32.xlu0 %v9524_v32, %s9257_s28 }
 0x20b   :  { %1161 = vrot.lane.b32.xlu0 %v9524_v32, %s9259_s0 }
 0x20f   :  { %1284 = vrot.lane.b32.xlu0 %v9524_v32, %s12191_s30 }
 0x213   :  { %1558 = vrot.lane.b32.xlu0 %v9538_v48, %s9257_s28 }
 0x217   :  { %1682 = vrot.lane.b32.xlu0 %v9538_v48, %s9259_s0 }
 0x21b   :  { %1805 = vrot.lane.b32.xlu0 %v9538_v48, %s12191_s30 }
 0x21f   :  { %2079 = vrot.lane.b32.xlu0 %v9552_v61, %s9257_s28 }
 0x223   :  { %2203 = vrot.lane.b32.xlu0 %v9552_v61, %s9259_s0 }
 0x227   :  { %2326 = vrot.lane.b32.xlu0 %v9552_v61, %s12191_s30 }
 0x272   :  { %v444_v43 = vpop.xlane.xlu0 %443 }
 0x273   :  { %v448_v62 = vsub.f32 %v439_v16, %v444_v43 }
 0x275   :  { %v450_v63 = vmul.f32 1.442695, %v448_v62 }
 0x276   :  { %v447_v0 = vpop.xlane.xlu0 %446 }
 0x277   :  { %8802 = vpow2.f32 %v450_v63  ;;  %v449_v1 = vsub.f32 %v440_v19, %v447_v0 }
 0x279   :  { %v452_v45 = vmul.f32 1.442695, %v449_v1 }
 0x27a   :  { %v515_v10 = vpop.permute.xlu0 %514 }
 0x27b   :  { %8804 = vpow2.f32 %v452_v45  ;;  %v520_v21 = vsel %vm391_vm1, %v515_v10, 0 }
 0x27e   :  { %v762_v19 = vpop.permute.xlu0 %761 }
 0x27f   :  { %v767_v23 = vsel %vm391_vm1, %v762_v19, 0 }
 0x281   :  { %v8803_v5 = vpop.eup %8802 }
 0x282   :  { %v454_v6 = vsel %vm441_vm2, %v8803_v5, 0.0  ;;  %v1038_v26 = vpop.permute.xlu0 %1037 }
 0x283   :  { %455 = vadd.xlane.f32.xlu1 %v454_v6  ;;  %v1043_v27 = vsel %vm391_vm1, %v1038_v26, 0 }
 0x285   :  { %v8805_v7 = vpop.eup %8804 }
 0x286   :  { %v457_v8 = vsel %vm441_vm2, %v8805_v7, 0.0  ;;  %v1162_v29 = vpop.permute.xlu0 %1161 }
 0x287   :  { %458 = vadd.xlane.f32.xlu1 %v457_v8  ;;  %v1167_v30 = vsel %vm391_vm1, %v1162_v29, 0 }
 0x28a   :  { %v1285_v32 = vpop.permute.xlu0 %1284 }
 0x28b   :  { %v1290_v33 = vsel %vm391_vm1, %v1285_v32, 0 }
 0x28e   :  { %v1559_v36 = vpop.permute.xlu0 %1558 }
 0x28f   :  { %v1564_v38 = vsel %vm391_vm1, %v1559_v36, 0 }
 0x292   :  { %v1683_v41 = vpop.permute.xlu0 %1682 }
 0x293   :  { %v1688_v46 = vsel %vm391_vm1, %v1683_v41, 0 }
 0x296   :  { %v1806_v48 = vpop.permute.xlu0 %1805 }
 0x297   :  { %v1811_v49 = vsel %vm391_vm1, %v1806_v48, 0 }
 0x298   :  { %511 = vrot.lane.b32.xlu1 %v9488_v53, %s9257_s28 }
 0x29a   :  { %v2080_v52 = vpop.permute.xlu0 %2079 }
 0x29b   :  { %v2085_v56 = vsel %vm391_vm1, %v2080_v52, 0 }
 0x29c   :  { %638 = vrot.lane.b32.xlu1 %v9491_v55, %s9259_s0 }
 0x29e   :  { %v2204_v57 = vpop.permute.xlu0 %2203 }
 0x29f   :  { %v2209_v59 = vsel %vm391_vm1, %v2204_v57, 0 }
 0x2a0   :  { %636 = vrot.lane.b32.xlu1 %v9488_v53, %s9259_s0 }
 0x2a2   :  { %v2327_v61 = vpop.permute.xlu0 %2326 }
 0x2a3   :  { %v2332_v43 = vsel %vm391_vm1, %v2327_v61, 0 }
 0x2a4   :  { %759 = vrot.lane.b32.xlu1 %v9488_v53, %s12191_s30 }
 0x2a8   :  { %1034 = vrot.lane.b32.xlu1 %v9522_v31, %s9257_s28 }
 0x2ac   :  { %1159 = vrot.lane.b32.xlu1 %v9522_v31, %s9259_s0 }
 0x2b0   :  { %1282 = vrot.lane.b32.xlu1 %v9522_v31, %s12191_s30 }
 0x2b4   :  { %1555 = vrot.lane.b32.xlu1 %v9536_v47, %s9257_s28 }
 0x2b8   :  { %1680 = vrot.lane.b32.xlu1 %v9536_v47, %s9259_s0 }
 0x2bc   :  { %1803 = vrot.lane.b32.xlu1 %v9536_v47, %s12191_s30 }
 0x2c0   :  { %2076 = vrot.lane.b32.xlu1 %v9550_v60, %s9257_s28 }
 0x2c4   :  { %2201 = vrot.lane.b32.xlu1 %v9550_v60, %s9259_s0 }
 0x2c8   :  { %2324 = vrot.lane.b32.xlu1 %v9550_v60, %s12191_s30 }
 0x310   :  { %v456_v53 = vpop.xlane.xlu1 %455 }
 0x311   :  { %8806 = vrcp.f32 %v456_v53 }
 0x314   :  { %v459_v55 = vpop.xlane.xlu1 %458 }
 0x315   :  { %8808 = vrcp.f32 %v459_v55 }
 0x318   :  { %v512_v9 = vpop.permute.xlu1 %511 }
 0x31b   :  { %v8807_v12 = vpop.eup %8806 }
 0x31c   :  { %v639_v11 = vpop.permute.xlu1 %638  ;;  %v462_v17 = vmul.f32 %v8807_v12, %v8803_v5 }
 0x31d   :  { %v644_v15 = vsel %vm391_vm1, %v639_v11, 0 }
 0x31e   :  { %8047 = vmatpush3.bf16.xpose.msra.mxu0 %v644_v15 }
 0x31f   :  { %v8809_v16 = vpop.eup %8808  ;;  %8058 = vmatprep.subr.bf16.mxu0 %v12184_v37 }
 0x320   :  { %v463_v18 = vmul.f32 %v8809_v16, %v8805_v7  ;;  %v637_v22 = vpop.permute.xlu1 %636 }
 0x322   :  { %v464_v20 = vpack.c.bf16 %v463_v18, %v462_v17 }
 0x324   :  { %8031 = vmatmul.mubr.msk.bf16.vlgmr.msra.gmra.mrb[12].mxu1 %vm441_vm2, %v464_v20  ;;  %v760_v24 = vpop.permute.xlu1 %759 }
 0x325   :  { %8035 = vmatpush3.bf16.xpose.msra.mxu1 %v520_v21  ;;  %8049 = vmatmul.mubr.msk.bf16.vlgmr.msra.gmra.mrb[16].mxu0 %vm391_vm1, %v637_v22 }
 0x326   :  { %8059 = vmatpush3.bf16.xpose.msra.mxu0 %v767_v23  ;;  %8036 = vmatprep.mubr.msk.bf16.mxu1 %vm9256_vm0, %v12184_v37 }
 0x327   :  { %8060 = vmatprep.mubr.msk.bf16.mxu0 %vm9256_vm0, %v12184_v37  ;;  %8070 = vmatprep.subr.bf16.mxu0 %v12184_v37 }
 0x328   :  { %8040 = vmatprep.subr.bf16.mxu1 %v12184_v37  ;;  %v1035_v28 = vpop.permute.xlu1 %1034 }
 0x32c   :  { %8037 = vmatmul.mubr.msk.bf16.vlgmr.msra.gmra.mrb[16].mxu1 %vm391_vm1, %v512_v9 }
 0x32d   :  { %8061 = vmatmul.mubr.msk.bf16.vlgmr.msra.gmra.mrb[20].mxu0 %vm391_vm1, %v760_v24  ;;  %8042 = vmatprep.mubr.msk.bf16.mxu1 %vm9256_vm0, %v12184_v37 }
 0x32e   :  { %8071 = vmatpush3.bf16.xpose.msra.mxu0 %v920_v25  ;;  %8072 = vmatprep.mubr.msk.bf16.mxu0 %vm9256_vm0, %v12184_v37 }
 0x32f   :  { %8082 = vmatprep.subr.bf16.mxu0 %v12184_v37 }
 0x335   :  { %8073 = vmatmul.mubr.msk.bf16.vlgmr.msra.gmra.mrb[24].mxu0 %vm391_vm1, %v9522_v31  ;;  %v1160_v31 = vpop.permute.xlu1 %1159 }
 0x336   :  { %8083 = vmatpush3.bf16.xpose.msra.mxu0 %v1043_v27  ;;  %8084 = vmatprep.mubr.msk.bf16.mxu0 %vm9256_vm0, %v12184_v37 }
 0x337   :  { %8094 = vmatprep.subr.bf16.mxu0 %v12184_v37 }
 0x339   :  { %v1283_v34 = vpop.permute.xlu1 %1282 }
 0x33d   :  { %8085 = vmatmul.mubr.msk.bf16.vlgmr.msra.gmra.mrb[28].mxu0 %vm391_vm1, %v1035_v28  ;;  %v1556_v44 = vpop.permute.xlu1 %1555 }
 0x33e   :  { %8095 = vmatpush3.bf16.xpose.msra.mxu0 %v1167_v30  ;;  %8096 = vmatprep.mubr.msk.bf16.mxu0 %vm9256_vm0, %v12184_v37 }
 0x33f   :  { %8106 = vmatprep.subr.bf16.mxu0 %v12184_v37 }
 0x345   :  { %8097 = vmatmul.mubr.msk.bf16.vlgmr.msra.gmra.mrb[32].mxu0 %vm391_vm1, %v1160_v31 }
 0x346   :  { %8107 = vmatpush3.bf16.xpose.msra.mxu0 %v1290_v33  ;;  %8108 = vmatprep.mubr.msk.bf16.mxu0 %vm9256_vm0, %v12184_v37 }
 0x347   :  { %8118 = vmatprep.subr.bf16.mxu0 %v12184_v37 }
 0x34d   :  { %8109 = vmatmul.mubr.msk.bf16.vlgmr.msra.gmra.mrb[36].mxu0 %vm391_vm1, %v1283_v34 }
 0x34e   :  { %8119 = vmatpush3.bf16.xpose.msra.mxu0 %v1441_v35  ;;  %8120 = vmatprep.mubr.msk.bf16.mxu0 %vm9256_vm0, %v12184_v37 }
 0x34f   :  { %8130 = vmatprep.subr.bf16.mxu0 %v12184_v37 }
 0x355   :  { %8121 = vmatmul.mubr.msk.bf16.vlgmr.msra.gmra.mrb[40].mxu0 %vm391_vm1, %v9536_v47  ;;  %v1681_v47 = vpop.permute.xlu1 %1680 }
 0x356   :  { %8131 = vmatpush3.bf16.xpose.msra.mxu0 %v1564_v38  ;;  %8132 = vmatprep.mubr.msk.bf16.mxu0 %vm9256_vm0, %v12184_v37 }
 0x357   :  { %8142 = vmatprep.subr.bf16.mxu0 %v12184_v37 }
 0x359   :  { %v1804_v50 = vpop.permute.xlu1 %1803 }
 0x35d   :  { %8133 = vmatmul.mubr.msk.bf16.vlgmr.msra.gmra.mrb[44].mxu0 %vm391_vm1, %v1556_v44  ;;  %v2077_v58 = vpop.permute.xlu1 %2076 }
 0x35e   :  { %8143 = vmatpush3.bf16.xpose.msra.mxu0 %v1688_v46  ;;  %8144 = vmatprep.mubr.msk.bf16.mxu0 %vm9256_vm0, %v12184_v37 }
 0x35f   :  { %8154 = vmatprep.subr.bf16.mxu0 %v12184_v37 }
 0x365   :  { %8145 = vmatmul.mubr.msk.bf16.vlgmr.msra.gmra.mrb[48].mxu0 %vm391_vm1, %v1681_v47 }
 0x366   :  { %8155 = vmatpush3.bf16.xpose.msra.mxu0 %v1811_v49  ;;  %8156 = vmatprep.mubr.msk.bf16.mxu0 %vm9256_vm0, %v12184_v37 }
 0x367   :  { %8166 = vmatprep.subr.bf16.mxu0 %v12184_v37 }
 0x36d   :  { %8157 = vmatmul.mubr.msk.bf16.vlgmr.msra.gmra.mrb[52].mxu0 %vm391_vm1, %v1804_v50 }
 0x36e   :  { %8167 = vmatpush3.bf16.xpose.msra.mxu0 %v1962_v51  ;;  %8168 = vmatprep.mubr.msk.bf16.mxu0 %vm9256_vm0, %v12184_v37 }
 0x36f   :  { %8178 = vmatprep.subr.bf16.mxu0 %v12184_v37 }
 0x375   :  { %8169 = vmatmul.mubr.msk.bf16.vlgmr.msra.gmra.mrb[56].mxu0 %vm391_vm1, %v9550_v60  ;;  %v2202_v60 = vpop.permute.xlu1 %2201 }
 0x376   :  { %8179 = vmatpush3.bf16.xpose.msra.mxu0 %v2085_v56  ;;  %8180 = vmatprep.mubr.msk.bf16.mxu0 %vm9256_vm0, %v12184_v37 }
 0x377   :  { %8190 = vmatprep.subr.bf16.mxu0 %v12184_v37 }
 0x379   :  { %v2325_v62 = vpop.permute.xlu1 %2324 }
 0x37d   :  { %8181 = vmatmul.mubr.msk.bf16.vlgmr.msra.gmra.mrb[60].mxu0 %vm391_vm1, %v2077_v58 }
 0x37e   :  { %8191 = vmatpush3.bf16.xpose.msra.mxu0 %v2209_v59  ;;  %8192 = vmatprep.mubr.msk.bf16.mxu0 %vm9256_vm0, %v12184_v37 }
 0x37f   :  { %8202 = vmatprep.subr.bf16.mxu0 %v12184_v37 }
 0x385   :  { %8193 = vmatmul.mubr.msk.bf16.vlgmr.msra.gmra.mrb[64].mxu0 %vm391_vm1, %v2202_v60 }
 0x386   :  { %8203 = vmatpush3.bf16.xpose.msra.mxu0 %v2332_v43  ;;  %8204 = vmatprep.mubr.msk.bf16.mxu0 %vm9256_vm0, %v12184_v37 }
 0x38d   :  { %8205 = vmatmul.mubr.msk.bf16.vlgmr.msra.gmra.mrb[68].mxu0 %vm391_vm1, %v2325_v62 }
 0x3f7   :  { %v9669_v63 = vpop.f32.mrb[12].mxu1 }
 0x3f8   :  { %12223 = vst [vmem:[#allocation12_spill] sm:$0xff] %v9669_v63  ;;  %v8032_v0 = vpop.f32.mrb[13].mxu1  ;;  %v680_v1 = vpop.f32.mrb[16].mxu0 }
 0x3f9   :  { %v9671_v45 = vmul.f32 0.17677669, %v680_v1  ;;  %v9673_v5 = vpop.f32.mrb[14].mxu1  ;;  %v8050_v6 = vpop.f32.mrb[17].mxu0 }
 0x3fa   :  { %12224 = vst [vmem:[#allocation13_spill] sm:$0xff] %v9673_v5  ;;  %v8033_v7 = vpop.f32.mrb[15].mxu1  ;;  %v683_v8 = vpop.f32.mrb[18].mxu0 }
 0x3fb   :  { %v9675_v53 = vmul.f32 0.17677669, %v683_v8  ;;  %v8051_v55 = vpop.f32.mrb[19].mxu0  ;;  %v689_v9 = vsel %vm441_vm2, %v9671_v45, -inf }
 0x3fc   :  { %690 = vmax.xlane.f32.xlu0 %v689_v9 }
 0x3fd   :  { %v692_v11 = vsel %vm441_vm2, %v9675_v53, -inf }
 0x3ff   :  { %v9679_v10 = vpop.f32.mrb[16].mxu1 }
 0x400   :  { %693 = vmax.xlane.f32.xlu0 %v692_v11  ;;  %v8038_v12 = vpop.f32.mrb[17].mxu1  ;;  %v803_v15 = vpop.f32.mrb[20].mxu0 }
 0x401   :  { %v9683_v16 = vmul.f32 0.17677669, %v803_v15  ;;  %v9685_v17 = vpop.f32.mrb[18].mxu1  ;;  %v8062_v18 = vpop.f32.mrb[21].mxu0 }
 0x402   :  { %v8039_v19 = vpop.f32.mrb[19].mxu1  ;;  %v806_v20 = vpop.f32.mrb[22].mxu0 }
 0x403   :  { %v9687_v21 = vmul.f32 0.17677669, %v806_v20  ;;  %v8063_v22 = vpop.f32.mrb[23].mxu0  ;;  %v812_v23 = vsel %vm441_vm2, %v9683_v16, -inf }
 0x404   :  { %813 = vmax.xlane.f32.xlu0 %v812_v23 }
 0x405   :  { %v815_v24 = vsel %vm441_vm2, %v9687_v21, -inf }
 0x406   :  { %816 = vmax.xlane.f32.xlu1 %v815_v24 }
 0x408   :  { %v956_v25 = vpop.f32.mrb[24].mxu0 }
 0x409   :  { %v9693_v26 = vmul.f32 0.17677669, %v956_v25  ;;  %v8074_v27 = vpop.f32.mrb[25].mxu0 }
 0x40a   :  { %v959_v28 = vpop.f32.mrb[26].mxu0 }
 0x40b   :  { %v9695_v29 = vmul.f32 0.17677669, %v959_v28  ;;  %v8075_v30 = vpop.f32.mrb[27].mxu0  ;;  %v965_v32 = vsel %vm441_vm2, %v9693_v26, -inf }
 0x40c   :  { %966 = vmax.xlane.f32.xlu0 %v965_v32 }
 0x40d   :  { %v968_v31 = vsel %vm441_vm2, %v9695_v29, -inf }
 0x40e   :  { %969 = vmax.xlane.f32.xlu1 %v968_v31 }
 0x410   :  { %v1079_v33 = vpop.f32.mrb[28].mxu0 }
 0x411   :  { %v9701_v34 = vmul.f32 0.17677669, %v1079_v33  ;;  %v8086_v35 = vpop.f32.mrb[29].mxu0 }
 0x412   :  { %v1082_v36 = vpop.f32.mrb[30].mxu0 }
 0x413   :  { %v9703_v38 = vmul.f32 0.17677669, %v1082_v36  ;;  %v1088_v41 = vsel %vm441_vm2, %v9701_v34, -inf  ;;  %v8087_v44 = vpop.f32.mrb[31].mxu0 }
 0x414   :  { %1089 = vmax.xlane.f32.xlu0 %v1088_v41 }
 0x415   :  { %v1091_v46 = vsel %vm441_vm2, %v9703_v38, -inf }
 0x416   :  { %1092 = vmax.xlane.f32.xlu1 %v1091_v46 }
 0x418   :  { %v1203_v48 = vpop.f32.mrb[32].mxu0 }
 0x419   :  { %v9709_v47 = vmul.f32 0.17677669, %v1203_v48  ;;  %v8098_v49 = vpop.f32.mrb[33].mxu0 }
 0x41a   :  { %v1206_v50 = vpop.f32.mrb[34].mxu0 }
 0x41b   :  { %v9711_v51 = vmul.f32 0.17677669, %v1206_v50  ;;  %v8099_v52 = vpop.f32.mrb[35].mxu0  ;;  %v1212_v56 = vsel %vm441_vm2, %v9709_v47, -inf }
 0x41c   :  { %1213 = vmax.xlane.f32.xlu0 %v1212_v56 }
 0x41d   :  { %v1215_v57 = vsel %vm441_vm2, %v9711_v51, -inf }
 0x41e   :  { %1216 = vmax.xlane.f32.xlu1 %v1215_v57 }
 0x420   :  { %v1326_v58 = vpop.f32.mrb[36].mxu0 }
 0x421   :  { %v9717_v59 = vmul.f32 0.17677669, %v1326_v58  ;;  %v8110_v61 = vpop.f32.mrb[37].mxu0 }
 0x422   :  { %v1329_v60 = vpop.f32.mrb[38].mxu0 }
 0x423   :  { %v9719_v43 = vmul.f32 0.17677669, %v1329_v60  ;;  %v8111_v62 = vpop.f32.mrb[39].mxu0  ;;  %v1335_v0 = vsel %vm441_vm2, %v9717_v59, -inf }
 0x424   :  { %1336 = vmax.xlane.f32.xlu0 %v1335_v0 }
 0x425   :  { %v1338_v1 = vsel %vm441_vm2, %v9719_v43, -inf }
 0x426   :  { %1339 = vmax.xlane.f32.xlu1 %v1338_v1 }
 0x428   :  { %v1477_v6 = vpop.f32.mrb[40].mxu0 }
 0x429   :  { %v8122_v7 = vpop.f32.mrb[41].mxu0  ;;  %v9729_v44 = vmul.f32 0.17677669, %v1477_v6 }
 0x42a   :  { %v1480_v8 = vpop.f32.mrb[42].mxu0 }
 0x42b   :  { %v8123_v55 = vpop.f32.mrb[43].mxu0  ;;  %v9731_v46 = vmul.f32 0.17677669, %v1480_v8  ;;  %v1486_v50 = vsel %vm441_vm2, %v9729_v44, -inf }
 0x42d   :  { %v1489_v58 = vsel %vm441_vm2, %v9731_v46, -inf }
 0x430   :  { %v1600_v9 = vpop.f32.mrb[44].mxu0 }
 0x431   :  { %v8134_v11 = vpop.f32.mrb[45].mxu0  ;;  %v9733_v48 = vmul.f32 0.17677669, %v1600_v9 }
 0x432   :  { %v1603_v12 = vpop.f32.mrb[46].mxu0 }
 0x433   :  { %v8135_v15 = vpop.f32.mrb[47].mxu0  ;;  %v9735_v49 = vmul.f32 0.17677669, %v1603_v12  ;;  %v1609_v61 = vsel %vm441_vm2, %v9733_v48, -inf }
 0x435   :  { %v1612_v1 = vsel %vm441_vm2, %v9735_v49, -inf }
 0x437   :  { %712 = vrot.lane.b32.xlu1 %v9504_v4, %s9259_s0 }
 0x438   :  { %v1724_v18 = vpop.f32.mrb[48].mxu0 }
 0x439   :  { %v8146_v19 = vpop.f32.mrb[49].mxu0  ;;  %v9739_v57 = vmul.f32 0.17677669, %v1724_v18 }
 0x43a   :  { %589 = vrot.lane.b32.xlu0 %v9504_v4, %s9257_s28  ;;  %v1727_v20 = vpop.f32.mrb[50].mxu0 }
 0x43b   :  { %v8147_v22 = vpop.f32.mrb[51].mxu0  ;;  %v9745_v0 = vmul.f32 0.17677669, %v1727_v20  ;;  %v1733_v7 = vsel %vm441_vm2, %v9739_v57, -inf }
 0x43d   :  { %v1736_v55 = vsel %vm441_vm2, %v9745_v0, -inf }
 0x440   :  { %v1847_v23 = vpop.f32.mrb[52].mxu0 }
 0x441   :  { %v8158_v24 = vpop.f32.mrb[53].mxu0  ;;  %v9749_v6 = vmul.f32 0.17677669, %v1847_v23 }
 0x442   :  { %v1850_v25 = vpop.f32.mrb[54].mxu0 }
 0x443   :  { %v8159_v27 = vpop.f32.mrb[55].mxu0  ;;  %v9753_v8 = vmul.f32 0.17677669, %v1850_v25  ;;  %v1856_v12 = vsel %vm441_vm2, %v9749_v6, -inf }
 0x445   :  { %v1859_v20 = vsel %vm441_vm2, %v9753_v8, -inf }
 0x448   :  { %v1998_v28 = vpop.f32.mrb[56].mxu0 }
 0x449   :  { %v8170_v30 = vpop.f32.mrb[57].mxu0  ;;  %v9759_v19 = vmul.f32 0.17677669, %v1998_v28 }
 0x44a   :  { %v2001_v32 = vpop.f32.mrb[58].mxu0 }
 0x44b   :  { %v8171_v31 = vpop.f32.mrb[59].mxu0  ;;  %v9763_v22 = vmul.f32 0.17677669, %v2001_v32  ;;  %v2007_v24 = vsel %vm441_vm2, %v9759_v19, -inf }
 0x44d   :  { %v2010_v27 = vsel %vm441_vm2, %v9763_v22, -inf }
 0x450   :  { %v2121_v33 = vpop.f32.mrb[60].mxu0 }
 0x451   :  { %v8182_v35 = vpop.f32.mrb[61].mxu0  ;;  %v9765_v23 = vmul.f32 0.17677669, %v2121_v33 }
 0x452   :  { %v2124_v36 = vpop.f32.mrb[62].mxu0 }
 0x453   :  { %v8183_v41 = vpop.f32.mrb[63].mxu0  ;;  %v9769_v25 = vmul.f32 0.17677669, %v2124_v36  ;;  %v2130_v28 = vsel %vm441_vm2, %v9765_v23, -inf }
 0x455   :  { %v2133_v32 = vsel %vm441_vm2, %v9769_v25, -inf }
 0x458   :  { %v2245_v52 = vpop.f32.mrb[64].mxu0 }
 0x459   :  { %1487 = vmax.xlane.f32.xlu0 %v1486_v50  ;;  %v8194_v56 = vpop.f32.mrb[65].mxu0  ;;  %v9775_v30 = vmul.f32 0.17677669, %v2245_v52 }
 0x45a   :  { %v2248_v60 = vpop.f32.mrb[66].mxu0 }
 0x45b   :  { %1490 = vmax.xlane.f32.xlu1 %v1489_v58  ;;  %v8195_v62 = vpop.f32.mrb[67].mxu0  ;;  %v9779_v31 = vmul.f32 0.17677669, %v2248_v60  ;;  %v2254_v33 = vsel %vm441_vm2, %v9775_v30, -inf }
 0x45d   :  { %1610 = vmax.xlane.f32.xlu0 %v1609_v61  ;;  %v2257_v36 = vsel %vm441_vm2, %v9779_v31, -inf }
 0x45f   :  { %1613 = vmax.xlane.f32.xlu1 %v1612_v1 }
 0x460   :  { %v2368_v9 = vpop.f32.mrb[68].mxu0 }
 0x461   :  { %1734 = vmax.xlane.f32.xlu0 %v1733_v7  ;;  %v8206_v11 = vpop.f32.mrb[69].mxu0  ;;  %v9783_v35 = vmul.f32 0.17677669, %v2368_v9 }
 0x462   :  { %v2371_v15 = vpop.f32.mrb[70].mxu0 }
 0x463   :  { %1737 = vmax.xlane.f32.xlu1 %v1736_v55  ;;  %v8207_v18 = vpop.f32.mrb[71].mxu0  ;;  %v9787_v41 = vmul.f32 0.17677669, %v2371_v15  ;;  %v2377_v50 = vsel %vm441_vm2, %v9783_v35, -inf }
 0x465   :  { %1857 = vmax.xlane.f32.xlu0 %v1856_v12  ;;  %v2380_v52 = vsel %vm441_vm2, %v9787_v41, -inf }
 0x467   :  { %1860 = vmax.xlane.f32.xlu1 %v1859_v20 }
 0x469   :  { %2008 = vmax.xlane.f32.xlu0 %v2007_v24 }
 0x46b   :  { %2011 = vmax.xlane.f32.xlu1 %v2010_v27 }
 0x46d   :  { %2131 = vmax.xlane.f32.xlu0 %v2130_v28 }
 0x46f   :  { %2134 = vmax.xlane.f32.xlu1 %v2133_v32 }
 0x471   :  { %2255 = vmax.xlane.f32.xlu0 %v2254_v33 }
 0x473   :  { %2258 = vmax.xlane.f32.xlu1 %v2257_v36 }
 0x475   :  { %2378 = vmax.xlane.f32.xlu0 %v2377_v50 }
 0x477   :  { %2381 = vmax.xlane.f32.xlu1 %v2380_v52 }
 0x489   :  { %v691_v56 = vpop.xlane.xlu0 %690 }
 0x48a   :  { %v695_v58 = vsub.f32 %v9671_v45, %v691_v56 }
 0x48c   :  { %v697_v61 = vmul.f32 1.442695, %v695_v58 }
 0x48d   :  { %v694_v60 = vpop.xlane.xlu0 %693 }
 0x48e   :  { %8810 = vpow2.f32 %v697_v61  ;;  %v696_v62 = vsub.f32 %v9675_v53, %v694_v60 }
 0x490   :  { %v699_v1 = vmul.f32 1.442695, %v696_v62 }
 0x491   :  { %v814_v7 = vpop.xlane.xlu0 %813 }
 0x492   :  { %8812 = vpow2.f32 %v699_v1  ;;  %v818_v55 = vsub.f32 %v9683_v16, %v814_v7 }
 0x493   :  { %v817_v9 = vpop.xlane.xlu1 %816 }
 0x494   :  { %v820_v11 = vmul.f32 1.442695, %v818_v55  ;;  %v819_v12 = vsub.f32 %v9687_v21, %v817_v9 }
 0x496   :  { %8814 = vpow2.f32 %v820_v11  ;;  %v822_v15 = vmul.f32 1.442695, %v819_v12 }
 0x498   :  { %v9797_v18 = vpop.eup %8810  ;;  %8816 = vpow2.f32 %v822_v15 }
 0x499   :  { %v967_v45 = vpop.xlane.xlu0 %966  ;;  %v701_v20 = vsel %vm441_vm2, %v9797_v18, 0.0 }
 0x49a   :  { %v971_v53 = vsub.f32 %v9693_v26, %v967_v45  ;;  %702 = vadd.xlane.f32.xlu0 %v701_v20 }
 0x49b   :  { %v970_v24 = vpop.xlane.xlu1 %969 }
 0x49c   :  { %v9802_v27 = vpop.eup %8812  ;;  %v973_v16 = vmul.f32 1.442695, %v971_v53  ;;  %v972_v28 = vsub.f32 %v9695_v29, %v970_v24 }
 0x49d   :  { %v704_v21 = vsel %vm441_vm2, %v9802_v27, 0.0 }
 0x49e   :  { %8818 = vpow2.f32 %v973_v16  ;;  %v975_v32 = vmul.f32 1.442695, %v972_v28  ;;  %705 = vadd.xlane.f32.xlu1 %v704_v21 }
 0x4a0   :  { %v9807_v33 = vpop.eup %8814  ;;  %8820 = vpow2.f32 %v975_v32 }
 0x4a1   :  { %v1090_v36 = vpop.xlane.xlu0 %1089  ;;  %v824_v26 = vsel %vm441_vm2, %v9807_v33, 0.0 }
 0x4a2   :  { %v9811_v50 = vpop.eup %8816  ;;  %v1094_v52 = vsub.f32 %v9701_v34, %v1090_v36  ;;  %825 = vadd.xlane.f32.xlu0 %v824_v26 }
 0x4a3   :  { %v1093_v56 = vpop.xlane.xlu1 %1092  ;;  %v827_v29 = vsel %vm441_vm2, %v9811_v50, 0.0 }
 0x4a4   :  { %v1096_v58 = vmul.f32 1.442695, %v1094_v52  ;;  %v1095_v61 = vsub.f32 %v9703_v38, %v1093_v56  ;;  %828 = vadd.xlane.f32.xlu1 %v827_v29 }
 0x4a6   :  { %8822 = vpow2.f32 %v1096_v58  ;;  %v1098_v60 = vmul.f32 1.442695, %v1095_v61 }
 0x4a8   :  { %v9817_v62 = vpop.eup %8818  ;;  %8824 = vpow2.f32 %v1098_v60 }
 0x4a9   :  { %v1214_v1 = vpop.xlane.xlu0 %1213  ;;  %v977_v7 = vsel %vm441_vm2, %v9817_v62, 0.0 }
 0x4aa   :  { %v9821_v55 = vpop.eup %8820  ;;  %v1218_v34 = vsub.f32 %v9709_v47, %v1214_v1  ;;  %978 = vadd.xlane.f32.xlu0 %v977_v7 }
 0x4ab   :  { %v1217_v9 = vpop.xlane.xlu1 %1216  ;;  %v980_v11 = vsel %vm441_vm2, %v9821_v55, 0.0 }
 0x4ac   :  { %v1220_v38 = vmul.f32 1.442695, %v1218_v34  ;;  %v1219_v12 = vsub.f32 %v9711_v51, %v1217_v9  ;;  %981 = vadd.xlane.f32.xlu1 %v980_v11  ;;  %v9836_v51 = vmul.f32 0.17677669, %v9685_v17 }
 0x4ae   :  { %8826 = vpow2.f32 %v1220_v38  ;;  %v1222_v15 = vmul.f32 1.442695, %v1219_v12 }
 0x4b0   :  { %v9827_v45 = vpop.eup %8822  ;;  %8828 = vpow2.f32 %v1222_v15 }
 0x4b1   :  { %v1337_v20 = vpop.xlane.xlu0 %1336  ;;  %v1100_v53 = vsel %vm441_vm2, %v9827_v45, 0.0 }
 0x4b2   :  { %v9831_v24 = vpop.eup %8824  ;;  %v1341_v47 = vsub.f32 %v9717_v59, %v1337_v20  ;;  %1101 = vadd.xlane.f32.xlu1 %v1100_v53  ;;  %v9844_v59 = vmul.f32 0.17677669, %v9679_v10 }
 0x4b3   :  { %v1340_v16 = vpop.xlane.xlu1 %1339  ;;  %v1103_v36 = vsel %vm441_vm2, %v9831_v24, 0.0 }
 0x4b4   :  { %v1343_v28 = vmul.f32 1.442695, %v1341_v47  ;;  %v1342_v21 = vsub.f32 %v9719_v43, %v1340_v16  ;;  %v568_v43 = vsel %vm441_vm2, %v9836_v51, -inf  ;;  %v565_v29 = vsel %vm441_vm2, %v9844_v59, -inf }
 0x4b5   :  { %v590_v32 = vpop.permute.xlu0 %589 }
 0x4b6   :  { %8830 = vpow2.f32 %v1343_v28  ;;  %v1345_v26 = vmul.f32 1.442695, %v1342_v21  ;;  %1104 = vadd.xlane.f32.xlu1 %v1103_v36  ;;  %8041 = vmatpush3.bf16.msra.mxu1 %v590_v32 }
 0x4b7   :  { %8052 = vmatprep.subr.bf16.mxu1 %v12184_v37  ;;  %v9868_v7 = vpop.permute.xlu1 %712 }
 0x4b8   :  { %v9841_v52 = vpop.eup %8826  ;;  %8832 = vpow2.f32 %v1345_v26 }
 0x4b9   :  { %v1224_v17 = vsel %vm441_vm2, %v9841_v52, 0.0 }
 0x4ba   :  { %v9850_v56 = vpop.eup %8828  ;;  %1225 = vadd.xlane.f32.xlu0 %v1224_v17  ;;  %569 = vmax.xlane.f32.xlu1 %v568_v43 }
 0x4bb   :  { %v1227_v58 = vsel %vm441_vm2, %v9850_v56, 0.0 }
 0x4be   :  { %566 = vmax.xlane.f32.xlu0 %v565_v29  ;;  %1228 = vadd.xlane.f32.xlu1 %v1227_v58 }
 0x4c0   :  { %v9856_v10 = vpop.eup %8830 }
 0x4c1   :  { %v1347_v61 = vsel %vm441_vm2, %v9856_v10, 0.0 }
 0x4c2   :  { %v9860_v60 = vpop.eup %8832  ;;  %1348 = vadd.xlane.f32.xlu1 %v1347_v61 }
 0x4c3   :  { %v1350_v1 = vsel %vm441_vm2, %v9860_v60, 0.0 }
 0x4c6   :  { %1351 = vadd.xlane.f32.xlu1 %v1350_v1 }
 0x4d4   :  { %835 = vrot.lane.b32.xlu0 %v9504_v4, %s12191_s30 }
 0x4d8   :  { %1112 = vrot.lane.b32.xlu0 %v9500_v3, %s9257_s28 }
 0x4e6   :  { %v1488_v34 = vpop.xlane.xlu0 %1487 }
 0x4e7   :  { %v1492_v9 = vsub.f32 %v9729_v44, %v1488_v34 }
 0x4e8   :  { %v1491_v11 = vpop.xlane.xlu1 %1490 }
 0x4e9   :  { %v1494_v38 = vmul.f32 1.442695, %v1492_v9  ;;  %v1493_v12 = vsub.f32 %v9731_v46, %v1491_v11 }
 0x4ea   :  { %v1611_v15 = vpop.xlane.xlu0 %1610 }
 0x4eb   :  { %8834 = vpow2.f32 %v1494_v38  ;;  %v1496_v20 = vmul.f32 1.442695, %v1493_v12  ;;  %v1615_v53 = vsub.f32 %v9733_v48, %v1611_v15 }
 0x4ec   :  { %v1614_v47 = vpop.xlane.xlu1 %1613 }
 0x4ed   :  { %8836 = vpow2.f32 %v1496_v20  ;;  %v1617_v4 = vmul.f32 1.442695, %v1615_v53  ;;  %v1616_v16 = vsub.f32 %v9735_v49, %v1614_v47 }
 0x4ee   :  { %v1735_v61 = vpop.xlane.xlu0 %1734 }
 0x4ef   :  { %v1619_v28 = vmul.f32 1.442695, %v1616_v16  ;;  %8838 = vpow2.f32 %v1617_v4  ;;  %v1739_v11 = vsub.f32 %v9739_v57, %v1735_v61 }
 0x4f0   :  { %v1738_v21 = vpop.xlane.xlu1 %1737 }
 0x4f1   :  { %8840 = vpow2.f32 %v1619_v28  ;;  %v1740_v44 = vsub.f32 %v9745_v0, %v1738_v21  ;;  %v1741_v38 = vmul.f32 1.442695, %v1739_v11 }
 0x4f2   :  { %v1858_v34 = vpop.xlane.xlu0 %1857 }
 0x4f3   :  { %v1743_v32 = vmul.f32 1.442695, %v1740_v44  ;;  %v1862_v12 = vsub.f32 %v9749_v6, %v1858_v34 }
 0x4f4   :  { %v1861_v1 = vpop.xlane.xlu1 %1860 }
 0x4f5   :  { %v9875_v36 = vpop.eup %8834  ;;  %8842 = vpow2.f32 %v1743_v32  ;;  %v1864_v53 = vmul.f32 1.442695, %v1862_v12 }
 0x4f6   :  { %v1498_v46 = vsel %vm441_vm2, %v9875_v36, 0.0  ;;  %v2009_v15 = vpop.xlane.xlu0 %2008  ;;  %8844 = vpow2.f32 %v1741_v38 }
 0x4f7   :  { %v9879_v26 = vpop.eup %8836  ;;  %1499 = vadd.xlane.f32.xlu1 %v1498_v46  ;;  %v2013_v47 = vsub.f32 %v9759_v19, %v2009_v15  ;;  %8846 = vpow2.f32 %v1864_v53 }
 0x4f8   :  { %v1501_v49 = vsel %vm441_vm2, %v9879_v26, 0.0  ;;  %v2012_v9 = vpop.xlane.xlu1 %2011 }
 0x4f9   :  { %v9881_v48 = vpop.eup %8838  ;;  %v2015_v16 = vmul.f32 1.442695, %v2013_v47  ;;  %v2014_v53 = vsub.f32 %v9763_v22, %v2012_v9 }
 0x4fa   :  { %v1621_v43 = vsel %vm441_vm2, %v9881_v48, 0.0  ;;  %v2132_v28 = vpop.xlane.xlu0 %2131 }
 0x4fb   :  { %v9885_v17 = vpop.eup %8840  ;;  %1502 = vadd.xlane.f32.xlu1 %v1501_v49  ;;  %8848 = vpow2.f32 %v2015_v16 }
 0x4fc   :  { %v1624_v0 = vsel %vm441_vm2, %v9885_v17, 0.0  ;;  %v2135_v20 = vpop.xlane.xlu1 %2134 }
 0x4fd   :  { %1625 = vadd.xlane.f32.xlu0 %v1624_v0 }
 0x4fe   :  { %v9904_v32 = vpop.xlane.xlu0 %2255 }
 0x4ff   :  { %v9891_v29 = vpop.eup %8842  ;;  %1622 = vadd.xlane.f32.xlu1 %v1621_v43 }
 0x500   :  { %v1748_v58 = vsel %vm441_vm2, %v9891_v29, 0.0  ;;  %v2259_v4 = vpop.xlane.xlu1 %2258  ;;  %v9902_v44 = vpop.eup %8844 }
 0x501   :  { %1749 = vadd.xlane.f32.xlu0 %v1748_v58  ;;  %v1745_v6 = vsel %vm441_vm2, %v9902_v44, 0.0  ;;  %v9910_v46 = vpop.eup %8846 }
 0x502   :  { %v9912_v19 = vpop.xlane.xlu0 %2378  ;;  %v1868_v0 = vsel %vm441_vm2, %v9910_v46, 0.0 }
 0x504   :  { %v9900_v21 = vpop.xlane.xlu1 %2381 }
 0x505   :  { %v9918_v43 = vpop.eup %8848 }
 0x506   :  { %v2019_v34 = vsel %vm441_vm2, %v9918_v43, 0.0 }
 0x510   :  { %1235 = vrot.lane.b32.xlu1 %v9500_v3, %s9259_s0 }
 0x527   :  { %v9920_v58 = vpop.xlane.xlu0 %702 }
 0x52b   :  { %v9906_v57 = vpop.xlane.xlu1 %705 }
 0x52f   :  { %v9926_v11 = vpop.xlane.xlu0 %825 }
 0x531   :  { %v9914_v49 = vpop.xlane.xlu1 %828 }
 0x534   :  { %1746 = vadd.xlane.f32.xlu1 %v1745_v6 }
 0x537   :  { %v9930_v12 = vpop.xlane.xlu0 %978 }
 0x538   :  { %1869 = vadd.xlane.f32.xlu1 %v1868_v0  ;;  %v2017_v0 = vmul.f32 1.442695, %v2014_v53 }
 0x539   :  { %v9922_v61 = vpop.xlane.xlu1 %981 }
 0x53c   :  { %2020 = vadd.xlane.f32.xlu1 %v2019_v34 }
 0x53f   :  { %v9928_v38 = vpop.xlane.xlu1 %1101 }
 0x543   :  { %v9932_v15 = vpop.xlane.xlu1 %1104 }
 0x547   :  { %v9935_v47 = vpop.xlane.xlu0 %1225  ;;  %v570_v16 = vpop.xlane.xlu1 %569 }
 0x548   :  { %v572_v6 = vsub.f32 %v9836_v51, %v570_v16  ;;  %v2261_v16 = vsub.f32 %v9779_v31, %v2259_v4  ;;  %v2260_v4 = vsub.f32 %v9775_v30, %v9904_v32 }
 0x54a   :  { %v575_v54 = vmul.f32 1.442695, %v572_v6 }
 0x54b   :  { %v567_v2 = vpop.xlane.xlu0 %566 }
 0x54c   :  { %8850 = vpow2.f32 %v575_v54  ;;  %v571_v34 = vsub.f32 %v9844_v59, %v567_v2  ;;  %v1863_v2 = vsub.f32 %v9753_v8, %v1861_v1  ;;  %v2137_v59 = vsub.f32 %v9769_v25, %v2135_v20  ;;  %v9979_v20 = vpop.xlane.xlu1 %1228 }
 0x54d   :  { %8852 = vpow2.f32 %v2017_v0  ;;  %v2264_v0 = vmul.f32 1.442695, %v2261_v16 }
 0x54e   :  { %v573_v37 = vmul.f32 1.442695, %v571_v34  ;;  %v2140_v6 = vmul.f32 1.442695, %v2137_v59  ;;  %v2384_v59 = vsub.f32 %v9787_v41, %v9900_v21 }
 0x550   :  { %8854 = vpow2.f32 %v573_v37  ;;  %v2136_v37 = vsub.f32 %v9765_v23, %v2132_v28  ;;  %v2383_v28 = vsub.f32 %v9783_v35, %v9912_v19  ;;  %v2387_v16 = vmul.f32 1.442695, %v2384_v59 }
 0x552   :  { %v2138_v53 = vmul.f32 1.442695, %v2136_v37  ;;  %v2262_v37 = vmul.f32 1.442695, %v2260_v4 }
 0x556   :  { %v9939_v39 = vpop.eup %8850 }
 0x557   :  { %v580_v42 = vsel %vm441_vm2, %v9939_v39, 0.0  ;;  %v9943_v22 = vpop.eup %8852 }
 0x558   :  { %581 = vadd.xlane.f32.xlu1 %v580_v42  ;;  %v2022_v54 = vsel %vm441_vm2, %v9943_v22, 0.0  ;;  %v1866_v42 = vmul.f32 1.442695, %v1863_v2  ;;  %v9985_v2 = vpop.xlane.xlu1 %1348 }
 0x55a   :  { %v9945_v9 = vpop.eup %8854  ;;  %8856 = vpow2.f32 %v1866_v42  ;;  %v2385_v42 = vmul.f32 1.442695, %v2383_v28 }
 0x55b   :  { %v577_v51 = vsel %vm441_vm2, %v9945_v9, 0.0  ;;  %8858 = vpow2.f32 %v2138_v53 }
 0x55c   :  { %578 = vadd.xlane.f32.xlu0 %v577_v51  ;;  %2023 = vadd.xlane.f32.xlu1 %v2022_v54  ;;  %8860 = vpow2.f32 %v2140_v6  ;;  %v9989_v53 = vpop.xlane.xlu1 %1351 }
 0x55d   :  { %8862 = vpow2.f32 %v2264_v0 }
 0x55e   :  { %8864 = vpow2.f32 %v2262_v37 }
 0x55f   :  { %8866 = vpow2.f32 %v2385_v42 }
 0x560   :  { %8868 = vpow2.f32 %v2387_v16 }
 0x564   :  { %v9959_v34 = vpop.eup %8856 }
 0x565   :  { %v9961_v51 = vpop.eup %8858  ;;  %v1871_v8 = vsel %vm441_vm2, %v9959_v34, 0.0 }
 0x566   :  { %v9963_v54 = vpop.eup %8860  ;;  %v2142_v23 = vsel %vm441_vm2, %v9961_v51, 0.0 }
 0x567   :  { %v9969_v25 = vpop.eup %8862  ;;  %v2145_v31 = vsel %vm441_vm2, %v9963_v54, 0.0 }
 0x568   :  { %v2269_v1 = vsel %vm441_vm2, %v9969_v25, 0.0  ;;  %v9993_v0 = vpop.eup %8864 }
 0x569   :  { %v9997_v35 = vpop.eup %8866  ;;  %v2266_v32 = vsel %vm441_vm2, %v9993_v0, 0.0 }
 0x56a   :  { %v2389_v41 = vsel %vm441_vm2, %v9997_v35, 0.0  ;;  %v10003_v21 = vpop.eup %8868 }
 0x56d   :  { %1633 = vrot.lane.b32.xlu1 %v9510_v14, %s9257_s28 }
 0x572   :  { %1358 = vrot.lane.b32.xlu0 %v9500_v3, %s12191_s30 }
 0x584   :  { %v9991_v6 = vpop.xlane.xlu1 %1499 }
 0x588   :  { %v9995_v30 = vpop.xlane.xlu1 %1502 }
 0x58c   :  { %v10005_v19 = vpop.xlane.xlu1 %1622 }
 0x591   :  { %1872 = vadd.xlane.f32.xlu0 %v1871_v8  ;;  %2143 = vadd.xlane.f32.xlu1 %v2142_v23  ;;  %v2392_v8 = vsel %vm441_vm2, %v10003_v21, 0.0  ;;  %v10009_v23 = vpop.permute.xlu1 %1235 }
 0x595   :  { %2146 = vadd.xlane.f32.xlu0 %v2145_v31  ;;  %2270 = vadd.xlane.f32.xlu1 %v2269_v1  ;;  %v836_v31 = vpop.permute.xlu0 %835 }
 0x599   :  { %v1113_v4 = vpop.permute.xlu0 %1112 }
 0x59d   :  { %v10015_v37 = vpop.xlane.xlu0 %1625 }
 0x5a1   :  { %v10021_v59 = vpop.xlane.xlu0 %1749 }
 0x5a6   :  { %1879 = vrot.lane.b32.xlu1 %v9510_v14, %s12191_s30 }
 0x5ab   :  { %1756 = vrot.lane.b32.xlu0 %v9510_v14, %s9259_s0 }
 0x5c1   :  { %v10011_v1 = vpop.xlane.xlu1 %1746 }
 0x5c5   :  { %v10013_v28 = vpop.xlane.xlu1 %1869 }
 0x5c9   :  { %v10017_v42 = vpop.xlane.xlu1 %2020 }
 0x5ca   :  { %2267 = vadd.xlane.f32.xlu0 %v2266_v32  ;;  %2390 = vadd.xlane.f32.xlu1 %v2389_v41 }
 0x5ce   :  { %2393 = vadd.xlane.f32.xlu0 %v2392_v8 }
 0x5e4   :  { %2154 = vrot.lane.b32.xlu0 %v9508_v13, %s9257_s28 }
 0x5e5   :  { %v582_v16 = vpop.xlane.xlu1 %581 }
 0x5e6   :  { %8870 = vrcp.f32 %v582_v16 }
 0x5e8   :  { %2277 = vrot.lane.b32.xlu0 %v9508_v13, %s9259_s0 }
 0x5e9   :  { %v579_v32 = vpop.xlane.xlu0 %578 }
 0x5ea   :  { %8872 = vrcp.f32 %v579_v32 }
 0x5eb   :  { %8874 = vrcp.f32 %v9906_v57  ;;  %v12225_v57 = vmov 0.0  }
 0x5ec   :  { %2400 = vrot.lane.b32.xlu0 %v9508_v13, %s12191_s30  ;;  %8876 = vrcp.f32 %v9920_v58 }
 0x5ed   :  { %8878 = vrcp.f32 %v9914_v49 }
 0x5ee   :  { %8880 = vrcp.f32 %v9926_v11 }
 0x5ef   :  { %8882 = vrcp.f32 %v9922_v61 }
 0x5f0   :  { %v8871_v41 = vpop.eup %8870  ;;  %8884 = vrcp.f32 %v9930_v12 }
 0x5f1   :  { %v586_v40 = vmul.f32 %v8871_v41, %v9939_v39  ;;  %8886 = vrcp.f32 %v9932_v15 }
 0x5f2   :  { %8888 = vrcp.f32 %v9928_v38 }
 0x5f3   :  { %8890 = vrcp.f32 %v9979_v20 }
 0x5f4   :  { %v8873_v8 = vpop.eup %8872  ;;  %8892 = vrcp.f32 %v9935_v47 }
 0x5f5   :  { %v585_v63 = vmul.f32 %v8873_v8, %v9945_v9  ;;  %v8875_v5 = vpop.eup %8874  ;;  %8894 = vrcp.f32 %v9989_v53 }
 0x5f6   :  { %v8877_v32 = vpop.eup %8876  ;;  %v710_v58 = vmul.f32 %v8875_v5, %v9802_v27  ;;  %8896 = vrcp.f32 %v9985_v2  ;;  %v1359_v2 = vpop.permute.xlu0 %1358 }
 0x5f7   :  { %v587_v16 = vpack.c.bf16 %v586_v40, %v585_v63  ;;  %v709_v39 = vmul.f32 %v8877_v32, %v9797_v18  ;;  %v8879_v63 = vpop.eup %8878  ;;  %8898 = vrcp.f32 %v9995_v30 }
 0x5f8   :  { %v8881_v49 = vpop.eup %8880  ;;  %8900 = vrcp.f32 %v9991_v6 }
 0x5f9   :  { %8043 = vmatmul.mubr.msk.bf16.vlgmr.msra.gmra.mrb[20].mxu1 %vm441_vm2, %v587_v16  ;;  %v711_v40 = vpack.c.bf16 %v710_v58, %v709_v39  ;;  %v832_v5 = vmul.f32 %v8881_v49, %v9807_v33  ;;  %v8883_v27 = vpop.eup %8882  ;;  %8902 = vrcp.f32 %v10005_v19 }
 0x5fa   :  { %8053 = vmatpush3.bf16.msra.mxu1 %v9868_v7  ;;  %8054 = vmatprep.mubr.msk.bf16.mxu1 %vm9256_vm0, %v12225_v57  ;;  %v833_v7 = vmul.f32 %v8879_v63, %v9811_v50  ;;  %v8885_v61 = vpop.eup %8884  ;;  %v986_v50 = vmul.f32 %v8883_v27, %v9821_v55  ;;  %8904 = vrcp.f32 %v10015_v37 }
 0x5fb   :  { %8064 = vmatprep.subr.bf16.mxu1 %v12225_v57  ;;  %v985_v33 = vmul.f32 %v8885_v61, %v9817_v62  ;;  %v8887_v12 = vpop.eup %8886  ;;  %8906 = vrcp.f32 %v10011_v1 }
 0x5fc   :  { %v834_v18 = vpack.c.bf16 %v833_v7, %v832_v5  ;;  %v8889_v38 = vpop.eup %8888  ;;  %8908 = vrcp.f32 %v10021_v59 }
 0x5fd   :  { %v987_v11 = vpack.c.bf16 %v986_v50, %v985_v33  ;;  %v1108_v55 = vmul.f32 %v8889_v38, %v9827_v45  ;;  %v8891_v15 = vpop.eup %8890 }
 0x5fe   :  { %v8893_v47 = vpop.eup %8892 }
 0x5ff   :  { %v1232_v45 = vmul.f32 %v8893_v47, %v9841_v52  ;;  %v8895_v20 = vpop.eup %8894 }
 0x600   :  { %v8897_v53 = vpop.eup %8896 }
 0x601   :  { %8055 = vmatmul.mubr.msk.bf16.vlgmr.msra.gmra.mrb[24].mxu1 %vm441_vm2, %v711_v40  ;;  %v1355_v52 = vmul.f32 %v8897_v53, %v9856_v10 }
 0x602   :  { %8065 = vmatpush3.bf16.msra.mxu1 %v836_v31  ;;  %8066 = vmatprep.mubr.msk.bf16.mxu1 %vm9256_vm0, %v12225_v57  ;;  %v2024_v31 = vpop.xlane.xlu1 %2023 }
 0x603   :  { %8076 = vmatprep.subr.bf16.mxu1 %v12225_v57 }
 0x606   :  { %v1634_v41 = vpop.permute.xlu1 %1633 }
 0x609   :  { %8067 = vmatmul.mubr.msk.bf16.vlgmr.msra.gmra.mrb[28].mxu1 %vm441_vm2, %v834_v18 }
 0x60a   :  { %8077 = vmatpush3.bf16.msra.mxu1 %v9500_v3  ;;  %8078 = vmatprep.mubr.msk.bf16.mxu1 %vm9256_vm0, %v12225_v57  ;;  %v1109_v3 = vmul.f32 %v8887_v12, %v9831_v24  ;;  %v1233_v24 = vmul.f32 %v8891_v15, %v9850_v56  ;;  %v1356_v56 = vmul.f32 %v8895_v20, %v9860_v60 }
 0x60b   :  { %8088 = vmatprep.subr.bf16.mxu1 %v12225_v57 }
 0x60c   :  { %v1110_v62 = vpack.c.bf16 %v1109_v3, %v1108_v55  ;;  %v1234_v9 = vpack.c.bf16 %v1233_v24, %v1232_v45  ;;  %v1357_v30 = vpack.c.bf16 %v1356_v56, %v1355_v52 }
 0x611   :  { %8079 = vmatmul.mubr.msk.bf16.vlgmr.msra.gmra.mrb[32].mxu1 %vm441_vm2, %v987_v11 }
 0x612   :  { %8089 = vmatpush3.bf16.msra.mxu1 %v1113_v4  ;;  %8090 = vmatprep.mubr.msk.bf16.mxu1 %vm9256_vm0, %v12225_v57 }
 0x613   :  { %8100 = vmatprep.subr.bf16.mxu1 %v12225_v57 }
 0x619   :  { %8091 = vmatmul.mubr.msk.bf16.vlgmr.msra.gmra.mrb[36].mxu1 %vm441_vm2, %v1110_v62 }
 0x61a   :  { %8101 = vmatpush3.bf16.msra.mxu1 %v10009_v23  ;;  %8102 = vmatprep.mubr.msk.bf16.mxu1 %vm9256_vm0, %v12225_v57  ;;  %v8899_v23 = vpop.eup %8898 }
 0x61b   :  { %8112 = vmatprep.subr.bf16.mxu1 %v12225_v57  ;;  %v8901_v6 = vpop.eup %8900  ;;  %v1507_v60 = vmul.f32 %v8899_v23, %v9879_v26  ;;  %v8666_v23 = vld [vmem:[%s12162_s3] sm:$0xff]  }
 0x61c   :  { %v1506_v10 = vmul.f32 %v8901_v6, %v9875_v36  ;;  %v8903_v37 = vpop.eup %8902  ;;  %8214 = vmatprep.subr.bf16.mxu0 %v8666_v23 }
 0x61d   :  { %v1629_v26 = vmul.f32 %v8903_v37, %v9881_v48  ;;  %8215 = vmatpush3.bf16.msra.mxu0 %v8666_v23 }
 0x61e   :  { %v1873_v19 = vpop.xlane.xlu0 %1872  ;;  %v1508_v4 = vpack.c.bf16 %v1507_v60, %v1506_v10  ;;  %v2144_v1 = vpop.xlane.xlu1 %2143  ;;  %v8668_v10 = vld [vmem:[%s12162_s3 + $0x10] sm:$0xff]  }
 0x61f   :  { %8910 = vrcp.f32 %v1873_v19 }
 0x620   :  { %8912 = vrcp.f32 %v10013_v28 }
 0x621   :  { %8103 = vmatmul.mubr.msk.bf16.vlgmr.msra.gmra.mrb[40].mxu1 %vm441_vm2, %v1234_v9  ;;  %8914 = vrcp.f32 %v2024_v31  ;;  %v8667_v31 = vld [vmem:[%s12162_s3 + $0x8] sm:$0xff]  }
 0x622   :  { %8113 = vmatpush3.bf16.msra.mxu1 %v1359_v2  ;;  %8114 = vmatprep.mubr.msk.bf16.mxu1 %vm9256_vm0, %v12225_v57  ;;  %v2147_v8 = vpop.xlane.xlu0 %2146  ;;  %v2271_v39 = vpop.xlane.xlu1 %2270  ;;  %8916 = vrcp.f32 %v10017_v42 }
 0x623   :  { %8124 = vmatprep.subr.bf16.mxu1 %v12225_v57  ;;  %8918 = vrcp.f32 %v2147_v8  ;;  %8216 = vmatprep.subr.bf16.mxu0 %v8667_v31  ;;  %v8669_v8 = vld [vmem:[%s12162_s3 + $0x18] sm:$0xff]  }
 0x624   :  { %8920 = vrcp.f32 %v2144_v1  ;;  %8217 = vmatpush3.bf16.msra.mxu0 %v8667_v31 }
 0x625   :  { %8218 = vmatprep.subr.bf16.mxu0 %v8668_v10 }
 0x626   :  { %v1757_v59 = vpop.permute.xlu0 %1756  ;;  %v1880_v28 = vpop.permute.xlu1 %1879 }
 0x628   :  { %8219 = vmatpush3.bf16.msra.mxu0 %v8668_v10 }
 0x629   :  { %8115 = vmatmul.mubr.msk.bf16.vlgmr.msra.gmra.mrb[44].mxu1 %vm441_vm2, %v1357_v30  ;;  %8220 = vmatprep.subr.bf16.mxu0 %v8669_v8 }
 0x62a   :  { %8125 = vmatpush3.bf16.msra.mxu1 %v9510_v14  ;;  %8126 = vmatprep.mubr.msk.bf16.mxu1 %vm9256_vm0, %v12225_v57  ;;  %v8905_v14 = vpop.eup %8904 }
 0x62b   :  { %8136 = vmatprep.subr.bf16.mxu1 %v12225_v57  ;;  %v1630_v36 = vmul.f32 %v8905_v14, %v9885_v17  ;;  %v8907_v32 = vpop.eup %8906 }
 0x62c   :  { %v8909_v58 = vpop.eup %8908  ;;  %v1753_v48 = vmul.f32 %v8907_v32, %v9902_v44  ;;  %8221 = vmatpush3.bf16.msra.mxu0 %v8669_v8 }
 0x62d   :  { %v1631_v16 = vpack.c.bf16 %v1630_v36, %v1629_v26  ;;  %v1754_v17 = vmul.f32 %v8909_v58, %v9891_v29  ;;  %v8911_v63 = vpop.eup %8910  ;;  %v8671_v58 = vld [vmem:[%s12162_s3 + $0x28] sm:$0xff]  }
 0x62e   :  { %v8913_v49 = vpop.eup %8912  ;;  %v1877_v44 = vmul.f32 %v8911_v63, %v9959_v34 }
 0x62f   :  { %v1755_v40 = vpack.c.bf16 %v1754_v17, %v1753_v48  ;;  %v1876_v7 = vmul.f32 %v8913_v49, %v9910_v46  ;;  %v8915_v5 = vpop.eup %8914  ;;  %v8672_v17 = vld [vmem:[%s12162_s3 + $0x30] sm:$0xff]   ;;  %v8673_v49 = vld [vmem:[%s12162_s3 + $0x38] sm:$0xff]  }
 0x630   :  { %v8917_v18 = vpop.eup %8916  ;;  %v2028_v42 = vmul.f32 %v8915_v5, %v9943_v22 }
 0x631   :  { %8127 = vmatmul.mubr.msk.bf16.vlgmr.msra.gmra.mrb[48].mxu1 %vm441_vm2, %v1508_v4  ;;  %v1878_v29 = vpack.c.bf16 %v1877_v44, %v1876_v7  ;;  %v2027_v34 = vmul.f32 %v8917_v18, %v9918_v43 }
 0x632   :  { %8137 = vmatpush3.bf16.msra.mxu1 %v1634_v41  ;;  %8138 = vmatprep.mubr.msk.bf16.mxu1 %vm9256_vm0, %v12225_v57 }
 0x633   :  { %8148 = vmatprep.subr.bf16.mxu1 %v12225_v57  ;;  %v2029_v27 = vpack.c.bf16 %v2028_v42, %v2027_v34 }
 0x639   :  { %8139 = vmatmul.mubr.msk.bf16.vlgmr.msra.gmra.mrb[52].mxu1 %vm441_vm2, %v1631_v16  ;;  %v8670_v16 = vld [vmem:[%s12162_s3 + $0x20] sm:$0xff]  }
 0x63a   :  { %8149 = vmatpush3.bf16.msra.mxu1 %v1757_v59  ;;  %8150 = vmatprep.mubr.msk.bf16.mxu1 %vm9256_vm0, %v12225_v57 }
 0x63b   :  { %8160 = vmatprep.subr.bf16.mxu1 %v12225_v57  ;;  %8222 = vmatprep.subr.bf16.mxu0 %v8670_v16 }
 0x63c   :  { %8223 = vmatpush3.bf16.msra.mxu0 %v8670_v16 }
 0x63d   :  { %8224 = vmatprep.subr.bf16.mxu0 %v8671_v58 }
 0x640   :  { %8225 = vmatpush3.bf16.msra.mxu0 %v8671_v58 }
 0x641   :  { %8151 = vmatmul.mubr.msk.bf16.vlgmr.msra.gmra.mrb[56].mxu1 %vm441_vm2, %v1755_v40  ;;  %8226 = vmatprep.subr.bf16.mxu0 %v8672_v17 }
 0x642   :  { %8161 = vmatpush3.bf16.msra.mxu1 %v1880_v28  ;;  %8162 = vmatprep.mubr.msk.bf16.mxu1 %vm9256_vm0, %v12225_v57 }
 0x643   :  { %8172 = vmatprep.subr.bf16.mxu1 %v12225_v57 }
 0x644   :  { %8227 = vmatpush3.bf16.msra.mxu0 %v8672_v17 }
 0x645   :  { %8228 = vmatprep.subr.bf16.mxu0 %v8673_v49 }
 0x648   :  { %8229 = vmatpush3.bf16.msra.mxu0 %v8673_v49 }
 0x649   :  { %8163 = vmatmul.mubr.msk.bf16.vlgmr.msra.gmra.mrb[60].mxu1 %vm441_vm2, %v1878_v29 }
 0x64a   :  { %8173 = vmatpush3.bf16.msra.mxu1 %v9508_v13  ;;  %8174 = vmatprep.mubr.msk.bf16.mxu1 %vm9256_vm0, %v12225_v57  ;;  %v8919_v13 = vpop.eup %8918 }
 0x64b   :  { %8184 = vmatprep.subr.bf16.mxu1 %v12225_v57  ;;  %v8921_v50 = vpop.eup %8920  ;;  %v2151_v22 = vmul.f32 %v8919_v13, %v9963_v54 }
 0x64c   :  { %v2150_v33 = vmul.f32 %v8921_v50, %v9961_v51 }
 0x64e   :  { %v2152_v12 = vpack.c.bf16 %v2151_v22, %v2150_v33 }
 0x651   :  { %8175 = vmatmul.mubr.msk.bf16.vlgmr.msra.gmra.mrb[64].mxu1 %vm441_vm2, %v2029_v27 }
 0x652   :  { %8186 = vmatprep.mubr.msk.bf16.mxu1 %vm9256_vm0, %v12225_v57 }
 0x657   :  { %v2268_v46 = vpop.xlane.xlu0 %2267  ;;  %v2391_v11 = vpop.xlane.xlu1 %2390 }
 0x658   :  { %8922 = vrcp.f32 %v2268_v46 }
 0x659   :  { %8924 = vrcp.f32 %v2271_v39 }
 0x65b   :  { %v2394_v61 = vpop.xlane.xlu0 %2393 }
 0x65c   :  { %8926 = vrcp.f32 %v2394_v61 }
 0x65d   :  { %8928 = vrcp.f32 %v2391_v11 }
 0x65f   :  { %v2155_v43 = vpop.permute.xlu0 %2154 }
 0x660   :  { %8185 = vmatpush3.bf16.msra.mxu1 %v2155_v43 }
 0x661   :  { %8196 = vmatprep.subr.bf16.mxu1 %v12225_v57 }
 0x662   :  { %v8923_v38 = vpop.eup %8922 }
 0x663   :  { %v2278_v3 = vpop.permute.xlu0 %2277  ;;  %8187 = vmatmul.mubr.msk.bf16.vlgmr.msra.gmra.mrb[68].mxu1 %vm441_vm2, %v2152_v12  ;;  %v8925_v55 = vpop.eup %8924  ;;  %v2274_v54 = vmul.f32 %v8923_v38, %v9993_v0  ;;  %v12226_v0 = vmov 0  }
 0x664   :  { %8197 = vmatpush3.bf16.msra.mxu1 %v2278_v3  ;;  %8198 = vmatprep.mubr.msk.bf16.mxu1 %vm9256_vm0, %v12225_v57  ;;  %v2275_v51 = vmul.f32 %v8925_v55, %v9969_v25 }
 0x665   :  { %8208 = vmatprep.subr.bf16.mxu1 %v12225_v57 }
 0x666   :  { %v2276_v62 = vpack.c.bf16 %v2275_v51, %v2274_v54  ;;  %v8927_v15 = vpop.eup %8926 }
 0x667   :  { %v2401_v47 = vpop.permute.xlu0 %2400  ;;  %v8929_v24 = vpop.eup %8928  ;;  %v2398_v45 = vmul.f32 %v8927_v15, %v10003_v21 }
 0x668   :  { %v2397_v9 = vmul.f32 %v8929_v24, %v9997_v35 }
 0x66a   :  { %v2399_v20 = vpack.c.bf16 %v2398_v45, %v2397_v9 }
 0x66b   :  { %8199 = vmatmul.mubr.msk.bf16.vlgmr.msra.gmra.mrb[72].mxu1 %vm441_vm2, %v2276_v62 }
 0x66c   :  { %8209 = vmatpush3.bf16.msra.mxu1 %v2401_v47  ;;  %8210 = vmatprep.mubr.msk.bf16.mxu1 %vm9256_vm0, %v12225_v57 }
 0x673   :  { %8211 = vmatmul.mubr.msk.bf16.vlgmr.msra.gmra.mrb[76].mxu1 %vm441_vm2, %v2399_v20 }
 0x674   :  { %2847 = vmatprep.mubr.bf16.mxu1 %v12226_v0 }
 0x6cc   :  { %v629_v25 = vpop.f32.mrb[20].mxu1 }
 0x6cd   :  { %v8044_v2 = vpop.f32.mrb[21].mxu1 }
 0x6ce   :  { %v632_v53 = vpop.f32.mrb[22].mxu1 }
 0x6cf   :  { %v8512_v56 = vpack.i.bf16 %v632_v53, %v629_v25  ;;  %v8045_v52 = vpop.f32.mrb[23].mxu1 }
 0x6d1   :  { %8513 = vrot.lane.b32.xlu1 %v8512_v56, %s12191_s30 }
 0x6d4   :  { %v752_v30 = vpop.f32.mrb[24].mxu1 }
 0x6d5   :  { %v8056_v21 = vpop.f32.mrb[25].mxu1 }
 0x6d6   :  { %v755_v6 = vpop.f32.mrb[26].mxu1 }
 0x6d7   :  { %v8517_v35 = vpack.i.bf16 %v755_v6, %v752_v30  ;;  %v8057_v60 = vpop.f32.mrb[27].mxu1 }
 0x6d9   :  { %8518 = vrot.lane.b32.xlu0 %v8517_v35, %s9259_s0 }
 0x6dc   :  { %v875_v19 = vpop.f32.mrb[28].mxu1 }
 0x6dd   :  { %v8068_v4 = vpop.f32.mrb[29].mxu1 }
 0x6de   :  { %v878_v37 = vpop.f32.mrb[30].mxu1 }
 0x6df   :  { %v8522_v41 = vpack.i.bf16 %v878_v37, %v875_v19  ;;  %v8069_v14 = vpop.f32.mrb[31].mxu1 }
 0x6e1   :  { %8523 = vrot.lane.b32.xlu0 %v8522_v41, %s9257_s28 }
 0x6e4   :  { %v10151_v26 = vpop.f32.mrb[32].mxu1 }
 0x6e5   :  { %v8080_v36 = vpop.f32.mrb[33].mxu1 }
 0x6e6   :  { %v10156_v1 = vpop.f32.mrb[34].mxu1 }
 0x6e7   :  { %v8081_v32 = vpop.f32.mrb[35].mxu1 }
 0x6ec   :  { %v1152_v59 = vpop.f32.mrb[36].mxu1 }
 0x6ed   :  { %v8092_v48 = vpop.f32.mrb[37].mxu1 }
 0x6ee   :  { %v1155_v39 = vpop.f32.mrb[38].mxu1 }
 0x6ef   :  { %v8527_v40 = vpack.i.bf16 %v1155_v39, %v1152_v59  ;;  %v8093_v63 = vpop.f32.mrb[39].mxu1  ;;  %v12227_v39 = vld [vmem:[#allocation13_spill] sm:$0xff] }
 0x6f1   :  { %8528 = vrot.lane.b32.xlu0 %v8527_v40, %s12191_s30  ;;  %v12228_v40 = vld [vmem:[#allocation12_spill] sm:$0xff] }
 0x6f4   :  { %v1275_v28 = vpop.f32.mrb[40].mxu1 }
 0x6f5   :  { %v8104_v44 = vpop.f32.mrb[41].mxu1 }
 0x6f6   :  { %v1278_v7 = vpop.f32.mrb[42].mxu1 }
 0x6f7   :  { %v8532_v29 = vpack.i.bf16 %v1278_v7, %v1275_v28  ;;  %v8105_v5 = vpop.f32.mrb[43].mxu1 }
 0x6f9   :  { %8533 = vrot.lane.b32.xlu0 %v8532_v29, %s9259_s0 }
 0x6fc   :  { %v1398_v18 = vpop.f32.mrb[44].mxu1 }
 0x6fd   :  { %v8116_v42 = vpop.f32.mrb[45].mxu1 }
 0x6fe   :  { %v1401_v34 = vpop.f32.mrb[46].mxu1 }
 0x6ff   :  { %v8537_v27 = vpack.i.bf16 %v1401_v34, %v1398_v18  ;;  %v8117_v46 = vpop.f32.mrb[47].mxu1 }
 0x701   :  { %8538 = vrot.lane.b32.xlu1 %v8537_v27, %s9257_s28 }
 0x704   :  { %v10173_v13 = vpop.f32.mrb[48].mxu1 }
 0x705   :  { %v8128_v61 = vpop.f32.mrb[49].mxu1 }
 0x706   :  { %v10175_v50 = vpop.f32.mrb[50].mxu1 }
 0x707   :  { %v8129_v22 = vpop.f32.mrb[51].mxu1 }
 0x70c   :  { %v1673_v33 = vpop.f32.mrb[52].mxu1 }
 0x70d   :  { %v8140_v11 = vpop.f32.mrb[53].mxu1 }
 0x70e   :  { %v1676_v43 = vpop.f32.mrb[54].mxu1 }
 0x70f   :  { %v8542_v12 = vpack.i.bf16 %v1676_v43, %v1673_v33  ;;  %v8141_v38 = vpop.f32.mrb[55].mxu1 }
 0x711   :  { %8543 = vrot.lane.b32.xlu0 %v8542_v12, %s12191_s30 }
 0x714   :  { %v1796_v3 = vpop.f32.mrb[56].mxu1 }
 0x715   :  { %v8152_v55 = vpop.f32.mrb[57].mxu1 }
 0x716   :  { %v1799_v54 = vpop.f32.mrb[58].mxu1 }
 0x717   :  { %v8547_v51 = vpack.i.bf16 %v1799_v54, %v1796_v3  ;;  %v8153_v62 = vpop.f32.mrb[59].mxu1 }
 0x719   :  { %8548 = vrot.lane.b32.xlu1 %v8547_v51, %s9259_s0 }
 0x71c   :  { %v1919_v15 = vpop.f32.mrb[60].mxu1 }
 0x71d   :  { %v8164_v47 = vpop.f32.mrb[61].mxu1 }
 0x71e   :  { %v1922_v24 = vpop.f32.mrb[62].mxu1 }
 0x71f   :  { %v8552_v45 = vpack.i.bf16 %v1922_v24, %v1919_v15  ;;  %v8165_v9 = vpop.f32.mrb[63].mxu1 }
 0x721   :  { %8553 = vrot.lane.b32.xlu1 %v8552_v45, %s9257_s28 }
 0x724   :  { %v10180_v20 = vpop.f32.mrb[64].mxu1 }
 0x725   :  { %v8176_v25 = vpop.f32.mrb[65].mxu1 }
 0x726   :  { %v10182_v2 = vpop.f32.mrb[66].mxu1 }
 0x727   :  { %v8177_v53 = vpop.f32.mrb[67].mxu1 }
 0x736   :  { %v2194_v56 = vpop.f32.mrb[68].mxu1 }
 0x737   :  { %v8188_v52 = vpop.f32.mrb[69].mxu1 }
 0x738   :  { %v2197_v30 = vpop.f32.mrb[70].mxu1 }
 0x739   :  { %v8557_v23 = vpack.i.bf16 %v2197_v30, %v2194_v56  ;;  %v8189_v21 = vpop.f32.mrb[71].mxu1 }
 0x73b   :  { %8558 = vrot.lane.b32.xlu0 %v8557_v23, %s12191_s30 }
 0x73e   :  { %v2317_v6 = vpop.f32.mrb[72].mxu1 }
 0x73f   :  { %v8200_v35 = vpop.f32.mrb[73].mxu1 }
 0x740   :  { %v2320_v60 = vpop.f32.mrb[74].mxu1 }
 0x741   :  { %v8562_v31 = vpack.i.bf16 %v2320_v60, %v2317_v6  ;;  %v8201_v10 = vpop.f32.mrb[75].mxu1 }
 0x743   :  { %8563 = vrot.lane.b32.xlu0 %v8562_v31, %s9259_s0  ;;  %v8514_v8 = vpop.permute.xlu1 %8513 }
 0x744   :  { %v8516_v16 = vunpack.i.h.bf16 %v8514_v8  ;;  %v8515_v32 = vunpack.i.l.bf16 %v8514_v8 }
 0x746   :  { %v2440_v19 = vpop.f32.mrb[76].mxu1  ;;  %v907_v17 = vsel %vm391_vm1, %v12227_v39, %v8516_v16  ;;  %v906_v63 = vsel %vm391_vm1, %v12228_v40, %v8515_v32 }
 0x747   :  { %v8212_v4 = vpop.f32.mrb[77].mxu1 }
 0x748   :  { %v2443_v37 = vpop.f32.mrb[78].mxu1 }
 0x749   :  { %v8567_v41 = vpack.i.bf16 %v2443_v37, %v2440_v19  ;;  %v8213_v14 = vpop.f32.mrb[79].mxu1 }
 0x74b   :  { %8568 = vrot.lane.b32.xlu1 %v8567_v41, %s9257_s28  ;;  %v8519_v36 = vpop.permute.xlu0 %8518 }
 0x74c   :  { %v8521_v59 = vunpack.i.h.bf16 %v8519_v36  ;;  %v8520_v58 = vunpack.i.l.bf16 %v8519_v36 }
 0x74e   :  { %v909_v44 = vsel %vm908_vm3, %v906_v63, %v8520_v58  ;;  %v910_v7 = vsel %vm908_vm3, %v907_v17, %v8521_v59  ;;  %v8679_v17 = vld [vmem:[%s12166_s7 + $0x14] ss:$8 sps:$4 sm:$0xff]   ;;  %v8677_v63 = vld [vmem:[%s12166_s7 + $0x10] ss:$8 sps:$4 sm:$0xff]  }
 0x753   :  { %v8524_v48 = vpop.permute.xlu0 %8523 }
 0x754   :  { %v8526_v28 = vunpack.i.h.bf16 %v8524_v48  ;;  %v8525_v49 = vunpack.i.l.bf16 %v8524_v48  ;;  %v8676_v48 = vld [vmem:[%s12166_s7 + $0x4] ss:$8 sps:$4 sm:$0xff]  }
 0x755   :  { %2815 = vmatprep.subr.bf16.mxu1 %v8676_v48 }
 0x756   :  { %v912_v29 = vsel %vm911_vm4, %v909_v44, %v8525_v49  ;;  %v913_v5 = vsel %vm911_vm4, %v910_v7, %v8526_v28 }
 0x757   :  { %v2477_v18 = vpack.c.bf16 %v913_v5, %v912_v29  ;;  %v8682_v5 = vld [vmem:[%s12166_s7 + $0x24] ss:$8 sps:$4 sm:$0xff]  }
 0x759   :  { %8230 = vmatprep.mubr.bf16.mxu0 %v2477_v18  ;;  %v8680_v18 = vld [vmem:[%s12166_s7 + $0x20] ss:$8 sps:$4 sm:$0xff]  }
 0x763   :  { %v8529_v42 = vpop.permute.xlu0 %8528 }
 0x764   :  { %v8531_v27 = vunpack.i.h.bf16 %v8529_v42  ;;  %v8530_v46 = vunpack.i.l.bf16 %v8529_v42  ;;  %v9198_v42 = vld [vmem:[%s12218_s20] sm:$0xff] }
 0x766   :  { %v1430_v11 = vsel %vm391_vm1, %v10156_v1, %v8531_v27  ;;  %v1429_v43 = vsel %vm391_vm1, %v10151_v26, %v8530_v46  ;;  %v9199_v46 = vld [vmem:[%s12218_s20 + $0x8] sm:$0xff] }
 0x76b   :  { %v8534_v34 = vpop.permute.xlu0 %8533 }
 0x76c   :  { %v8536_v61 = vunpack.i.h.bf16 %v8534_v34  ;;  %v8535_v22 = vunpack.i.l.bf16 %v8534_v34 }
 0x76e   :  { %v1432_v3 = vsel %vm908_vm3, %v1430_v11, %v8536_v61  ;;  %v1431_v55 = vsel %vm908_vm3, %v1429_v43, %v8535_v22  ;;  %v9200_v22 = vld [vmem:[%s12218_s20 + $0x10] sm:$0xff] }
 0x76f   :  { %v8685_v43 = vld [vmem:[%s12166_s7 + $0x34] ss:$8 sps:$4 sm:$0xff]  }
 0x773   :  { %v8539_v33 = vpop.permute.xlu1 %8538 }
 0x774   :  { %v8541_v12 = vunpack.i.h.bf16 %v8539_v33  ;;  %v8540_v38 = vunpack.i.l.bf16 %v8539_v33 }
 0x776   :  { %v1434_v54 = vsel %vm911_vm4, %v1432_v3, %v8541_v12  ;;  %v1433_v51 = vsel %vm911_vm4, %v1431_v55, %v8540_v38  ;;  %v8683_v12 = vld [vmem:[%s12166_s7 + $0x30] ss:$8 sps:$4 sm:$0xff]  }
 0x777   :  { %v2478_v62 = vpack.c.bf16 %v1434_v54, %v1433_v51  ;;  %v9201_v38 = vld [vmem:[%s12218_s20 + $0x18] sm:$0xff]  ;;  %v8688_v51 = vld [vmem:[%s12166_s7 + $0x44] ss:$8 sps:$4 sm:$0xff]  }
 0x779   :  { %8231 = vmatmul.mubr.bf16.vlgmr.msra.gmra.mrb[72].mxu0 %v2478_v62  ;;  %v8686_v62 = vld [vmem:[%s12166_s7 + $0x40] ss:$8 sps:$4 sm:$0xff]  }
 0x783   :  { %v8544_v15 = vpop.permute.xlu0 %8543 }
 0x784   :  { %v8546_v24 = vunpack.i.h.bf16 %v8544_v15  ;;  %v8545_v45 = vunpack.i.l.bf16 %v8544_v15  ;;  %v8691_v15 = vld [vmem:[%s12166_s7 + $0x54] ss:$8 sps:$4 sm:$0xff]  }
 0x786   :  { %v1951_v26 = vsel %vm391_vm1, %v10175_v50, %v8546_v24  ;;  %v1950_v53 = vsel %vm391_vm1, %v10173_v13, %v8545_v45  ;;  %v8694_v24 = vld [vmem:[%s12166_s7 + $0x64] ss:$8 sps:$4 sm:$0xff]   ;;  %v8692_v45 = vld [vmem:[%s12166_s7 + $0x60] ss:$8 sps:$4 sm:$0xff]  }
 0x78b   :  { %v8549_v47 = vpop.permute.xlu1 %8548 }
 0x78c   :  { %v8551_v1 = vunpack.i.h.bf16 %v8549_v47  ;;  %v8550_v9 = vunpack.i.l.bf16 %v8549_v47  ;;  %v8689_v47 = vld [vmem:[%s12166_s7 + $0x50] ss:$8 sps:$4 sm:$0xff]  }
 0x78e   :  { %v1952_v30 = vsel %vm908_vm3, %v1950_v53, %v8550_v9  ;;  %v1953_v23 = vsel %vm908_vm3, %v1951_v26, %v8551_v1  ;;  %v8695_v1 = vld [vmem:[%s12166_s7 + $0x70] ss:$8 sps:$4 sm:$0xff]   ;;  %v8697_v9 = vld [vmem:[%s12166_s7 + $0x74] ss:$8 sps:$4 sm:$0xff]  }
 0x793   :  { %v8554_v25 = vpop.permute.xlu1 %8553 }
 0x794   :  { %v8556_v56 = vunpack.i.h.bf16 %v8554_v25  ;;  %v8555_v52 = vunpack.i.l.bf16 %v8554_v25 }
 0x796   :  { %v1954_v21 = vsel %vm911_vm4, %v1952_v30, %v8555_v52  ;;  %v1955_v6 = vsel %vm911_vm4, %v1953_v23, %v8556_v56  ;;  %v9202_v23 = vld [vmem:[%s12218_s20 + $0x20] sm:$0xff] }
 0x797   :  { %v2479_v35 = vpack.c.bf16 %v1955_v6, %v1954_v21 }
 0x799   :  { %8234 = vmatprep.mubr.bf16.mxu0 %v2479_v35 }
 0x7ad   :  { %v8559_v60 = vpop.permute.xlu0 %8558 }
 0x7ae   :  { %v8561_v10 = vunpack.i.h.bf16 %v8559_v60  ;;  %v8560_v19 = vunpack.i.l.bf16 %v8559_v60 }
 0x7b0   :  { %v2472_v13 = vsel %vm391_vm1, %v10182_v2, %v8561_v10  ;;  %v2471_v41 = vsel %vm391_vm1, %v10180_v20, %v8560_v19  ;;  %v8674_v20 = vld [vmem:[%s12166_s7] ss:$8 sps:$4 sm:$0xff]   ;;  %v9204_v19 = vld [vmem:[%s12218_s20 + $0x30] sm:$0xff] }
 0x7b1   :  { %v7473_v2 = vld [vmem:[%s12163_s4] ss:$0 sm:$0xff]  ;;  %2816 = vmatpush1.bf16.msra.mxu1 %v8674_v20 }
 0x7b2   :  { %2817 = vmatprep.subr.bf16.mxu1 %v8679_v17 }
 0x7b5   :  { %v8564_v31 = vpop.permute.xlu0 %8563  ;;  %2818 = vmatpush1.bf16.msra.mxu1 %v8677_v63 }
 0x7b6   :  { %v8566_v50 = vunpack.i.h.bf16 %v8564_v31  ;;  %v8565_v4 = vunpack.i.l.bf16 %v8564_v31  ;;  %2819 = vmatprep.subr.bf16.mxu1 %v8682_v5  ;;  %v9203_v31 = vld [vmem:[%s12218_s20 + $0x28] sm:$0xff] }
 0x7b8   :  { %v2473_v36 = vsel %vm908_vm3, %v2471_v41, %v8565_v4  ;;  %v2474_v16 = vsel %vm908_vm3, %v2472_v13, %v8566_v50 }
 0x7b9   :  { %2820 = vmatpush1.bf16.msra.mxu1 %v8680_v18 }
 0x7ba   :  { %2821 = vmatprep.subr.bf16.mxu1 %v8685_v43 }
 0x7bd   :  { %v8569_v37 = vpop.permute.xlu1 %8568  ;;  %2822 = vmatpush1.bf16.msra.mxu1 %v8683_v12 }
 0x7be   :  { %v8571_v14 = vunpack.i.h.bf16 %v8569_v37  ;;  %v8570_v8 = vunpack.i.l.bf16 %v8569_v37  ;;  %2823 = vmatprep.subr.bf16.mxu1 %v8688_v51  ;;  %v9205_v37 = vld [vmem:[%s12218_s20 + $0x38] sm:$0xff] }
 0x7c0   :  { %v2475_v32 = vsel %vm911_vm4, %v2473_v36, %v8570_v8  ;;  %v2476_v59 = vsel %vm911_vm4, %v2474_v16, %v8571_v14 }
 0x7c1   :  { %v2480_v58 = vpack.c.bf16 %v2476_v59, %v2475_v32  ;;  %2824 = vmatpush1.bf16.msra.mxu1 %v8686_v62 }
 0x7c2   :  { %2825 = vmatprep.subr.bf16.mxu1 %v8691_v15 }
 0x7c3   :  { %8235 = vmatmul.mubr.bf16.gmra.mrb[76].mxu0 %v2480_v58 }
 0x7c5   :  { %2826 = vmatpush1.bf16.msra.mxu1 %v8689_v47 }
 0x7c6   :  { %2827 = vmatprep.subr.bf16.mxu1 %v8694_v24  ;;  %v2625_v24 = vld [vmem:[%s12164_s5] sm:$0x1] }
 0x7c9   :  { %2828 = vmatpush1.bf16.msra.mxu1 %v8692_v45 }
 0x7ca   :  { %2829 = vmatprep.subr.bf16.mxu1 %v8697_v9  ;;  %v12229_v9 = vld [vmem:[#allocation10_spill] sm:$0xff] }
 0x7cd   :  { %2830 = vmatpush1.bf16.msra.mxu1 %v8695_v1 }
 0x84c   :  { %v8232_v39 = vpop.f32.mrb[72].mxu0 }
 0x84d   :  { %v2586_v40 = vpop.f32.mrb[73].mxu0  ;;  %v2595_v7 = vadd.f32 %v8232_v39, %v7473_v2 }
 0x84e   :  { %v2587_v28 = vadd.f32 %v7473_v2, %v2586_v40  ;;  %v8233_v49 = vpop.f32.mrb[74].mxu0 }
 0x84f   :  { %v2589_v44 = vpop.f32.mrb[75].mxu0  ;;  %v2598_v27 = vadd.f32 %v8233_v49, %v7473_v2  ;;  %v2619_v33 = vadd.f32 %v9200_v22, %v2595_v7 }
 0x850   :  { %v2590_v29 = vadd.f32 %v7473_v2, %v2589_v44  ;;  %v2617_v34 = vadd.f32 %v9198_v42, %v2587_v28 }
 0x851   :  { %v2620_v3 = vadd.f32 %v9201_v38, %v2598_v27 }
 0x852   :  { %v2618_v61 = vadd.f32 %v9199_v46, %v2590_v29 }
 0x854   :  { %v2627_v11 = vadd.f32 %v2618_v61, %v2617_v34 }
 0x856   :  { %v2628_v55 = vadd.f32 %v2627_v11, %v2619_v33 }
 0x858   :  { %v2629_v54 = vadd.f32 %v2628_v55, %v2620_v3 }
 0x896   :  { %v8236_v25 = vpop.f32.mrb[76].mxu0 }
 0x897   :  { %v2602_v26 = vpop.f32.mrb[77].mxu0  ;;  %v2611_v30 = vadd.f32 %v8236_v25, %v7473_v2 }
 0x898   :  { %v2603_v53 = vadd.f32 %v7473_v2, %v2602_v26  ;;  %v8237_v56 = vpop.f32.mrb[78].mxu0  ;;  %v7482_v26 = vld [vmem:[%s12165_s6] ss:$0 sm:$0xff] }
 0x899   :  { %v2605_v52 = vpop.f32.mrb[79].mxu0  ;;  %v2614_v60 = vadd.f32 %v8237_v56, %v7473_v2  ;;  %v2623_v50 = vadd.f32 %v9204_v19, %v2611_v30 }
 0x89a   :  { %v2621_v21 = vadd.f32 %v9202_v23, %v2603_v53  ;;  %v2606_v6 = vadd.f32 %v7473_v2, %v2605_v52 }
 0x89b   :  { %v2624_v13 = vadd.f32 %v9205_v37, %v2614_v60 }
 0x89c   :  { %v2630_v35 = vadd.f32 %v2629_v54, %v2621_v21  ;;  %v2622_v10 = vadd.f32 %v9203_v31, %v2606_v6 }
 0x89e   :  { %v2631_v4 = vadd.f32 %v2630_v35, %v2622_v10 }
 0x8a0   :  { %v2632_v41 = vadd.f32 %v2631_v4, %v2623_v50 }
 0x8a2   :  { %v2633_v14 = vadd.f32 %v2632_v41, %v2624_v13 }
 0x8a4   :  { %v2634_v8 = vrot.slane %v2633_v14, 4 }
 0x8a6   :  { %v2635_v36 = vadd.f32 %v2634_v8, %v2633_v14 }
 0x8a8   :  { %v2636_v16 = vrot.slane %v2635_v36, 2 }
 0x8aa   :  { %v2637_v32 = vadd.f32 %v2636_v16, %v2635_v36  ;;  %v8698_v16 = vld [vmem:[%s12168_s9 + $0x40] sm:$0xff]  }
 0x8ab   :  { %7818 = vmatprep.subr.bf16.mxu0 %v8698_v16 }
 0x8ac   :  { %v2638_v59 = vrot.slane %v2637_v32, 1 }
 0x8ae   :  { %v2639_v58 = vadd.f32 %v2638_v59, %v2637_v32  ;;  %v8699_v32 = vld [vmem:[%s12168_s9] sm:$0xff]   ;;  %v8700_v59 = vld [vmem:[%s12168_s9 + $0x48] sm:$0xff]  }
 0x8af   :  { %7819 = vmatpush3.bf16.msra.mxu0 %v8699_v32 }
 0x8b0   :  { %v2641_v48 = vmul.f32 0.015625, %v2639_v58  ;;  %v8701_v58 = vld [vmem:[%s12168_s9 + $0x8] sm:$0xff]   ;;  %7820 = vmatprep.subr.bf16.mxu0 %v8700_v59 }
 0x8b2   :  { %v2642_v20 = vsub.f32 %v2617_v34, %v2641_v48  ;;  %v2643_v2 = vsub.f32 %v2618_v61, %v2641_v48  ;;  %v2644_v39 = vsub.f32 %v2619_v33, %v2641_v48  ;;  %v2645_v17 = vsub.f32 %v2620_v3, %v2641_v48 }
 0x8b3   :  { %v2646_v40 = vsub.f32 %v2621_v21, %v2641_v48  ;;  %v2647_v63 = vsub.f32 %v2622_v10, %v2641_v48  ;;  %v2648_v28 = vsub.f32 %v2623_v50, %v2641_v48  ;;  %v2649_v49 = vsub.f32 %v2624_v13, %v2641_v48  ;;  %7821 = vmatpush3.bf16.msra.mxu0 %v8701_v58  ;;  %v8702_v48 = vld [vmem:[%s12168_s9 + $0x50] sm:$0xff]  }
 0x8b4   :  { %v2650_v44 = vmul.f32 %v2642_v20, %v2642_v20  ;;  %v2651_v7 = vmul.f32 %v2643_v2, %v2643_v2  ;;  %v2652_v29 = vmul.f32 %v2644_v39, %v2644_v39  ;;  %v2653_v18 = vmul.f32 %v2645_v17, %v2645_v17  ;;  %7822 = vmatprep.subr.bf16.mxu0 %v8702_v48 }
 0x8b5   :  { %v2654_v27 = vmul.f32 %v2646_v40, %v2646_v40  ;;  %v2655_v22 = vmul.f32 %v2647_v63, %v2647_v63  ;;  %v2656_v43 = vmul.f32 %v2648_v28, %v2648_v28  ;;  %v2657_v34 = vmul.f32 %v2649_v49, %v2649_v49 }
 0x8b6   :  { %v2658_v5 = vadd.f32 %v2651_v7, %v2650_v44  ;;  %v8711_v44 = vld [vmem:[%s12168_s9 + $0x30] sm:$0xff]   ;;  %v8712_v7 = vld [vmem:[%s12168_s9 + $0x78] sm:$0xff]  }
 0x8b8   :  { %v2659_v42 = vadd.f32 %v2658_v5, %v2652_v29  ;;  %v8713_v29 = vld [vmem:[%s12168_s9 + $0x38] sm:$0xff]   ;;  %v2723_v5 = vld [vmem:[%s12167_s8] sm:$0x3] }
 0x8ba   :  { %v2660_v46 = vadd.f32 %v2659_v42, %v2653_v18  ;;  %v10381_v18 = vrot.slane %v2723_v5, %v12229_v9  ;;  %v12238_v42 = vld [vmem:[#allocation11_spill] sm:$0xff] }
 0x8bc   :  { %v2661_v11 = vadd.f32 %v2660_v46, %v2654_v27  ;;  %v10384_v27 = vrot.slane %v2723_v5, %v12238_v42 }
 0x8be   :  { %v2662_v12 = vadd.f32 %v2661_v11, %v2655_v22 }
 0x8c0   :  { %v2663_v61 = vadd.f32 %v2662_v12, %v2656_v43 }
 0x8c2   :  { %v2664_v33 = vadd.f32 %v2663_v61, %v2657_v34 }
 0x8c4   :  { %v2665_v38 = vrot.slane %v2664_v33, 4 }
 0x8c6   :  { %v2666_v3 = vadd.f32 %v2665_v38, %v2664_v33 }
 0x8c8   :  { %v2667_v55 = vrot.slane %v2666_v3, 2 }
 0x8ca   :  { %v2668_v54 = vadd.f32 %v2667_v55, %v2666_v3 }
 0x8cc   :  { %v2669_v51 = vrot.slane %v2668_v54, 1 }
 0x8ce   :  { %v2670_v62 = vadd.f32 %v2669_v51, %v2668_v54 }
 0x8d0   :  { %v2671_v15 = vmul.f32 0.015625, %v2670_v62 }
 0x8d2   :  { %v2672_v47 = vadd.f32 1e-05, %v2671_v15 }
 0x8d4   :  { %8930 = vrsqrt.f32 %v2672_v47 }
 0x8de   :  { %v8931_v45 = vpop.eup %8930 }
 0x8df   :  { %v2674_v1 = vmul.f32 %v8931_v45, %v2625_v24 }
 0x8e1   :  { %v2679_v25 = vrot.slane %v2674_v1, %v12229_v9 }
 0x8e3   :  { %v2686_v53 = vmul.f32 %v2679_v25, %v2647_v63  ;;  %v2681_v56 = vmul.f32 %v2679_v25, %v2642_v20  ;;  %v2682_v52 = vmul.f32 %v2679_v25, %v2643_v2  ;;  %v2683_v30 = vmul.f32 %v2679_v25, %v2644_v39  ;;  %v8703_v20 = vld [vmem:[%s12168_s9 + $0x10] sm:$0xff]   ;;  %v8704_v2 = vld [vmem:[%s12168_s9 + $0x58] sm:$0xff]   ;;  %v8708_v63 = vld [vmem:[%s12168_s9 + $0x68] sm:$0xff]  }
 0x8e4   :  { %v2684_v23 = vmul.f32 %v2679_v25, %v2645_v17  ;;  %v2685_v21 = vmul.f32 %v2679_v25, %v2646_v40  ;;  %v2687_v6 = vmul.f32 %v2679_v25, %v2648_v28  ;;  %v2688_v35 = vmul.f32 %v2679_v25, %v2649_v49  ;;  %7823 = vmatpush3.bf16.msra.mxu0 %v8703_v20  ;;  %v8705_v39 = vld [vmem:[%s12168_s9 + $0x18] sm:$0xff]   ;;  %v8706_v17 = vld [vmem:[%s12168_s9 + $0x60] sm:$0xff]   ;;  %v8709_v28 = vld [vmem:[%s12168_s9 + $0x28] sm:$0xff]  }
 0x8e5   :  { %v10301_v60 = vadd.f32 %v7482_v26, %v2681_v56  ;;  %v10303_v31 = vadd.f32 %v7482_v26, %v2682_v52  ;;  %v10308_v19 = vadd.f32 %v7482_v26, %v2683_v30  ;;  %v10317_v13 = vadd.f32 %v7482_v26, %v2686_v53  ;;  %7824 = vmatprep.subr.bf16.mxu0 %v8704_v2  ;;  %v8707_v40 = vld [vmem:[%s12168_s9 + $0x20] sm:$0xff]   ;;  %v8710_v49 = vld [vmem:[%s12168_s9 + $0x70] sm:$0xff]  }
 0x8e6   :  { %v10310_v50 = vadd.f32 %v7482_v26, %v2684_v23  ;;  %v10315_v37 = vadd.f32 %v7482_v26, %v2685_v21  ;;  %v10322_v14 = vadd.f32 %v7482_v26, %v2687_v6  ;;  %v10324_v8 = vadd.f32 %v7482_v26, %v2688_v35 }
 0x8e7   :  { %12230 = vst [vmem:[#allocation13_spill] sm:$0xff] %v10301_v60  ;;  %12231 = vst [vmem:[#allocation12_spill] sm:$0xff] %v10303_v31  ;;  %v2703_v10 = vpack.c.bf16 %v10303_v31, %v10301_v60 }
 0x8e8   :  { %12232 = vst [vmem:[#allocation14_spill] sm:$0xff] %v10308_v19  ;;  %12233 = vst [vmem:[#allocation15_spill] sm:$0xff] %v10310_v50  ;;  %v2704_v4 = vpack.c.bf16 %v10310_v50, %v10308_v19  ;;  %v2705_v41 = vpack.c.bf16 %v10317_v13, %v10315_v37  ;;  %v2706_v36 = vpack.c.bf16 %v10324_v8, %v10322_v14  ;;  %7825 = vmatpush3.bf16.msra.mxu0 %v8705_v39 }
 0x8e9   :  { %2848 = vmatmul.mubr.bf16.vlgmr.msra.gmra.mrb[80].mxu1 %v2703_v10  ;;  %12234 = vst [vmem:[#allocation16_spill] sm:$0xff] %v10315_v37  ;;  %12235 = vst [vmem:[#allocation17_spill] sm:$0xff] %v10317_v13  ;;  %7826 = vmatprep.subr.bf16.mxu0 %v8706_v17 }
 0x8ea   :  { %2857 = vmatprep.mubr.bf16.mxu1 %v12226_v0  ;;  %12236 = vst [vmem:[#allocation18_spill] sm:$0xff] %v10322_v14  ;;  %12237 = vst [vmem:[#allocation19_spill] sm:$0xff] %v10324_v8 }
 0x8ec   :  { %7827 = vmatpush3.bf16.msra.mxu0 %v8707_v40 }
 0x8ed   :  { %7828 = vmatprep.subr.bf16.mxu0 %v8708_v63 }
 0x8f0   :  { %7829 = vmatpush3.bf16.msra.mxu0 %v8709_v28 }
 0x8f1   :  { %2858 = vmatmul.mubr.bf16.gmra.mrb[84].mxu1 %v2704_v4  ;;  %7830 = vmatprep.subr.bf16.mxu0 %v8710_v49 }
 0x8f2   :  { %2867 = vmatprep.mubr.bf16.mxu1 %v12226_v0 }
 0x8f4   :  { %7831 = vmatpush3.bf16.msra.mxu0 %v8711_v44 }
 0x8f5   :  { %7832 = vmatprep.subr.bf16.mxu0 %v8712_v7 }
 0x8f8   :  { %7833 = vmatpush3.bf16.msra.mxu0 %v8713_v29 }
 0x8f9   :  { %2868 = vmatmul.mubr.bf16.gmra.mrb[88].mxu1 %v2705_v41 }
 0x8fa   :  { %2877 = vmatprep.mubr.bf16.mxu1 %v12226_v0 }
 0x901   :  { %2878 = vmatmul.mubr.bf16.gmra.mrb[92].mxu1 %v2706_v36 }
 0x902   :  { %3828 = vmatprep.mubr.bf16.mxu1 %v12226_v0 }
 0x9bc   :  { %v2849_v46 = vpop.f32.mrb[80].mxu1 }
 0x9bd   :  { %v2850_v22 = vadd.f32 %v2849_v46, %v10381_v18  ;;  %v2851_v11 = vpop.f32.mrb[81].mxu1 }
 0x9be   :  { %v10388_v43 = vadd.f32 %v2851_v11, %v10384_v27  ;;  %v2853_v12 = vpop.f32.mrb[82].mxu1 }
 0x9bf   :  { %v10390_v34 = vmul.f32 0.70710677, %v2850_v22  ;;  %v2854_v61 = vadd.f32 %v2853_v12, %v10381_v18  ;;  %v2855_v33 = vpop.f32.mrb[83].mxu1  ;;  %v10444_v46 = vmul.f32 0.5, %v2850_v22 }
 0x9c0   :  { %v10394_v38 = vmul.f32 0.70710677, %v10388_v43  ;;  %v10397_v3 = vadd.f32 %v2855_v33, %v10384_v27 }
 0x9c1   :  { %v2920_v55 = vand.u32 2147483647, %v10390_v34  ;;  %v10400_v54 = vmul.f32 0.70710677, %v2854_v61  ;;  %vm3240_vm5 = vcmp.ge.f32.partialorder %v10390_v34, 0.0 }
 0x9c2   :  { %v2921_v51 = vand.u32 2147483647, %v10394_v38  ;;  %v10404_v62 = vmul.f32 0.70710677, %v10397_v3  ;;  %vm3241_vm7 = vcmp.ge.f32.partialorder %v10394_v38, 0.0 }
 0x9c3   :  { %v2936_v15 = vmul.f32 0.3275911, %v2920_v55  ;;  %v2922_v47 = vand.u32 2147483647, %v10400_v54  ;;  %v3144_v16 = vsub.f32 0.0, %v2920_v55  ;;  %vm3242_vm6 = vcmp.ge.f32.partialorder %v10400_v54, 0.0 }
 0x9c4   :  { %v2937_v24 = vmul.f32 0.3275911, %v2921_v51  ;;  %v2923_v45 = vand.u32 2147483647, %v10404_v62  ;;  %v2859_v26 = vpop.f32.mrb[84].mxu1  ;;  %v3145_v63 = vsub.f32 0.0, %v2921_v51 }
 0x9c5   :  { %v2952_v1 = vadd.f32 1.0, %v2936_v15  ;;  %v2938_v25 = vmul.f32 0.3275911, %v2922_v47  ;;  %v2861_v52 = vpop.f32.mrb[85].mxu1  ;;  %v10409_v35 = vadd.f32 %v2859_v26, %v10381_v18  ;;  %v3146_v2 = vsub.f32 0.0, %v2922_v47 }
 0x9c6   :  { %v2953_v53 = vadd.f32 1.0, %v2937_v24  ;;  %v2939_v56 = vmul.f32 0.3275911, %v2923_v45  ;;  %v2863_v23 = vpop.f32.mrb[86].mxu1  ;;  %v10412_v10 = vadd.f32 %v2861_v52, %v10384_v27  ;;  %v3160_v44 = vmul.f32 %v3144_v16, %v2920_v55 }
 0x9c7   :  { %8932 = vrcp.f32 %v2952_v1  ;;  %v2954_v30 = vadd.f32 1.0, %v2938_v25  ;;  %v2865_v21 = vpop.f32.mrb[87].mxu1  ;;  %v10415_v4 = vadd.f32 %v2863_v23, %v10381_v18  ;;  %v10418_v41 = vmul.f32 0.70710677, %v10409_v35 }
 0x9c8   :  { %8934 = vrcp.f32 %v2953_v53  ;;  %v2955_v6 = vadd.f32 1.0, %v2939_v56  ;;  %v10421_v36 = vadd.f32 %v2865_v21, %v10384_v27  ;;  %v10424_v32 = vmul.f32 0.70710677, %v10412_v10 }
 0x9c9   :  { %8936 = vrcp.f32 %v2954_v30  ;;  %v10427_v59 = vmul.f32 0.70710677, %v10415_v4  ;;  %v2924_v48 = vand.u32 2147483647, %v10418_v41  ;;  %v3147_v11 = vsub.f32 0.0, %v2923_v45 }
 0x9ca   :  { %8938 = vrcp.f32 %v2955_v6  ;;  %v2925_v39 = vand.u32 2147483647, %v10424_v32  ;;  %v10439_v49 = vmul.f32 0.70710677, %v10421_v36  ;;  %v10454_v25 = vmul.f32 0.5, %v2854_v61 }
 0x9cb   :  { %v10434_v17 = vand.u32 2147483647, %v10427_v59  ;;  %v2940_v28 = vmul.f32 0.3275911, %v2924_v48  ;;  %v3162_v55 = vmul.f32 %v3146_v2, %v2922_v47  ;;  %v3161_v56 = vmul.f32 %v3145_v63, %v2921_v51 }
 0x9cc   :  { %v2869_v58 = vpop.f32.mrb[88].mxu1  ;;  %v2941_v7 = vmul.f32 0.3275911, %v2925_v39  ;;  %v10447_v33 = vand.u32 2147483647, %v10439_v49  ;;  %v3163_v16 = vmul.f32 %v3147_v11, %v2923_v45  ;;  %v3149_v42 = vsub.f32 0.0, %v2925_v39 }
 0x9cd   :  { %v10430_v20 = vpop.f32.mrb[89].mxu1  ;;  %v2942_v29 = vmul.f32 0.3275911, %v10434_v17  ;;  %v2956_v12 = vadd.f32 1.0, %v2940_v28  ;;  %v3176_v30 = vmul.f32 1.442695, %v3160_v44  ;;  %v10471_v45 = vadd.f32 %v2869_v58, %v10381_v18 }
 0x9ce   :  { %v10436_v40 = vpop.f32.mrb[90].mxu1  ;;  %v2957_v26 = vadd.f32 1.0, %v2941_v7  ;;  %v2943_v23 = vmul.f32 0.3275911, %v10447_v33  ;;  %v3148_v28 = vsub.f32 0.0, %v2924_v48  ;;  %vm3243_vm8 = vcmp.ge.f32.partialorder %v10404_v62, 0.0 }
 0x9cf   :  { %v10449_v15 = vpop.f32.mrb[91].mxu1  ;;  %8940 = vrcp.f32 %v2956_v12  ;;  %v2958_v22 = vadd.f32 1.0, %v2942_v29  ;;  %v3180_v51 = vmul.f32 1.442695, %v3162_v55  ;;  %v3150_v12 = vsub.f32 0.0, %v10434_v17 }
 0x9d0   :  { %8942 = vrcp.f32 %v2957_v26  ;;  %v2959_v63 = vadd.f32 1.0, %v2943_v23  ;;  %v3165_v23 = vmul.f32 %v3149_v42, %v2925_v39  ;;  %v10481_v58 = vmul.f32 0.70710677, %v10471_v45 }
 0x9d1   :  { %v10442_v5 = vpop.eup %8932  ;;  %8944 = vrcp.f32 %v2958_v22  ;;  %vm3244_vm9 = vcmp.ge.f32.partialorder %v10418_v41, 0.0  ;;  %vm3245_vm10 = vcmp.ge.f32.partialorder %v10424_v32, 0.0  ;;  %vm3246_vm11 = vcmp.ge.f32.partialorder %v10427_v59, 0.0 }
 0x9d2   :  { %v10451_v24 = vpop.eup %8934  ;;  %v3000_v1 = vmul.f32 1.0614054, %v10442_v5  ;;  %8946 = vpow2.f32 %v3176_v30  ;;  %v3178_v30 = vmul.f32 1.442695, %v3161_v56  ;;  %vm3247_vm12 = vcmp.ge.f32.partialorder %v10439_v49, 0.0 }
 0x9d3   :  { %v3001_v53 = vmul.f32 1.0614054, %v10451_v24  ;;  %v10458_v21 = vpop.eup %8936  ;;  %8948 = vrcp.f32 %v2959_v63  ;;  %vm3248_vm13 = vcmp.ge.f32.partialorder %v10481_v58, 0.0 }
 0x9d4   :  { %v3016_v52 = vadd.f32 -1.4531521, %v3000_v1  ;;  %v10460_v61 = vpop.f32.mrb[92].mxu1  ;;  %v3002_v2 = vmul.f32 1.0614054, %v10458_v21  ;;  %v10466_v44 = vpop.eup %8938  ;;  %8950 = vpow2.f32 %v3180_v51 }
 0x9d5   :  { %v3017_v6 = vadd.f32 -1.4531521, %v3001_v53  ;;  %v10464_v7 = vpop.f32.mrb[93].mxu1  ;;  %v3003_v55 = vmul.f32 1.0614054, %v10466_v44  ;;  %8952 = vpow2.f32 %v3178_v30  ;;  %v10593_v38 = vadd.f32 %v10460_v61, %v10381_v18 }
 0x9d6   :  { %v3032_v47 = vmul.f32 %v10442_v5, %v3016_v52  ;;  %v10473_v11 = vpop.f32.mrb[94].mxu1  ;;  %v3018_v26 = vadd.f32 -1.4531521, %v3002_v2  ;;  %v3164_v52 = vmul.f32 %v3148_v28, %v2924_v48  ;;  %v3182_v2 = vmul.f32 1.442695, %v3163_v16 }
 0x9d7   :  { %v3033_v29 = vmul.f32 %v10451_v24, %v3017_v6  ;;  %v10476_v0 = vpop.f32.mrb[95].mxu1  ;;  %v3019_v9 = vadd.f32 -1.4531521, %v3003_v55  ;;  %v10486_v48 = vand.u32 2147483647, %v10481_v58  ;;  %v10627_v41 = vadd.f32 %v10473_v11, %v10381_v18 }
 0x9d8   :  { %v3048_v1 = vadd.f32 1.4214138, %v3032_v47  ;;  %v3034_v6 = vmul.f32 %v10458_v21, %v3018_v26  ;;  %v3184_v63 = vmul.f32 1.442695, %v3164_v52  ;;  %v3166_v26 = vmul.f32 %v3150_v12, %v10434_v17 }
 0x9d9   :  { %v3049_v53 = vadd.f32 1.4214138, %v3033_v29  ;;  %v3035_v42 = vmul.f32 %v10466_v44, %v3019_v9  ;;  %v10488_v39 = vpop.eup %8940  ;;  %v2944_v52 = vmul.f32 0.3275911, %v10486_v48 }
 0x9da   :  { %v3064_v22 = vmul.f32 %v10442_v5, %v3048_v1  ;;  %v3050_v29 = vadd.f32 1.4214138, %v3034_v6  ;;  %v3186_v1 = vmul.f32 1.442695, %v3165_v23  ;;  %v10491_v55 = vpop.eup %8942  ;;  %v3151_v6 = vsub.f32 0.0, %v10447_v33 }
 0x9db   :  { %v3065_v47 = vmul.f32 %v10451_v24, %v3049_v53  ;;  %v3051_v51 = vadd.f32 1.4214138, %v3035_v42  ;;  %v3004_v53 = vmul.f32 1.0614054, %v10488_v39  ;;  %v10501_v14 = vpop.eup %8944  ;;  %v2960_v42 = vadd.f32 1.0, %v2944_v52 }
 0x9dc   :  { %v3080_v8 = vadd.f32 -0.28449672, %v3064_v22  ;;  %v3066_v16 = vmul.f32 %v10458_v21, %v3050_v29  ;;  %v3005_v22 = vmul.f32 1.0614054, %v10491_v55  ;;  %v3188_v29 = vmul.f32 1.442695, %v3166_v26 }
 0x9dd   :  { %v3081_v28 = vadd.f32 -0.28449672, %v3065_v47  ;;  %v3067_v17 = vmul.f32 %v10466_v44, %v3051_v51  ;;  %v3020_v12 = vadd.f32 -1.4531521, %v3004_v53  ;;  %v3006_v53 = vmul.f32 1.0614054, %v10501_v14 }
 0x9de   :  { %v3096_v56 = vmul.f32 %v10442_v5, %v3080_v8  ;;  %v3082_v47 = vadd.f32 -0.28449672, %v3066_v16  ;;  %v3021_v8 = vadd.f32 -1.4531521, %v3005_v22  ;;  %v3167_v19 = vmul.f32 %v3151_v6, %v10447_v33 }
 0x9df   :  { %v3097_v9 = vmul.f32 %v10451_v24, %v3081_v28  ;;  %v8947_v28 = vpop.eup %8946  ;;  %v3083_v50 = vadd.f32 -0.28449672, %v3067_v17  ;;  %8954 = vrcp.f32 %v2960_v42 }
 0x9e0   :  { %v3112_v23 = vadd.f32 0.2548296, %v3096_v56  ;;  %v3098_v37 = vmul.f32 %v10458_v21, %v3082_v47  ;;  %v3036_v56 = vmul.f32 %v10488_v39, %v3020_v12  ;;  %v10507_v16 = vpop.eup %8948  ;;  %v3037_v51 = vmul.f32 %v10491_v55, %v3021_v8 }
 0x9e1   :  { %v3113_v26 = vadd.f32 0.2548296, %v3097_v9  ;;  %v8951_v31 = vpop.eup %8950  ;;  %8956 = vpow2.f32 %v3182_v2  ;;  %v3007_v47 = vmul.f32 1.0614054, %v10507_v16  ;;  %v3099_v8 = vmul.f32 %v10466_v44, %v3083_v50 }
 0x9e2   :  { %v3128_v13 = vmul.f32 %v10442_v5, %v3112_v23  ;;  %v3114_v22 = vadd.f32 0.2548296, %v3098_v37  ;;  %v3052_v52 = vadd.f32 1.4214138, %v3036_v56  ;;  %v3053_v5 = vadd.f32 1.4214138, %v3037_v51 }
 0x9e3   :  { %v3022_v23 = vadd.f32 -1.4531521, %v3006_v53  ;;  %8958 = vpow2.f32 %v3186_v1  ;;  %v3023_v37 = vadd.f32 -1.4531521, %v3007_v47  ;;  %v3190_v42 = vmul.f32 1.442695, %v3167_v19 }
 0x9e4   :  { %v3208_v30 = vmul.f32 %v8947_v28, %v3128_v13  ;;  %v3130_v12 = vmul.f32 %v10458_v21, %v3114_v22  ;;  %v3068_v60 = vmul.f32 %v10488_v39, %v3052_v52  ;;  %v3069_v33 = vmul.f32 %v10491_v55, %v3053_v5  ;;  %v8953_v22 = vpop.eup %8952 }
 0x9e5   :  { %v3038_v13 = vmul.f32 %v10501_v14, %v3022_v23  ;;  %v3129_v28 = vmul.f32 %v10451_v24, %v3113_v26  ;;  %v3039_v21 = vmul.f32 %v10507_v16, %v3023_v37  ;;  %8960 = vpow2.f32 %v3184_v63 }
 0x9e6   :  { %v3224_v17 = vsub.f32 1.0, %v3208_v30  ;;  %v3210_v6 = vmul.f32 %v8951_v31, %v3130_v12  ;;  %v3084_v2 = vadd.f32 -0.28449672, %v3068_v60  ;;  %v3085_v56 = vadd.f32 -0.28449672, %v3069_v33 }
 0x9e7   :  { %v3054_v51 = vadd.f32 1.4214138, %v3038_v13  ;;  %v3115_v30 = vadd.f32 0.2548296, %v3099_v8  ;;  %8962 = vpow2.f32 %v3188_v29  ;;  %v10528_v26 = vadd.f32 %v10430_v20, %v10384_v27 }
 0x9e8   :  { %v3256_v9 = vsub.f32 0.0, %v3224_v17  ;;  %v3226_v53 = vsub.f32 1.0, %v3210_v6  ;;  %v3100_v1 = vmul.f32 %v10488_v39, %v3084_v2  ;;  %v3101_v60 = vmul.f32 %v10491_v55, %v3085_v56 }
 0x9e9   :  { %v3070_v31 = vmul.f32 %v10501_v14, %v3054_v51  ;;  %v10530_v34 = vpop.eup %8954  ;;  %v3055_v23 = vadd.f32 1.4214138, %v3039_v21  ;;  %8964 = vpow2.f32 %v3190_v42  ;;  %v3209_v47 = vmul.f32 %v8953_v22, %v3129_v28 }
 0x9ea   :  { %v3272_v50 = vsel %vm3240_vm5, %v3224_v17, %v3256_v9  ;;  %v3258_v24 = vsub.f32 0.0, %v3226_v53  ;;  %v3117_v52 = vadd.f32 0.2548296, %v3101_v60  ;;  %v3131_v63 = vmul.f32 %v10466_v44, %v3115_v30 }
 0x9eb   :  { %v3288_v19 = vadd.f32 1.0, %v3272_v50  ;;  %v3086_v5 = vadd.f32 -0.28449672, %v3070_v31  ;;  %v3116_v17 = vadd.f32 0.2548296, %v3100_v1  ;;  %v8957_v12 = vpop.eup %8956  ;;  %v3071_v20 = vmul.f32 %v10507_v16, %v3055_v23 }
 0x9ec   :  { %v3274_v54 = vsel %vm3242_vm6, %v3226_v53, %v3258_v24  ;;  %v3133_v33 = vmul.f32 %v10491_v55, %v3117_v52  ;;  %v3008_v13 = vmul.f32 1.0614054, %v10530_v34  ;;  %v10538_v37 = vmul.f32 0.70710677, %v10528_v26 }
 0x9ed   :  { %v3290_v8 = vadd.f32 1.0, %v3274_v54  ;;  %v3102_v29 = vmul.f32 %v10501_v14, %v3086_v5  ;;  %v8959_v9 = vpop.eup %8958  ;;  %v10541_v6 = vmul.f32 %v3288_v19, %v10444_v46  ;;  %v3225_v42 = vsub.f32 1.0, %v3209_v47 }
 0x9ee   :  { %v3087_v28 = vadd.f32 -0.28449672, %v3071_v20  ;;  %v3024_v55 = vadd.f32 -1.4531521, %v3008_v13  ;;  %v3211_v51 = vmul.f32 %v8957_v12, %v3131_v63  ;;  %v3132_v21 = vmul.f32 %v10488_v39, %v3116_v17 }
 0x9ef   :  { %v10544_v44 = vmul.f32 %v3290_v8, %v10454_v25  ;;  %v3118_v2 = vadd.f32 0.2548296, %v3102_v29  ;;  %v3213_v50 = vmul.f32 %v8959_v9, %v3133_v33  ;;  %v2929_v25 = vand.u32 2147483647, %v10538_v37  ;;  %v8961_v1 = vpop.eup %8960 }
 0x9f0   :  { %v3103_v30 = vmul.f32 %v10507_v16, %v3087_v28  ;;  %v3040_v46 = vmul.f32 %v10530_v34, %v3024_v55  ;;  %v2889_v22 = vmul.f32 0.5, %v10388_v43  ;;  %v10556_v60 = vmul.f32 0.5, %v10397_v3 }
 0x9f1   :  { %v3320_v56 = vpack.c.bf16 %v10544_v44, %v10541_v6  ;;  %v3134_v53 = vmul.f32 %v10501_v14, %v3118_v2  ;;  %v10560_v39 = vadd.f32 %v10436_v40, %v10381_v18  ;;  %v8963_v31 = vpop.eup %8962  ;;  %v3152_v19 = vsub.f32 0.0, %v10486_v48 }
 0x9f2   :  { %v3119_v14 = vadd.f32 0.2548296, %v3103_v30  ;;  %v2945_v24 = vmul.f32 0.3275911, %v2929_v25  ;;  %v3257_v5 = vsub.f32 0.0, %v3225_v42  ;;  %v3227_v23 = vsub.f32 1.0, %v3211_v51 }
 0x9f3   :  { %v8965_v52 = vpop.eup %8964  ;;  %v3212_v43 = vmul.f32 %v8961_v1, %v3132_v21  ;;  %v3056_v47 = vadd.f32 1.4214138, %v3040_v46  ;;  %v3229_v54 = vsub.f32 1.0, %v3213_v50  ;;  %v3214_v63 = vmul.f32 %v8963_v31, %v3134_v53 }
 0x9f4   :  { %v3135_v3 = vmul.f32 %v10507_v16, %v3119_v14  ;;  %v2961_v17 = vadd.f32 1.0, %v2945_v24  ;;  %v10566_v40 = vmul.f32 0.5, %v10409_v35  ;;  %v10569_v12 = vmul.f32 0.5, %v10412_v10 }
 0x9f5   :  { %v10572_v8 = vmul.f32 0.5, %v10415_v4  ;;  %v10575_v33 = vmul.f32 0.70710677, %v10560_v39  ;;  %v10578_v29 = vmul.f32 0.5, %v10421_v36  ;;  %v3168_v13 = vmul.f32 %v3152_v19, %v10486_v48 }
 0x9f6   :  { %v3215_v20 = vmul.f32 %v8965_v52, %v3135_v3  ;;  %8966 = vrcp.f32 %v2961_v17  ;;  %v3273_v35 = vsel %vm3241_vm7, %v3225_v42, %v3257_v5  ;;  %v3259_v16 = vsub.f32 0.0, %v3227_v23 }
 0x9f7   :  { %v3072_v10 = vmul.f32 %v10530_v34, %v3056_v47  ;;  %v2930_v4 = vand.u32 2147483647, %v10575_v33  ;;  %v3228_v9 = vsub.f32 1.0, %v3212_v43  ;;  %v3261_v2 = vsub.f32 0.0, %v3229_v54 }
 0x9f8   :  { %v3230_v28 = vsub.f32 1.0, %v3214_v63  ;;  %v10588_v36 = vadd.f32 %v10449_v15, %v10384_v27  ;;  %v3231_v48 = vsub.f32 1.0, %v3215_v20  ;;  %v3289_v42 = vadd.f32 1.0, %v3273_v35 }
 0x9f9   :  { %v2946_v55 = vmul.f32 0.3275911, %v2930_v4  ;;  %v3192_v51 = vmul.f32 1.442695, %v3168_v13  ;;  %v3153_v21 = vsub.f32 0.0, %v2929_v25  ;;  %v3275_v50 = vsel %vm3243_vm8, %v3227_v23, %v3259_v16 }
 0x9fa   :  { %v3088_v53 = vadd.f32 -0.28449672, %v3072_v10  ;;  %v10599_v15 = vmul.f32 0.70710677, %v10588_v36  ;;  %v3260_v32 = vsub.f32 0.0, %v3228_v9  ;;  %v3277_v46 = vsel %vm3245_vm10, %v3229_v54, %v3261_v2 }
 0x9fb   :  { %v2962_v30 = vadd.f32 1.0, %v2946_v55  ;;  %v3262_v1 = vsub.f32 0.0, %v3230_v28  ;;  %v10602_v31 = vmul.f32 0.70710677, %v10593_v38  ;;  %v3263_v61 = vsub.f32 0.0, %v3231_v48 }
 0x9fc   :  { %v2931_v14 = vand.u32 2147483647, %v10599_v15  ;;  %v10607_v19 = vadd.f32 %v10464_v7, %v10384_v27  ;;  %v3305_v62 = vmul.f32 %v3289_v42, %v2889_v22  ;;  %v3169_v24 = vmul.f32 %v3153_v21, %v2929_v25 }
 0x9fd   :  { %8968 = vrcp.f32 %v2962_v30  ;;  %v10611_v52 = vand.u32 2147483647, %v10602_v31  ;;  %v3291_v5 = vadd.f32 1.0, %v3275_v50  ;;  %v3104_v23 = vmul.f32 %v10530_v34, %v3088_v53 }
 0x9fe   :  { %8970 = vpow2.f32 %v3192_v51  ;;  %v2947_v43 = vmul.f32 0.3275911, %v2931_v14  ;;  %v3276_v54 = vsel %vm3244_vm9, %v3228_v9, %v3260_v32  ;;  %v3293_v63 = vadd.f32 1.0, %v3277_v46 }
 0x9ff   :  { %v3278_v7 = vsel %vm3246_vm11, %v3230_v28, %v3262_v1  ;;  %v2948_v49 = vmul.f32 0.3275911, %v10611_v52  ;;  %v3279_v25 = vsel %vm3247_vm12, %v3231_v48, %v3263_v61  ;;  %v10623_v17 = vmul.f32 0.70710677, %v10607_v19 }
 0xa00   :  { %v10614_v47 = vpop.eup %8966  ;;  %v2963_v3 = vadd.f32 1.0, %v2947_v43  ;;  %v3194_v20 = vmul.f32 1.442695, %v3169_v24  ;;  %v3154_v13 = vsub.f32 0.0, %v2930_v4  ;;  %v3120_v16 = vadd.f32 0.2548296, %v3104_v23 }
 0xa01   :  { %v3009_v22 = vmul.f32 1.0614054, %v10614_v47  ;;  %v2964_v35 = vadd.f32 1.0, %v2948_v49  ;;  %v10630_v59 = vand.u32 2147483647, %v10623_v17  ;;  %v3307_v9 = vmul.f32 %v3291_v5, %v10556_v60 }
 0xa02   :  { %8972 = vrcp.f32 %v2963_v3  ;;  %v3292_v2 = vadd.f32 1.0, %v3276_v54  ;;  %v3295_v28 = vadd.f32 1.0, %v3279_v25  ;;  %v3309_v48 = vmul.f32 %v3293_v63, %v10569_v12 }
 0xa03   :  { %v3025_v10 = vadd.f32 -1.4531521, %v3009_v22  ;;  %8974 = vrcp.f32 %v2964_v35  ;;  %v3155_v42 = vsub.f32 0.0, %v2931_v14  ;;  %v2949_v51 = vmul.f32 0.3275911, %v10630_v59 }
 0xa04   :  { %v3294_v18 = vadd.f32 1.0, %v3278_v7  ;;  %8976 = vpow2.f32 %v3194_v20  ;;  %v3170_v11 = vmul.f32 %v3154_v13, %v2930_v4  ;;  %v10637_v21 = vmul.f32 0.70710677, %v10627_v41 }
 0xa05   :  { %v3041_v55 = vmul.f32 %v10614_v47, %v3025_v10  ;;  %v3136_v60 = vmul.f32 %v10530_v34, %v3120_v16  ;;  %v2965_v30 = vadd.f32 1.0, %v2949_v51  ;;  %v10644_v12 = vadd.f32 %v10476_v0, %v10384_v27 }
 0xa06   :  { %v3311_v32 = vmul.f32 %v3295_v28, %v10578_v29  ;;  %v3156_v1 = vsub.f32 0.0, %v10611_v52  ;;  %v10650_v4 = vand.u32 2147483647, %v10637_v21  ;;  %v3171_v5 = vmul.f32 %v3155_v42, %v2931_v14 }
 0xa07   :  { %v10639_v50 = vpop.eup %8968  ;;  %v3057_v53 = vadd.f32 1.4214138, %v3041_v55  ;;  %8978 = vrcp.f32 %v2965_v30  ;;  %v10654_v34 = vmul.f32 0.70710677, %v10644_v12  ;;  %v3310_v0 = vmul.f32 %v3294_v18, %v10572_v8 }
 0xa08   :  { %v3010_v46 = vmul.f32 1.0614054, %v10639_v50  ;;  %v8971_v61 = vpop.eup %8970  ;;  %v2950_v29 = vmul.f32 0.3275911, %v10650_v4  ;;  %v3321_v23 = vpack.c.bf16 %v3307_v9, %v3305_v62  ;;  %v3308_v43 = vmul.f32 %v3292_v2, %v10566_v40 }
 0xa09   :  { %v3073_v24 = vmul.f32 %v10614_v47, %v3057_v53  ;;  %v3196_v63 = vmul.f32 1.442695, %v3170_v11  ;;  %v10660_v7 = vand.u32 2147483647, %v10654_v34  ;;  %v10662_v49 = vmul.f32 %v8971_v61, %v3136_v60 }
 0xa0a   :  { %v3026_v27 = vadd.f32 -1.4531521, %v3010_v46  ;;  %v2966_v25 = vadd.f32 1.0, %v2950_v29  ;;  %3495 = vmatprep.mubr.bf16.mxu0 %v3321_v23  ;;  %v3323_v22 = vpack.c.bf16 %v3311_v32, %v3309_v48  ;;  %v3198_v20 = vmul.f32 1.442695, %v3171_v5 }
 0xa0b   :  { %v3089_v54 = vadd.f32 -0.28449672, %v3073_v24  ;;  %v3172_v62 = vmul.f32 %v3156_v1, %v10611_v52  ;;  %v2951_v40 = vmul.f32 0.3275911, %v10660_v7  ;;  %3496 = vmatmul.mubr.bf16.vlgmr.msra.gmra.mrb[80].mxu0 %v3320_v56  ;;  %v3322_v10 = vpack.c.bf16 %v3310_v0, %v3308_v43 }
 0xa0c   :  { %v3042_v14 = vmul.f32 %v10639_v50, %v3026_v27  ;;  %v10665_v3 = vpop.eup %8972  ;;  %8980 = vrcp.f32 %v2966_v25  ;;  %3503 = vmatprep.mubr.bf16.mxu0 %v3323_v22  ;;  %v3157_v52 = vsub.f32 0.0, %v10630_v59  ;;  %v3232_v44 = vsub.f32 1.0, %v10662_v49 }
 0xa0d   :  { %v3105_v8 = vmul.f32 %v10614_v47, %v3089_v54  ;;  %v10673_v13 = vpop.eup %8974  ;;  %v3011_v16 = vmul.f32 1.0614054, %v10665_v3  ;;  %8982 = vpow2.f32 %v3196_v63  ;;  %v2967_v6 = vadd.f32 1.0, %v2951_v40 }
 0xa0e   :  { %v3058_v35 = vadd.f32 1.4214138, %v3042_v14  ;;  %v3012_v2 = vmul.f32 1.0614054, %v10673_v13  ;;  %v8977_v28 = vpop.eup %8976  ;;  %v3200_v51 = vmul.f32 1.442695, %v3172_v62  ;;  %v3173_v46 = vmul.f32 %v3157_v52, %v10630_v59 }
 0xa0f   :  { %v3121_v9 = vadd.f32 0.2548296, %v3105_v8  ;;  %v3027_v55 = vadd.f32 -1.4531521, %v3011_v16  ;;  %v3158_v60 = vsub.f32 0.0, %v10650_v4  ;;  %8984 = vrcp.f32 %v2967_v6 }
 0xa10   :  { %v3074_v48 = vmul.f32 %v10639_v50, %v3058_v35  ;;  %v3028_v42 = vadd.f32 -1.4531521, %v3012_v2  ;;  %v10686_v30 = vmul.f32 0.5, %v10471_v45  ;;  %8986 = vpow2.f32 %v3198_v20 }
 0xa11   :  { %v3137_v56 = vmul.f32 %v10614_v47, %v3121_v9  ;;  %v3043_v11 = vmul.f32 %v10665_v3, %v3027_v55  ;;  %v10683_v53 = vpop.eup %8978  ;;  %v3264_v5 = vsub.f32 0.0, %v3232_v44  ;;  %8988 = vpow2.f32 %v3200_v51 }
 0xa12   :  { %v3090_v18 = vadd.f32 -0.28449672, %v3074_v48  ;;  %v3044_v32 = vmul.f32 %v10673_v13, %v3028_v42  ;;  %v3013_v24 = vmul.f32 1.0614054, %v10683_v53  ;;  %v3174_v23 = vmul.f32 %v3158_v60, %v10650_v4 }
 0xa13   :  { %v3217_v1 = vmul.f32 %v8977_v28, %v3137_v56  ;;  %v3059_v61 = vadd.f32 1.4214138, %v3043_v11  ;;  %3504 = vmatmul.mubr.bf16.gmra.mrb[84].mxu0 %v3322_v10  ;;  %vm3249_vm14 = vcmp.ge.f32.partialorder %v10538_v37, 0.0  ;;  %v2898_v59 = vmul.f32 0.5, %v10560_v39 }
 0xa14   :  { %v3106_v47 = vmul.f32 %v10639_v50, %v3090_v18  ;;  %v3060_v0 = vadd.f32 1.4214138, %v3044_v32  ;;  %v3029_v29 = vadd.f32 -1.4531521, %v3013_v24  ;;  %v3202_v54 = vmul.f32 1.442695, %v3173_v46 }
 0xa15   :  { %v3075_v45 = vmul.f32 %v10665_v3, %v3059_v61  ;;  %v3159_v63 = vsub.f32 0.0, %v10660_v7  ;;  %v3233_v14 = vsub.f32 1.0, %v3217_v1  ;;  %v3280_v4 = vsel %vm3248_vm13, %v3232_v44, %v3264_v5 }
 0xa16   :  { %v3122_v27 = vadd.f32 0.2548296, %v3106_v47  ;;  %v3076_v43 = vmul.f32 %v10673_v13, %v3060_v0  ;;  %v10699_v49 = vpop.eup %8980  ;;  %v3045_v8 = vmul.f32 %v10683_v53, %v3029_v29  ;;  %vm3250_vm15 = vcmp.ge.f32.partialorder %v10575_v33, 0.0 }
 0xa17   :  { %v3091_v22 = vadd.f32 -0.28449672, %v3075_v45  ;;  %v8983_v20 = vpop.eup %8982  ;;  %v3014_v62 = vmul.f32 1.0614054, %v10699_v49  ;;  %v3204_v10 = vmul.f32 1.442695, %v3174_v23  ;;  %8990 = vpow2.f32 %v3202_v54 }
 0xa18   :  { %v3138_v25 = vmul.f32 %v10639_v50, %v3122_v27  ;;  %v3092_v39 = vadd.f32 -0.28449672, %v3076_v43  ;;  %v3061_v16 = vadd.f32 1.4214138, %v3045_v8  ;;  %v3175_v2 = vmul.f32 %v3159_v63, %v10660_v7 }
 0xa19   :  { %v3107_v35 = vmul.f32 %v10665_v3, %v3091_v22  ;;  %v3030_v50 = vadd.f32 -1.4531521, %v3014_v62  ;;  %v10710_v52 = vpop.eup %8984  ;;  %v3265_v58 = vsub.f32 0.0, %v3233_v14  ;;  %v3296_v44 = vadd.f32 1.0, %v3280_v4 }
 0xa1a   :  { %v3218_v40 = vmul.f32 %v8983_v20, %v3138_v25  ;;  %v3108_v9 = vmul.f32 %v10673_v13, %v3092_v39  ;;  %v3077_v55 = vmul.f32 %v10683_v53, %v3061_v16  ;;  %v8987_v6 = vpop.eup %8986  ;;  %v3015_v51 = vmul.f32 1.0614054, %v10710_v52 }
 0xa1b   :  { %v3123_v48 = vadd.f32 0.2548296, %v3107_v35  ;;  %v3046_v42 = vmul.f32 %v10699_v49, %v3030_v50  ;;  %8992 = vpow2.f32 %v3204_v10  ;;  %v8989_v7 = vpop.eup %8988  ;;  %v3206_v47 = vmul.f32 1.442695, %v3175_v2 }
 0xa1c   :  { %v3234_v28 = vsub.f32 1.0, %v3218_v40  ;;  %v3124_v56 = vadd.f32 0.2548296, %v3108_v9  ;;  %v3093_v60 = vadd.f32 -0.28449672, %v3077_v55  ;;  %v3281_v61 = vsel %vm3249_vm14, %v3233_v14, %v3265_v58 }
 0xa1d   :  { %v3139_v11 = vmul.f32 %v10665_v3, %v3123_v48  ;;  %v3062_v46 = vadd.f32 1.4214138, %v3046_v42  ;;  %v3031_v1 = vadd.f32 -1.4531521, %v3015_v51  ;;  %8994 = vpow2.f32 %v3206_v47 }
 0xa1e   :  { %v3266_v18 = vsub.f32 0.0, %v3234_v28  ;;  %v3140_v32 = vmul.f32 %v10673_v13, %v3124_v56  ;;  %v3109_v0 = vmul.f32 %v10683_v53, %v3093_v60  ;;  %v3312_v13 = vmul.f32 %v3296_v44, %v10686_v30 }
 0xa1f   :  { %v3219_v5 = vmul.f32 %v8987_v6, %v3139_v11  ;;  %v3078_v3 = vmul.f32 %v10699_v49, %v3062_v46  ;;  %v3047_v29 = vmul.f32 %v10710_v52, %v3031_v1  ;;  %v3297_v14 = vadd.f32 1.0, %v3281_v61 }
 0xa20   :  { %v3282_v24 = vsel %vm3250_vm15, %v3234_v28, %v3266_v18  ;;  %v3220_v45 = vmul.f32 %v8989_v7, %v3140_v32  ;;  %v3125_v43 = vadd.f32 0.2548296, %v3109_v0  ;;  %vm3251_vm5 = vcmp.ge.f32.partialorder %v10599_v15, 0.0 }
 0xa21   :  { %v3298_v27 = vadd.f32 1.0, %v3282_v24  ;;  %v3235_v23 = vsub.f32 1.0, %v3219_v5  ;;  %v3094_v63 = vadd.f32 -0.28449672, %v3078_v3  ;;  %v3063_v37 = vadd.f32 1.4214138, %v3047_v29  ;;  %v8991_v8 = vpop.eup %8990 }
 0xa22   :  { %v3236_v25 = vsub.f32 1.0, %v3220_v45  ;;  %v3141_v22 = vmul.f32 %v10683_v53, %v3125_v43  ;;  %v2897_v30 = vmul.f32 0.5, %v10528_v26  ;;  %v2899_v40 = vmul.f32 0.5, %v10588_v36  ;;  %v8721_v29 = vld [vmem:[%s12217_s29 + $0xe0] ss:$12 sps:$4 sm:$0xff]  }
 0xa23   :  { %v3314_v54 = vmul.f32 %v3298_v27, %v2898_v59  ;;  %v3267_v33 = vsub.f32 0.0, %v3235_v23  ;;  %v3110_v20 = vmul.f32 %v10699_v49, %v3094_v63  ;;  %v3079_v4 = vmul.f32 %v10710_v52, %v3063_v37  ;;  %v8725_v43 = vld [vmem:[%s12217_s29 + $0xf8] ss:$12 sps:$4 sm:$0xff]   ;;  %v8726_v63 = vld [vmem:[%s12217_s29 + $0x108] ss:$12 sps:$4 sm:$0xff]  }
 0xa24   :  { %v3221_v59 = vmul.f32 %v8991_v8, %v3141_v22  ;;  %v3313_v50 = vmul.f32 %v3297_v14, %v2897_v30  ;;  %v3268_v53 = vsub.f32 0.0, %v3236_v25  ;;  %vm3252_vm6 = vcmp.ge.f32.partialorder %v10602_v31, 0.0  ;;  %v8729_v37 = vld [vmem:[%s12217_s29 + $0x110] ss:$12 sps:$4 sm:$0xff]   ;;  %v8734_v8 = vld [vmem:[%s12217_s29 + $0x138] ss:$12 sps:$4 sm:$0xff]  }
 0xa25   :  { %v3324_v39 = vpack.c.bf16 %v3314_v54, %v3312_v13  ;;  %v3283_v62 = vsel %vm3251_vm5, %v3235_v23, %v3267_v33  ;;  %v3126_v16 = vadd.f32 0.2548296, %v3110_v20  ;;  %v3095_v10 = vadd.f32 -0.28449672, %v3079_v4  ;;  %v8993_v9 = vpop.eup %8992  ;;  %v8724_v13 = vld [vmem:[%s12217_s29 + $0xf4] ss:$12 sps:$4 sm:$0xff]  }
 0xa26   :  { %v3299_v35 = vadd.f32 1.0, %v3283_v62  ;;  %v3237_v58 = vsub.f32 1.0, %v3221_v59  ;;  %v3284_v44 = vsel %vm3252_vm6, %v3236_v25, %v3268_v53  ;;  %vm3253_vm7 = vcmp.ge.f32.partialorder %v10623_v17, 0.0  ;;  %v8722_v23 = vld [vmem:[%s12217_s29 + $0xf0] ss:$12 sps:$4 sm:$0xff]  }
 0xa27   :  { %v3142_v15 = vmul.f32 %v10699_v49, %v3126_v16  ;;  %v3111_v28 = vmul.f32 %v10710_v52, %v3095_v10  ;;  %v8995_v26 = vpop.eup %8994  ;;  %v3300_v11 = vadd.f32 1.0, %v3284_v44  ;;  %vm3254_vm8 = vcmp.ge.f32.partialorder %v10637_v21, 0.0  ;;  %v8728_v54 = vld [vmem:[%s12217_s29 + $0x10c] ss:$12 sps:$4 sm:$0xff]   ;;  %v8732_v14 = vld [vmem:[%s12217_s29 + $0x124] ss:$12 sps:$4 sm:$0xff]  }
 0xa28   :  { %v3315_v2 = vmul.f32 %v3299_v35, %v2899_v40  ;;  %v3269_v36 = vsub.f32 0.0, %v3237_v58  ;;  %v2900_v31 = vmul.f32 0.5, %v10593_v38  ;;  %v2902_v32 = vmul.f32 0.5, %v10627_v41  ;;  %v8716_v38 = vld [vmem:[%s12217_s29 + $0xc4] ss:$12 sps:$4 sm:$0xff]  }
 0xa29   :  { %v3222_v48 = vmul.f32 %v8993_v9, %v3142_v15  ;;  %v3127_v55 = vadd.f32 0.2548296, %v3111_v28  ;;  %vm3255_vm9 = vcmp.ge.f32.partialorder %v10654_v34, 0.0  ;;  %v2901_v5 = vmul.f32 0.5, %v10607_v19  ;;  %v8714_v41 = vld [vmem:[%s12217_s29 + $0xc0] ss:$12 sps:$4 sm:$0xff]   ;;  %3796 = vmatprep.subr.bf16.mxu1 %v8716_v38 }
 0xa2a   :  { %v3325_v6 = vpack.c.bf16 %v3315_v2, %v3313_v50  ;;  %v3285_v49 = vsel %vm3253_vm7, %v3237_v58, %v3269_v36  ;;  %v3316_v47 = vmul.f32 %v3300_v11, %v2900_v31  ;;  %v2903_v17 = vmul.f32 0.5, %v10644_v12  ;;  %v8717_v19 = vld [vmem:[%s12217_s29 + $0xc8] ss:$12 sps:$4 sm:$0xff]   ;;  %3797 = vmatpush1.bf16.msra.mxu1 %v8714_v41  ;;  %v8718_v34 = vld [vmem:[%s12217_s29 + $0xd8] ss:$12 sps:$4 sm:$0xff]  }
 0xa2b   :  { %v3238_v56 = vsub.f32 1.0, %v3222_v48  ;;  %v3143_v42 = vmul.f32 %v10710_v52, %v3127_v55  ;;  %v3301_v52 = vadd.f32 1.0, %v3285_v49  ;;  %8238 = vmatprep.subr.bf16.mxu0 %v8717_v19  ;;  %v8720_v12 = vld [vmem:[%s12217_s29 + $0xdc] ss:$12 sps:$4 sm:$0xff]   ;;  %v8730_v33 = vld [vmem:[%s12217_s29 + $0x120] ss:$12 sps:$4 sm:$0xff]  }
 0xa2c   :  { %3511 = vmatprep.mubr.bf16.mxu0 %v3325_v6  ;;  %8239 = vmatpush3.bf16.msra.mxu0 %v8717_v19  ;;  %v8733_v25 = vld [vmem:[%s12217_s29 + $0x128] ss:$12 sps:$4 sm:$0xff]   ;;  %v8737_v20 = vld [vmem:[%s12217_s29 + $0x140] ss:$12 sps:$4 sm:$0xff]   ;;  %v8741_v30 = vld [vmem:[%s12217_s29 + $0x158] ss:$12 sps:$4 sm:$0xff]  }
 0xa2d   :  { %3512 = vmatmul.mubr.bf16.gmra.mrb[88].mxu0 %v3324_v39  ;;  %v3270_v51 = vsub.f32 0.0, %v3238_v56  ;;  %v3223_v18 = vmul.f32 %v8995_v26, %v3143_v42  ;;  %v3317_v27 = vmul.f32 %v3301_v52, %v2901_v5  ;;  %3798 = vmatprep.subr.bf16.mxu1 %v8720_v12  ;;  %v8736_v22 = vld [vmem:[%s12217_s29 + $0x13c] ss:$12 sps:$4 sm:$0xff]   ;;  %v8740_v4 = vld [vmem:[%s12217_s29 + $0x154] ss:$12 sps:$4 sm:$0xff]   ;;  %v12241_v49 = vld [vmem:[#allocation14_spill] sm:$0xff] }
 0xa2e   :  { %3799 = vmatpush1.bf16.msra.mxu1 %v8718_v34  ;;  %8240 = vmatprep.subr.bf16.mxu0 %v8721_v29  ;;  %v8738_v39 = vld [vmem:[%s12217_s29 + $0x150] ss:$12 sps:$4 sm:$0xff]   ;;  %v8744_v62 = vld [vmem:[%s12217_s29 + $0x16c] ss:$12 sps:$4 sm:$0xff]   ;;  %v8742_v40 = vld [vmem:[%s12217_s29 + $0x168] ss:$12 sps:$4 sm:$0xff]  }
 0xa2f   :  { %v3286_v60 = vsel %vm3254_vm8, %v3238_v56, %v3270_v51  ;;  %v3239_v7 = vsub.f32 1.0, %v3223_v18  ;;  %3800 = vmatprep.subr.bf16.mxu1 %v8724_v13  ;;  %v8745_v59 = vld [vmem:[%s12217_s29 + $0x170] ss:$12 sps:$4 sm:$0xff]   ;;  %v7499_v16 = vld [vmem:[%s12169_s10] ss:$0 sm:$0xff]  ;;  %v12239_v28 = vld [vmem:[#allocation13_spill] sm:$0xff] }
 0xa30   :  { %v3302_v46 = vadd.f32 1.0, %v3286_v60  ;;  %8241 = vmatpush3.bf16.msra.mxu0 %v8721_v29  ;;  %v12240_v55 = vld [vmem:[#allocation12_spill] sm:$0xff]  ;;  %v12244_v38 = vld [vmem:[#allocation17_spill] sm:$0xff] }
 0xa31   :  { %v3271_v1 = vsub.f32 0.0, %v3239_v7  ;;  %8242 = vmatprep.subr.bf16.mxu0 %v8725_v43 }
 0xa32   :  { %v3318_v61 = vmul.f32 %v3302_v46, %v2902_v32  ;;  %3801 = vmatpush1.bf16.msra.mxu1 %v8722_v23  ;;  %v12242_v32 = vld [vmem:[#allocation15_spill] sm:$0xff] }
 0xa33   :  { %v3287_v24 = vsel %vm3255_vm9, %v3239_v7, %v3271_v1  ;;  %3802 = vmatprep.subr.bf16.mxu1 %v8728_v54 }
 0xa34   :  { %v3303_v21 = vadd.f32 1.0, %v3287_v24  ;;  %v3326_v0 = vpack.c.bf16 %v3318_v61, %v3316_v47  ;;  %8243 = vmatpush3.bf16.msra.mxu0 %v8725_v43 }
 0xa35   :  { %8244 = vmatprep.subr.bf16.mxu0 %v8729_v37 }
 0xa36   :  { %v3319_v45 = vmul.f32 %v3303_v21, %v2903_v17  ;;  %3803 = vmatpush1.bf16.msra.mxu1 %v8726_v63  ;;  %v12245_v63 = vld [vmem:[#allocation18_spill] sm:$0xff] }
 0xa37   :  { %3804 = vmatprep.subr.bf16.mxu1 %v8732_v14 }
 0xa38   :  { %v3327_v3 = vpack.c.bf16 %v3319_v45, %v3317_v27  ;;  %8245 = vmatpush3.bf16.msra.mxu0 %v8729_v37 }
 0xa39   :  { %8246 = vmatprep.subr.bf16.mxu0 %v8733_v25 }
 0xa3a   :  { %3519 = vmatprep.mubr.bf16.mxu0 %v3327_v3  ;;  %3805 = vmatpush1.bf16.msra.mxu1 %v8730_v33 }
 0xa3b   :  { %3520 = vmatmul.mubr.bf16.gmra.mrb[92].mxu0 %v3326_v0  ;;  %3806 = vmatprep.subr.bf16.mxu1 %v8736_v22  ;;  %v12243_v0 = vld [vmem:[#allocation16_spill] sm:$0xff] }
 0xa3c   :  { %8247 = vmatpush3.bf16.msra.mxu0 %v8733_v25  ;;  %v12246_v25 = vld [vmem:[#allocation19_spill] sm:$0xff] }
 0xa3d   :  { %8248 = vmatprep.subr.bf16.mxu0 %v8737_v20 }
 0xa3e   :  { %3807 = vmatpush1.bf16.msra.mxu1 %v8734_v8 }
 0xa3f   :  { %3808 = vmatprep.subr.bf16.mxu1 %v8740_v4 }
 0xa40   :  { %8249 = vmatpush3.bf16.msra.mxu0 %v8737_v20 }
 0xa41   :  { %8250 = vmatprep.subr.bf16.mxu0 %v8741_v30 }
 0xa42   :  { %3809 = vmatpush1.bf16.msra.mxu1 %v8738_v39 }
 0xa43   :  { %3810 = vmatprep.subr.bf16.mxu1 %v8744_v62 }
 0xa44   :  { %8251 = vmatpush3.bf16.msra.mxu0 %v8741_v30 }
 0xa45   :  { %8252 = vmatprep.subr.bf16.mxu0 %v8745_v59 }
 0xa46   :  { %3811 = vmatpush1.bf16.msra.mxu1 %v8742_v40 }
 0xa47   :  { %8262 = vmatprep.subr.bf16.mxu1 %v12225_v57 }
 0xa48   :  { %8253 = vmatpush3.bf16.msra.mxu0 %v8745_v59 }
 0xa49   :  { %8274 = vmatprep.subr.bf16.mxu0 %v12225_v57 }
 0xade   :  { %v7834_v35 = vpop.f32.mrb[80].mxu0 }
 0xadf   :  { %v7835_v10 = vpop.f32.mrb[81].mxu0 }
 0xae0   :  { %v7836_v9 = vadd.f32 %v7835_v10, %v7834_v35  ;;  %v7837_v50 = vpop.f32.mrb[82].mxu0 }
 0xae1   :  { %v7838_v53 = vpop.f32.mrb[83].mxu0 }
 0xae2   :  { %v3498_v2 = vadd.f32 %v7836_v9, %v7499_v16  ;;  %v7839_v58 = vadd.f32 %v7838_v53, %v7837_v50 }
 0xae4   :  { %v3501_v15 = vadd.f32 %v7839_v58, %v7499_v16  ;;  %v3528_v48 = vadd.f32 %v3498_v2, %v12239_v28 }
 0xae6   :  { %v3529_v6 = vadd.f32 %v3501_v15, %v12240_v55  ;;  %v7840_v26 = vpop.f32.mrb[84].mxu0 }
 0xae7   :  { %v7841_v44 = vpop.f32.mrb[85].mxu0 }
 0xae8   :  { %v3538_v36 = vadd.f32 %v3529_v6, %v3528_v48  ;;  %v7842_v56 = vadd.f32 %v7841_v44, %v7840_v26  ;;  %v7843_v42 = vpop.f32.mrb[86].mxu0 }
 0xae9   :  { %v7844_v51 = vpop.f32.mrb[87].mxu0 }
 0xaea   :  { %v3506_v18 = vadd.f32 %v7842_v56, %v7499_v16  ;;  %v7845_v11 = vadd.f32 %v7844_v51, %v7843_v42 }
 0xaec   :  { %v3530_v60 = vadd.f32 %v3506_v18, %v12241_v49  ;;  %v3509_v7 = vadd.f32 %v7845_v11, %v7499_v16 }
 0xaee   :  { %v3539_v31 = vadd.f32 %v3538_v36, %v3530_v60  ;;  %v3531_v46 = vadd.f32 %v3509_v7, %v12242_v32 }
 0xaf0   :  { %v3540_v1 = vadd.f32 %v3539_v31, %v3531_v46 }
 0xb00   :  { %v7846_v47 = vpop.f32.mrb[88].mxu0 }
 0xb01   :  { %v7847_v52 = vpop.f32.mrb[89].mxu0 }
 0xb02   :  { %v7848_v61 = vadd.f32 %v7847_v52, %v7846_v47  ;;  %v7849_v24 = vpop.f32.mrb[90].mxu0 }
 0xb03   :  { %v7850_v5 = vpop.f32.mrb[91].mxu0 }
 0xb04   :  { %v3514_v17 = vadd.f32 %v7848_v61, %v7499_v16  ;;  %v7851_v21 = vadd.f32 %v7850_v5, %v7849_v24  ;;  %v3536_v24 = vld [vmem:[%s12170_s11] sm:$0x1] }
 0xb06   :  { %v3532_v27 = vadd.f32 %v3514_v17, %v12243_v0  ;;  %v3517_v45 = vadd.f32 %v7851_v21, %v7499_v16  ;;  %v12247_v21 = vld [vmem:[#allocation10_spill] sm:$0xff] }
 0xb08   :  { %v3541_v3 = vadd.f32 %v3540_v1, %v3532_v27  ;;  %v3533_v41 = vadd.f32 %v3517_v45, %v12244_v38 }
 0xb0a   :  { %v3542_v19 = vadd.f32 %v3541_v3, %v3533_v41 }
 0xb0e   :  { %v7852_v12 = vpop.f32.mrb[92].mxu0 }
 0xb0f   :  { %v7853_v34 = vpop.f32.mrb[93].mxu0 }
 0xb10   :  { %v7854_v29 = vadd.f32 %v7853_v34, %v7852_v12  ;;  %v7855_v13 = vpop.f32.mrb[94].mxu0 }
 0xb11   :  { %v7856_v23 = vpop.f32.mrb[95].mxu0 }
 0xb12   :  { %v3522_v43 = vadd.f32 %v7854_v29, %v7499_v16  ;;  %v7857_v54 = vadd.f32 %v7856_v23, %v7855_v13 }
 0xb14   :  { %v3534_v37 = vadd.f32 %v3522_v43, %v12245_v63  ;;  %v3525_v14 = vadd.f32 %v7857_v54, %v7499_v16 }
 0xb16   :  { %v3543_v33 = vadd.f32 %v3542_v19, %v3534_v37  ;;  %v3535_v22 = vadd.f32 %v3525_v14, %v12246_v25 }
 0xb18   :  { %v3544_v8 = vadd.f32 %v3543_v33, %v3535_v22 }
 0xb1a   :  { %v3545_v20 = vrot.slane %v3544_v8, 4 }
 0xb1c   :  { %v3546_v4 = vadd.f32 %v3545_v20, %v3544_v8 }
 0xb1e   :  { %v3547_v39 = vrot.slane %v3546_v4, 2 }
 0xb20   :  { %v3548_v30 = vadd.f32 %v3547_v39, %v3546_v4  ;;  %v7549_v39 = vld [vmem:[%s12221_s27 + $0x3] sm:$0x7]  ;;  %s12254_s27 = smov 32  }
 0xb22   :  { %v3549_v62 = vrot.slane %v3548_v30, 1 }
 0xb24   :  { %v3550_v59 = vadd.f32 %v3549_v62, %v3548_v30  ;;  %v10869_v30 = vrot.slane %v7549_v39, %v12247_v21 }
 0xb26   :  { %v3551_v40 = vmul.f32 0.015625, %v3550_v59  ;;  %v12251_v59 = vld [vmem:[#allocation11_spill] sm:$0xff] }
 0xb28   :  { %v3552_v35 = vsub.f32 %v3528_v48, %v3551_v40  ;;  %v3553_v10 = vsub.f32 %v3529_v6, %v3551_v40  ;;  %v3554_v9 = vsub.f32 %v3530_v60, %v3551_v40  ;;  %v3555_v50 = vsub.f32 %v3531_v46, %v3551_v40 }
 0xb29   :  { %v3556_v53 = vsub.f32 %v3532_v27, %v3551_v40  ;;  %v3557_v2 = vsub.f32 %v3533_v41, %v3551_v40  ;;  %v3558_v58 = vsub.f32 %v3534_v37, %v3551_v40  ;;  %v3559_v15 = vsub.f32 %v3535_v22, %v3551_v40  ;;  %v7516_v27 = vld [vmem:[%s12171_s12] ss:$0 sm:$0xff] }
 0xb2a   :  { %v3560_v16 = vmul.f32 %v3552_v35, %v3552_v35  ;;  %v3561_v28 = vmul.f32 %v3553_v10, %v3553_v10  ;;  %v3562_v55 = vmul.f32 %v3554_v9, %v3554_v9  ;;  %v3563_v44 = vmul.f32 %v3555_v50, %v3555_v50 }
 0xb2b   :  { %v3564_v56 = vmul.f32 %v3556_v53, %v3556_v53  ;;  %v3565_v51 = vmul.f32 %v3557_v2, %v3557_v2  ;;  %v3566_v11 = vmul.f32 %v3558_v58, %v3558_v58  ;;  %v3567_v48 = vmul.f32 %v3559_v15, %v3559_v15 }
 0xb2c   :  { %v3568_v26 = vadd.f32 %v3561_v28, %v3560_v16  ;;  %v12248_v22 = vmov 0   ;;  %v10872_v40 = vrot.slane %v7549_v39, %v12251_v59 }
 0xb2e   :  { %v3569_v36 = vadd.f32 %v3568_v26, %v3562_v55 }
 0xb30   :  { %v3570_v42 = vadd.f32 %v3569_v36, %v3563_v44 }
 0xb32   :  { %v3571_v18 = vadd.f32 %v3570_v42, %v3564_v56 }
 0xb34   :  { %v3572_v49 = vadd.f32 %v3571_v18, %v3565_v51 }
 0xb36   :  { %v3573_v6 = vadd.f32 %v3572_v49, %v3566_v11 }
 0xb38   :  { %v3574_v60 = vadd.f32 %v3573_v6, %v3567_v48 }
 0xb3a   :  { %v3575_v7 = vrot.slane %v3574_v60, 4 }
 0xb3c   :  { %v3576_v31 = vadd.f32 %v3575_v7, %v3574_v60 }
 0xb3e   :  { %v3577_v32 = vrot.slane %v3576_v31, 2 }
 0xb40   :  { %v3578_v46 = vadd.f32 %v3577_v32, %v3576_v31 }
 0xb42   :  { %v3579_v1 = vrot.slane %v3578_v46, 1 }
 0xb44   :  { %v3580_v47 = vadd.f32 %v3579_v1, %v3578_v46 }
 0xb46   :  { %v3581_v52 = vmul.f32 0.015625, %v3580_v47 }
 0xb48   :  { %v3582_v61 = vadd.f32 1e-05, %v3581_v52 }
 0xb4a   :  { %8996 = vrsqrt.f32 %v3582_v61 }
 0xb54   :  { %v8997_v5 = vpop.eup %8996 }
 0xb55   :  { %v3584_v17 = vmul.f32 %v8997_v5, %v3536_v24 }
 0xb57   :  { %v3589_v0 = vrot.slane %v3584_v17, %v12247_v21 }
 0xb59   :  { %v3591_v45 = vmul.f32 %v3589_v0, %v3552_v35  ;;  %v3592_v3 = vmul.f32 %v3589_v0, %v3553_v10  ;;  %v3593_v38 = vmul.f32 %v3589_v0, %v3554_v9  ;;  %v3594_v41 = vmul.f32 %v3589_v0, %v3555_v50  ;;  %v12252_v35 = vld [vmem:[#allocation9_spill] sm:$0xff] }
 0xb5a   :  { %v3595_v19 = vmul.f32 %v3589_v0, %v3556_v53  ;;  %v3596_v12 = vmul.f32 %v3589_v0, %v3557_v2  ;;  %v3597_v34 = vmul.f32 %v3589_v0, %v3558_v58  ;;  %v3598_v29 = vmul.f32 %v3589_v0, %v3559_v15 }
 0xb5b   :  { %v10834_v13 = vadd.f32 %v7516_v27, %v3591_v45  ;;  %v10836_v23 = vadd.f32 %v7516_v27, %v3592_v3  ;;  %v10838_v43 = vadd.f32 %v7516_v27, %v3593_v38  ;;  %v10840_v54 = vadd.f32 %v7516_v27, %v3594_v41 }
 0xb5c   :  { %v10842_v63 = vadd.f32 %v7516_v27, %v3595_v19  ;;  %v10844_v37 = vadd.f32 %v7516_v27, %v3596_v12  ;;  %v10853_v8 = vadd.f32 %v7516_v27, %v3597_v34  ;;  %v10855_v20 = vadd.f32 %v7516_v27, %v3598_v29 }
 0xb5d   :  { %v3613_v14 = vpack.c.bf16 %v10836_v23, %v10834_v13  ;;  %v3614_v33 = vpack.c.bf16 %v10840_v54, %v10838_v43  ;;  %v12253_v10 = vsub.s32 2, %v12252_v35 }
 0xb5e   :  { %v3615_v25 = vpack.c.bf16 %v10844_v37, %v10842_v63  ;;  %12249 = vst [vmem:[#allocation13_spill] sm:$0xff] %v10853_v8  ;;  %12250 = vst [vmem:[#allocation12_spill] sm:$0xff] %v10855_v20  ;;  %v3616_v4 = vpack.c.bf16 %v10855_v20, %v10853_v8 }
 0xb5f   :  { %3829 = vmatmul.mubr.bf16.vlgmr.msra.gmra.mrb[96].mxu1 %v3613_v14  ;;  %8254 = vmatprep.mubr.bf16.mxu0 %v3613_v14  ;;  %v3664_v9 = vrot.slane %v7549_v39, %v12253_v10 }
 0xb60   :  { %8255 = vmatmul.mubr.bf16.vlgmr.msra.gmra.mrb[96].mxu0 %v3614_v33  ;;  %3838 = vmatprep.mubr.bf16.mxu1 %v12248_v22 }
 0xb61   :  { %8258 = vmatprep.mubr.bf16.mxu0 %v3615_v25 }
 0xb67   :  { %3839 = vmatmul.mubr.bf16.gmra.mrb[100].mxu1 %v3614_v33 }
 0xb68   :  { %8259 = vmatmul.mubr.bf16.gmra.mrb[100].mxu0 %v3616_v4  ;;  %3848 = vmatprep.mubr.bf16.mxu1 %v12248_v22 }
 0xb69   :  { %8276 = vmatprep.mubr.msk.bf16.mxu0 %vm9256_vm0, %v12225_v57 }
 0xb6f   :  { %3849 = vmatmul.mubr.bf16.gmra.mrb[104].mxu1 %v3615_v25 }
 0xb70   :  { %3858 = vmatprep.mubr.bf16.mxu1 %v12248_v22 }
 0xb77   :  { %3859 = vmatmul.mubr.bf16.gmra.mrb[108].mxu1 %v3616_v4 }
 0xb78   :  { %8264 = vmatprep.mubr.msk.bf16.mxu1 %vm9256_vm0, %v12225_v57 }
 0xc32   :  { %v3830_v62 = vpop.f32.mrb[96].mxu1 }
 0xc33   :  { %v3832_v50 = vpop.f32.mrb[97].mxu1  ;;  %v8256_v53 = vpop.f32.mrb[96].mxu0  ;;  %v3831_v15 = vadd.f32 %v3830_v62, %v10869_v30 }
 0xc34   :  { %v3834_v2 = vpop.f32.mrb[98].mxu1  ;;  %v3903_v58 = vpop.f32.mrb[97].mxu0  ;;  %v3833_v26 = vadd.f32 %v3832_v50, %v10872_v40  ;;  %v3912_v44 = vadd.f32 %v8256_v53, %v3664_v9 }
 0xc35   :  { %v3835_v16 = vadd.f32 %v3834_v2, %v10869_v30  ;;  %v3836_v28 = vpop.f32.mrb[99].mxu1  ;;  %v8257_v55 = vpop.f32.mrb[98].mxu0  ;;  %v3904_v18 = vadd.f32 %v3903_v58, %v3664_v9 }
 0xc36   :  { %v3837_v36 = vadd.f32 %v3836_v28, %v10872_v40  ;;  %v3915_v56 = vadd.f32 %v8257_v55, %v3664_v9  ;;  %v3906_v42 = vpop.f32.mrb[99].mxu0 }
 0xc37   :  { %v3934_v51 = vpack.c.bf16 %v3835_v16, %v3831_v15  ;;  %v3907_v11 = vadd.f32 %v3906_v42, %v3664_v9 }
 0xc38   :  { %v3935_v49 = vpack.c.bf16 %v3837_v36, %v3833_v26  ;;  %v10880_v48 = vpack.c.bf16 %v3915_v56, %v3912_v44 }
 0xc39   :  { %v10882_v6 = vpack.c.bf16 %v3907_v11, %v3904_v18  ;;  %4054 = vrot.lane.b32.xlu1 %v3934_v51, %s9257_s28 }
 0xc3a   :  { %v3840_v60 = vpop.f32.mrb[100].mxu1  ;;  %4057 = vrot.lane.b32.xlu0 %v3935_v49, %s9257_s28  ;;  %v3940_v7 = vsel %vm391_vm1, %v3935_v49, 0 }
 0xc3b   :  { %v3842_v31 = vpop.f32.mrb[101].mxu1  ;;  %v8260_v32 = vpop.f32.mrb[100].mxu0  ;;  %8263 = vmatpush3.bf16.xpose.msra.mxu1 %v3940_v7  ;;  %v3841_v52 = vadd.f32 %v3840_v60, %v10869_v30 }
 0xc3c   :  { %v3928_v46 = vadd.f32 %v8260_v32, %v3664_v9  ;;  %v3844_v1 = vpop.f32.mrb[102].mxu1  ;;  %v3919_v47 = vpop.f32.mrb[101].mxu0  ;;  %8268 = vmatprep.subr.bf16.mxu1 %v12225_v57  ;;  %v3843_v0 = vadd.f32 %v3842_v31, %v10872_v40 }
 0xc3d   :  { %v3845_v61 = vadd.f32 %v3844_v1, %v10869_v30  ;;  %v3920_v24 = vadd.f32 %v3919_v47, %v3664_v9  ;;  %v3846_v5 = vpop.f32.mrb[103].mxu1  ;;  %v8261_v17 = vpop.f32.mrb[102].mxu0  ;;  %4179 = vrot.lane.b32.xlu1 %v3934_v51, %s9259_s0 }
 0xc3e   :  { %v3847_v27 = vadd.f32 %v3846_v5, %v10872_v40  ;;  %v3931_v45 = vadd.f32 %v8261_v17, %v3664_v9  ;;  %v3922_v3 = vpop.f32.mrb[103].mxu0  ;;  %4181 = vrot.lane.b32.xlu0 %v3935_v49, %s9259_s0 }
 0xc3f   :  { %v10894_v38 = vpack.c.bf16 %v3845_v61, %v3841_v52  ;;  %v3923_v41 = vadd.f32 %v3922_v3, %v3664_v9 }
 0xc40   :  { %v10896_v19 = vpack.c.bf16 %v3847_v27, %v3843_v0  ;;  %v10898_v12 = vpack.c.bf16 %v3931_v45, %v3928_v46 }
 0xc41   :  { %v10900_v34 = vpack.c.bf16 %v3923_v41, %v3920_v24  ;;  %4302 = vrot.lane.b32.xlu1 %v3934_v51, %s12254_s27 }
 0xc42   :  { %v3850_v29 = vpop.f32.mrb[104].mxu1  ;;  %4304 = vrot.lane.b32.xlu0 %v3935_v49, %s12254_s27  ;;  %8265 = vmatmul.mubr.msk.bf16.vlgmr.msra.gmra.mrb[112].mxu1 %vm391_vm1, %v3934_v51 }
 0xc43   :  { %v3852_v14 = vpop.f32.mrb[105].mxu1  ;;  %8269 = vmatpush3.bf16.msra.mxu1 %v10882_v6  ;;  %8270 = vmatprep.mubr.msk.bf16.mxu1 %vm9256_vm0, %v12225_v57  ;;  %v3851_v25 = vadd.f32 %v3850_v29, %v10869_v30 }
 0xc44   :  { %v3854_v33 = vpop.f32.mrb[106].mxu1  ;;  %8280 = vmatprep.subr.bf16.mxu1 %v12225_v57  ;;  %v3853_v62 = vadd.f32 %v3852_v14, %v10872_v40 }
 0xc45   :  { %v3855_v4 = vadd.f32 %v3854_v33, %v10869_v30  ;;  %v3856_v39 = vpop.f32.mrb[107].mxu1  ;;  %4575 = vrot.lane.b32.xlu1 %v10894_v38, %s9257_s28 }
 0xc46   :  { %v3857_v35 = vadd.f32 %v3856_v39, %v10872_v40  ;;  %4578 = vrot.lane.b32.xlu0 %v10896_v19, %s9257_s28 }
 0xc47   :  { %v10917_v10 = vpack.c.bf16 %v3855_v4, %v3851_v25 }
 0xc48   :  { %v10919_v9 = vpack.c.bf16 %v3857_v35, %v3853_v62 }
 0xc49   :  { %4700 = vrot.lane.b32.xlu1 %v10894_v38, %s9259_s0 }
 0xc4a   :  { %v3860_v50 = vpop.f32.mrb[108].mxu1  ;;  %4702 = vrot.lane.b32.xlu0 %v10896_v19, %s9259_s0  ;;  %v4982_v24 = vsel %vm391_vm1, %v10919_v9, 0 }
 0xc4b   :  { %v3862_v53 = vpop.f32.mrb[109].mxu1  ;;  %v3861_v58 = vadd.f32 %v3860_v50, %v10869_v30 }
 0xc4c   :  { %v3864_v2 = vpop.f32.mrb[110].mxu1  ;;  %v3863_v28 = vadd.f32 %v3862_v53, %v10872_v40 }
 0xc4d   :  { %v3865_v15 = vadd.f32 %v3864_v2, %v10869_v30  ;;  %v3866_v16 = vpop.f32.mrb[111].mxu1  ;;  %4823 = vrot.lane.b32.xlu1 %v10894_v38, %s12254_s27 }
 0xc4e   :  { %v3867_v55 = vadd.f32 %v3866_v16, %v10872_v40  ;;  %4825 = vrot.lane.b32.xlu0 %v10896_v19, %s12254_s27 }
 0xc4f   :  { %v10933_v26 = vpack.c.bf16 %v3865_v15, %v3861_v58 }
 0xc50   :  { %v10935_v44 = vpack.c.bf16 %v3867_v55, %v3863_v28 }
 0xc51   :  { %5096 = vrot.lane.b32.xlu1 %v10917_v10, %s9257_s28 }
 0xc52   :  { %5099 = vrot.lane.b32.xlu0 %v10919_v9, %s9257_s28  ;;  %v5503_v29 = vsel %vm391_vm1, %v10935_v44, 0 }
 0xc55   :  { %5221 = vrot.lane.b32.xlu1 %v10917_v10, %s9259_s0 }
 0xc56   :  { %5223 = vrot.lane.b32.xlu0 %v10919_v9, %s9259_s0 }
 0xc59   :  { %5344 = vrot.lane.b32.xlu1 %v10917_v10, %s12254_s27 }
 0xc5a   :  { %5346 = vrot.lane.b32.xlu0 %v10919_v9, %s12254_s27 }
 0xc5d   :  { %5617 = vrot.lane.b32.xlu1 %v10933_v26, %s9257_s28 }
 0xc5e   :  { %5620 = vrot.lane.b32.xlu0 %v10935_v44, %s9257_s28 }
 0xc61   :  { %5742 = vrot.lane.b32.xlu1 %v10933_v26, %s9259_s0 }
 0xc62   :  { %5744 = vrot.lane.b32.xlu0 %v10935_v44, %s9259_s0 }
 0xc65   :  { %5865 = vrot.lane.b32.xlu1 %v10933_v26, %s12254_s27 }
 0xc66   :  { %5867 = vrot.lane.b32.xlu0 %v10935_v44, %s12254_s27 }
 0xc69   :  { %4255 = vrot.lane.b32.xlu1 %v10882_v6, %s9259_s0 }
 0xc6a   :  { %4132 = vrot.lane.b32.xlu0 %v10882_v6, %s9257_s28 }
 0xc6d   :  { %4776 = vrot.lane.b32.xlu1 %v10880_v48, %s9259_s0 }
 0xc6e   :  { %4378 = vrot.lane.b32.xlu0 %v10882_v6, %s12254_s27  ;;  %v4461_v6 = vsel %vm391_vm1, %v10896_v19, 0 }
 0xc72   :  { %4653 = vrot.lane.b32.xlu0 %v10880_v48, %s9257_s28 }
 0xc76   :  { %4899 = vrot.lane.b32.xlu0 %v10880_v48, %s12254_s27 }
 0xcab   :  { %v4055_v56 = vpop.permute.xlu1 %4054 }
 0xcac   :  { %v4058_v30 = vpop.permute.xlu0 %4057 }
 0xcad   :  { %v4063_v40 = vsel %vm391_vm1, %v4058_v30, 0 }
 0xcae   :  { %8275 = vmatpush3.bf16.xpose.msra.mxu0 %v4063_v40 }
 0xcaf   :  { %8286 = vmatprep.subr.bf16.mxu0 %v12225_v57  ;;  %v4180_v18 = vpop.permute.xlu1 %4179 }
 0xcb0   :  { %v4182_v36 = vpop.permute.xlu0 %4181 }
 0xcb1   :  { %v4187_v42 = vsel %vm391_vm1, %v4182_v36, 0 }
 0xcb3   :  { %v4303_v49 = vpop.permute.xlu1 %4302 }
 0xcb4   :  { %v4305_v51 = vpop.permute.xlu0 %4304 }
 0xcb5   :  { %8277 = vmatmul.mubr.msk.bf16.vlgmr.msra.gmra.mrb[104].mxu0 %vm391_vm1, %v4055_v56  ;;  %v4310_v11 = vsel %vm391_vm1, %v4305_v51, 0 }
 0xcb6   :  { %8287 = vmatpush3.bf16.xpose.msra.mxu0 %v4187_v42  ;;  %8288 = vmatprep.mubr.msk.bf16.mxu0 %vm9256_vm0, %v12225_v57 }
 0xcb7   :  { %8298 = vmatprep.subr.bf16.mxu0 %v12225_v57  ;;  %v4576_v32 = vpop.permute.xlu1 %4575 }
 0xcb8   :  { %v4579_v60 = vpop.permute.xlu0 %4578 }
 0xcb9   :  { %v4584_v7 = vsel %vm391_vm1, %v4579_v60, 0 }
 0xcbb   :  { %v4701_v47 = vpop.permute.xlu1 %4700 }
 0xcbc   :  { %v4703_v31 = vpop.permute.xlu0 %4702 }
 0xcbd   :  { %8289 = vmatmul.mubr.msk.bf16.vlgmr.msra.gmra.mrb[108].mxu0 %vm391_vm1, %v4180_v18  ;;  %v4708_v46 = vsel %vm391_vm1, %v4703_v31, 0 }
 0xcbe   :  { %8299 = vmatpush3.bf16.xpose.msra.mxu0 %v4310_v11  ;;  %8300 = vmatprep.mubr.msk.bf16.mxu0 %vm9256_vm0, %v12225_v57 }
 0xcbf   :  { %8310 = vmatprep.subr.bf16.mxu0 %v12225_v57  ;;  %v4824_v61 = vpop.permute.xlu1 %4823 }
 0xcc0   :  { %v4826_v1 = vpop.permute.xlu0 %4825 }
 0xcc1   :  { %v4831_v52 = vsel %vm391_vm1, %v4826_v1, 0 }
 0xcc3   :  { %v5097_v27 = vpop.permute.xlu1 %5096 }
 0xcc4   :  { %v5100_v5 = vpop.permute.xlu0 %5099 }
 0xcc5   :  { %8301 = vmatmul.mubr.msk.bf16.vlgmr.msra.gmra.mrb[112].mxu0 %vm391_vm1, %v4303_v49  ;;  %v5105_v17 = vsel %vm391_vm1, %v5100_v5, 0 }
 0xcc6   :  { %8311 = vmatpush3.bf16.xpose.msra.mxu0 %v4461_v6  ;;  %8312 = vmatprep.mubr.msk.bf16.mxu0 %vm9256_vm0, %v12225_v57 }
 0xcc7   :  { %8322 = vmatprep.subr.bf16.mxu0 %v12225_v57 }
 0xcc8   :  { %v5224_v0 = vpop.permute.xlu0 %5223 }
 0xcc9   :  { %v5229_v45 = vsel %vm391_vm1, %v5224_v0, 0 }
 0xccc   :  { %v5347_v3 = vpop.permute.xlu0 %5346 }
 0xccd   :  { %8313 = vmatmul.mubr.msk.bf16.vlgmr.msra.gmra.mrb[116].mxu0 %vm391_vm1, %v10894_v38  ;;  %v5222_v38 = vpop.permute.xlu1 %5221  ;;  %v5352_v41 = vsel %vm391_vm1, %v5347_v3, 0 }
 0xcce   :  { %8323 = vmatpush3.bf16.xpose.msra.mxu0 %v4584_v7  ;;  %8324 = vmatprep.mubr.msk.bf16.mxu0 %vm9256_vm0, %v12225_v57 }
 0xccf   :  { %8334 = vmatprep.subr.bf16.mxu0 %v12225_v57 }
 0xcd0   :  { %v5621_v14 = vpop.permute.xlu0 %5620 }
 0xcd1   :  { %v5345_v19 = vpop.permute.xlu1 %5344  ;;  %v5626_v33 = vsel %vm391_vm1, %v5621_v14, 0 }
 0xcd4   :  { %v5745_v25 = vpop.permute.xlu0 %5744 }
 0xcd5   :  { %8325 = vmatmul.mubr.msk.bf16.vlgmr.msra.gmra.mrb[120].mxu0 %vm391_vm1, %v4576_v32  ;;  %v5618_v4 = vpop.permute.xlu1 %5617  ;;  %v5750_v39 = vsel %vm391_vm1, %v5745_v25, 0 }
 0xcd6   :  { %8335 = vmatpush3.bf16.xpose.msra.mxu0 %v4708_v46  ;;  %8336 = vmatprep.mubr.msk.bf16.mxu0 %vm9256_vm0, %v12225_v57 }
 0xcd7   :  { %8346 = vmatprep.subr.bf16.mxu0 %v12225_v57 }
 0xcd8   :  { %v5868_v58 = vpop.permute.xlu0 %5867 }
 0xcd9   :  { %v5743_v16 = vpop.permute.xlu1 %5742  ;;  %v5873_v28 = vsel %vm391_vm1, %v5868_v58, 0 }
 0xcdc   :  { %v11067_v18 = vpop.permute.xlu0 %4132 }
 0xcdd   :  { %8337 = vmatmul.mubr.msk.bf16.vlgmr.msra.gmra.mrb[124].mxu0 %vm391_vm1, %v4701_v47  ;;  %v5866_v55 = vpop.permute.xlu1 %5865 }
 0xcde   :  { %8347 = vmatpush3.bf16.xpose.msra.mxu0 %v4831_v52  ;;  %8348 = vmatprep.mubr.msk.bf16.mxu0 %vm9256_vm0, %v12225_v57 }
 0xcdf   :  { %8358 = vmatprep.subr.bf16.mxu0 %v12225_v57 }
 0xce0   :  { %v11077_v1 = vpop.permute.xlu0 %4378 }
 0xce5   :  { %8349 = vmatmul.mubr.msk.bf16.vlgmr.msra.gmra.mrb[128].mxu0 %vm391_vm1, %v4824_v61 }
 0xce6   :  { %8359 = vmatpush3.bf16.xpose.msra.mxu0 %v4982_v24  ;;  %8360 = vmatprep.mubr.msk.bf16.mxu0 %vm9256_vm0, %v12225_v57 }
 0xce7   :  { %8370 = vmatprep.subr.bf16.mxu0 %v12225_v57 }
 0xced   :  { %8361 = vmatmul.mubr.msk.bf16.vlgmr.msra.gmra.mrb[132].mxu0 %vm391_vm1, %v10917_v10 }
 0xcee   :  { %8371 = vmatpush3.bf16.xpose.msra.mxu0 %v5105_v17  ;;  %8372 = vmatprep.mubr.msk.bf16.mxu0 %vm9256_vm0, %v12225_v57 }
 0xcef   :  { %8382 = vmatprep.subr.bf16.mxu0 %v12225_v57 }
 0xcf5   :  { %8373 = vmatmul.mubr.msk.bf16.vlgmr.msra.gmra.mrb[136].mxu0 %vm391_vm1, %v5097_v27  ;;  %v11085_v27 = vpop.permute.xlu0 %4653 }
 0xcf6   :  { %8383 = vmatpush3.bf16.xpose.msra.mxu0 %v5229_v45  ;;  %8384 = vmatprep.mubr.msk.bf16.mxu0 %vm9256_vm0, %v12225_v57 }
 0xcf7   :  { %8394 = vmatprep.subr.bf16.mxu0 %v12225_v57 }
 0xcfd   :  { %8385 = vmatmul.mubr.msk.bf16.vlgmr.msra.gmra.mrb[140].mxu0 %vm391_vm1, %v5222_v38 }
 0xcfe   :  { %8395 = vmatpush3.bf16.xpose.msra.mxu0 %v5352_v41  ;;  %8396 = vmatprep.mubr.msk.bf16.mxu0 %vm9256_vm0, %v12225_v57 }
 0xcff   :  { %8406 = vmatprep.subr.bf16.mxu0 %v12225_v57 }
 0xd05   :  { %8397 = vmatmul.mubr.msk.bf16.vlgmr.msra.gmra.mrb[144].mxu0 %vm391_vm1, %v5345_v19  ;;  %v11091_v19 = vpop.permute.xlu0 %4899 }
 0xd06   :  { %8407 = vmatpush3.bf16.xpose.msra.mxu0 %v5503_v29  ;;  %8408 = vmatprep.mubr.msk.bf16.mxu0 %vm9256_vm0, %v12225_v57 }
 0xd07   :  { %8418 = vmatprep.subr.bf16.mxu0 %v12225_v57 }
 0xd0d   :  { %8409 = vmatmul.mubr.msk.bf16.vlgmr.msra.gmra.mrb[148].mxu0 %vm391_vm1, %v10933_v26 }
 0xd0e   :  { %8419 = vmatpush3.bf16.xpose.msra.mxu0 %v5626_v33  ;;  %8420 = vmatprep.mubr.msk.bf16.mxu0 %vm9256_vm0, %v12225_v57 }
 0xd0f   :  { %8430 = vmatprep.subr.bf16.mxu0 %v12225_v57 }
 0xd15   :  { %v3976_v62 = vpop.f32.mrb[112].mxu1  ;;  %8421 = vmatmul.mubr.msk.bf16.vlgmr.msra.gmra.mrb[152].mxu0 %vm391_vm1, %v5618_v4 }
 0xd16   :  { %v11043_v35 = vmul.f32 0.17677669, %v3976_v62  ;;  %v8266_v10 = vpop.f32.mrb[113].mxu1  ;;  %8431 = vmatpush3.bf16.xpose.msra.mxu0 %v5750_v39  ;;  %8432 = vmatprep.mubr.msk.bf16.mxu0 %vm9256_vm0, %v12225_v57 }
 0xd17   :  { %v3979_v9 = vpop.f32.mrb[114].mxu1  ;;  %8442 = vmatprep.subr.bf16.mxu0 %v12225_v57 }
 0xd18   :  { %v11048_v50 = vmul.f32 0.17677669, %v3979_v9  ;;  %v8267_v53 = vpop.f32.mrb[115].mxu1  ;;  %v3985_v2 = vsel %vm441_vm2, %v11043_v35, -inf }
 0xd19   :  { %3986 = vmax.xlane.f32.xlu0 %v3985_v2 }
 0xd1a   :  { %v3988_v15 = vsel %vm441_vm2, %v11048_v50, -inf }
 0xd1b   :  { %3989 = vmax.xlane.f32.xlu1 %v3988_v15 }
 0xd1d   :  { %8433 = vmatmul.mubr.msk.bf16.vlgmr.msra.gmra.mrb[156].mxu0 %vm391_vm1, %v5743_v16 }
 0xd1e   :  { %8443 = vmatpush3.bf16.xpose.msra.mxu0 %v5873_v28  ;;  %8444 = vmatprep.mubr.msk.bf16.mxu0 %vm9256_vm0, %v12225_v57 }
 0xd25   :  { %8445 = vmatmul.mubr.msk.bf16.vlgmr.msra.gmra.mrb[160].mxu0 %vm391_vm1, %v5866_v55 }
 0xd88   :  { %v4099_v26 = vpop.f32.mrb[104].mxu0 }
 0xd89   :  { %v11059_v44 = vmul.f32 0.17677669, %v4099_v26  ;;  %v8278_v30 = vpop.f32.mrb[105].mxu0 }
 0xd8a   :  { %v4102_v40 = vpop.f32.mrb[106].mxu0 }
 0xd8b   :  { %v11061_v36 = vmul.f32 0.17677669, %v4102_v40  ;;  %v8279_v56 = vpop.f32.mrb[107].mxu0  ;;  %v4108_v42 = vsel %vm441_vm2, %v11059_v44, -inf }
 0xd8c   :  { %4109 = vmax.xlane.f32.xlu0 %v4108_v42 }
 0xd8d   :  { %v4111_v51 = vsel %vm441_vm2, %v11061_v36, -inf }
 0xd90   :  { %v4223_v11 = vpop.f32.mrb[108].mxu0  ;;  %4112 = vmax.xlane.f32.xlu0 %v4111_v51 }
 0xd91   :  { %v11069_v49 = vmul.f32 0.17677669, %v4223_v11  ;;  %v8290_v6 = vpop.f32.mrb[109].mxu0 }
 0xd92   :  { %v4226_v60 = vpop.f32.mrb[110].mxu0 }
 0xd93   :  { %v11071_v7 = vmul.f32 0.17677669, %v4226_v60  ;;  %v8291_v31 = vpop.f32.mrb[111].mxu0  ;;  %v4232_v32 = vsel %vm441_vm2, %v11069_v49, -inf }
 0xd94   :  { %4233 = vmax.xlane.f32.xlu0 %v4232_v32 }
 0xd95   :  { %v4235_v46 = vsel %vm441_vm2, %v11071_v7, -inf }
 0xd96   :  { %4236 = vmax.xlane.f32.xlu1 %v4235_v46  ;;  %v11118_v46 = vpop.permute.xlu1 %4255 }
 0xd98   :  { %v4346_v47 = vpop.f32.mrb[112].mxu0 }
 0xd99   :  { %v11079_v52 = vmul.f32 0.17677669, %v4346_v47  ;;  %v8302_v61 = vpop.f32.mrb[113].mxu0 }
 0xd9a   :  { %v4349_v24 = vpop.f32.mrb[114].mxu0 }
 0xd9b   :  { %v11081_v5 = vmul.f32 0.17677669, %v4349_v24  ;;  %v8303_v17 = vpop.f32.mrb[115].mxu0  ;;  %v4355_v0 = vsel %vm441_vm2, %v11079_v52, -inf }
 0xd9c   :  { %4356 = vmax.xlane.f32.xlu0 %v4355_v0 }
 0xd9d   :  { %v4358_v45 = vsel %vm441_vm2, %v11081_v5, -inf }
 0xd9e   :  { %4359 = vmax.xlane.f32.xlu1 %v4358_v45 }
 0xda0   :  { %v4497_v3 = vpop.f32.mrb[116].mxu0 }
 0xda1   :  { %v11089_v38 = vmul.f32 0.17677669, %v4497_v3  ;;  %v8314_v41 = vpop.f32.mrb[117].mxu0  ;;  %v11124_v3 = vpop.permute.xlu1 %4776 }
 0xda2   :  { %v4500_v29 = vpop.f32.mrb[118].mxu0 }
 0xda3   :  { %v11093_v14 = vmul.f32 0.17677669, %v4500_v29  ;;  %v8315_v33 = vpop.f32.mrb[119].mxu0  ;;  %v4506_v25 = vsel %vm441_vm2, %v11089_v38, -inf }
 0xda4   :  { %4507 = vmax.xlane.f32.xlu0 %v4506_v25 }
 0xda5   :  { %v4509_v4 = vsel %vm441_vm2, %v11093_v14, -inf }
 0xda6   :  { %v3987_v39 = vpop.xlane.xlu0 %3986  ;;  %4510 = vmax.xlane.f32.xlu1 %v4509_v4 }
 0xda7   :  { %v3991_v62 = vsub.f32 %v11043_v35, %v3987_v39 }
 0xda8   :  { %v4620_v10 = vpop.f32.mrb[120].mxu0  ;;  %v3990_v25 = vpop.xlane.xlu1 %3989 }
 0xda9   :  { %v3993_v9 = vmul.f32 1.442695, %v3991_v62  ;;  %v11100_v53 = vmul.f32 0.17677669, %v4620_v10  ;;  %v8326_v2 = vpop.f32.mrb[121].mxu0  ;;  %v3992_v10 = vsub.f32 %v11048_v50, %v3990_v25 }
 0xdaa   :  { %v4623_v58 = vpop.f32.mrb[122].mxu0 }
 0xdab   :  { %8998 = vpow2.f32 %v3993_v9  ;;  %v8327_v15 = vpop.f32.mrb[123].mxu0  ;;  %v4629_v16 = vsel %vm441_vm2, %v11100_v53, -inf  ;;  %v3995_v2 = vmul.f32 1.442695, %v3992_v10 }
 0xdac   :  { %4630 = vmax.xlane.f32.xlu0 %v4629_v16 }
 0xdad   :  { %9000 = vpow2.f32 %v3995_v2 }
 0xdb0   :  { %v4744_v28 = vpop.f32.mrb[124].mxu0 }
 0xdb1   :  { %v11104_v55 = vmul.f32 0.17677669, %v4744_v28  ;;  %v8338_v26 = vpop.f32.mrb[125].mxu0 }
 0xdb2   :  { %v4747_v30 = vpop.f32.mrb[126].mxu0 }
 0xdb3   :  { %v8339_v40 = vpop.f32.mrb[127].mxu0  ;;  %v4753_v35 = vsel %vm441_vm2, %v11104_v55, -inf }
 0xdb4   :  { %4754 = vmax.xlane.f32.xlu0 %v4753_v35  ;;  %v11135_v35 = vmul.f32 0.17677669, %v4623_v58 }
 0xdb5   :  { %v11108_v56 = vpop.eup %8998 }
 0xdb6   :  { %v3997_v42 = vsel %vm441_vm2, %v11108_v56, 0.0 }
 0xdb7   :  { %5174 = vrot.lane.b32.xlu1 %v10900_v34, %s9257_s28 }
 0xdb8   :  { %v4867_v51 = vpop.f32.mrb[128].mxu0  ;;  %3998 = vadd.xlane.f32.xlu0 %v3997_v42 }
 0xdb9   :  { %v11114_v11 = vmul.f32 0.17677669, %v4867_v51  ;;  %v8350_v6 = vpop.f32.mrb[129].mxu0 }
 0xdba   :  { %v4870_v60 = vpop.f32.mrb[130].mxu0 }
 0xdbb   :  { %v8351_v31 = vpop.f32.mrb[131].mxu0  ;;  %v4876_v32 = vsel %vm441_vm2, %v11114_v11, -inf }
 0xdbc   :  { %4877 = vmax.xlane.f32.xlu0 %v4876_v32  ;;  %v11139_v31 = vmul.f32 0.17677669, %v4747_v30  ;;  %v4632_v32 = vsel %vm441_vm2, %v11135_v35, -inf }
 0xdbe   :  { %v4756_v58 = vsel %vm441_vm2, %v11139_v31, -inf }
 0xdc0   :  { %v5018_v47 = vpop.f32.mrb[132].mxu0 }
 0xdc1   :  { %v11120_v61 = vmul.f32 0.17677669, %v5018_v47  ;;  %v8362_v24 = vpop.f32.mrb[133].mxu0 }
 0xdc2   :  { %v5021_v17 = vpop.f32.mrb[134].mxu0 }
 0xdc3   :  { %v8363_v0 = vpop.f32.mrb[135].mxu0  ;;  %v5027_v45 = vsel %vm441_vm2, %v11120_v61, -inf }
 0xdc4   :  { %5028 = vmax.xlane.f32.xlu0 %v5027_v45  ;;  %v11147_v0 = vpop.eup %9000 }
 0xdc8   :  { %v5141_v41 = vpop.f32.mrb[136].mxu0 }
 0xdc9   :  { %v11126_v29 = vmul.f32 0.17677669, %v5141_v41  ;;  %v8374_v33 = vpop.f32.mrb[137].mxu0 }
 0xdca   :  { %v5144_v4 = vpop.f32.mrb[138].mxu0  ;;  %v11151_v33 = vmul.f32 0.17677669, %v4870_v60 }
 0xdcb   :  { %v8375_v39 = vpop.f32.mrb[139].mxu0  ;;  %v5150_v62 = vsel %vm441_vm2, %v11126_v29, -inf }
 0xdcc   :  { %5151 = vmax.xlane.f32.xlu0 %v5150_v62  ;;  %v4000_v39 = vsel %vm441_vm2, %v11147_v0, 0.0  ;;  %v4879_v2 = vsel %vm441_vm2, %v11151_v33, -inf }
 0xdd0   :  { %v5265_v9 = vpop.f32.mrb[140].mxu0 }
 0xdd1   :  { %v11131_v15 = vmul.f32 0.17677669, %v5265_v9  ;;  %v8386_v16 = vpop.f32.mrb[141].mxu0  ;;  %v11157_v9 = vmul.f32 0.17677669, %v5021_v17 }
 0xdd2   :  { %v5268_v28 = vpop.f32.mrb[142].mxu0 }
 0xdd3   :  { %v8387_v26 = vpop.f32.mrb[143].mxu0  ;;  %v5274_v40 = vsel %vm441_vm2, %v11131_v15, -inf }
 0xdd4   :  { %5275 = vmax.xlane.f32.xlu0 %v5274_v40  ;;  %v11163_v40 = vmul.f32 0.17677669, %v5144_v4 }
 0xdd8   :  { %v5388_v42 = vpop.f32.mrb[144].mxu0 }
 0xdd9   :  { %v11137_v51 = vmul.f32 0.17677669, %v5388_v42  ;;  %v8398_v6 = vpop.f32.mrb[145].mxu0 }
 0xdda   :  { %v5391_v50 = vpop.f32.mrb[146].mxu0  ;;  %v5030_v6 = vsel %vm441_vm2, %v11157_v9, -inf }
 0xddb   :  { %v8399_v47 = vpop.f32.mrb[147].mxu0  ;;  %4633 = vmax.xlane.f32.xlu1 %v4632_v32  ;;  %v5397_v24 = vsel %vm441_vm2, %v11137_v51, -inf }
 0xddc   :  { %5398 = vmax.xlane.f32.xlu0 %v5397_v24  ;;  %v11169_v47 = vmul.f32 0.17677669, %v5268_v28  ;;  %v5153_v24 = vsel %vm441_vm2, %v11163_v40, -inf }
 0xddf   :  { %4757 = vmax.xlane.f32.xlu1 %v4756_v58 }
 0xde0   :  { %v5539_v45 = vpop.f32.mrb[148].mxu0 }
 0xde1   :  { %v11149_v41 = vmul.f32 0.17677669, %v5539_v45  ;;  %v8410_v30 = vpop.f32.mrb[149].mxu0 }
 0xde2   :  { %v5542_v25 = vpop.f32.mrb[150].mxu0  ;;  %v11175_v30 = vmul.f32 0.17677669, %v5391_v50 }
 0xde3   :  { %v8411_v62 = vpop.f32.mrb[151].mxu0  ;;  %4001 = vadd.xlane.f32.xlu1 %v4000_v39  ;;  %v5548_v10 = vsel %vm441_vm2, %v11149_v41, -inf }
 0xde4   :  { %5549 = vmax.xlane.f32.xlu0 %v5548_v10  ;;  %v5277_v62 = vsel %vm441_vm2, %v11169_v47, -inf }
 0xde7   :  { %4880 = vmax.xlane.f32.xlu1 %v4879_v2  ;;  %v11181_v2 = vmul.f32 0.17677669, %v5542_v25 }
 0xde8   :  { %v5662_v16 = vpop.f32.mrb[152].mxu0 }
 0xde9   :  { %v11161_v26 = vmul.f32 0.17677669, %v5662_v16  ;;  %v8422_v60 = vpop.f32.mrb[153].mxu0  ;;  %v5400_v16 = vsel %vm441_vm2, %v11175_v30, -inf }
 0xdea   :  { %v5665_v42 = vpop.f32.mrb[154].mxu0 }
 0xdeb   :  { %v8423_v32 = vpop.f32.mrb[155].mxu0  ;;  %5031 = vmax.xlane.f32.xlu1 %v5030_v6  ;;  %v5671_v17 = vsel %vm441_vm2, %v11161_v26, -inf }
 0xdec   :  { %5672 = vmax.xlane.f32.xlu0 %v5671_v17  ;;  %v11187_v32 = vmul.f32 0.17677669, %v5665_v42 }
 0xdef   :  { %5154 = vmax.xlane.f32.xlu1 %v5153_v24  ;;  %v5551_v24 = vsel %vm441_vm2, %v11181_v2, -inf }
 0xdf0   :  { %v5786_v58 = vpop.f32.mrb[156].mxu0 }
 0xdf1   :  { %v11173_v45 = vmul.f32 0.17677669, %v5786_v58  ;;  %v8434_v4 = vpop.f32.mrb[157].mxu0 }
 0xdf2   :  { %v5789_v39 = vpop.f32.mrb[158].mxu0 }
 0xdf3   :  { %v8435_v10 = vpop.f32.mrb[159].mxu0  ;;  %5278 = vmax.xlane.f32.xlu1 %v5277_v62  ;;  %v5795_v28 = vsel %vm441_vm2, %v11173_v45, -inf  ;;  %v11193_v4 = vmul.f32 0.17677669, %v5789_v39  ;;  %v5674_v62 = vsel %vm441_vm2, %v11187_v32, -inf }
 0xdf4   :  { %5796 = vmax.xlane.f32.xlu0 %v5795_v28 }
 0xdf5   :  { %v5798_v42 = vsel %vm441_vm2, %v11193_v4, -inf }
 0xdf7   :  { %5401 = vmax.xlane.f32.xlu1 %v5400_v16 }
 0xdf8   :  { %v5909_v60 = vpop.f32.mrb[160].mxu0 }
 0xdf9   :  { %v11185_v6 = vmul.f32 0.17677669, %v5909_v60  ;;  %v8446_v50 = vpop.f32.mrb[161].mxu0 }
 0xdfa   :  { %v5912_v17 = vpop.f32.mrb[162].mxu0 }
 0xdfb   :  { %v8447_v58 = vpop.f32.mrb[163].mxu0  ;;  %5552 = vmax.xlane.f32.xlu1 %v5551_v24  ;;  %v5918_v25 = vsel %vm441_vm2, %v11185_v6, -inf  ;;  %v11197_v10 = vmul.f32 0.17677669, %v5912_v17 }
 0xdfc   :  { %5919 = vmax.xlane.f32.xlu0 %v5918_v25 }
 0xdfd   :  { %v5921_v28 = vsel %vm441_vm2, %v11197_v10, -inf }
 0xdff   :  { %5675 = vmax.xlane.f32.xlu1 %v5674_v62 }
 0xe03   :  { %5799 = vmax.xlane.f32.xlu1 %v5798_v42 }
 0xe07   :  { %5922 = vmax.xlane.f32.xlu1 %v5921_v28 }
 0xe19   :  { %v4110_v16 = vpop.xlane.xlu0 %4109 }
 0xe1a   :  { %v4114_v60 = vsub.f32 %v11059_v44, %v4110_v16 }
 0xe1c   :  { %v4116_v50 = vmul.f32 1.442695, %v4114_v60 }
 0xe1d   :  { %v4113_v39 = vpop.xlane.xlu0 %4112 }
 0xe1e   :  { %9002 = vpow2.f32 %v4116_v50  ;;  %v4115_v24 = vsub.f32 %v11061_v36, %v4113_v39 }
 0xe20   :  { %v4118_v58 = vmul.f32 1.442695, %v4115_v24 }
 0xe21   :  { %v4234_v25 = vpop.xlane.xlu0 %4233 }
 0xe22   :  { %9004 = vpow2.f32 %v4118_v58  ;;  %v4238_v17 = vsub.f32 %v11069_v49, %v4234_v25 }
 0xe23   :  { %v4237_v62 = vpop.xlane.xlu1 %4236 }
 0xe24   :  { %v4240_v59 = vmul.f32 1.442695, %v4238_v17  ;;  %v4239_v42 = vsub.f32 %v11071_v7, %v4237_v62 }
 0xe26   :  { %9006 = vpow2.f32 %v4240_v59  ;;  %v4242_v21 = vmul.f32 1.442695, %v4239_v42 }
 0xe28   :  { %v11207_v28 = vpop.eup %9002  ;;  %9008 = vpow2.f32 %v4242_v21 }
 0xe29   :  { %v4357_v44 = vpop.xlane.xlu0 %4356  ;;  %v4120_v16 = vsel %vm441_vm2, %v11207_v28, 0.0 }
 0xe2a   :  { %v4361_v36 = vsub.f32 %v11079_v52, %v4357_v44  ;;  %4121 = vadd.xlane.f32.xlu0 %v4120_v16 }
 0xe2b   :  { %v4360_v60 = vpop.xlane.xlu1 %4359 }
 0xe2c   :  { %v11212_v50 = vpop.eup %9004  ;;  %v4363_v49 = vmul.f32 1.442695, %v4361_v36  ;;  %v4362_v39 = vsub.f32 %v11081_v5, %v4360_v60 }
 0xe2d   :  { %v4123_v59 = vsel %vm441_vm2, %v11212_v50, 0.0 }
 0xe2e   :  { %9010 = vpow2.f32 %v4363_v49  ;;  %v4365_v7 = vmul.f32 1.442695, %v4362_v39  ;;  %4124 = vadd.xlane.f32.xlu1 %v4123_v59 }
 0xe30   :  { %v11217_v21 = vpop.eup %9006  ;;  %9012 = vpow2.f32 %v4365_v7 }
 0xe31   :  { %v4508_v24 = vpop.xlane.xlu0 %4507  ;;  %v4244_v52 = vsel %vm441_vm2, %v11217_v21, 0.0 }
 0xe32   :  { %v11221_v58 = vpop.eup %9008  ;;  %v4512_v25 = vsub.f32 %v11089_v38, %v4508_v24  ;;  %4245 = vadd.xlane.f32.xlu0 %v4244_v52 }
 0xe33   :  { %v4511_v17 = vpop.xlane.xlu1 %4510  ;;  %v4247_v5 = vsel %vm441_vm2, %v11221_v58, 0.0 }
 0xe34   :  { %v4514_v62 = vmul.f32 1.442695, %v4512_v25  ;;  %v4513_v42 = vsub.f32 %v11093_v14, %v4511_v17  ;;  %4248 = vadd.xlane.f32.xlu1 %v4247_v5 }
 0xe36   :  { %9014 = vpow2.f32 %v4514_v62  ;;  %v4516_v44 = vmul.f32 1.442695, %v4513_v42 }
 0xe37   :  { %v11251_v42 = vpop.permute.xlu1 %5174 }
 0xe38   :  { %v11227_v16 = vpop.eup %9010  ;;  %9016 = vpow2.f32 %v4516_v44 }
 0xe39   :  { %v4631_v36 = vpop.xlane.xlu0 %4630  ;;  %v4367_v60 = vsel %vm441_vm2, %v11227_v16, 0.0 }
 0xe3a   :  { %v11231_v49 = vpop.eup %9012  ;;  %v4635_v38 = vsub.f32 %v11100_v53, %v4631_v36  ;;  %4368 = vadd.xlane.f32.xlu0 %v4367_v60 }
 0xe3b   :  { %v4370_v39 = vsel %vm441_vm2, %v11231_v49, 0.0 }
 0xe3c   :  { %v4637_v59 = vmul.f32 1.442695, %v4635_v38  ;;  %4371 = vadd.xlane.f32.xlu1 %v4370_v39 }
 0xe3e   :  { %9018 = vpow2.f32 %v4637_v59 }
 0xe40   :  { %v11236_v14 = vpop.eup %9014 }
 0xe41   :  { %v4518_v7 = vsel %vm441_vm2, %v11236_v14, 0.0  ;;  %v4755_v17 = vpop.xlane.xlu0 %4754 }
 0xe42   :  { %v11240_v24 = vpop.eup %9016  ;;  %4519 = vadd.xlane.f32.xlu0 %v4518_v7  ;;  %v4759_v5 = vsub.f32 %v11104_v55, %v4755_v17 }
 0xe43   :  { %v4521_v52 = vsel %vm441_vm2, %v11240_v24, 0.0 }
 0xe44   :  { %4522 = vadd.xlane.f32.xlu1 %v4521_v52  ;;  %v4761_v44 = vmul.f32 1.442695, %v4759_v5 }
 0xe45   :  { %v3999_v62 = vpop.xlane.xlu0 %3998 }
 0xe46   :  { %9020 = vpow2.f32 %v4761_v44 }
 0xe48   :  { %v11244_v53 = vpop.eup %9018 }
 0xe49   :  { %v4641_v25 = vsel %vm441_vm2, %v11244_v53, 0.0  ;;  %v4878_v36 = vpop.xlane.xlu0 %4877 }
 0xe4a   :  { %4642 = vadd.xlane.f32.xlu1 %v4641_v25  ;;  %v4882_v39 = vsub.f32 %v11114_v11, %v4878_v36 }
 0xe4c   :  { %v4884_v25 = vmul.f32 1.442695, %v4882_v39 }
 0xe50   :  { %v11256_v17 = vpop.eup %9020 }
 0xe51   :  { %v5029_v20 = vpop.xlane.xlu0 %5028  ;;  %v4765_v36 = vsel %vm441_vm2, %v11256_v17, 0.0 }
 0xe52   :  { %v5033_v5 = vsub.f32 %v11120_v61, %v5029_v20 }
 0xe58   :  { %5297 = vrot.lane.b32.xlu0 %v10900_v34, %s9259_s0 }
 0xe68   :  { %v4634_v60 = vpop.xlane.xlu1 %4633 }
 0xe69   :  { %v4636_v38 = vsub.f32 %v11135_v35, %v4634_v60  ;;  %v5152_v35 = vpop.xlane.xlu0 %5151  ;;  %v5035_v60 = vmul.f32 1.442695, %v5033_v5 }
 0xe6b   :  { %v4639_v59 = vmul.f32 1.442695, %v4636_v38 }
 0xe6c   :  { %v4758_v7 = vpop.xlane.xlu1 %4757 }
 0xe6d   :  { %9022 = vpow2.f32 %v4639_v59  ;;  %v4760_v52 = vsub.f32 %v11139_v31, %v4758_v7  ;;  %v5276_v38 = vpop.xlane.xlu0 %5275 }
 0xe6e   :  { %9024 = vrcp.f32 %v3999_v62 }
 0xe6f   :  { %v4763_v8 = vmul.f32 1.442695, %v4760_v52 }
 0xe70   :  { %v4002_v55 = vpop.xlane.xlu1 %4001 }
 0xe71   :  { %9026 = vpow2.f32 %v4763_v8  ;;  %v5399_v7 = vpop.xlane.xlu0 %5398 }
 0xe72   :  { %9028 = vrcp.f32 %v4002_v55 }
 0xe73   :  { %9030 = vpow2.f32 %v4884_v25 }
 0xe74   :  { %v4881_v44 = vpop.xlane.xlu1 %4880 }
 0xe75   :  { %v4883_v11 = vsub.f32 %v11151_v33, %v4881_v44  ;;  %v5156_v33 = vsub.f32 %v11126_v29, %v5152_v35  ;;  %v5280_v35 = vsub.f32 %v11131_v15, %v5276_v38 }
 0xe77   :  { %v11262_v31 = vpop.eup %9022  ;;  %v4886_v62 = vmul.f32 1.442695, %v4883_v11  ;;  %4766 = vadd.xlane.f32.xlu0 %v4765_v36  ;;  %v5158_v29 = vmul.f32 1.442695, %v5156_v33 }
 0xe78   :  { %v5032_v8 = vpop.xlane.xlu1 %5031  ;;  %v4644_v39 = vsel %vm441_vm2, %v11262_v31, 0.0  ;;  %v9025_v61 = vpop.eup %9024 }
 0xe79   :  { %9032 = vpow2.f32 %v4886_v62  ;;  %v5034_v20 = vsub.f32 %v11157_v9, %v5032_v8  ;;  %4645 = vadd.xlane.f32.xlu1 %v4644_v39  ;;  %v4005_v11 = vmul.f32 %v9025_v61, %v11108_v56 }
 0xe7a   :  { %9034 = vpow2.f32 %v5035_v60  ;;  %v5550_v60 = vpop.xlane.xlu0 %5549 }
 0xe7b   :  { %v11268_v59 = vpop.eup %9026  ;;  %v5037_v52 = vmul.f32 1.442695, %v5034_v20 }
 0xe7c   :  { %v9029_v25 = vpop.eup %9028  ;;  %v5155_v55 = vpop.xlane.xlu1 %5154  ;;  %v4768_v5 = vsel %vm441_vm2, %v11268_v59, 0.0 }
 0xe7d   :  { %v11272_v44 = vpop.eup %9030  ;;  %v4006_v9 = vmul.f32 %v9029_v25, %v11147_v0  ;;  %v5157_v36 = vsub.f32 %v11163_v40, %v5155_v55  ;;  %4769 = vadd.xlane.f32.xlu1 %v4768_v5  ;;  %9036 = vpow2.f32 %v5037_v52  ;;  %v5282_v0 = vmul.f32 1.442695, %v5280_v35 }
 0xe7e   :  { %v4888_v20 = vsel %vm441_vm2, %v11272_v44, 0.0  ;;  %v5403_v40 = vsub.f32 %v11137_v51, %v5399_v7  ;;  %v5673_v38 = vpop.xlane.xlu0 %5672  ;;  %v5554_v55 = vsub.f32 %v11149_v41, %v5550_v60 }
 0xe7f   :  { %v5160_v62 = vmul.f32 1.442695, %v5157_v36  ;;  %v4007_v8 = vpack.c.bf16 %v4006_v9, %v4005_v11 }
 0xe80   :  { %v5279_v39 = vpop.xlane.xlu1 %5278  ;;  %v5405_v25 = vmul.f32 1.442695, %v5403_v40 }
 0xe81   :  { %9038 = vpow2.f32 %v5160_v62  ;;  %8271 = vmatmul.mubr.msk.bf16.vlgmr.msra.gmra.mrb[116].mxu1 %vm441_vm2, %v4007_v8  ;;  %v5281_v56 = vsub.f32 %v11169_v47, %v5279_v39  ;;  %4889 = vadd.xlane.f32.xlu1 %v4888_v20 }
 0xe82   :  { %8281 = vmatpush3.bf16.msra.mxu1 %v11067_v18  ;;  %8282 = vmatprep.mubr.msk.bf16.mxu1 %vm9256_vm0, %v12225_v57  ;;  %9040 = vpow2.f32 %v5158_v29  ;;  %v5797_v5 = vpop.xlane.xlu0 %5796 }
 0xe83   :  { %v11285_v15 = vpop.eup %9032  ;;  %v5284_v61 = vmul.f32 1.442695, %v5281_v56  ;;  %8292 = vmatprep.subr.bf16.mxu1 %v12225_v57  ;;  %v5801_v36 = vsub.f32 %v11173_v45, %v5797_v5  ;;  %v5677_v56 = vsub.f32 %v11161_v26, %v5673_v38 }
 0xe84   :  { %v5402_v33 = vpop.xlane.xlu1 %5401  ;;  %v4891_v47 = vsel %vm441_vm2, %v11285_v15, 0.0  ;;  %v11291_v52 = vpop.eup %9034 }
 0xe85   :  { %9042 = vpow2.f32 %v5284_v61  ;;  %v5404_v18 = vsub.f32 %v11175_v30, %v5402_v33  ;;  %4892 = vadd.xlane.f32.xlu1 %v4891_v47  ;;  %v5039_v11 = vsel %vm441_vm2, %v11291_v52, 0.0  ;;  %v5556_v30 = vmul.f32 1.442695, %v5554_v55 }
 0xe86   :  { %9044 = vpow2.f32 %v5282_v0  ;;  %v5803_v45 = vmul.f32 1.442695, %v5801_v36 }
 0xe87   :  { %v5407_v51 = vmul.f32 1.442695, %v5404_v18  ;;  %v11297_v9 = vpop.eup %9036  ;;  %v5679_v18 = vmul.f32 1.442695, %v5677_v56 }
 0xe88   :  { %v5553_v7 = vpop.xlane.xlu1 %5552  ;;  %v5042_v41 = vsel %vm441_vm2, %v11297_v9, 0.0 }
 0xe89   :  { %9046 = vpow2.f32 %v5407_v51  ;;  %5040 = vadd.xlane.f32.xlu1 %v5039_v11  ;;  %v5555_v35 = vsub.f32 %v11181_v2, %v5553_v7 }
 0xe8a   :  { %9048 = vpow2.f32 %v5405_v25 }
 0xe8b   :  { %v11300_v29 = vpop.eup %9038  ;;  %9050 = vpow2.f32 %v5556_v30  ;;  %v5558_v2 = vmul.f32 1.442695, %v5555_v35 }
 0xe8c   :  { %v5676_v62 = vpop.xlane.xlu1 %5675  ;;  %v5165_v60 = vsel %vm441_vm2, %v11300_v29, 0.0  ;;  %v11307_v8 = vpop.eup %9040 }
 0xe8d   :  { %v5678_v39 = vsub.f32 %v11187_v32, %v5676_v62  ;;  %5043 = vadd.xlane.f32.xlu1 %v5042_v41  ;;  %5166 = vadd.xlane.f32.xlu0 %v5165_v60  ;;  %v5162_v61 = vsel %vm441_vm2, %v11307_v8, 0.0 }
 0xe8f   :  { %v11310_v20 = vpop.eup %9042  ;;  %v5681_v0 = vmul.f32 1.442695, %v5678_v39 }
 0xe90   :  { %v5800_v40 = vpop.xlane.xlu1 %5799  ;;  %v5289_v33 = vsel %vm441_vm2, %v11310_v20, 0.0  ;;  %v11317_v47 = vpop.eup %9044 }
 0xe91   :  { %9052 = vpow2.f32 %v5681_v0  ;;  %5163 = vadd.xlane.f32.xlu1 %v5162_v61  ;;  %5290 = vadd.xlane.f32.xlu0 %v5289_v33  ;;  %v5802_v26 = vsub.f32 %v11193_v4, %v5800_v40  ;;  %v5286_v38 = vsel %vm441_vm2, %v11317_v47, 0.0 }
 0xe92   :  { %9054 = vpow2.f32 %v5803_v45 }
 0xe93   :  { %v11319_v32 = vpop.eup %9046  ;;  %9056 = vpow2.f32 %v5558_v2  ;;  %v5805_v5 = vmul.f32 1.442695, %v5802_v26  ;;  %v5920_v2 = vpop.xlane.xlu0 %5919 }
 0xe94   :  { %v5412_v25 = vsel %vm441_vm2, %v11319_v32, 0.0  ;;  %v11326_v55 = vpop.eup %9048  ;;  %9058 = vpow2.f32 %v5679_v18  ;;  %v5923_v0 = vpop.xlane.xlu1 %5922 }
 0xe95   :  { %5287 = vadd.xlane.f32.xlu1 %v5286_v38  ;;  %5413 = vadd.xlane.f32.xlu0 %v5412_v25  ;;  %v5409_v51 = vsel %vm441_vm2, %v11326_v55, 0.0  ;;  %v11330_v7 = vpop.eup %9050  ;;  %9060 = vpow2.f32 %v5805_v5  ;;  %v5925_v38 = vsub.f32 %v11197_v10, %v5923_v0 }
 0xe96   :  { %v5560_v36 = vsel %vm441_vm2, %v11330_v7, 0.0 }
 0xe99   :  { %5410 = vadd.xlane.f32.xlu1 %v5409_v51 }
 0xe9b   :  { %v11332_v11 = vpop.eup %9052 }
 0xe9c   :  { %v11334_v4 = vpop.eup %9054  ;;  %v5686_v30 = vsel %vm441_vm2, %v11332_v11, 0.0 }
 0xe9d   :  { %v11340_v35 = vpop.eup %9056  ;;  %5561 = vadd.xlane.f32.xlu1 %v5560_v36  ;;  %5687 = vadd.xlane.f32.xlu0 %v5686_v30  ;;  %v5807_v41 = vsel %vm441_vm2, %v11334_v4, 0.0  ;;  %v5924_v30 = vsub.f32 %v11185_v6, %v5920_v2 }
 0xe9e   :  { %v5563_v62 = vsel %vm441_vm2, %v11340_v35, 0.0  ;;  %v11346_v60 = vpop.eup %9058 }
 0xe9f   :  { %v5683_v39 = vsel %vm441_vm2, %v11346_v60, 0.0  ;;  %v11350_v45 = vpop.eup %9060 }
 0xea0   :  { %v5810_v56 = vsel %vm441_vm2, %v11350_v45, 0.0 }
 0xea1   :  { %5564 = vadd.xlane.f32.xlu1 %v5563_v62  ;;  %5808 = vadd.xlane.f32.xlu0 %v5807_v41  ;;  %v5928_v62 = vmul.f32 1.442695, %v5925_v38 }
 0xea5   :  { %5684 = vadd.xlane.f32.xlu1 %v5683_v39 }
 0xea9   :  { %5811 = vadd.xlane.f32.xlu1 %v5810_v56 }
 0xeb7   :  { %v4122_v40 = vpop.xlane.xlu0 %4121  ;;  %5695 = vrot.lane.b32.xlu0 %v10898_v12, %s9257_s28 }
 0xeb8   :  { %9062 = vrcp.f32 %v4122_v40 }
 0xeba   :  { %5420 = vrot.lane.b32.xlu1 %v10900_v34, %s12254_s27 }
 0xebb   :  { %5818 = vrot.lane.b32.xlu0 %v10898_v12, %s9259_s0  ;;  %v4125_v61 = vpop.xlane.xlu1 %4124 }
 0xebc   :  { %9064 = vrcp.f32 %v4125_v61  ;;  %v5926_v61 = vmul.f32 1.442695, %v5924_v30 }
 0xebf   :  { %v4246_v33 = vpop.xlane.xlu0 %4245 }
 0xec0   :  { %9066 = vrcp.f32 %v4246_v33 }
 0xec1   :  { %v4249_v18 = vpop.xlane.xlu1 %4248 }
 0xec2   :  { %9068 = vrcp.f32 %v4249_v18  ;;  %v9063_v26 = vpop.eup %9062 }
 0xec3   :  { %v4128_v5 = vmul.f32 %v9063_v26, %v11207_v28 }
 0xec6   :  { %v9065_v25 = vpop.eup %9064 }
 0xec7   :  { %v4129_v51 = vmul.f32 %v9065_v25, %v11212_v50  ;;  %v4369_v36 = vpop.xlane.xlu0 %4368 }
 0xec8   :  { %9070 = vrcp.f32 %v4369_v36 }
 0xec9   :  { %v4372_v41 = vpop.xlane.xlu1 %4371  ;;  %v4130_v39 = vpack.c.bf16 %v4129_v51, %v4128_v5 }
 0xeca   :  { %9072 = vrcp.f32 %v4372_v41  ;;  %v9067_v56 = vpop.eup %9066 }
 0xecb   :  { %8283 = vmatmul.mubr.msk.bf16.vlgmr.msra.gmra.mrb[120].mxu1 %vm441_vm2, %v4130_v39  ;;  %9074 = vpow2.f32 %v5928_v62  ;;  %v4252_v6 = vmul.f32 %v9067_v56, %v11217_v21 }
 0xecc   :  { %v9069_v40 = vpop.eup %9068  ;;  %8293 = vmatpush3.bf16.msra.mxu1 %v11118_v46  ;;  %8294 = vmatprep.mubr.msk.bf16.mxu1 %vm9256_vm0, %v12225_v57  ;;  %9076 = vpow2.f32 %v5926_v61 }
 0xecd   :  { %v4253_v10 = vmul.f32 %v9069_v40, %v11221_v58  ;;  %8304 = vmatprep.subr.bf16.mxu1 %v12225_v57 }
 0xecf   :  { %v4520_v28 = vpop.xlane.xlu0 %4519  ;;  %v4254_v2 = vpack.c.bf16 %v4253_v10, %v4252_v6 }
 0xed0   :  { %9078 = vrcp.f32 %v4520_v28 }
 0xed1   :  { %v4523_v50 = vpop.xlane.xlu1 %4522 }
 0xed2   :  { %9080 = vrcp.f32 %v4523_v50  ;;  %v9071_v0 = vpop.eup %9070 }
 0xed3   :  { %8295 = vmatmul.mubr.msk.bf16.vlgmr.msra.gmra.mrb[124].mxu1 %vm441_vm2, %v4254_v2  ;;  %v4375_v58 = vmul.f32 %v9071_v0, %v11227_v16 }
 0xed4   :  { %v9073_v33 = vpop.eup %9072  ;;  %8305 = vmatpush3.bf16.msra.mxu1 %v11077_v1  ;;  %8306 = vmatprep.mubr.msk.bf16.mxu1 %vm9256_vm0, %v12225_v57 }
 0xed5   :  { %v4376_v46 = vmul.f32 %v9073_v33, %v11231_v49  ;;  %8316 = vmatprep.subr.bf16.mxu1 %v12225_v57  ;;  %v11377_v21 = vpop.eup %9074 }
 0xed6   :  { %v5933_v18 = vsel %vm441_vm2, %v11377_v21, 0.0  ;;  %v11382_v38 = vpop.eup %9076 }
 0xed7   :  { %v4377_v26 = vpack.c.bf16 %v4376_v46, %v4375_v58  ;;  %v5930_v16 = vsel %vm441_vm2, %v11382_v38, 0.0 }
 0xeda   :  { %5934 = vadd.xlane.f32.xlu0 %v5933_v18  ;;  %v9079_v25 = vpop.eup %9078 }
 0xedb   :  { %8307 = vmatmul.mubr.msk.bf16.vlgmr.msra.gmra.mrb[128].mxu1 %vm441_vm2, %v4377_v26  ;;  %v4526_v5 = vmul.f32 %v9079_v25, %v11236_v14 }
 0xedc   :  { %v9081_v1 = vpop.eup %9080  ;;  %8317 = vmatpush3.bf16.msra.mxu1 %v10880_v48  ;;  %8318 = vmatprep.mubr.msk.bf16.mxu1 %vm9256_vm0, %v12225_v57  ;;  %v4643_v48 = vpop.xlane.xlu1 %4642 }
 0xedd   :  { %v4527_v49 = vmul.f32 %v9081_v1, %v11240_v24  ;;  %8328 = vmatprep.subr.bf16.mxu1 %v12225_v57  ;;  %9082 = vrcp.f32 %v4643_v48  ;;  %v11400_v24 = vpop.permute.xlu0 %5297 }
 0xede   :  { %5931 = vadd.xlane.f32.xlu1 %v5930_v16 }
 0xedf   :  { %v4528_v51 = vpack.c.bf16 %v4527_v49, %v4526_v5 }
 0xee3   :  { %8319 = vmatmul.mubr.msk.bf16.vlgmr.msra.gmra.mrb[132].mxu1 %vm441_vm2, %v4528_v51 }
 0xee4   :  { %8329 = vmatpush3.bf16.msra.mxu1 %v11085_v27  ;;  %8330 = vmatprep.mubr.msk.bf16.mxu1 %vm9256_vm0, %v12225_v57 }
 0xee5   :  { %8340 = vmatprep.subr.bf16.mxu1 %v12225_v57 }
 0xee7   :  { %v9083_v27 = vpop.eup %9082 }
 0xee8   :  { %v4649_v39 = vmul.f32 %v9083_v27, %v11244_v53 }
 0xef0   :  { %5941 = vrot.lane.b32.xlu0 %v10898_v12, %s12254_s27 }
 0xf04   :  { %v4767_v14 = vpop.xlane.xlu0 %4766 }
 0xf06   :  { %v4646_v36 = vpop.xlane.xlu1 %4645 }
 0xf07   :  { %9084 = vrcp.f32 %v4646_v36 }
 0xf0a   :  { %v4770_v30 = vpop.xlane.xlu1 %4769 }
 0xf0b   :  { %9086 = vrcp.f32 %v4770_v30 }
 0xf0c   :  { %9088 = vrcp.f32 %v4767_v14 }
 0xf0e   :  { %v4890_v62 = vpop.xlane.xlu1 %4889 }
 0xf11   :  { %v9085_v41 = vpop.eup %9084 }
 0xf12   :  { %v4650_v56 = vmul.f32 %v9085_v41, %v11262_v31  ;;  %v4893_v40 = vpop.xlane.xlu1 %4892 }
 0xf13   :  { %9090 = vrcp.f32 %v4893_v40 }
 0xf14   :  { %v4651_v61 = vpack.c.bf16 %v4650_v56, %v4649_v39  ;;  %9092 = vrcp.f32 %v4890_v62 }
 0xf15   :  { %v9087_v10 = vpop.eup %9086 }
 0xf16   :  { %8331 = vmatmul.mubr.msk.bf16.vlgmr.msra.gmra.mrb[136].mxu1 %vm441_vm2, %v4651_v61  ;;  %v5041_v6 = vpop.xlane.xlu1 %5040  ;;  %v9089_v28 = vpop.eup %9088  ;;  %v4774_v50 = vmul.f32 %v9087_v10, %v11268_v59 }
 0xf17   :  { %8341 = vmatpush3.bf16.msra.mxu1 %v11124_v3  ;;  %8342 = vmatprep.mubr.msk.bf16.mxu1 %vm9256_vm0, %v12225_v57  ;;  %v4773_v53 = vmul.f32 %v9089_v28, %v11256_v17 }
 0xf18   :  { %8352 = vmatprep.subr.bf16.mxu1 %v12225_v57 }
 0xf19   :  { %v4775_v2 = vpack.c.bf16 %v4774_v50, %v4773_v53 }
 0xf1a   :  { %v5044_v31 = vpop.xlane.xlu1 %5043  ;;  %v5167_v59 = vpop.xlane.xlu0 %5166 }
 0xf1b   :  { %9094 = vrcp.f32 %v5044_v31 }
 0xf1c   :  { %9096 = vrcp.f32 %v5041_v6 }
 0xf1d   :  { %v9091_v0 = vpop.eup %9090 }
 0xf1e   :  { %8343 = vmatmul.mubr.msk.bf16.vlgmr.msra.gmra.mrb[140].mxu1 %vm441_vm2, %v4775_v2  ;;  %v5164_v33 = vpop.xlane.xlu1 %5163  ;;  %v9093_v46 = vpop.eup %9092  ;;  %v4897_v3 = vmul.f32 %v9091_v0, %v11285_v15 }
 0xf1f   :  { %8353 = vmatpush3.bf16.msra.mxu1 %v11091_v19  ;;  %8354 = vmatprep.mubr.msk.bf16.mxu1 %vm9256_vm0, %v12225_v57  ;;  %v4896_v17 = vmul.f32 %v9093_v46, %v11272_v44  ;;  %9098 = vrcp.f32 %v5164_v33  ;;  %v5291_v15 = vpop.xlane.xlu0 %5290 }
 0xf20   :  { %8364 = vmatprep.subr.bf16.mxu1 %v12225_v57  ;;  %9100 = vrcp.f32 %v5167_v59 }
 0xf21   :  { %v4898_v18 = vpack.c.bf16 %v4897_v3, %v4896_v17 }
 0xf22   :  { %v5288_v58 = vpop.xlane.xlu1 %5287 }
 0xf23   :  { %9102 = vrcp.f32 %v5288_v58 }
 0xf24   :  { %9104 = vrcp.f32 %v5291_v15 }
 0xf25   :  { %v9095_v26 = vpop.eup %9094 }
 0xf26   :  { %8355 = vmatmul.mubr.msk.bf16.vlgmr.msra.gmra.mrb[144].mxu1 %vm441_vm2, %v4898_v18  ;;  %v5411_v25 = vpop.xlane.xlu1 %5410  ;;  %v9097_v1 = vpop.eup %9096  ;;  %v5048_v19 = vmul.f32 %v9095_v26, %v11297_v9 }
 0xf27   :  { %8365 = vmatpush3.bf16.msra.mxu1 %v10900_v34  ;;  %8366 = vmatprep.mubr.msk.bf16.mxu1 %vm9256_vm0, %v12225_v57  ;;  %v5047_v44 = vmul.f32 %v9097_v1, %v11291_v52  ;;  %v5414_v9 = vpop.xlane.xlu0 %5413  ;;  %9106 = vrcp.f32 %v5411_v25 }
 0xf28   :  { %8376 = vmatprep.subr.bf16.mxu1 %v12225_v57  ;;  %9108 = vrcp.f32 %v5414_v9 }
 0xf29   :  { %v5049_v16 = vpack.c.bf16 %v5048_v19, %v5047_v44  ;;  %v9099_v5 = vpop.eup %9098 }
 0xf2a   :  { %v5562_v49 = vpop.xlane.xlu1 %5561  ;;  %v9101_v48 = vpop.eup %9100  ;;  %v5170_v34 = vmul.f32 %v9099_v5, %v11307_v8 }
 0xf2b   :  { %v5171_v52 = vmul.f32 %v9101_v48, %v11300_v29  ;;  %v5688_v40 = vpop.xlane.xlu0 %5687 }
 0xf2d   :  { %v5172_v14 = vpack.c.bf16 %v5171_v52, %v5170_v34  ;;  %v9103_v30 = vpop.eup %9102 }
 0xf2e   :  { %8367 = vmatmul.mubr.msk.bf16.vlgmr.msra.gmra.mrb[148].mxu1 %vm441_vm2, %v5049_v16  ;;  %v5565_v51 = vpop.xlane.xlu1 %5564  ;;  %v9105_v62 = vpop.eup %9104 }
 0xf2f   :  { %8377 = vmatpush3.bf16.msra.mxu1 %v11251_v42  ;;  %8378 = vmatprep.mubr.msk.bf16.mxu1 %vm9256_vm0, %v12225_v57  ;;  %v5294_v42 = vmul.f32 %v9103_v30, %v11317_v47  ;;  %v5295_v29 = vmul.f32 %v9105_v62, %v11310_v20  ;;  %9110 = vrcp.f32 %v5565_v51  ;;  %v5809_v6 = vpop.xlane.xlu0 %5808 }
 0xf30   :  { %8388 = vmatprep.subr.bf16.mxu1 %v12225_v57  ;;  %9112 = vrcp.f32 %v5562_v49 }
 0xf31   :  { %v5296_v27 = vpack.c.bf16 %v5295_v29, %v5294_v42  ;;  %v9107_v41 = vpop.eup %9106 }
 0xf32   :  { %v5685_v36 = vpop.xlane.xlu1 %5684  ;;  %v9109_v56 = vpop.eup %9108 }
 0xf33   :  { %v5418_v47 = vmul.f32 %v9109_v56, %v11319_v32  ;;  %9114 = vrcp.f32 %v5685_v36  ;;  %v5696_v53 = vpop.permute.xlu0 %5695  ;;  %v8749_v56 = vld [vmem:[%s12162_s3 + $0x58] sm:$0xff]  }
 0xf34   :  { %9116 = vrcp.f32 %v5688_v40 }
 0xf36   :  { %8379 = vmatmul.mubr.msk.bf16.vlgmr.msra.gmra.mrb[152].mxu1 %vm441_vm2, %v5172_v14  ;;  %v5812_v8 = vpop.xlane.xlu1 %5811 }
 0xf37   :  { %8389 = vmatpush3.bf16.msra.mxu1 %v11400_v24  ;;  %8390 = vmatprep.mubr.msk.bf16.mxu1 %vm9256_vm0, %v12225_v57  ;;  %v5417_v24 = vmul.f32 %v9107_v41, %v11326_v55  ;;  %9118 = vrcp.f32 %v5812_v8  ;;  %v5819_v46 = vpop.permute.xlu0 %5818  ;;  %v8747_v41 = vld [vmem:[%s12162_s3 + $0x48] sm:$0xff]  }
 0xf38   :  { %8400 = vmatprep.subr.bf16.mxu1 %v12225_v57  ;;  %9120 = vrcp.f32 %v5809_v6 }
 0xf39   :  { %v5419_v20 = vpack.c.bf16 %v5418_v47, %v5417_v24  ;;  %v9111_v61 = vpop.eup %9110  ;;  %v8750_v24 = vld [vmem:[%s12162_s3 + $0x60] sm:$0xff]  }
 0xf3a   :  { %v5421_v39 = vpop.permute.xlu1 %5420  ;;  %v9113_v10 = vpop.eup %9112  ;;  %v5569_v55 = vmul.f32 %v9111_v61, %v11340_v35 }
 0xf3b   :  { %v5568_v32 = vmul.f32 %v9113_v10, %v11330_v7  ;;  %v8752_v10 = vld [vmem:[%s12162_s3 + $0x70] sm:$0xff]  }
 0xf3d   :  { %v5570_v28 = vpack.c.bf16 %v5569_v55, %v5568_v32  ;;  %v9115_v50 = vpop.eup %9114 }
 0xf3e   :  { %8391 = vmatmul.mubr.msk.bf16.vlgmr.msra.gmra.mrb[156].mxu1 %vm441_vm2, %v5296_v27  ;;  %v9117_v31 = vpop.eup %9116  ;;  %v8746_v27 = vld [vmem:[%s12162_s3 + $0x40] sm:$0xff]  }
 0xf3f   :  { %8401 = vmatpush3.bf16.msra.mxu1 %v5421_v39  ;;  %8402 = vmatprep.mubr.msk.bf16.mxu1 %vm9256_vm0, %v12225_v57  ;;  %v5692_v35 = vmul.f32 %v9117_v31, %v11332_v11  ;;  %v8748_v39 = vld [vmem:[%s12162_s3 + $0x50] sm:$0xff]  }
 0xf40   :  { %8412 = vmatprep.subr.bf16.mxu1 %v12225_v57  ;;  %8454 = vmatprep.subr.bf16.mxu0 %v8746_v27 }
 0xf41   :  { %v9119_v0 = vpop.eup %9118  ;;  %8455 = vmatpush3.bf16.msra.mxu0 %v8746_v27 }
 0xf42   :  { %v9121_v17 = vpop.eup %9120  ;;  %8456 = vmatprep.subr.bf16.mxu0 %v8747_v41 }
 0xf43   :  { %v5815_v11 = vmul.f32 %v9121_v17, %v11334_v4 }
 0xf45   :  { %8457 = vmatpush3.bf16.msra.mxu0 %v8747_v41 }
 0xf46   :  { %8403 = vmatmul.mubr.msk.bf16.vlgmr.msra.gmra.mrb[160].mxu1 %vm441_vm2, %v5419_v20  ;;  %8458 = vmatprep.subr.bf16.mxu0 %v8748_v39  ;;  %v8751_v20 = vld [vmem:[%s12162_s3 + $0x68] sm:$0xff]  }
 0xf47   :  { %8413 = vmatpush3.bf16.msra.mxu1 %v10898_v12  ;;  %8414 = vmatprep.mubr.msk.bf16.mxu1 %vm9256_vm0, %v12225_v57  ;;  %v5691_v12 = vmul.f32 %v9115_v50, %v11346_v60  ;;  %v5816_v60 = vmul.f32 %v9119_v0, %v11350_v45  ;;  %v8753_v50 = vld [vmem:[%s12162_s3 + $0x78] sm:$0xff]  }
 0xf48   :  { %8424 = vmatprep.subr.bf16.mxu1 %v12225_v57 }
 0xf49   :  { %v5693_v7 = vpack.c.bf16 %v5692_v35, %v5691_v12  ;;  %v5817_v58 = vpack.c.bf16 %v5816_v60, %v5815_v11  ;;  %8459 = vmatpush3.bf16.msra.mxu0 %v8748_v39 }
 0xf4a   :  { %8460 = vmatprep.subr.bf16.mxu0 %v8749_v56 }
 0xf4d   :  { %8461 = vmatpush3.bf16.msra.mxu0 %v8749_v56 }
 0xf4e   :  { %8415 = vmatmul.mubr.msk.bf16.vlgmr.msra.gmra.mrb[164].mxu1 %vm441_vm2, %v5570_v28  ;;  %8462 = vmatprep.subr.bf16.mxu0 %v8750_v24 }
 0xf4f   :  { %8425 = vmatpush3.bf16.msra.mxu1 %v5696_v53  ;;  %8426 = vmatprep.mubr.msk.bf16.mxu1 %vm9256_vm0, %v12225_v57 }
 0xf50   :  { %8436 = vmatprep.subr.bf16.mxu1 %v12225_v57 }
 0xf51   :  { %8463 = vmatpush3.bf16.msra.mxu0 %v8750_v24 }
 0xf52   :  { %8464 = vmatprep.subr.bf16.mxu0 %v8751_v20 }
 0xf54   :  { %v11458_v2 = vpop.f32.mrb[116].mxu1 }
 0xf55   :  { %v8272_v33 = vpop.f32.mrb[117].mxu1  ;;  %8465 = vmatpush3.bf16.msra.mxu0 %v8751_v20 }
 0xf56   :  { %v11460_v3 = vpop.f32.mrb[118].mxu1  ;;  %8427 = vmatmul.mubr.msk.bf16.vlgmr.msra.gmra.mrb[168].mxu1 %vm441_vm2, %v5693_v7  ;;  %8466 = vmatprep.subr.bf16.mxu0 %v8752_v10 }
 0xf57   :  { %v8273_v59 = vpop.f32.mrb[119].mxu1  ;;  %8437 = vmatpush3.bf16.msra.mxu1 %v5819_v46  ;;  %8438 = vmatprep.mubr.msk.bf16.mxu1 %vm9256_vm0, %v12225_v57 }
 0xf58   :  { %8448 = vmatprep.subr.bf16.mxu1 %v12225_v57 }
 0xf59   :  { %8467 = vmatpush3.bf16.msra.mxu0 %v8752_v10 }
 0xf5a   :  { %8468 = vmatprep.subr.bf16.mxu0 %v8753_v50 }
 0xf5d   :  { %8469 = vmatpush3.bf16.msra.mxu0 %v8753_v50 }
 0xf5e   :  { %8439 = vmatmul.mubr.msk.bf16.vlgmr.msra.gmra.mrb[172].mxu1 %vm441_vm2, %v5817_v58 }
 0xf5f   :  { %8450 = vmatprep.mubr.msk.bf16.mxu1 %vm9256_vm0, %v12225_v57 }
 0xf67   :  { %v5935_v18 = vpop.xlane.xlu0 %5934 }
 0xf68   :  { %9122 = vrcp.f32 %v5935_v18 }
 0xf6b   :  { %v5942_v26 = vpop.permute.xlu0 %5941  ;;  %v5932_v25 = vpop.xlane.xlu1 %5931 }
 0xf6c   :  { %9124 = vrcp.f32 %v5932_v25  ;;  %8449 = vmatpush3.bf16.msra.mxu1 %v5942_v26 }
 0xf72   :  { %v9123_v1 = vpop.eup %9122 }
 0xf73   :  { %v5939_v45 = vmul.f32 %v9123_v1, %v11377_v21 }
 0xf76   :  { %v9125_v19 = vpop.eup %9124 }
 0xf77   :  { %v5938_v44 = vmul.f32 %v9125_v19, %v11382_v38 }
 0xf79   :  { %v5940_v15 = vpack.c.bf16 %v5939_v45, %v5938_v44 }
 0xf7b   :  { %8451 = vmatmul.mubr.msk.bf16.vlgmr.msra.gmra.mrb[176].mxu1 %vm441_vm2, %v5940_v15 }
 0xf7c   :  { %6393 = vmatprep.mubr.bf16.mxu1 %v12248_v22 }
 0xf9e   :  { %v4172_v4 = vpop.f32.mrb[120].mxu1 }
 0xf9f   :  { %v8284_v49 = vpop.f32.mrb[121].mxu1 }
 0xfa0   :  { %v4175_v57 = vpop.f32.mrb[122].mxu1 }
 0xfa1   :  { %v8572_v16 = vpack.i.bf16 %v4175_v57, %v4172_v4  ;;  %v8285_v5 = vpop.f32.mrb[123].mxu1 }
 0xfa3   :  { %8573 = vrot.lane.b32.xlu1 %v8572_v16, %s12254_s27 }
 0xfa6   :  { %v4295_v51 = vpop.f32.mrb[124].mxu1 }
 0xfa7   :  { %v8296_v48 = vpop.f32.mrb[125].mxu1 }
 0xfa8   :  { %v4298_v34 = vpop.f32.mrb[126].mxu1 }
 0xfa9   :  { %v8577_v52 = vpack.i.bf16 %v4298_v34, %v4295_v51  ;;  %v8297_v9 = vpop.f32.mrb[127].mxu1 }
 0xfab   :  { %8578 = vrot.lane.b32.xlu0 %v8577_v52, %s9259_s0 }
 0xfae   :  { %v4418_v21 = vpop.f32.mrb[128].mxu1 }
 0xfaf   :  { %v8308_v38 = vpop.f32.mrb[129].mxu1 }
 0xfb0   :  { %v4421_v36 = vpop.f32.mrb[130].mxu1 }
 0xfb1   :  { %v8582_v14 = vpack.i.bf16 %v4421_v36, %v4418_v21  ;;  %v8309_v30 = vpop.f32.mrb[131].mxu1 }
 0xfb3   :  { %8583 = vrot.lane.b32.xlu0 %v8582_v14, %s9257_s28 }
 0xfb6   :  { %v11478_v62 = vpop.f32.mrb[132].mxu1 }
 0xfb7   :  { %v8320_v42 = vpop.f32.mrb[133].mxu1 }
 0xfb8   :  { %v11480_v8 = vpop.f32.mrb[134].mxu1 }
 0xfb9   :  { %v8321_v29 = vpop.f32.mrb[135].mxu1 }
 0xfe9   :  { %v4693_v47 = vpop.f32.mrb[136].mxu1 }
 0xfea   :  { %v8332_v40 = vpop.f32.mrb[137].mxu1 }
 0xfeb   :  { %v4696_v61 = vpop.f32.mrb[138].mxu1 }
 0xfec   :  { %v8587_v6 = vpack.i.bf16 %v4696_v61, %v4693_v47  ;;  %v8333_v55 = vpop.f32.mrb[139].mxu1 }
 0xfee   :  { %8588 = vrot.lane.b32.xlu0 %v8587_v6, %s12254_s27 }
 0xff1   :  { %v4816_v32 = vpop.f32.mrb[140].mxu1 }
 0xff2   :  { %v8344_v28 = vpop.f32.mrb[141].mxu1 }
 0xff3   :  { %v4819_v53 = vpop.f32.mrb[142].mxu1 }
 0xff4   :  { %v8592_v31 = vpack.i.bf16 %v4819_v53, %v4816_v32  ;;  %v8345_v12 = vpop.f32.mrb[143].mxu1 }
 0xff6   :  { %8593 = vrot.lane.b32.xlu0 %v8592_v31, %s9259_s0 }
 0xff9   :  { %v4939_v35 = vpop.f32.mrb[144].mxu1 }
 0xffa   :  { %v8356_v7 = vpop.f32.mrb[145].mxu1 }
 0xffb   :  { %v4942_v0 = vpop.f32.mrb[146].mxu1 }
 0xffc   :  { %v8597_v33 = vpack.i.bf16 %v4942_v0, %v4939_v35  ;;  %v8357_v46 = vpop.f32.mrb[147].mxu1 }
 0xffe   :  { %8598 = vrot.lane.b32.xlu1 %v8597_v33, %s9257_s28 }
0x1001   :  { %v11509_v17 = vpop.f32.mrb[148].mxu1 }
0x1002   :  { %v8368_v59 = vpop.f32.mrb[149].mxu1 }
0x1003   :  { %v11511_v60 = vpop.f32.mrb[150].mxu1 }
0x1004   :  { %v8369_v11 = vpop.f32.mrb[151].mxu1 }
0x1009   :  { %v5214_v58 = vpop.f32.mrb[152].mxu1 }
0x100a   :  { %v8380_v18 = vpop.f32.mrb[153].mxu1 }
0x100b   :  { %v5217_v26 = vpop.f32.mrb[154].mxu1 }
0x100c   :  { %v8602_v25 = vpack.i.bf16 %v5217_v26, %v5214_v58  ;;  %v8381_v1 = vpop.f32.mrb[155].mxu1 }
0x100e   :  { %8603 = vrot.lane.b32.xlu0 %v8602_v25, %s12254_s27 }
0x1011   :  { %v5337_v19 = vpop.f32.mrb[156].mxu1 }
0x1012   :  { %v8392_v45 = vpop.f32.mrb[157].mxu1 }
0x1013   :  { %v5340_v44 = vpop.f32.mrb[158].mxu1 }
0x1014   :  { %v8607_v15 = vpack.i.bf16 %v5340_v44, %v5337_v19  ;;  %v8393_v4 = vpop.f32.mrb[159].mxu1 }
0x1015   :  { %v8574_v48 = vpop.permute.xlu1 %8573 }
0x1016   :  { %8608 = vrot.lane.b32.xlu1 %v8607_v15, %s9259_s0  ;;  %v8576_v9 = vunpack.i.h.bf16 %v8574_v48  ;;  %v8575_v21 = vunpack.i.l.bf16 %v8574_v48 }
0x1018   :  { %v4450_v27 = vsel %vm391_vm1, %v11460_v3, %v8576_v9  ;;  %v4449_v41 = vsel %vm391_vm1, %v11458_v2, %v8575_v21 }
0x1019   :  { %v5460_v49 = vpop.f32.mrb[160].mxu1 }
0x101a   :  { %v8404_v57 = vpop.f32.mrb[161].mxu1 }
0x101b   :  { %v5463_v16 = vpop.f32.mrb[162].mxu1 }
0x101c   :  { %v8612_v5 = vpack.i.bf16 %v5463_v16, %v5460_v49  ;;  %v8405_v51 = vpop.f32.mrb[163].mxu1 }
0x101d   :  { %v8579_v34 = vpop.permute.xlu0 %8578 }
0x101e   :  { %8613 = vrot.lane.b32.xlu1 %v8612_v5, %s9257_s28  ;;  %v8581_v36 = vunpack.i.h.bf16 %v8579_v34  ;;  %v8580_v14 = vunpack.i.l.bf16 %v8579_v34 }
0x1020   :  { %v4452_v24 = vsel %vm908_vm3, %v4450_v27, %v8581_v36  ;;  %v4451_v47 = vsel %vm908_vm3, %v4449_v41, %v8580_v14 }
0x1021   :  { %v11516_v52 = vpop.f32.mrb[164].mxu1 }
0x1022   :  { %v8416_v38 = vpop.f32.mrb[165].mxu1 }
0x1023   :  { %v11518_v30 = vpop.f32.mrb[166].mxu1 }
0x1024   :  { %v8417_v42 = vpop.f32.mrb[167].mxu1 }
0x1025   :  { %v8584_v29 = vpop.permute.xlu0 %8583 }
0x1026   :  { %v8586_v39 = vunpack.i.h.bf16 %v8584_v29  ;;  %v8585_v56 = vunpack.i.l.bf16 %v8584_v29 }
0x1028   :  { %v4453_v40 = vsel %vm911_vm4, %v4451_v47, %v8585_v56  ;;  %v4454_v20 = vsel %vm911_vm4, %v4452_v24, %v8586_v39 }
0x1029   :  { %v5735_v61 = vpop.f32.mrb[168].mxu1  ;;  %v6018_v10 = vpack.c.bf16 %v4454_v20, %v4453_v40 }
0x102a   :  { %v8428_v6 = vpop.f32.mrb[169].mxu1 }
0x102b   :  { %v5738_v55 = vpop.f32.mrb[170].mxu1  ;;  %8470 = vmatprep.mubr.bf16.mxu0 %v6018_v10 }
0x102c   :  { %v8617_v32 = vpack.i.bf16 %v5738_v55, %v5735_v61  ;;  %v8429_v3 = vpop.f32.mrb[171].mxu1 }
0x102e   :  { %8618 = vrot.lane.b32.xlu0 %v8617_v32, %s12254_s27 }
0x1031   :  { %v5858_v2 = vpop.f32.mrb[172].mxu1 }
0x1032   :  { %v8440_v28 = vpop.f32.mrb[173].mxu1 }
0x1033   :  { %v5861_v50 = vpop.f32.mrb[174].mxu1 }
0x1034   :  { %v8622_v53 = vpack.i.bf16 %v5861_v50, %v5858_v2  ;;  %v8441_v31 = vpop.f32.mrb[175].mxu1 }
0x1036   :  { %8623 = vrot.lane.b32.xlu0 %v8622_v53, %s9259_s0  ;;  %v7623_v53 = vld [vmem:[%s12163_s4 + $0x1] ss:$0 sm:$0xff] }
0x104e   :  { %v5981_v12 = vpop.f32.mrb[176].mxu1 }
0x104f   :  { %v8452_v35 = vpop.f32.mrb[177].mxu1 }
0x1050   :  { %v5984_v7 = vpop.f32.mrb[178].mxu1 }
0x1051   :  { %v8627_v0 = vpack.i.bf16 %v5984_v7, %v5981_v12  ;;  %v8453_v33 = vpop.f32.mrb[179].mxu1 }
0x1053   :  { %8628 = vrot.lane.b32.xlu1 %v8627_v0, %s9257_s28 }
0x1060   :  { %v8589_v46 = vpop.permute.xlu0 %8588 }
0x1061   :  { %v8591_v11 = vunpack.i.h.bf16 %v8589_v46  ;;  %v8590_v58 = vunpack.i.l.bf16 %v8589_v46 }
0x1063   :  { %v4971_v1 = vsel %vm391_vm1, %v11480_v8, %v8591_v11  ;;  %v4970_v19 = vsel %vm391_vm1, %v11478_v62, %v8590_v58 }
0x1068   :  { %v8594_v59 = vpop.permute.xlu0 %8593 }
0x1069   :  { %v8596_v18 = vunpack.i.h.bf16 %v8594_v59  ;;  %v8595_v26 = vunpack.i.l.bf16 %v8594_v59 }
0x106b   :  { %v4973_v15 = vsel %vm908_vm3, %v4971_v1, %v8596_v18  ;;  %v4972_v4 = vsel %vm908_vm3, %v4970_v19, %v8595_v26  ;;  %v8756_v18 = vld [vmem:[%s12166_s7 + $0x84] ss:$8 sps:$4 sm:$0xff]   ;;  %v8754_v26 = vld [vmem:[%s12166_s7 + $0x80] ss:$8 sps:$4 sm:$0xff]  }
0x106c   :  { %6361 = vmatprep.subr.bf16.mxu1 %v8756_v18  ;;  %v8762_v19 = vld [vmem:[%s12166_s7 + $0xa4] ss:$8 sps:$4 sm:$0xff]  }
0x106d   :  { %6362 = vmatpush1.bf16.msra.mxu1 %v8754_v26 }
0x1070   :  { %v8599_v25 = vpop.permute.xlu1 %8598 }
0x1071   :  { %v8601_v45 = vunpack.i.h.bf16 %v8599_v25  ;;  %v8600_v44 = vunpack.i.l.bf16 %v8599_v25 }
0x1073   :  { %v4975_v49 = vsel %vm911_vm4, %v4973_v15, %v8601_v45  ;;  %v4974_v57 = vsel %vm911_vm4, %v4972_v4, %v8600_v44  ;;  %v8765_v45 = vld [vmem:[%s12166_s7 + $0xb4] ss:$8 sps:$4 sm:$0xff]   ;;  %v8763_v44 = vld [vmem:[%s12166_s7 + $0xb0] ss:$8 sps:$4 sm:$0xff]   ;;  %v8768_v15 = vld [vmem:[%s12166_s7 + $0xc4] ss:$8 sps:$4 sm:$0xff]  }
0x1074   :  { %v6019_v16 = vpack.c.bf16 %v4975_v49, %v4974_v57  ;;  %v8766_v4 = vld [vmem:[%s12166_s7 + $0xc0] ss:$8 sps:$4 sm:$0xff]   ;;  %v8771_v49 = vld [vmem:[%s12166_s7 + $0xd4] ss:$8 sps:$4 sm:$0xff]   ;;  %v8769_v57 = vld [vmem:[%s12166_s7 + $0xd0] ss:$8 sps:$4 sm:$0xff]  }
0x1076   :  { %8471 = vmatmul.mubr.bf16.vlgmr.msra.gmra.mrb[164].mxu0 %v6019_v16  ;;  %v8774_v16 = vld [vmem:[%s12166_s7 + $0xe4] ss:$8 sps:$4 sm:$0xff]  }
0x1080   :  { %v8604_v5 = vpop.permute.xlu0 %8603 }
0x1081   :  { %v8606_v48 = vunpack.i.h.bf16 %v8604_v5  ;;  %v8605_v34 = vunpack.i.l.bf16 %v8604_v5  ;;  %v8772_v5 = vld [vmem:[%s12166_s7 + $0xe0] ss:$8 sps:$4 sm:$0xff]  }
0x1083   :  { %v5492_v62 = vsel %vm391_vm1, %v11511_v60, %v8606_v48  ;;  %v5491_v38 = vsel %vm391_vm1, %v11509_v17, %v8605_v34  ;;  %v8775_v48 = vld [vmem:[%s12166_s7 + $0xf0] ss:$8 sps:$4 sm:$0xff]  }
0x1088   :  { %v8609_v51 = vpop.permute.xlu1 %8608 }
0x1089   :  { %v8611_v8 = vunpack.i.h.bf16 %v8609_v51  ;;  %v8610_v9 = vunpack.i.l.bf16 %v8609_v51  ;;  %v8777_v51 = vld [vmem:[%s12166_s7 + $0xf4] ss:$8 sps:$4 sm:$0xff]  }
0x108b   :  { %v5494_v42 = vsel %vm908_vm3, %v5492_v62, %v8611_v8  ;;  %v5493_v29 = vsel %vm908_vm3, %v5491_v38, %v8610_v9 }
0x1090   :  { %v8614_v21 = vpop.permute.xlu1 %8613 }
0x1091   :  { %v8616_v36 = vunpack.i.h.bf16 %v8614_v21  ;;  %v8615_v14 = vunpack.i.l.bf16 %v8614_v21 }
0x1093   :  { %v5495_v27 = vsel %vm911_vm4, %v5493_v29, %v8615_v14  ;;  %v5496_v41 = vsel %vm911_vm4, %v5494_v42, %v8616_v36 }
0x1094   :  { %v6020_v39 = vpack.c.bf16 %v5496_v41, %v5495_v27  ;;  %v12255_v41 = vld [vmem:[#allocation13_spill] sm:$0xff] }
0x1096   :  { %8474 = vmatprep.mubr.bf16.mxu0 %v6020_v39 }
0x10a0   :  { %v8619_v56 = vpop.permute.xlu0 %8618 }
0x10a1   :  { %v8621_v47 = vunpack.i.h.bf16 %v8619_v56  ;;  %v8620_v40 = vunpack.i.l.bf16 %v8619_v56 }
0x10a3   :  { %v6013_v17 = vsel %vm391_vm1, %v11518_v30, %v8621_v47  ;;  %v6012_v10 = vsel %vm391_vm1, %v11516_v52, %v8620_v40 }
0x10a8   :  { %v8624_v24 = vpop.permute.xlu0 %8623 }
0x10a9   :  { %v8626_v60 = vunpack.i.h.bf16 %v8624_v24  ;;  %v8625_v20 = vunpack.i.l.bf16 %v8624_v24  ;;  %v12256_v24 = vld [vmem:[#allocation12_spill] sm:$0xff] }
0x10ab   :  { %v6015_v32 = vsel %vm908_vm3, %v6013_v17, %v8626_v60  ;;  %v6014_v3 = vsel %vm908_vm3, %v6012_v10, %v8625_v20 }
0x10c5   :  { %v8629_v61 = vpop.permute.xlu1 %8628 }
0x10c6   :  { %v8631_v6 = vunpack.i.h.bf16 %v8629_v61  ;;  %v8630_v55 = vunpack.i.l.bf16 %v8629_v61 }
0x10c8   :  { %v6016_v2 = vsel %vm911_vm4, %v6014_v3, %v8630_v55  ;;  %v6017_v28 = vsel %vm911_vm4, %v6015_v32, %v8631_v6 }
0x10c9   :  { %v6021_v50 = vpack.c.bf16 %v6017_v28, %v6016_v2 }
0x10cb   :  { %8475 = vmatmul.mubr.bf16.gmra.mrb[168].mxu0 %v6021_v50 }
0x1149   :  { %v8472_v30 = vpop.f32.mrb[164].mxu0 }
0x114a   :  { %v6129_v31 = vpop.f32.mrb[165].mxu0  ;;  %v6138_v7 = vadd.f32 %v8472_v30, %v7623_v53 }
0x114b   :  { %v6130_v12 = vadd.f32 %v7623_v53, %v6129_v31  ;;  %v8473_v52 = vpop.f32.mrb[166].mxu0 }
0x114c   :  { %v6132_v35 = vpop.f32.mrb[167].mxu0  ;;  %v6141_v46 = vadd.f32 %v8473_v52, %v7623_v53  ;;  %v6162_v11 = vadd.f32 %v6138_v7, %v10838_v43  ;;  %v8757_v43 = vld [vmem:[%s12166_s7 + $0x90] ss:$8 sps:$4 sm:$0xff]  }
0x114d   :  { %v6133_v0 = vadd.f32 %v7623_v53, %v6132_v35  ;;  %v11559_v33 = vadd.f32 %v6130_v12, %v10834_v13 }
0x114e   :  { %v6163_v25 = vadd.f32 %v6141_v46, %v10840_v54  ;;  %v8760_v54 = vld [vmem:[%s12166_s7 + $0xa0] ss:$8 sps:$4 sm:$0xff]  }
0x114f   :  { %v6161_v59 = vadd.f32 %v6133_v0, %v10836_v23  ;;  %v8759_v23 = vld [vmem:[%s12166_s7 + $0x94] ss:$8 sps:$4 sm:$0xff]  }
0x1150   :  { %6363 = vmatprep.subr.bf16.mxu1 %v8759_v23 }
0x1151   :  { %v6172_v58 = vadd.f32 %v6161_v59, %v11559_v33  ;;  %6364 = vmatpush1.bf16.msra.mxu1 %v8757_v43 }
0x1152   :  { %6365 = vmatprep.subr.bf16.mxu1 %v8762_v19 }
0x1153   :  { %v6173_v1 = vadd.f32 %v6172_v58, %v6162_v11 }
0x1155   :  { %v6174_v13 = vadd.f32 %v6173_v1, %v6163_v25  ;;  %6366 = vmatpush1.bf16.msra.mxu1 %v8760_v54 }
0x1156   :  { %6367 = vmatprep.subr.bf16.mxu1 %v8765_v45 }
0x1159   :  { %6368 = vmatpush1.bf16.msra.mxu1 %v8763_v44 }
0x115a   :  { %6369 = vmatprep.subr.bf16.mxu1 %v8768_v15 }
0x115d   :  { %6370 = vmatpush1.bf16.msra.mxu1 %v8766_v4  ;;  %v7632_v4 = vld [vmem:[%s12164_s5 + $0x1] sm:$0x1] }
0x115e   :  { %6371 = vmatprep.subr.bf16.mxu1 %v8771_v49 }
0x1161   :  { %6372 = vmatpush1.bf16.msra.mxu1 %v8769_v57 }
0x1162   :  { %6373 = vmatprep.subr.bf16.mxu1 %v8774_v16  ;;  %v12257_v16 = vld [vmem:[#allocation10_spill] sm:$0xff] }
0x1165   :  { %6374 = vmatpush1.bf16.msra.mxu1 %v8772_v5 }
0x1166   :  { %6375 = vmatprep.subr.bf16.mxu1 %v8777_v51  ;;  %v7634_v51 = vld [vmem:[%s12165_s6 + $0x1] ss:$0 sm:$0xff] }
0x1169   :  { %6376 = vmatpush1.bf16.msra.mxu1 %v8775_v48 }
0x119e   :  { %v8476_v34 = vpop.f32.mrb[168].mxu0 }
0x119f   :  { %v6145_v8 = vpop.f32.mrb[169].mxu0  ;;  %v6154_v38 = vadd.f32 %v8476_v34, %v7623_v53 }
0x11a0   :  { %v6146_v9 = vadd.f32 %v7623_v53, %v6145_v8  ;;  %v8477_v21 = vpop.f32.mrb[170].mxu0 }
0x11a1   :  { %v6148_v62 = vpop.f32.mrb[171].mxu0  ;;  %v6157_v29 = vadd.f32 %v8477_v21, %v7623_v53  ;;  %v6166_v39 = vadd.f32 %v6154_v38, %v12255_v41 }
0x11a2   :  { %v6164_v36 = vadd.f32 %v6146_v9, %v10842_v63  ;;  %v6149_v14 = vadd.f32 %v7623_v53, %v6148_v62 }
0x11a3   :  { %v6167_v47 = vadd.f32 %v6157_v29, %v12256_v24 }
0x11a4   :  { %v6175_v42 = vadd.f32 %v6174_v13, %v6164_v36  ;;  %v6165_v27 = vadd.f32 %v6149_v14, %v10844_v37 }
0x11a6   :  { %v6176_v56 = vadd.f32 %v6175_v42, %v6165_v27 }
0x11a8   :  { %v6177_v40 = vadd.f32 %v6176_v56, %v6166_v39 }
0x11aa   :  { %v6178_v60 = vadd.f32 %v6177_v40, %v6167_v47 }
0x11ac   :  { %v6179_v20 = vrot.slane %v6178_v60, 4 }
0x11ae   :  { %v6180_v61 = vadd.f32 %v6179_v20, %v6178_v60 }
0x11b0   :  { %v6181_v17 = vrot.slane %v6180_v61, 2 }
0x11b2   :  { %v6182_v10 = vadd.f32 %v6181_v17, %v6180_v61  ;;  %v8778_v61 = vld [vmem:[%s12168_s9 + $0xc0] sm:$0xff]  }
0x11b3   :  { %7946 = vmatprep.subr.bf16.mxu0 %v8778_v61  ;;  %v8779_v17 = vld [vmem:[%s12168_s9 + $0x80] sm:$0xff]  }
0x11b4   :  { %v6183_v6 = vrot.slane %v6182_v10, 1  ;;  %7947 = vmatpush3.bf16.msra.mxu0 %v8779_v17 }
0x11b6   :  { %v6184_v55 = vadd.f32 %v6183_v6, %v6182_v10  ;;  %v8781_v10 = vld [vmem:[%s12168_s9 + $0x88] sm:$0xff]   ;;  %v8782_v6 = vld [vmem:[%s12168_s9 + $0xd0] sm:$0xff]  }
0x11b8   :  { %v6185_v32 = vmul.f32 0.015625, %v6184_v55  ;;  %v8783_v55 = vld [vmem:[%s12168_s9 + $0x90] sm:$0xff]  }
0x11ba   :  { %v6186_v63 = vsub.f32 %v11559_v33, %v6185_v32  ;;  %v6187_v3 = vsub.f32 %v6161_v59, %v6185_v32  ;;  %v6188_v2 = vsub.f32 %v6162_v11, %v6185_v32  ;;  %v6189_v28 = vsub.f32 %v6163_v25, %v6185_v32 }
0x11bb   :  { %v6190_v37 = vsub.f32 %v6164_v36, %v6185_v32  ;;  %v6191_v50 = vsub.f32 %v6165_v27, %v6185_v32  ;;  %v6192_v53 = vsub.f32 %v6166_v39, %v6185_v32  ;;  %v6193_v30 = vsub.f32 %v6167_v47, %v6185_v32  ;;  %v8784_v32 = vld [vmem:[%s12168_s9 + $0xd8] sm:$0xff]  }
0x11bc   :  { %v6194_v31 = vmul.f32 %v6186_v63, %v6186_v63  ;;  %v6195_v12 = vmul.f32 %v6187_v3, %v6187_v3  ;;  %v6196_v52 = vmul.f32 %v6188_v2, %v6188_v2  ;;  %v6197_v7 = vmul.f32 %v6189_v28, %v6189_v28 }
0x11bd   :  { %v6198_v46 = vmul.f32 %v6190_v37, %v6190_v37  ;;  %v6199_v18 = vmul.f32 %v6191_v50, %v6191_v50  ;;  %v6200_v1 = vmul.f32 %v6192_v53, %v6192_v53  ;;  %v6201_v33 = vmul.f32 %v6193_v30, %v6193_v30 }
0x11be   :  { %v6202_v35 = vadd.f32 %v6195_v12, %v6194_v31  ;;  %v8793_v31 = vld [vmem:[%s12168_s9 + $0xb8] sm:$0xff]   ;;  %v7651_v12 = vld [vmem:[%s12167_s8 + $0x2] sm:$0x3] }
0x11c0   :  { %v6203_v0 = vadd.f32 %v6202_v35, %v6196_v52  ;;  %v11704_v52 = vrot.slane %v7651_v12, %v12257_v16  ;;  %v12265_v35 = vld [vmem:[#allocation11_spill] sm:$0xff] }
0x11c2   :  { %v6204_v58 = vadd.f32 %v6203_v0, %v6197_v7  ;;  %v11707_v7 = vrot.slane %v7651_v12, %v12265_v35 }
0x11c4   :  { %v6205_v26 = vadd.f32 %v6204_v58, %v6198_v46 }
0x11c6   :  { %v6206_v13 = vadd.f32 %v6205_v26, %v6199_v18 }
0x11c8   :  { %v6207_v59 = vadd.f32 %v6206_v13, %v6200_v1 }
0x11ca   :  { %v6208_v11 = vadd.f32 %v6207_v59, %v6201_v33 }
0x11cc   :  { %v6209_v25 = vrot.slane %v6208_v11, 4 }
0x11ce   :  { %v6210_v23 = vadd.f32 %v6209_v25, %v6208_v11 }
0x11d0   :  { %v6211_v43 = vrot.slane %v6210_v23, 2 }
0x11d2   :  { %v6212_v19 = vadd.f32 %v6211_v43, %v6210_v23 }
0x11d4   :  { %v6213_v54 = vrot.slane %v6212_v19, 1 }
0x11d6   :  { %v6214_v45 = vadd.f32 %v6213_v54, %v6212_v19 }
0x11d8   :  { %v6215_v44 = vmul.f32 0.015625, %v6214_v45 }
0x11da   :  { %v6216_v15 = vadd.f32 1e-05, %v6215_v44 }
0x11dc   :  { %9126 = vrsqrt.f32 %v6216_v15 }
0x11e6   :  { %v9127_v49 = vpop.eup %9126 }
0x11e7   :  { %v6218_v57 = vmul.f32 %v9127_v49, %v7632_v4 }
0x11e9   :  { %v6223_v5 = vrot.slane %v6218_v57, %v12257_v16 }
0x11eb   :  { %v6230_v48 = vmul.f32 %v6223_v5, %v6191_v50  ;;  %v6225_v34 = vmul.f32 %v6223_v5, %v6186_v63  ;;  %v6226_v8 = vmul.f32 %v6223_v5, %v6187_v3  ;;  %v6227_v9 = vmul.f32 %v6223_v5, %v6188_v2  ;;  %v8785_v63 = vld [vmem:[%s12168_s9 + $0x98] sm:$0xff]   ;;  %v8786_v3 = vld [vmem:[%s12168_s9 + $0xe0] sm:$0xff]   ;;  %v8790_v50 = vld [vmem:[%s12168_s9 + $0xf0] sm:$0xff]  }
0x11ec   :  { %v6228_v21 = vmul.f32 %v6223_v5, %v6189_v28  ;;  %v6229_v62 = vmul.f32 %v6223_v5, %v6190_v37  ;;  %v6231_v38 = vmul.f32 %v6223_v5, %v6192_v53  ;;  %v6232_v36 = vmul.f32 %v6223_v5, %v6193_v30  ;;  %v8787_v2 = vld [vmem:[%s12168_s9 + $0xa0] sm:$0xff]   ;;  %v8788_v28 = vld [vmem:[%s12168_s9 + $0xe8] sm:$0xff]   ;;  %v8791_v53 = vld [vmem:[%s12168_s9 + $0xb0] sm:$0xff]  }
0x11ed   :  { %v11625_v14 = vadd.f32 %v7634_v51, %v6225_v34  ;;  %v11627_v42 = vadd.f32 %v7634_v51, %v6226_v8  ;;  %v11632_v27 = vadd.f32 %v7634_v51, %v6227_v9  ;;  %v11641_v24 = vadd.f32 %v7634_v51, %v6230_v48  ;;  %v8789_v37 = vld [vmem:[%s12168_s9 + $0xa8] sm:$0xff]   ;;  %v8792_v30 = vld [vmem:[%s12168_s9 + $0xf8] sm:$0xff]  }
0x11ee   :  { %v11634_v41 = vadd.f32 %v7634_v51, %v6228_v21  ;;  %v11639_v56 = vadd.f32 %v7634_v51, %v6229_v62  ;;  %v11646_v40 = vadd.f32 %v7634_v51, %v6231_v38  ;;  %v11648_v60 = vadd.f32 %v7634_v51, %v6232_v36 }
0x11ef   :  { %12258 = vst [vmem:[#allocation14_spill] sm:$0xff] %v11627_v42  ;;  %v6247_v29 = vpack.c.bf16 %v11627_v42, %v11625_v14  ;;  %12259 = vst [vmem:[#allocation15_spill] sm:$0xff] %v11632_v27 }
0x11f0   :  { %12260 = vst [vmem:[#allocation16_spill] sm:$0xff] %v11634_v41  ;;  %v6248_v39 = vpack.c.bf16 %v11634_v41, %v11632_v27  ;;  %12261 = vst [vmem:[#allocation17_spill] sm:$0xff] %v11639_v56  ;;  %v6249_v47 = vpack.c.bf16 %v11641_v24, %v11639_v56  ;;  %v6250_v20 = vpack.c.bf16 %v11648_v60, %v11646_v40 }
0x11f1   :  { %6394 = vmatmul.mubr.bf16.vlgmr.msra.gmra.mrb[180].mxu1 %v6247_v29  ;;  %12262 = vst [vmem:[#allocation18_spill] sm:$0xff] %v11641_v24  ;;  %12263 = vst [vmem:[#allocation19_spill] sm:$0xff] %v11646_v40 }
0x11f2   :  { %6403 = vmatprep.mubr.bf16.mxu1 %v12248_v22  ;;  %12264 = vst [vmem:[#allocation9_spill] sm:$0xff] %v11648_v60 }
0x11f9   :  { %6404 = vmatmul.mubr.bf16.gmra.mrb[184].mxu1 %v6248_v39 }
0x11fa   :  { %6413 = vmatprep.mubr.bf16.mxu1 %v12248_v22 }
0x1201   :  { %6414 = vmatmul.mubr.bf16.gmra.mrb[188].mxu1 %v6249_v47 }
0x1202   :  { %6423 = vmatprep.mubr.bf16.mxu1 %v12248_v22  ;;  %v8780_v22 = vld [vmem:[%s12168_s9 + $0xc8] sm:$0xff]  }
0x1203   :  { %7948 = vmatprep.subr.bf16.mxu0 %v8780_v22 }
0x1204   :  { %7949 = vmatpush3.bf16.msra.mxu0 %v8781_v10 }
0x1205   :  { %7950 = vmatprep.subr.bf16.mxu0 %v8782_v6 }
0x1208   :  { %7951 = vmatpush3.bf16.msra.mxu0 %v8783_v55 }
0x1209   :  { %6424 = vmatmul.mubr.bf16.gmra.mrb[192].mxu1 %v6250_v20  ;;  %7952 = vmatprep.subr.bf16.mxu0 %v8784_v32 }
0x120c   :  { %7953 = vmatpush3.bf16.msra.mxu0 %v8785_v63 }
0x120d   :  { %7954 = vmatprep.subr.bf16.mxu0 %v8786_v3 }
0x1210   :  { %7955 = vmatpush3.bf16.msra.mxu0 %v8787_v2 }
0x1211   :  { %7956 = vmatprep.subr.bf16.mxu0 %v8788_v28 }
0x1214   :  { %7957 = vmatpush3.bf16.msra.mxu0 %v8789_v37 }
0x1215   :  { %7958 = vmatprep.subr.bf16.mxu0 %v8790_v50 }
0x1218   :  { %7959 = vmatpush3.bf16.msra.mxu0 %v8791_v53 }
0x1219   :  { %7960 = vmatprep.subr.bf16.mxu0 %v8792_v30 }
0x121c   :  { %7961 = vmatpush3.bf16.msra.mxu0 %v8793_v31 }
0x12c4   :  { %v6395_v0 = vpop.f32.mrb[180].mxu1 }
0x12c5   :  { %v6396_v46 = vadd.f32 %v6395_v0, %v11704_v52  ;;  %v6397_v58 = vpop.f32.mrb[181].mxu1 }
0x12c6   :  { %v11711_v18 = vadd.f32 %v6397_v58, %v11707_v7  ;;  %v6399_v26 = vpop.f32.mrb[182].mxu1 }
0x12c7   :  { %v11713_v1 = vmul.f32 0.70710677, %v6396_v46  ;;  %v6400_v13 = vadd.f32 %v6399_v26, %v11704_v52  ;;  %v6401_v33 = vpop.f32.mrb[183].mxu1  ;;  %v11767_v31 = vmul.f32 0.5, %v6396_v46 }
0x12c8   :  { %v11717_v59 = vmul.f32 0.70710677, %v11711_v18  ;;  %v11720_v11 = vadd.f32 %v6401_v33, %v11707_v7 }
0x12c9   :  { %v6466_v25 = vand.u32 2147483647, %v11713_v1  ;;  %v11723_v23 = vmul.f32 0.70710677, %v6400_v13  ;;  %vm6786_vm0 = vcmp.ge.f32.partialorder %v11713_v1, 0.0 }
0x12ca   :  { %v6467_v43 = vand.u32 2147483647, %v11717_v59  ;;  %v11727_v19 = vmul.f32 0.70710677, %v11720_v11  ;;  %vm6787_vm2 = vcmp.ge.f32.partialorder %v11717_v59, 0.0 }
0x12cb   :  { %v6482_v54 = vmul.f32 0.3275911, %v6466_v25  ;;  %v6468_v45 = vand.u32 2147483647, %v11723_v23  ;;  %v6690_v47 = vsub.f32 0.0, %v6466_v25  ;;  %vm6788_vm1 = vcmp.ge.f32.partialorder %v11723_v23, 0.0 }
0x12cc   :  { %v6483_v44 = vmul.f32 0.3275911, %v6467_v43  ;;  %v6469_v15 = vand.u32 2147483647, %v11727_v19  ;;  %v6405_v57 = vpop.f32.mrb[184].mxu1  ;;  %v6691_v3 = vsub.f32 0.0, %v6467_v43 }
0x12cd   :  { %v6498_v4 = vadd.f32 1.0, %v6482_v54  ;;  %v6484_v49 = vmul.f32 0.3275911, %v6468_v45  ;;  %v6407_v48 = vpop.f32.mrb[185].mxu1  ;;  %v11732_v62 = vadd.f32 %v6405_v57, %v11704_v52  ;;  %v6692_v6 = vsub.f32 0.0, %v6468_v45 }
0x12ce   :  { %v6499_v5 = vadd.f32 1.0, %v6483_v44  ;;  %v6485_v51 = vmul.f32 0.3275911, %v6469_v15  ;;  %v6409_v8 = vpop.f32.mrb[186].mxu1  ;;  %v11735_v38 = vadd.f32 %v6407_v48, %v11707_v7  ;;  %v6706_v37 = vmul.f32 %v6690_v47, %v6466_v25 }
0x12cf   :  { %9128 = vrcp.f32 %v6498_v4  ;;  %v6500_v34 = vadd.f32 1.0, %v6484_v49  ;;  %v6411_v9 = vpop.f32.mrb[187].mxu1  ;;  %v11738_v36 = vadd.f32 %v6409_v8, %v11704_v52  ;;  %v11741_v29 = vmul.f32 0.70710677, %v11732_v62 }
0x12d0   :  { %9130 = vrcp.f32 %v6499_v5  ;;  %v6501_v21 = vadd.f32 1.0, %v6485_v51  ;;  %v11744_v39 = vadd.f32 %v6411_v9, %v11707_v7  ;;  %v11747_v20 = vmul.f32 0.70710677, %v11735_v38 }
0x12d1   :  { %9132 = vrcp.f32 %v6500_v34  ;;  %v11750_v61 = vmul.f32 0.70710677, %v11738_v36  ;;  %v6470_v22 = vand.u32 2147483647, %v11741_v29  ;;  %v6693_v12 = vsub.f32 0.0, %v6469_v15 }
0x12d2   :  { %9134 = vrcp.f32 %v6501_v21  ;;  %v6471_v55 = vand.u32 2147483647, %v11747_v20  ;;  %v11762_v28 = vmul.f32 0.70710677, %v11744_v39  ;;  %v11777_v54 = vmul.f32 0.5, %v6400_v13 }
0x12d3   :  { %v11757_v32 = vand.u32 2147483647, %v11750_v61  ;;  %v6486_v2 = vmul.f32 0.3275911, %v6470_v22  ;;  %v6708_v25 = vmul.f32 %v6692_v6, %v6468_v45  ;;  %v6707_v49 = vmul.f32 %v6691_v3, %v6467_v43 }
0x12d4   :  { %v6415_v17 = vpop.f32.mrb[188].mxu1  ;;  %v6487_v50 = vmul.f32 0.3275911, %v6471_v55  ;;  %v11770_v0 = vand.u32 2147483647, %v11762_v28  ;;  %v6709_v8 = vmul.f32 %v6693_v12, %v6469_v15  ;;  %v6694_v9 = vsub.f32 0.0, %v6470_v22 }
0x12d5   :  { %v11753_v10 = vpop.f32.mrb[189].mxu1  ;;  %v6488_v53 = vmul.f32 0.3275911, %v11757_v32  ;;  %v6502_v35 = vadd.f32 1.0, %v6486_v2  ;;  %v6722_v5 = vmul.f32 1.442695, %v6706_v37  ;;  %v11794_v15 = vadd.f32 %v6415_v17, %v11704_v52 }
0x12d6   :  { %v11759_v63 = vpop.f32.mrb[190].mxu1  ;;  %v6503_v44 = vadd.f32 1.0, %v6487_v50  ;;  %v6489_v51 = vmul.f32 0.3275911, %v11770_v0  ;;  %v6695_v21 = vsub.f32 0.0, %v6471_v55  ;;  %v6696_v50 = vsub.f32 0.0, %v11757_v32 }
0x12d7   :  { %v11772_v58 = vpop.f32.mrb[191].mxu1  ;;  %9136 = vrcp.f32 %v6502_v35  ;;  %v6504_v46 = vadd.f32 1.0, %v6488_v53  ;;  %v6726_v43 = vmul.f32 1.442695, %v6708_v25  ;;  %v11804_v17 = vmul.f32 0.70710677, %v11794_v15 }
0x12d8   :  { %9138 = vrcp.f32 %v6503_v44  ;;  %v6505_v6 = vadd.f32 1.0, %v6489_v51  ;;  %v6710_v44 = vmul.f32 %v6694_v9, %v6470_v22  ;;  %vm6789_vm4 = vcmp.ge.f32.partialorder %v11727_v19, 0.0 }
0x12d9   :  { %v11765_v30 = vpop.eup %9128  ;;  %9140 = vrcp.f32 %v6504_v46  ;;  %vm6790_vm10 = vcmp.ge.f32.partialorder %v11741_v29, 0.0  ;;  %vm6791_vm11 = vcmp.ge.f32.partialorder %v11747_v20, 0.0  ;;  %vm6792_vm12 = vcmp.ge.f32.partialorder %v11750_v61, 0.0 }
0x12da   :  { %v11774_v26 = vpop.eup %9130  ;;  %v6546_v33 = vmul.f32 1.0614054, %v11765_v30  ;;  %9142 = vpow2.f32 %v6722_v5  ;;  %v6724_v5 = vmul.f32 1.442695, %v6707_v49  ;;  %vm6793_vm13 = vcmp.ge.f32.partialorder %v11762_v28, 0.0 }
0x12db   :  { %v6547_v4 = vmul.f32 1.0614054, %v11774_v26  ;;  %v11781_v48 = vpop.eup %9132  ;;  %9144 = vrcp.f32 %v6505_v6  ;;  %v6730_v6 = vmul.f32 1.442695, %v6710_v44  ;;  %vm6794_vm14 = vcmp.ge.f32.partialorder %v11804_v17, 0.0 }
0x12dc   :  { %v6562_v57 = vadd.f32 -1.4531521, %v6546_v33  ;;  %v11783_v13 = vpop.f32.mrb[192].mxu1  ;;  %v6548_v47 = vmul.f32 1.0614054, %v11781_v48  ;;  %v11789_v2 = vpop.eup %9134  ;;  %9146 = vpow2.f32 %v6726_v43 }
0x12dd   :  { %v6563_v34 = vadd.f32 -1.4531521, %v6547_v4  ;;  %v11787_v3 = vpop.f32.mrb[193].mxu1  ;;  %v6549_v33 = vmul.f32 1.0614054, %v11789_v2  ;;  %v6711_v4 = vmul.f32 %v6695_v21, %v6471_v55  ;;  %9148 = vpow2.f32 %v6724_v5 }
0x12de   :  { %v6578_v45 = vmul.f32 %v11765_v30, %v6562_v57  ;;  %v11796_v53 = vpop.f32.mrb[194].mxu1  ;;  %v6564_v35 = vadd.f32 -1.4531521, %v6548_v47  ;;  %v6728_v47 = vmul.f32 1.442695, %v6709_v8  ;;  %v11916_v59 = vadd.f32 %v11783_v13, %v11704_v52 }
0x12df   :  { %v6579_v37 = vmul.f32 %v11774_v26, %v6563_v34  ;;  %v11799_v57 = vpop.f32.mrb[195].mxu1  ;;  %v6565_v34 = vadd.f32 -1.4531521, %v6549_v33  ;;  %v11809_v55 = vand.u32 2147483647, %v11804_v17  ;;  %v11950_v29 = vadd.f32 %v11796_v53, %v11704_v52 }
0x12e0   :  { %v6594_v12 = vadd.f32 1.4214138, %v6578_v45  ;;  %v6580_v51 = vmul.f32 %v11781_v48, %v6564_v35  ;;  %v6712_v35 = vmul.f32 %v6696_v50, %v11757_v32 }
0x12e1   :  { %v6595_v25 = vadd.f32 1.4214138, %v6579_v37  ;;  %v6581_v22 = vmul.f32 %v11789_v2, %v6565_v34  ;;  %v11811_v9 = vpop.eup %9136  ;;  %v6697_v34 = vsub.f32 0.0, %v11770_v0  ;;  %v6490_v44 = vmul.f32 0.3275911, %v11809_v55 }
0x12e2   :  { %v6610_v46 = vmul.f32 %v11765_v30, %v6594_v12  ;;  %v6596_v37 = vadd.f32 1.4214138, %v6580_v51  ;;  %v6732_v12 = vmul.f32 1.442695, %v6711_v4  ;;  %v11814_v33 = vpop.eup %9138 }
0x12e3   :  { %v6611_v45 = vmul.f32 %v11774_v26, %v6595_v25  ;;  %v6597_v43 = vadd.f32 1.4214138, %v6581_v22  ;;  %v6550_v25 = vmul.f32 1.0614054, %v11811_v9  ;;  %v6551_v51 = vmul.f32 1.0614054, %v11814_v33  ;;  %v11824_v60 = vpop.eup %9140 }
0x12e4   :  { %v6626_v16 = vadd.f32 -0.28449672, %v6610_v46  ;;  %v6612_v8 = vmul.f32 %v11781_v48, %v6596_v37  ;;  %v6734_v37 = vmul.f32 1.442695, %v6712_v35  ;;  %v6506_v22 = vadd.f32 1.0, %v6490_v44 }
0x12e5   :  { %v6627_v21 = vadd.f32 -0.28449672, %v6611_v45  ;;  %v6613_v32 = vmul.f32 %v11789_v2, %v6597_v43  ;;  %v6566_v50 = vadd.f32 -1.4531521, %v6550_v25  ;;  %v6552_v25 = vmul.f32 1.0614054, %v11824_v60 }
0x12e6   :  { %v6642_v49 = vmul.f32 %v11765_v30, %v6626_v16  ;;  %v6628_v45 = vadd.f32 -0.28449672, %v6612_v8  ;;  %v6567_v16 = vadd.f32 -1.4531521, %v6551_v51  ;;  %v6713_v41 = vmul.f32 %v6697_v34, %v11770_v0 }
0x12e7   :  { %v6643_v46 = vmul.f32 %v11774_v26, %v6627_v21  ;;  %v9143_v21 = vpop.eup %9142  ;;  %v6629_v56 = vadd.f32 -0.28449672, %v6613_v32  ;;  %9150 = vrcp.f32 %v6506_v22 }
0x12e8   :  { %v6658_v4 = vadd.f32 0.2548296, %v6642_v49  ;;  %v6644_v24 = vmul.f32 %v11781_v48, %v6628_v45  ;;  %v6582_v49 = vmul.f32 %v11811_v9, %v6566_v50  ;;  %v11830_v8 = vpop.eup %9144  ;;  %v6583_v43 = vmul.f32 %v11814_v33, %v6567_v16 }
0x12e9   :  { %v6659_v35 = vadd.f32 0.2548296, %v6643_v46  ;;  %v9147_v27 = vpop.eup %9146  ;;  %9152 = vpow2.f32 %v6728_v47  ;;  %v6553_v45 = vmul.f32 1.0614054, %v11830_v8  ;;  %v6645_v16 = vmul.f32 %v11789_v2, %v6629_v56 }
0x12ea   :  { %v6674_v40 = vmul.f32 %v11765_v30, %v6658_v4  ;;  %v6660_v51 = vadd.f32 0.2548296, %v6644_v24  ;;  %v6598_v44 = vadd.f32 1.4214138, %v6582_v49  ;;  %v6599_v30 = vadd.f32 1.4214138, %v6583_v43 }
0x12eb   :  { %v6568_v4 = vadd.f32 -1.4531521, %v6552_v25  ;;  %9154 = vpow2.f32 %v6732_v12  ;;  %v6569_v24 = vadd.f32 -1.4531521, %v6553_v45  ;;  %v6736_v22 = vmul.f32 1.442695, %v6713_v41 }
0x12ec   :  { %v6754_v5 = vmul.f32 %v9143_v21, %v6674_v40  ;;  %v6676_v50 = vmul.f32 %v11781_v48, %v6660_v51  ;;  %v6614_v42 = vmul.f32 %v11811_v9, %v6598_v44  ;;  %v6615_v0 = vmul.f32 %v11814_v33, %v6599_v30  ;;  %v9149_v51 = vpop.eup %9148 }
0x12ed   :  { %v6584_v40 = vmul.f32 %v11824_v60, %v6568_v4  ;;  %v6675_v21 = vmul.f32 %v11774_v26, %v6659_v35  ;;  %v6585_v48 = vmul.f32 %v11830_v8, %v6569_v24  ;;  %9156 = vpow2.f32 %v6730_v6 }
0x12ee   :  { %v6770_v32 = vsub.f32 1.0, %v6754_v5  ;;  %v6756_v34 = vmul.f32 %v9147_v27, %v6676_v50  ;;  %v6630_v47 = vadd.f32 -0.28449672, %v6614_v42  ;;  %v6631_v49 = vadd.f32 -0.28449672, %v6615_v0 }
0x12ef   :  { %v6600_v43 = vadd.f32 1.4214138, %v6584_v40  ;;  %v6661_v5 = vadd.f32 0.2548296, %v6645_v16  ;;  %9158 = vpow2.f32 %v6734_v37  ;;  %v11851_v35 = vadd.f32 %v11753_v10, %v11707_v7 }
0x12f0   :  { %v6802_v46 = vsub.f32 0.0, %v6770_v32  ;;  %v6772_v25 = vsub.f32 1.0, %v6756_v34  ;;  %v6646_v12 = vmul.f32 %v11811_v9, %v6630_v47  ;;  %v6647_v42 = vmul.f32 %v11814_v33, %v6631_v49 }
0x12f1   :  { %v6616_v27 = vmul.f32 %v11824_v60, %v6600_v43  ;;  %v11853_v1 = vpop.eup %9150  ;;  %v6601_v4 = vadd.f32 1.4214138, %v6585_v48  ;;  %9160 = vpow2.f32 %v6736_v22  ;;  %v6755_v45 = vmul.f32 %v9149_v51, %v6675_v21 }
0x12f2   :  { %v6818_v56 = vsel %vm6786_vm0, %v6770_v32, %v6802_v46  ;;  %v6804_v26 = vsub.f32 0.0, %v6772_v25  ;;  %v6663_v44 = vadd.f32 0.2548296, %v6647_v42  ;;  %v6677_v6 = vmul.f32 %v11789_v2, %v6661_v5 }
0x12f3   :  { %v6834_v41 = vadd.f32 1.0, %v6818_v56  ;;  %v6632_v30 = vadd.f32 -0.28449672, %v6616_v27  ;;  %v6662_v32 = vadd.f32 0.2548296, %v6646_v12  ;;  %v9153_v50 = vpop.eup %9152  ;;  %v6617_v10 = vmul.f32 %v11830_v8, %v6601_v4 }
0x12f4   :  { %v6820_v23 = vsel %vm6788_vm1, %v6772_v25, %v6804_v26  ;;  %v6679_v0 = vmul.f32 %v11814_v33, %v6663_v44  ;;  %v6554_v40 = vmul.f32 1.0614054, %v11853_v1  ;;  %v11861_v24 = vmul.f32 0.70710677, %v11851_v35 }
0x12f5   :  { %v6836_v16 = vadd.f32 1.0, %v6820_v23  ;;  %v6648_v37 = vmul.f32 %v11824_v60, %v6632_v30  ;;  %v9155_v46 = vpop.eup %9154  ;;  %v11864_v34 = vmul.f32 %v6834_v41, %v11767_v31  ;;  %v6771_v22 = vsub.f32 1.0, %v6755_v45 }
0x12f6   :  { %v6633_v21 = vadd.f32 -0.28449672, %v6617_v10  ;;  %v6570_v33 = vadd.f32 -1.4531521, %v6554_v40  ;;  %v6757_v43 = vmul.f32 %v9153_v50, %v6677_v6  ;;  %v6678_v48 = vmul.f32 %v11811_v9, %v6662_v32 }
0x12f7   :  { %v11867_v2 = vmul.f32 %v6836_v16, %v11777_v54  ;;  %v6664_v47 = vadd.f32 0.2548296, %v6648_v37  ;;  %v6759_v56 = vmul.f32 %v9155_v46, %v6679_v0  ;;  %v6475_v54 = vand.u32 2147483647, %v11861_v24  ;;  %v9157_v12 = vpop.eup %9156 }
0x12f8   :  { %v6649_v5 = vmul.f32 %v11830_v8, %v6633_v21  ;;  %v6586_v31 = vmul.f32 %v11853_v1, %v6570_v33  ;;  %v6435_v51 = vmul.f32 0.5, %v11711_v18  ;;  %v11879_v42 = vmul.f32 0.5, %v11720_v11 }
0x12f9   :  { %v6866_v49 = vpack.c.bf16 %v11867_v2, %v11864_v34  ;;  %v6680_v25 = vmul.f32 %v11824_v60, %v6664_v47  ;;  %v11883_v9 = vadd.f32 %v11759_v63, %v11704_v52  ;;  %v9159_v27 = vpop.eup %9158  ;;  %v6698_v41 = vsub.f32 0.0, %v11809_v55 }
0x12fa   :  { %v6665_v60 = vadd.f32 0.2548296, %v6649_v5  ;;  %v6491_v26 = vmul.f32 0.3275911, %v6475_v54  ;;  %v6803_v30 = vsub.f32 0.0, %v6771_v22  ;;  %v6773_v4 = vsub.f32 1.0, %v6757_v43 }
0x12fb   :  { %v9161_v44 = vpop.eup %9160  ;;  %v6758_v18 = vmul.f32 %v9157_v12, %v6678_v48  ;;  %v6602_v45 = vadd.f32 1.4214138, %v6586_v31  ;;  %v6775_v23 = vsub.f32 1.0, %v6759_v56  ;;  %v6760_v6 = vmul.f32 %v9159_v27, %v6680_v25 }
0x12fc   :  { %v6681_v11 = vmul.f32 %v11830_v8, %v6665_v60  ;;  %v6507_v32 = vadd.f32 1.0, %v6491_v26  ;;  %v11889_v63 = vmul.f32 0.5, %v11732_v62  ;;  %v11892_v50 = vmul.f32 0.5, %v11735_v38 }
0x12fd   :  { %v11895_v16 = vmul.f32 0.5, %v11738_v36  ;;  %v11898_v0 = vmul.f32 0.70710677, %v11883_v9  ;;  %v11901_v37 = vmul.f32 0.5, %v11744_v39  ;;  %v6714_v40 = vmul.f32 %v6698_v41, %v11809_v55 }
0x12fe   :  { %v6761_v10 = vmul.f32 %v9161_v44, %v6681_v11  ;;  %9162 = vrcp.f32 %v6507_v32  ;;  %v6819_v62 = vsel %vm6787_vm2, %v6771_v22, %v6803_v30  ;;  %v6805_v8 = vsub.f32 0.0, %v6773_v4 }
0x12ff   :  { %v6618_v38 = vmul.f32 %v11853_v1, %v6602_v45  ;;  %v6476_v36 = vand.u32 2147483647, %v11898_v0  ;;  %v6774_v46 = vsub.f32 1.0, %v6758_v18  ;;  %v6807_v47 = vsub.f32 0.0, %v6775_v23 }
0x1300   :  { %v6776_v21 = vsub.f32 1.0, %v6760_v6  ;;  %v11911_v39 = vadd.f32 %v11772_v58, %v11707_v7  ;;  %v6777_v55 = vsub.f32 1.0, %v6761_v10  ;;  %v6835_v22 = vadd.f32 1.0, %v6819_v62 }
0x1301   :  { %v6492_v33 = vmul.f32 0.3275911, %v6476_v36  ;;  %v6738_v43 = vmul.f32 1.442695, %v6714_v40  ;;  %v6699_v48 = vsub.f32 0.0, %v6475_v54  ;;  %v6821_v56 = vsel %vm6789_vm4, %v6773_v4, %v6805_v8 }
0x1302   :  { %v6634_v25 = vadd.f32 -0.28449672, %v6618_v38  ;;  %v11922_v58 = vmul.f32 0.70710677, %v11911_v39  ;;  %v6806_v20 = vsub.f32 0.0, %v6774_v46  ;;  %v6823_v31 = vsel %vm6791_vm11, %v6775_v23, %v6807_v47 }
0x1303   :  { %v6508_v5 = vadd.f32 1.0, %v6492_v33  ;;  %v6808_v12 = vsub.f32 0.0, %v6776_v21  ;;  %v11925_v27 = vmul.f32 0.70710677, %v11916_v59  ;;  %v6809_v13 = vsub.f32 0.0, %v6777_v55 }
0x1304   :  { %v6477_v60 = vand.u32 2147483647, %v11922_v58  ;;  %v11930_v41 = vadd.f32 %v11787_v3, %v11707_v7  ;;  %v6851_v19 = vmul.f32 %v6835_v22, %v6435_v51  ;;  %v6715_v26 = vmul.f32 %v6699_v48, %v6475_v54 }
0x1305   :  { %9164 = vrcp.f32 %v6508_v5  ;;  %v11934_v44 = vand.u32 2147483647, %v11925_v27  ;;  %v6837_v30 = vadd.f32 1.0, %v6821_v56  ;;  %v6650_v4 = vmul.f32 %v11853_v1, %v6634_v25 }
0x1306   :  { %9166 = vpow2.f32 %v6738_v43  ;;  %v6493_v18 = vmul.f32 0.3275911, %v6477_v60  ;;  %v6822_v23 = vsel %vm6790_vm10, %v6774_v46, %v6806_v20  ;;  %v6839_v6 = vadd.f32 1.0, %v6823_v31 }
0x1307   :  { %v6824_v3 = vsel %vm6792_vm12, %v6776_v21, %v6808_v12  ;;  %v6494_v28 = vmul.f32 0.3275911, %v11934_v44  ;;  %v6825_v54 = vsel %vm6793_vm13, %v6777_v55, %v6809_v13  ;;  %v11946_v32 = vmul.f32 0.70710677, %v11930_v41 }
0x1308   :  { %v11937_v45 = vpop.eup %9162  ;;  %v6509_v11 = vadd.f32 1.0, %v6493_v18  ;;  %v6740_v10 = vmul.f32 1.442695, %v6715_v26  ;;  %v6700_v40 = vsub.f32 0.0, %v6476_v36  ;;  %v6666_v8 = vadd.f32 0.2548296, %v6650_v4 }
0x1309   :  { %v6555_v51 = vmul.f32 1.0614054, %v11937_v45  ;;  %v6510_v62 = vadd.f32 1.0, %v6494_v28  ;;  %v11953_v61 = vand.u32 2147483647, %v11946_v32  ;;  %v6853_v46 = vmul.f32 %v6837_v30, %v11879_v42 }
0x130a   :  { %9168 = vrcp.f32 %v6509_v11  ;;  %v6838_v47 = vadd.f32 1.0, %v6822_v23  ;;  %v6841_v21 = vadd.f32 1.0, %v6825_v54  ;;  %v6855_v55 = vmul.f32 %v6839_v6, %v11892_v50 }
0x130b   :  { %v6571_v38 = vadd.f32 -1.4531521, %v6555_v51  ;;  %9170 = vrcp.f32 %v6510_v62  ;;  %v6701_v22 = vsub.f32 0.0, %v6477_v60  ;;  %v6495_v43 = vmul.f32 0.3275911, %v11953_v61 }
0x130c   :  { %v6840_v52 = vadd.f32 1.0, %v6824_v3  ;;  %9172 = vpow2.f32 %v6740_v10  ;;  %v6716_v53 = vmul.f32 %v6700_v40, %v6476_v36  ;;  %v11960_v48 = vmul.f32 0.70710677, %v11950_v29 }
0x130d   :  { %v6587_v33 = vmul.f32 %v11937_v45, %v6571_v38  ;;  %v6682_v42 = vmul.f32 %v11853_v1, %v6666_v8  ;;  %v6511_v5 = vadd.f32 1.0, %v6495_v43  ;;  %v11967_v50 = vadd.f32 %v11799_v57, %v11707_v7 }
0x130e   :  { %v6857_v20 = vmul.f32 %v6841_v21, %v11901_v37  ;;  %v6702_v12 = vsub.f32 0.0, %v11934_v44  ;;  %v11973_v36 = vand.u32 2147483647, %v11960_v48  ;;  %v6717_v30 = vmul.f32 %v6701_v22, %v6477_v60 }
0x130f   :  { %v11962_v56 = vpop.eup %9164  ;;  %v6603_v25 = vadd.f32 1.4214138, %v6587_v33  ;;  %9174 = vrcp.f32 %v6511_v5  ;;  %v11977_v1 = vmul.f32 0.70710677, %v11967_v50  ;;  %v6856_v7 = vmul.f32 %v6840_v52, %v11895_v16 }
0x1310   :  { %v6556_v31 = vmul.f32 1.0614054, %v11962_v56  ;;  %v9167_v13 = vpop.eup %9166  ;;  %v6496_v37 = vmul.f32 0.3275911, %v11973_v36  ;;  %v6867_v4 = vpack.c.bf16 %v6853_v46, %v6851_v19  ;;  %v6854_v18 = vmul.f32 %v6838_v47, %v11889_v63 }
0x1311   :  { %v6619_v26 = vmul.f32 %v11937_v45, %v6603_v25  ;;  %v6742_v6 = vmul.f32 1.442695, %v6716_v53  ;;  %v11983_v3 = vand.u32 2147483647, %v11977_v1  ;;  %v11985_v28 = vmul.f32 %v9167_v13, %v6682_v42 }
0x1312   :  { %v6572_v57 = vadd.f32 -1.4531521, %v6556_v31  ;;  %v6512_v54 = vadd.f32 1.0, %v6496_v37  ;;  %7043 = vmatprep.mubr.bf16.mxu0 %v6867_v4  ;;  %v6869_v51 = vpack.c.bf16 %v6857_v20, %v6855_v55  ;;  %v6744_v10 = vmul.f32 1.442695, %v6717_v30 }
0x1313   :  { %v6635_v23 = vadd.f32 -0.28449672, %v6619_v26  ;;  %v6718_v19 = vmul.f32 %v6702_v12, %v11934_v44  ;;  %v6497_v63 = vmul.f32 0.3275911, %v11983_v3  ;;  %7044 = vmatmul.mubr.bf16.vlgmr.msra.gmra.mrb[172].mxu0 %v6866_v49  ;;  %v6868_v38 = vpack.c.bf16 %v6856_v7, %v6854_v18 }
0x1314   :  { %v6588_v60 = vmul.f32 %v11962_v56, %v6572_v57  ;;  %v11988_v11 = vpop.eup %9168  ;;  %9176 = vrcp.f32 %v6512_v54  ;;  %7051 = vmatprep.mubr.bf16.mxu0 %v6869_v51  ;;  %v6703_v44 = vsub.f32 0.0, %v11953_v61  ;;  %v6778_v2 = vsub.f32 1.0, %v11985_v28 }
0x1315   :  { %v6651_v16 = vmul.f32 %v11937_v45, %v6635_v23  ;;  %v11996_v40 = vpop.eup %9170  ;;  %v6557_v8 = vmul.f32 1.0614054, %v11988_v11  ;;  %9178 = vpow2.f32 %v6742_v6  ;;  %v6513_v34 = vadd.f32 1.0, %v6497_v63 }
0x1316   :  { %v6604_v62 = vadd.f32 1.4214138, %v6588_v60  ;;  %v6558_v47 = vmul.f32 1.0614054, %v11996_v40  ;;  %v9173_v21 = vpop.eup %9172  ;;  %v6746_v43 = vmul.f32 1.442695, %v6718_v19  ;;  %v6719_v31 = vmul.f32 %v6703_v44, %v11953_v61 }
0x1317   :  { %v6667_v46 = vadd.f32 0.2548296, %v6651_v16  ;;  %v6573_v33 = vadd.f32 -1.4531521, %v6557_v8  ;;  %v6704_v42 = vsub.f32 0.0, %v11973_v36  ;;  %9180 = vrcp.f32 %v6513_v34 }
0x1318   :  { %v6620_v55 = vmul.f32 %v11962_v56, %v6604_v62  ;;  %v6574_v22 = vadd.f32 -1.4531521, %v6558_v47  ;;  %v12009_v5 = vmul.f32 0.5, %v11794_v15  ;;  %9182 = vpow2.f32 %v6744_v10 }
0x1319   :  { %v6683_v49 = vmul.f32 %v11937_v45, %v6667_v46  ;;  %v6589_v53 = vmul.f32 %v11988_v11, %v6573_v33  ;;  %v12006_v25 = vpop.eup %9174  ;;  %v6810_v30 = vsub.f32 0.0, %v6778_v2  ;;  %9184 = vpow2.f32 %v6746_v43 }
0x131a   :  { %v6636_v52 = vadd.f32 -0.28449672, %v6620_v55  ;;  %v6590_v20 = vmul.f32 %v11996_v40, %v6574_v22  ;;  %v6559_v26 = vmul.f32 1.0614054, %v12006_v25  ;;  %v6720_v4 = vmul.f32 %v6704_v42, %v11973_v36 }
0x131b   :  { %v6763_v12 = vmul.f32 %v9173_v21, %v6683_v49  ;;  %v6605_v13 = vadd.f32 1.4214138, %v6589_v53  ;;  %7052 = vmatmul.mubr.bf16.gmra.mrb[176].mxu0 %v6868_v38  ;;  %vm6795_vm15 = vcmp.ge.f32.partialorder %v11861_v24, 0.0  ;;  %v6444_v61 = vmul.f32 0.5, %v11883_v9 }
0x131c   :  { %v6652_v45 = vmul.f32 %v11962_v56, %v6636_v52  ;;  %v6606_v7 = vadd.f32 1.4214138, %v6590_v20  ;;  %v6575_v37 = vadd.f32 -1.4531521, %v6559_v26  ;;  %v6748_v23 = vmul.f32 1.442695, %v6719_v31 }
0x131d   :  { %v6621_v15 = vmul.f32 %v11988_v11, %v6605_v13  ;;  %v6705_v6 = vsub.f32 0.0, %v11983_v3  ;;  %v6779_v60 = vsub.f32 1.0, %v6763_v12  ;;  %v6826_v36 = vsel %vm6794_vm14, %v6778_v2, %v6810_v30 }
0x131e   :  { %v6668_v57 = vadd.f32 0.2548296, %v6652_v45  ;;  %v6622_v18 = vmul.f32 %v11996_v40, %v6606_v7  ;;  %v12022_v28 = vpop.eup %9176  ;;  %v6591_v16 = vmul.f32 %v12006_v25, %v6575_v37  ;;  %vm6796_vm5 = vcmp.ge.f32.partialorder %v11898_v0, 0.0 }
0x131f   :  { %v6637_v51 = vadd.f32 -0.28449672, %v6621_v15  ;;  %v9179_v10 = vpop.eup %9178  ;;  %v6560_v19 = vmul.f32 1.0614054, %v12022_v28  ;;  %v6750_v38 = vmul.f32 1.442695, %v6720_v4  ;;  %9186 = vpow2.f32 %v6748_v23 }
0x1320   :  { %v6684_v54 = vmul.f32 %v11962_v56, %v6668_v57  ;;  %v6638_v9 = vadd.f32 -0.28449672, %v6622_v18  ;;  %v6607_v8 = vadd.f32 1.4214138, %v6591_v16  ;;  %v6721_v47 = vmul.f32 %v6705_v6, %v11983_v3 }
0x1321   :  { %v6653_v62 = vmul.f32 %v11988_v11, %v6637_v51  ;;  %v6576_v56 = vadd.f32 -1.4531521, %v6560_v19  ;;  %v12033_v44 = vpop.eup %9180  ;;  %v6811_v17 = vsub.f32 0.0, %v6779_v60  ;;  %v6842_v2 = vadd.f32 1.0, %v6826_v36 }
0x1322   :  { %v6764_v63 = vmul.f32 %v9179_v10, %v6684_v54  ;;  %v6654_v46 = vmul.f32 %v11996_v40, %v6638_v9  ;;  %v6623_v33 = vmul.f32 %v12006_v25, %v6607_v8  ;;  %v9183_v34 = vpop.eup %9182  ;;  %v6561_v43 = vmul.f32 1.0614054, %v12033_v44 }
0x1323   :  { %v6669_v55 = vadd.f32 0.2548296, %v6653_v62  ;;  %v6592_v22 = vmul.f32 %v12022_v28, %v6576_v56  ;;  %9188 = vpow2.f32 %v6750_v38  ;;  %v9185_v3 = vpop.eup %9184  ;;  %v6752_v45 = vmul.f32 1.442695, %v6721_v47 }
0x1324   :  { %v6780_v21 = vsub.f32 1.0, %v6764_v63  ;;  %v6670_v49 = vadd.f32 0.2548296, %v6654_v46  ;;  %v6639_v42 = vadd.f32 -0.28449672, %v6623_v33  ;;  %v6827_v13 = vsel %vm6795_vm15, %v6779_v60, %v6811_v17 }
0x1325   :  { %v6685_v53 = vmul.f32 %v11988_v11, %v6669_v55  ;;  %v6608_v31 = vadd.f32 1.4214138, %v6592_v22  ;;  %v6577_v12 = vadd.f32 -1.4531521, %v6561_v43  ;;  %9190 = vpow2.f32 %v6752_v45 }
0x1326   :  { %v6812_v52 = vsub.f32 0.0, %v6780_v21  ;;  %v6686_v20 = vmul.f32 %v11996_v40, %v6670_v49  ;;  %v6655_v7 = vmul.f32 %v12006_v25, %v6639_v42  ;;  %v6858_v40 = vmul.f32 %v6842_v2, %v12009_v5 }
0x1327   :  { %v6765_v30 = vmul.f32 %v9183_v34, %v6685_v53  ;;  %v6624_v11 = vmul.f32 %v12022_v28, %v6608_v31  ;;  %v6593_v37 = vmul.f32 %v12033_v44, %v6577_v12  ;;  %v6843_v60 = vadd.f32 1.0, %v6827_v13 }
0x1328   :  { %v6828_v26 = vsel %vm6796_vm5, %v6780_v21, %v6812_v52  ;;  %v6766_v15 = vmul.f32 %v9185_v3, %v6686_v20  ;;  %v6671_v18 = vadd.f32 0.2548296, %v6655_v7  ;;  %vm6797_vm6 = vcmp.ge.f32.partialorder %v11922_v58, 0.0 }
0x1329   :  { %v6844_v57 = vadd.f32 1.0, %v6828_v26  ;;  %v6781_v4 = vsub.f32 1.0, %v6765_v30  ;;  %v6640_v6 = vadd.f32 -0.28449672, %v6624_v11  ;;  %v6609_v24 = vadd.f32 1.4214138, %v6593_v37  ;;  %v9187_v16 = vpop.eup %9186 }
0x132a   :  { %v6782_v54 = vsub.f32 1.0, %v6766_v15  ;;  %v6687_v51 = vmul.f32 %v12006_v25, %v6671_v18  ;;  %v6443_v5 = vmul.f32 0.5, %v11851_v35  ;;  %v6445_v63 = vmul.f32 0.5, %v11911_v39  ;;  %v8799_v37 = vld [vmem:[%s12172_s13 + $0x28] sm:$0xff]  }
0x132b   :  { %v6860_v23 = vmul.f32 %v6844_v57, %v6444_v61  ;;  %v6813_v0 = vsub.f32 0.0, %v6781_v4  ;;  %v6656_v10 = vmul.f32 %v12022_v28, %v6640_v6  ;;  %v6625_v36 = vmul.f32 %v12033_v44, %v6609_v24 }
0x132c   :  { %v6767_v61 = vmul.f32 %v9187_v16, %v6687_v51  ;;  %v6859_v56 = vmul.f32 %v6843_v60, %v6443_v5  ;;  %v6814_v25 = vsub.f32 0.0, %v6782_v54  ;;  %vm6798_vm7 = vcmp.ge.f32.partialorder %v11925_v27, 0.0 }
0x132d   :  { %v6870_v9 = vpack.c.bf16 %v6860_v23, %v6858_v40  ;;  %v6829_v19 = vsel %vm6797_vm6, %v6781_v4, %v6813_v0  ;;  %v6672_v8 = vadd.f32 0.2548296, %v6656_v10  ;;  %v6641_v38 = vadd.f32 -0.28449672, %v6625_v36  ;;  %v9189_v46 = vpop.eup %9188  ;;  %v8800_v40 = vld [vmem:[%s12172_s13 + $0x30] sm:$0xff]   ;;  %v8801_v4 = vld [vmem:[%s12172_s13 + $0x38] sm:$0xff]  }
0x132e   :  { %v6845_v62 = vadd.f32 1.0, %v6829_v19  ;;  %v6783_v17 = vsub.f32 1.0, %v6767_v61  ;;  %v6830_v2 = vsel %vm6798_vm7, %v6782_v54, %v6814_v25  ;;  %vm6799_vm8 = vcmp.ge.f32.partialorder %v11946_v32, 0.0  ;;  %v7701_v23 = vld [vmem:[%s12169_s10 + $0x1] ss:$0 sm:$0xff]  ;;  %v12266_v36 = vld [vmem:[#allocation14_spill] sm:$0xff] }
0x132f   :  { %v6688_v58 = vmul.f32 %v12022_v28, %v6672_v8  ;;  %v6657_v21 = vmul.f32 %v12033_v44, %v6641_v38  ;;  %v9191_v35 = vpop.eup %9190  ;;  %v6846_v53 = vadd.f32 1.0, %v6830_v2  ;;  %vm6800_vm9 = vcmp.ge.f32.partialorder %v11960_v48, 0.0  ;;  %v7303_v8 = vld [vmem:[%s12174_s15] sm:$0xff]  ;;  %v7304_v38 = vld [vmem:[%s12174_s15 + $0x8] sm:$0xff]  ;;  %v12267_v25 = vld [vmem:[#allocation15_spill] sm:$0xff] }
0x1330   :  { %v6861_v47 = vmul.f32 %v6845_v62, %v6445_v63  ;;  %v6815_v39 = vsub.f32 0.0, %v6783_v17  ;;  %v6446_v27 = vmul.f32 0.5, %v11916_v59  ;;  %v6448_v20 = vmul.f32 0.5, %v11950_v29  ;;  %v8794_v59 = vld [vmem:[%s12172_s13] sm:$0xff]   ;;  %v8795_v29 = vld [vmem:[%s12172_s13 + $0x8] sm:$0xff]   ;;  %7309 = vperm.xlu0 %8632, %v7303_v8   ;;  %7314 = vperm.xlu1 %8633, %v7304_v38  }
0x1331   :  { %v6768_v55 = vmul.f32 %v9189_v46, %v6688_v58  ;;  %v6673_v33 = vadd.f32 0.2548296, %v6657_v21  ;;  %vm6801_vm0 = vcmp.ge.f32.partialorder %v11977_v1, 0.0  ;;  %v6447_v30 = vmul.f32 0.5, %v11930_v41  ;;  %8478 = vmatprep.subr.bf16.mxu1 %v8794_v59  ;;  %v8796_v41 = vld [vmem:[%s12172_s13 + $0x10] sm:$0xff]   ;;  %v8798_v1 = vld [vmem:[%s12172_s13 + $0x20] sm:$0xff]  }
0x1332   :  { %v6871_v34 = vpack.c.bf16 %v6861_v47, %v6859_v56  ;;  %v6831_v28 = vsel %vm6799_vm8, %v6783_v17, %v6815_v39  ;;  %v6862_v45 = vmul.f32 %v6846_v53, %v6446_v27  ;;  %v6449_v32 = vmul.f32 0.5, %v11967_v50  ;;  %8479 = vmatpush3.bf16.msra.mxu1 %v8794_v59  ;;  %v8797_v50 = vld [vmem:[%s12172_s13 + $0x18] sm:$0xff]  }
0x1333   :  { %v6784_v49 = vsub.f32 1.0, %v6768_v55  ;;  %v6689_v22 = vmul.f32 %v12033_v44, %v6673_v33  ;;  %v6847_v44 = vadd.f32 1.0, %v6831_v28  ;;  %8480 = vmatprep.subr.bf16.mxu1 %v8795_v29  ;;  %v12268_v21 = vld [vmem:[#allocation16_spill] sm:$0xff] }
0x1334   :  { %7059 = vmatprep.mubr.bf16.mxu0 %v6871_v34 }
0x1335   :  { %7060 = vmatmul.mubr.bf16.gmra.mrb[180].mxu0 %v6870_v9  ;;  %v6816_v43 = vsub.f32 0.0, %v6784_v49  ;;  %v6769_v52 = vmul.f32 %v9191_v35, %v6689_v22  ;;  %v6863_v57 = vmul.f32 %v6847_v44, %v6447_v30 }
0x1336   :  { %8481 = vmatpush3.bf16.msra.mxu1 %v8795_v29 }
0x1337   :  { %v6832_v42 = vsel %vm6800_vm9, %v6784_v49, %v6816_v43  ;;  %v6785_v3 = vsub.f32 1.0, %v6769_v52  ;;  %8482 = vmatprep.subr.bf16.mxu1 %v8796_v41  ;;  %v12269_v52 = vld [vmem:[#allocation17_spill] sm:$0xff] }
0x1338   :  { %v6848_v31 = vadd.f32 1.0, %v6832_v42 }
0x1339   :  { %v6817_v12 = vsub.f32 0.0, %v6785_v3 }
0x133a   :  { %v6864_v13 = vmul.f32 %v6848_v31, %v6448_v20  ;;  %8483 = vmatpush3.bf16.msra.mxu1 %v8796_v41 }
0x133b   :  { %v6833_v26 = vsel %vm6801_vm0, %v6785_v3, %v6817_v12  ;;  %8484 = vmatprep.subr.bf16.mxu1 %v8797_v50  ;;  %v12270_v3 = vld [vmem:[#allocation18_spill] sm:$0xff] }
0x133c   :  { %v6849_v48 = vadd.f32 1.0, %v6833_v26  ;;  %v6872_v7 = vpack.c.bf16 %v6864_v13, %v6862_v45 }
0x133e   :  { %v6865_v15 = vmul.f32 %v6849_v48, %v6449_v32  ;;  %8485 = vmatpush3.bf16.msra.mxu1 %v8797_v50  ;;  %v12271_v32 = vld [vmem:[#allocation19_spill] sm:$0xff] }
0x133f   :  { %8486 = vmatprep.subr.bf16.mxu1 %v8798_v1 }
0x1340   :  { %v6873_v11 = vpack.c.bf16 %v6865_v15, %v6863_v57  ;;  %v12272_v15 = vld [vmem:[#allocation9_spill] sm:$0xff] }
0x1342   :  { %7067 = vmatprep.mubr.bf16.mxu0 %v6873_v11  ;;  %8487 = vmatpush3.bf16.msra.mxu1 %v8798_v1 }
0x1343   :  { %7068 = vmatmul.mubr.bf16.gmra.mrb[184].mxu0 %v6872_v7  ;;  %8488 = vmatprep.subr.bf16.mxu1 %v8799_v37 }
0x1346   :  { %8489 = vmatpush3.bf16.msra.mxu1 %v8799_v37 }
0x1347   :  { %8490 = vmatprep.subr.bf16.mxu1 %v8800_v40 }
0x134a   :  { %8491 = vmatpush3.bf16.msra.mxu1 %v8800_v40 }
0x134b   :  { %8492 = vmatprep.subr.bf16.mxu1 %v8801_v4 }
0x134e   :  { %8493 = vmatpush3.bf16.msra.mxu1 %v8801_v4 }
0x13e6   :  { %v7962_v18 = vpop.f32.mrb[172].mxu0 }
0x13e7   :  { %v7963_v6 = vpop.f32.mrb[173].mxu0 }
0x13e8   :  { %v7964_v24 = vadd.f32 %v7963_v6, %v7962_v18  ;;  %v7965_v60 = vpop.f32.mrb[174].mxu0 }
0x13e9   :  { %v7966_v0 = vpop.f32.mrb[175].mxu0 }
0x13ea   :  { %v7046_v54 = vadd.f32 %v7964_v24, %v7701_v23  ;;  %v7967_v51 = vadd.f32 %v7966_v0, %v7965_v60 }
0x13ec   :  { %v7049_v16 = vadd.f32 %v7967_v51, %v7701_v23  ;;  %v7076_v10 = vadd.f32 %v7046_v54, %v11625_v14 }
0x13ee   :  { %v7077_v9 = vadd.f32 %v7049_v16, %v12266_v36  ;;  %v7968_v5 = vpop.f32.mrb[176].mxu0 }
0x13ef   :  { %v7969_v19 = vpop.f32.mrb[177].mxu0 }
0x13f0   :  { %v7088_v61 = vadd.f32 %v7077_v9, %v7076_v10  ;;  %v7970_v63 = vadd.f32 %v7969_v19, %v7968_v5  ;;  %v7971_v62 = vpop.f32.mrb[178].mxu0 }
0x13f1   :  { %v7972_v46 = vpop.f32.mrb[179].mxu0 }
0x13f2   :  { %v7054_v56 = vadd.f32 %v7970_v63, %v7701_v23  ;;  %v7973_v14 = vadd.f32 %v7972_v46, %v7971_v62 }
0x13f4   :  { %v7078_v47 = vadd.f32 %v7054_v56, %v12267_v25  ;;  %v7057_v17 = vadd.f32 %v7973_v14, %v7701_v23 }
0x13f6   :  { %v7089_v58 = vadd.f32 %v7088_v61, %v7078_v47  ;;  %v7079_v55 = vadd.f32 %v7057_v17, %v12268_v21 }
0x13f8   :  { %v7090_v33 = vadd.f32 %v7089_v58, %v7079_v55 }
0x1408   :  { %v7974_v34 = vpop.f32.mrb[180].mxu0 }
0x1409   :  { %v7975_v35 = vpop.f32.mrb[181].mxu0 }
0x140a   :  { %v7976_v2 = vadd.f32 %v7975_v35, %v7974_v34  ;;  %v7977_v39 = vpop.f32.mrb[182].mxu0 }
0x140b   :  { %v7978_v49 = vpop.f32.mrb[183].mxu0 }
0x140c   :  { %v7062_v22 = vadd.f32 %v7976_v2, %v7701_v23  ;;  %v7979_v43 = vadd.f32 %v7978_v49, %v7977_v39  ;;  %v7718_v2 = vld [vmem:[%s12170_s11 + $0x1] sm:$0x1] }
0x140e   :  { %v7080_v53 = vadd.f32 %v7062_v22, %v12269_v52  ;;  %v7065_v28 = vadd.f32 %v7979_v43, %v7701_v23  ;;  %v12273_v22 = vld [vmem:[#allocation10_spill] sm:$0xff]  ;;  %v7720_v52 = vld [vmem:[%s12171_s12 + $0x1] ss:$0 sm:$0xff] }
0x1410   :  { %v7091_v42 = vadd.f32 %v7090_v33, %v7080_v53  ;;  %v7081_v27 = vadd.f32 %v7065_v28, %v12270_v3 }
0x1412   :  { %v7092_v20 = vadd.f32 %v7091_v42, %v7081_v27 }
0x1416   :  { %v7980_v31 = vpop.f32.mrb[184].mxu0 }
0x1417   :  { %v7981_v12 = vpop.f32.mrb[185].mxu0 }
0x1418   :  { %v7982_v45 = vadd.f32 %v7981_v12, %v7980_v31  ;;  %v7983_v44 = vpop.f32.mrb[186].mxu0 }
0x1419   :  { %v7984_v13 = vpop.f32.mrb[187].mxu0 }
0x141a   :  { %v7070_v26 = vadd.f32 %v7982_v45, %v7701_v23  ;;  %v7985_v30 = vadd.f32 %v7984_v13, %v7983_v44 }
0x141c   :  { %v7082_v48 = vadd.f32 %v7070_v26, %v12271_v32  ;;  %v7073_v7 = vadd.f32 %v7985_v30, %v7701_v23 }
0x141e   :  { %v7093_v57 = vadd.f32 %v7092_v20, %v7082_v48  ;;  %v7083_v11 = vadd.f32 %v7073_v7, %v12272_v15 }
0x1420   :  { %v7094_v59 = vadd.f32 %v7093_v57, %v7083_v11 }
0x1422   :  { %v7095_v29 = vrot.slane %v7094_v59, 4 }
0x1424   :  { %v7096_v41 = vadd.f32 %v7095_v29, %v7094_v59  ;;  %v7721_v29 = vld [vmem:[%s12173_s14] ss:$0 sm:$0xff]  ;;  %s9260_s14 = smov [#allocation3]  }
0x1425   :  { %s7392_s9 = sshll.u32 %s9260_s14, 4  ;;  %s7393_s9 = int_to_ptr.vmem [resolvable:$true] %s7392_s9 }
0x1426   :  { %v7097_v50 = vrot.slane %v7096_v41, 2  ;;  %s9206_s30 = scalar_lea.vmem %s7393_s9, 1024  ;;  %p9211_p1 = scmp.lt.s32.totalorder %s7393_s9, %s7393_s9 }
0x1427   :  { %p9207_p0 = scmp.ne.s32.totalorder %s7393_s9, %s9206_s30  ;;  %p9212_p2 = scmp.lt.s32.totalorder %s9206_s30, %s9206_s30 }
0x1428   :  { %v7098_v1 = vadd.f32 %v7097_v50, %v7096_v41  ;;  %v7310_v50 = vpop.permute.xlu0 %7309 }
0x1429   :  { %p9213_p3 = por %p9212_p2, %p9211_p1 }
0x142a   :  { %v7099_v37 = vrot.slane %v7098_v1, 1 }
0x142b   :  { %p9214_p4 = pnand %p9213_p3, %p9207_p0 }
0x142c   :  { %v7100_v40 = vadd.f32 %v7099_v37, %v7098_v1 }
0x142e   :  { %v7101_v4 = vmul.f32 0.015625, %v7100_v40 }
0x1430   :  { %v7109_v18 = vsub.f32 %v7083_v11, %v7101_v4  ;;  %v7102_v6 = vsub.f32 %v7076_v10, %v7101_v4  ;;  %v7103_v24 = vsub.f32 %v7077_v9, %v7101_v4  ;;  %v7104_v60 = vsub.f32 %v7078_v47, %v7101_v4 }
0x1431   :  { %v7105_v0 = vsub.f32 %v7079_v55, %v7101_v4  ;;  %v7106_v54 = vsub.f32 %v7080_v53, %v7101_v4  ;;  %v7107_v51 = vsub.f32 %v7081_v27, %v7101_v4  ;;  %v7108_v16 = vsub.f32 %v7082_v48, %v7101_v4 }
0x1432   :  { %v7110_v23 = vmul.f32 %v7102_v6, %v7102_v6  ;;  %v7111_v36 = vmul.f32 %v7103_v24, %v7103_v24  ;;  %v7112_v5 = vmul.f32 %v7104_v60, %v7104_v60  ;;  %v7117_v25 = vmul.f32 %v7109_v18, %v7109_v18 }
0x1433   :  { %v7113_v61 = vmul.f32 %v7105_v0, %v7105_v0  ;;  %v7114_v62 = vmul.f32 %v7106_v54, %v7106_v54  ;;  %v7115_v38 = vmul.f32 %v7107_v51, %v7107_v51  ;;  %v7116_v56 = vmul.f32 %v7108_v16, %v7108_v16 }
0x1434   :  { %v7118_v19 = vadd.f32 %v7111_v36, %v7110_v23 }
0x1436   :  { %v7119_v63 = vadd.f32 %v7118_v19, %v7112_v5 }
0x1438   :  { %v7120_v8 = vadd.f32 %v7119_v63, %v7113_v61 }
0x143a   :  { %v7121_v46 = vadd.f32 %v7120_v8, %v7114_v62 }
0x143c   :  { %v7122_v14 = vadd.f32 %v7121_v46, %v7115_v38 }
0x143e   :  { %v7123_v10 = vadd.f32 %v7122_v14, %v7116_v56 }
0x1440   :  { %v7124_v9 = vadd.f32 %v7123_v10, %v7117_v25 }
0x1442   :  { %v7125_v47 = vrot.slane %v7124_v9, 4 }
0x1444   :  { %v7126_v17 = vadd.f32 %v7125_v47, %v7124_v9 }
0x1446   :  { %v7127_v58 = vrot.slane %v7126_v17, 2 }
0x1448   :  { %v7128_v21 = vadd.f32 %v7127_v58, %v7126_v17 }
0x144a   :  { %v7129_v55 = vrot.slane %v7128_v21, 1 }
0x144c   :  { %v7130_v33 = vadd.f32 %v7129_v55, %v7128_v21 }
0x144e   :  { %v7131_v34 = vmul.f32 0.015625, %v7130_v33 }
0x1450   :  { %v7132_v35 = vadd.f32 1e-05, %v7131_v34 }
0x1452   :  { %9192 = vrsqrt.f32 %v7132_v35 }
0x145c   :  { %v9193_v39 = vpop.eup %9192 }
0x145d   :  { %v7134_v49 = vmul.f32 %v9193_v39, %v7718_v2 }
0x145f   :  { %v7139_v43 = vrot.slane %v7134_v49, %v12273_v22 }
0x1461   :  { %v7141_v53 = vmul.f32 %v7139_v43, %v7102_v6  ;;  %v7142_v28 = vmul.f32 %v7139_v43, %v7103_v24  ;;  %v7143_v42 = vmul.f32 %v7139_v43, %v7104_v60  ;;  %v7144_v3 = vmul.f32 %v7139_v43, %v7105_v0 }
0x1462   :  { %v7145_v27 = vmul.f32 %v7139_v43, %v7106_v54  ;;  %v7146_v20 = vmul.f32 %v7139_v43, %v7107_v51  ;;  %v7147_v31 = vmul.f32 %v7139_v43, %v7108_v16  ;;  %v7148_v12 = vmul.f32 %v7139_v43, %v7109_v18  ;;  %v7315_v18 = vpop.permute.xlu1 %7314 }
0x1463   :  { %v7155_v45 = vadd.f32 %v7720_v52, %v7141_v53  ;;  %v7156_v44 = vadd.f32 %v7720_v52, %v7142_v28  ;;  %v7157_v13 = vadd.f32 %v7720_v52, %v7143_v42  ;;  %v7158_v26 = vadd.f32 %v7720_v52, %v7144_v3 }
0x1464   :  { %v7159_v30 = vadd.f32 %v7720_v52, %v7145_v27  ;;  %v7160_v32 = vadd.f32 %v7720_v52, %v7146_v20  ;;  %v7161_v48 = vadd.f32 %v7720_v52, %v7147_v31  ;;  %v7162_v7 = vadd.f32 %v7720_v52, %v7148_v12 }
0x1465   :  { %v7163_v57 = vpack.c.bf16 %v7156_v44, %v7155_v45  ;;  %v7164_v15 = vpack.c.bf16 %v7158_v26, %v7157_v13 }
0x1466   :  { %v7165_v11 = vpack.c.bf16 %v7160_v32, %v7159_v30  ;;  %v7166_v59 = vpack.c.bf16 %v7162_v7, %v7161_v48 }
0x1467   :  { %8494 = vmatprep.mubr.bf16.mxu1 %v7163_v57 }
0x1468   :  { %8495 = vmatmul.mubr.bf16.vlgmr.msra.gmra.mrb[196].mxu1 %v7164_v15 }
0x1469   :  { %8498 = vmatprep.mubr.bf16.mxu1 %v7165_v11 }
0x1470   :  { %8499 = vmatmul.mubr.bf16.gmra.mrb[200].mxu1 %v7166_v59 }
0x153b   :  { %v8496_v41 = vpop.f32.mrb[196].mxu1 }
0x153c   :  { %v7281_v1 = vadd.f32 %v8496_v41, %v7721_v29  ;;  %v7272_v37 = vpop.f32.mrb[197].mxu1 }
0x153d   :  { %v7273_v40 = vadd.f32 %v7721_v29, %v7272_v37  ;;  %v8497_v4 = vpop.f32.mrb[198].mxu1 }
0x153e   :  { %7329 = vst.msk [vmem:[#allocation3 + $0x10] sm:$0xff] %vm908_vm3, %v7281_v1  ;;  %v7331_v6 = vmul.f32 %v7310_v50, %v7281_v1  ;;  %v7284_v24 = vadd.f32 %v8497_v4, %v7721_v29  ;;  %v7275_v60 = vpop.f32.mrb[199].mxu1 }
0x153f   :  { %7305 = vst.msk [vmem:[#allocation3] sm:$0xff] %vm908_vm3, %v7273_v40  ;;  %v7317_v0 = vmul.f32 %v7310_v50, %v7273_v40  ;;  %v7276_v54 = vadd.f32 %v7721_v29, %v7275_v60 }
0x1540   :  { %7330 = vst.msk [vmem:[#allocation3 + $0x18] sm:$0xff] %vm908_vm3, %v7284_v24  ;;  %v7332_v51 = vmul.f32 %v7315_v18, %v7284_v24  ;;  %v7333_v23 = vsel %vm908_vm3, %v7331_v6, 0.0 }
0x1541   :  { %7306 = vst.msk [vmem:[#allocation3 + $0x8] sm:$0xff] %vm908_vm3, %v7276_v54  ;;  %v7318_v16 = vmul.f32 %v7315_v18, %v7276_v54  ;;  %v7319_v5 = vsel %vm908_vm3, %v7317_v0, 0.0 }
0x1542   :  { %v7334_v36 = vsel %vm908_vm3, %v7332_v51, 0.0 }
0x1543   :  { %v7320_v19 = vsel %vm908_vm3, %v7318_v16, 0.0  ;;  %v7335_v61 = vadd.f32 %v7334_v36, %v7333_v23  ;;  %v8500_v63 = vpop.f32.mrb[200].mxu1 }
0x1544   :  { %v7321_v62 = vadd.f32 %v7320_v19, %v7319_v5  ;;  %v7297_v8 = vadd.f32 %v8500_v63, %v7721_v29  ;;  %v7288_v38 = vpop.f32.mrb[201].mxu1 }
0x1545   :  { %v7336_v46 = vrot.slane %v7335_v61, 4  ;;  %v7289_v56 = vadd.f32 %v7721_v29, %v7288_v38  ;;  %v8501_v14 = vpop.f32.mrb[202].mxu1 }
0x1546   :  { %v7322_v25 = vrot.slane %v7321_v62, 4  ;;  %7357 = vst.msk [vmem:[#allocation3 + $0x30] sm:$0xff] %vm908_vm3, %v7297_v8  ;;  %v7359_v10 = vmul.f32 %v7310_v50, %v7297_v8  ;;  %v7300_v9 = vadd.f32 %v8501_v14, %v7721_v29  ;;  %v7291_v47 = vpop.f32.mrb[203].mxu1 }
0x1547   :  { %v7337_v17 = vadd.f32 %v7336_v46, %v7335_v61  ;;  %7343 = vst.msk [vmem:[#allocation3 + $0x20] sm:$0xff] %vm908_vm3, %v7289_v56  ;;  %v7345_v58 = vmul.f32 %v7310_v50, %v7289_v56  ;;  %v7292_v21 = vadd.f32 %v7721_v29, %v7291_v47 }
0x1548   :  { %v7323_v55 = vadd.f32 %v7322_v25, %v7321_v62  ;;  %7358 = vst.msk [vmem:[#allocation3 + $0x38] sm:$0xff] %vm908_vm3, %v7300_v9  ;;  %v7360_v33 = vmul.f32 %v7315_v18, %v7300_v9  ;;  %v7361_v39 = vsel %vm908_vm3, %v7359_v10, 0.0 }
0x1549   :  { %v7338_v34 = vrot.slane %v7337_v17, 2  ;;  %7344 = vst.msk [vmem:[#allocation3 + $0x28] sm:$0xff] %vm908_vm3, %v7292_v21  ;;  %v7346_v35 = vmul.f32 %v7315_v18, %v7292_v21 }
0x154a   :  { %v7324_v2 = vrot.slane %v7323_v55, 2  ;;  %v7362_v49 = vsel %vm908_vm3, %v7360_v33, 0.0 }
0x154b   :  { %9217 = shalt.err (!%p9214_p4)
}
0x154c   :  { %s9218_s3 = scalar_lea.hbm %s12176_s17, 1024 }
0x154d   :  { %p9219_p5 = scmp.ne.s32.totalorder %s12176_s17, %s9218_s3  ;;  %p9222_p6 = scmp.lt.u32.totalorder %s9218_s3, %s12176_s17 }
0x154f   :  { %p9224_p7 = pnand %p9222_p6, %p9219_p5 }
0x1551   :  { %9227 = shalt.err (!%p9224_p7)
}
0x1552   :  { %s9261_s27 = smov 128   ;;  %s9262_s4 = smov 8   ;;  %v7339_v22 = vadd.f32 %v7338_v34, %v7337_v17  ;;  %v7347_v43 = vsel %vm908_vm3, %v7345_v58, 0.0  ;;  %v7363_v52 = vadd.f32 %v7362_v49, %v7361_v39  ;;  %v7348_v53 = vsel %vm908_vm3, %v7346_v35, 0.0 }
0x1553   :  { %7398 = dma.vmem_to_hbm [thread:$0]  %s7393_s9, 1024, %s12176_s17, [#allocation4], %s9261_s27, %s9261_s27, %s9262_s4   ;;  %v7325_v28 = vadd.f32 %v7324_v2, %v7323_v55  ;;  %v7349_v42 = vadd.f32 %v7348_v53, %v7347_v43  ;;  %vm7370_vm1 = vcmask 1040384   ;;  %vm7372_vm2 = vcmask 1041408  }
0x1554   :  { %v7340_v3 = vrot.slane %v7339_v22, 1  ;;  %v7364_v27 = vrot.slane %v7363_v52, 4  ;;  %vm7374_vm3 = vcmask 1042432   ;;  %v7377_v29 = vstv %s12175_s16  ;;  %s9263_s20 = smov [#allocation5]  }
0x1555   :  { %v7326_v20 = vrot.slane %v7325_v28, 1  ;;  %v7350_v31 = vrot.slane %v7349_v42, 4  ;;  %s7405_s25 = sshll.u32 %s9263_s20, 4  ;;  %vm7385_vm4 = vcmask 519168   ;;  %s7406_s25 = int_to_ptr.vmem [resolvable:$true] %s7405_s25 }
0x1556   :  { %v7341_v12 = vadd.f32 %v7340_v3, %v7339_v22  ;;  %v7365_v45 = vadd.f32 %v7364_v27, %v7363_v52  ;;  %s9228_s26 = scalar_lea.vmem %s7406_s25, 64  ;;  %p9233_p9 = scmp.lt.s32.totalorder %s7406_s25, %s7406_s25 }
0x1557   :  { %v7327_v44 = vadd.f32 %v7326_v20, %v7325_v28  ;;  %v7351_v13 = vadd.f32 %v7350_v31, %v7349_v42  ;;  %p9229_p8 = scmp.ne.s32.totalorder %s7406_s25, %s9228_s26  ;;  %p9234_p10 = scmp.lt.s32.totalorder %s9228_s26, %s9228_s26 }
0x1558   :  { %v7366_v26 = vrot.slane %v7365_v45, 2 }
0x1559   :  { %v7371_v30 = vsel %vm7370_vm1, %v7327_v44, %v7341_v12  ;;  %v7352_v32 = vrot.slane %v7351_v13, 2  ;;  %p9235_p11 = por %p9234_p10, %p9233_p9 }
0x155a   :  { %v7367_v48 = vadd.f32 %v7366_v26, %v7365_v45 }
0x155b   :  { %v7353_v7 = vadd.f32 %v7352_v32, %v7351_v13  ;;  %p9236_p12 = pnand %p9235_p11, %p9229_p8 }
0x155c   :  { %v7368_v57 = vrot.slane %v7367_v48, 1 }
0x155d   :  { %v7354_v15 = vrot.slane %v7353_v7, 1 }
0x155e   :  { %v7369_v59 = vadd.f32 %v7368_v57, %v7367_v48 }
0x155f   :  { %v7355_v11 = vadd.f32 %v7354_v15, %v7353_v7 }
0x1561   :  { %v7373_v41 = vsel %vm7372_vm2, %v7371_v30, %v7355_v11 }
0x1562   :  { %v7375_v50 = vsel %vm7374_vm3, %v7373_v41, %v7369_v59 }
0x1563   :  { %v7378_v1 = vadd.f32 %v7377_v29, %v7375_v50 }
0x1565   :  { %v7379_v37 = vsub.f32 0.0, %v7378_v1 }
0x1567   :  { %v7380_v40 = vmul.f32 1.442695, %v7379_v37 }
0x1569   :  { %9194 = vpow2.f32 %v7380_v40 }
0x1573   :  { %v9195_v4 = vpop.eup %9194 }
0x1574   :  { %v7382_v18 = vadd.f32 1.0, %v9195_v4 }
0x1576   :  { %9196 = vrcp.f32 %v7382_v18 }
0x1580   :  { %v9197_v6 = vpop.eup %9196 }
0x1581   :  { %7386 = vst.msk [vmem:[#allocation5] sm:$0xf] %vm7385_vm4, %v9197_v6 }
0x1582   :  { %9239 = shalt.err (!%p9236_p12)
}
0x1583   :  { %s9240_s19 = scalar_lea.hbm %s12177_s18, 64 }
0x1584   :  { %p9241_p13 = scmp.ne.s32.totalorder %s12177_s18, %s9240_s19  ;;  %p9244_p0 = scmp.lt.u32.totalorder %s9240_s19, %s12177_s18 }
0x1586   :  { %p9246_p1 = pnand %p9244_p0, %p9241_p13 }
0x1588   :  { %9249 = shalt.err (!%p9246_p1)
}
0x1589   :  { %7408 = dma.vmem_to_hbm [thread:$0]  %s7406_s25, 64, %s12177_s18, [#allocation6]  }
0x158a   :  { %9250 = dma.done.wait [#allocation4], 1024  }
0x158b   :  { %9251 = vsyncadd [#allocation4], 4294966272 }
0x158c   :  { %9252 = dma.done.wait [#allocation6], 64  }
0x158d   :  { %9253 = vsyncadd [#allocation6], 4294967232 }
0x158e   :  { %7415 = vsyncpa [#allocation4], 1 }
0x158f   :  { %7416 = vsyncpa [#allocation6], 1 }

</bundles_post_ra>
